<compile_context>
chip_gen: v5e
topology: v5e:2x2
jax: 0.10.0
libtpu: 0.0.40
codegen_flags: <defaults>
</compile_context>

<pallas_src>
import functools
import math

import jax
import jax.numpy as jnp
from jax.experimental import pallas as pl
from jax.experimental.pallas import tpu as pltpu


# ----------------------------------------------------------------------------
# Fused kernel: conv1(+folded norm)+ReLU -> conv2+ReLU -> 1x1 heads -> decode.
#
# Layout trick: a frame is stored as a flattened, padded slab of shape
# ((H+4)*(W+2), C) (1 pad col each side, 2 pad rows top/bottom).  A 3x3 pad-1
# conv then becomes 9 *contiguous* row-slices of length H*(W+2) matmul'd with
# the per-tap (C_in, C_out) weight; only the two pad columns of each output row
# are contaminated and they are masked to zero (they double as the horizontal
# zero-padding for the next conv).
# ----------------------------------------------------------------------------
def _fused_rpn_kernel(x_ref, w1_ref, b1_ref, w2_ref, b2_ref,
                      wo_ref, bo_ref, wc_ref, bc_ref, ws_ref, bs_ref,
                      mask_ref, anc_ctr_ref, anc_sz_ref, dec_ref,
                      obj_ref, xy1_ref, xy2_ref,
                      feat_ref, *, H, W, F, clamp):
    row = W + 2                 # padded row stride
    Hc = H * row                # rows of the per-frame output slab
    core = 2 * row              # offset of the valid core inside the padded canvas

    # Zero the padded feature canvas once; borders stay zero, core is rewritten
    # every frame (scratch persists across grid steps).
    @pl.when(pl.program_id(0) == 0)
    def _():
        feat_ref[...] = jnp.zeros_like(feat_ref)

    # ---- conv1: 3x3 pad-1 conv with folded normalization (9 shifted MXU dots)
    acc = jnp.zeros((Hc, F), jnp.float32)
    for t in range(9):
        ky, kx = t // 3, t % 3
        start = (ky + 1) * row + (kx - 1)
        xa = x_ref[pl.ds(start, Hc), :].astype(jnp.bfloat16)
        acc = acc + jnp.dot(xa, w1_ref[t], preferred_element_type=jnp.float32)
    y1 = jnp.maximum(acc + b1_ref[...], 0.0) * mask_ref[...]   # zero pad columns
    feat_ref[pl.ds(core, Hc), :] = y1

    # ---- conv2 (RPN 3x3 conv) directly from the VMEM-resident padded canvas
    acc2 = jnp.zeros((Hc, F), jnp.float32)
    for t in range(9):
        ky, kx = t // 3, t % 3
        start = (ky + 1) * row + (kx - 1)
        fa = feat_ref[pl.ds(start, Hc), :].astype(jnp.bfloat16)
        acc2 = acc2 + jnp.dot(fa, w2_ref[t], preferred_element_type=jnp.float32)
    y2 = jnp.maximum(acc2 + b2_ref[...], 0.0).astype(jnp.bfloat16)

    # ---- 1x1 heads as an epilogue on data already in vregs (coordinate-major)
    obj = jnp.dot(y2, wo_ref[...], preferred_element_type=jnp.float32) + bo_ref[...]
    d_ctr = jnp.dot(y2, wc_ref[...], preferred_element_type=jnp.float32) + bc_ref[...]
    d_sz = jnp.dot(y2, ws_ref[...], preferred_element_type=jnp.float32) + bs_ref[...]

    # ---- decode + clip to image + rescale to output resolution + clip again
    a_sz = anc_sz_ref[...]                      # (1, 2A): [aw*A, ah*A]
    a_ctr = anc_ctr_ref[...]                    # (Hc, 2A): [acx*A, acy*A]
    p_ctr = d_ctr * a_sz + a_ctr
    p_sz = jnp.exp(jnp.minimum(d_sz, clamp)) * a_sz
    half = 0.5 * p_sz
    c1 = p_ctr - half                           # [x1*A, y1*A]
    c2 = p_ctr + half                           # [x2*A, y2*A]

    img_max = dec_ref[0:1, :]                   # clip to padded image size
    scale = dec_ref[1:2, :]                     # detector_postprocess rescale
    out_max = dec_ref[2:3, :]                   # clip to output size
    c1 = jnp.minimum(jnp.maximum(c1, 0.0), img_max)
    c2 = jnp.minimum(jnp.maximum(c2, 0.0), img_max)
    c1 = jnp.minimum(jnp.maximum(c1 * scale, 0.0), out_max)
    c2 = jnp.minimum(jnp.maximum(c2 * scale, 0.0), out_max)

    obj_ref[...] = obj
    xy1_ref[...] = c1
    xy2_ref[...] = c2


# ----------------------------------------------------------------------------
# Parameters for the synthetic backbone / RPN (conv weights stored per-tap,
# head weights split so delta columns are coordinate-major).
# ----------------------------------------------------------------------------
def init_params(key, C_in, C_feat, num_anchors):
    k = jax.random.split(key, 5)
    A = num_anchors
    return {
        "num_anchors": A,
        "backbone_w": 0.05 * jax.random.normal(k[0], (9, C_in, C_feat), jnp.float32),
        "backbone_b": jnp.zeros((C_feat,), jnp.float32),
        "rpn_conv_w": 0.05 * jax.random.normal(k[1], (9, C_feat, C_feat), jnp.float32),
        "rpn_conv_b": jnp.zeros((C_feat,), jnp.float32),
        "rpn_obj_w": 0.05 * jax.random.normal(k[2], (C_feat, A), jnp.float32),
        "rpn_obj_b": jnp.zeros((A,), jnp.float32),
        "rpn_ctr_w": 0.05 * jax.random.normal(k[3], (C_feat, 2 * A), jnp.float32),
        "rpn_ctr_b": jnp.zeros((2 * A,), jnp.float32),
        "rpn_sz_w": 0.05 * jax.random.normal(k[4], (C_feat, 2 * A), jnp.float32),
        "rpn_sz_b": jnp.zeros((2 * A,), jnp.float32),
    }


# ----------------------------------------------------------------------------
# Forward: preprocess (folded) -> fused backbone/RPN/decode kernel -> reformat.
# ----------------------------------------------------------------------------
def temporal_proposal_network_forward(images_nchw, params, pixel_mean, pixel_std,
                                      anchor_sizes, out_hw):
    """Returns (proposal_boxes (N, H*W*A, 4), objectness_logits (N, H*W*A))."""
    N, C, H, W = images_nchw.shape
    A = len(anchor_sizes)
    F = params["backbone_w"].shape[-1]
    row = W + 2
    Hc = H * row
    Mpad = (H + 4) * row
    out_h, out_w = out_hw

    # Fold (x - mean) / std into conv1 (exact: padding below uses pixel_mean, so
    # the normalized pad value is 0 just like normalize-then-zero-pad).
    inv_std = 1.0 / pixel_std
    w1 = params["backbone_w"] * inv_std[None, :, None]
    b1 = params["backbone_b"] - jnp.einsum(
        "c,tcf->f", pixel_mean * inv_std, params["backbone_w"])

    # Padded, flattened per-frame image slab: (N, (H+4)*(W+2), C).
    # TODO(synk): ImageList size_divisibility padding is folded into this canvas
    # for the toy shapes; real padded sizes would change the clip bounds below.
    x_nhwc = jnp.transpose(images_nchw, (0, 2, 3, 1)).astype(jnp.float32)
    canvas = jnp.tile(pixel_mean.reshape(1, 1, 1, C), (N, H + 4, W + 2, 1))
    canvas = canvas.at[:, 2:2 + H, 1:1 + W, :].set(x_nhwc)
    x_flat = canvas.reshape(N, Mpad, C)

    # Mask zeroing the two padded columns of every output row.
    col_valid = ((jnp.arange(row) >= 1) & (jnp.arange(row) <= W)).astype(jnp.float32)
    colmask = jnp.tile(col_valid, (H,)).reshape(Hc, 1)

    # Anchors on the padded-column grid, coordinate-major (centers + sizes).
    cy = jnp.arange(H, dtype=jnp.float32) + 0.5
    cx = jnp.arange(row, dtype=jnp.float32) - 0.5        # padded col jp -> real col jp-1
    cyg, cxg = jnp.meshgrid(cy, cx, indexing="ij")        # (H, W+2)
    cx_flat = cxg.reshape(Hc, 1)
    cy_flat = cyg.reshape(Hc, 1)
    anc_ctr = jnp.concatenate(
        [jnp.tile(cx_flat, (1, A)), jnp.tile(cy_flat, (1, A))], axis=1)   # (Hc, 2A)
    sizes = jnp.asarray(anchor_sizes, dtype=jnp.float32)
    anc_sz = jnp.concatenate([sizes, sizes]).reshape(1, 2 * A)            # aw == ah == size

    # Decode constants (x columns then y columns): clip-to-image, rescale, clip-to-output.
    dec = jnp.asarray(
        [[float(W)] * A + [float(H)] * A,
         [float(out_w) / float(W)] * A + [float(out_h) / float(H)] * A,
         [float(out_w)] * A + [float(out_h)] * A],
        dtype=jnp.float32)

    bf = jnp.bfloat16
    kernel = functools.partial(
        _fused_rpn_kernel, H=H, W=W, F=F, clamp=math.log(1000.0 / 16.0))

    obj_pad, xy1_pad, xy2_pad = pl.pallas_call(
        kernel,
        out_shape=(
            jax.ShapeDtypeStruct((N, Hc, A), jnp.float32),
            jax.ShapeDtypeStruct((N, Hc, 2 * A), jnp.float32),
            jax.ShapeDtypeStruct((N, Hc, 2 * A), jnp.float32),
        ),
        grid=(N,),
        in_specs=[
            pl.BlockSpec((None, Mpad, C), lambda n: (n, 0, 0)),     # image slab
            pl.BlockSpec((9, C, F), lambda n: (0, 0, 0)),           # conv1 w (folded)
            pl.BlockSpec((1, F), lambda n: (0, 0)),                 # conv1 b (folded)
            pl.BlockSpec((9, F, F), lambda n: (0, 0, 0)),           # rpn conv w
            pl.BlockSpec((1, F), lambda n: (0, 0)),                 # rpn conv b
            pl.BlockSpec((F, A), lambda n: (0, 0)),                 # objectness w
            pl.BlockSpec((1, A), lambda n: (0, 0)),
            pl.BlockSpec((F, 2 * A), lambda n: (0, 0)),             # delta-center w
            pl.BlockSpec((1, 2 * A), lambda n: (0, 0)),
            pl.BlockSpec((F, 2 * A), lambda n: (0, 0)),             # delta-size w
            pl.BlockSpec((1, 2 * A), lambda n: (0, 0)),
            pl.BlockSpec((Hc, 1), lambda n: (0, 0)),                # pad-column mask
            pl.BlockSpec((Hc, 2 * A), lambda n: (0, 0)),            # anchor centers
            pl.BlockSpec((1, 2 * A), lambda n: (0, 0)),             # anchor sizes
            pl.BlockSpec((3, 2 * A), lambda n: (0, 0)),             # decode constants
        ],
        out_specs=(
            pl.BlockSpec((None, Hc, A), lambda n: (n, 0, 0)),
            pl.BlockSpec((None, Hc, 2 * A), lambda n: (n, 0, 0)),
            pl.BlockSpec((None, Hc, 2 * A), lambda n: (n, 0, 0)),
        ),
        scratch_shapes=[pltpu.VMEM((Mpad, F), jnp.float32)],
        compiler_params=pltpu.CompilerParams(
            dimension_semantics=("parallel",),
            vmem_limit_bytes=32 * 1024 * 1024,
        ),
    )(
        x_flat,
        w1.astype(bf), b1.reshape(1, F),
        params["rpn_conv_w"].astype(bf), params["rpn_conv_b"].reshape(1, F),
        params["rpn_obj_w"].astype(bf), params["rpn_obj_b"].reshape(1, A),
        params["rpn_ctr_w"].astype(bf), params["rpn_ctr_b"].reshape(1, 2 * A),
        params["rpn_sz_w"].astype(bf), params["rpn_sz_b"].reshape(1, 2 * A),
        colmask, anc_ctr, anc_sz, dec,
    )

    # Drop the padded columns and convert to the module's (N, HWA, 4) / (N, HWA) API
    # layout (tiny final reformat kept in XLA; the per-box layout is dictated downstream).
    logits = obj_pad.reshape(N, H, row, A)[:, :, 1:1 + W, :].reshape(N, H * W * A)
    bxy1 = xy1_pad.reshape(N, H, row, 2, A)[:, :, 1:1 + W]
    bxy2 = xy2_pad.reshape(N, H, row, 2, A)[:, :, 1:1 + W]
    boxes = jnp.concatenate([bxy1, bxy2], axis=3)                   # (N, H, W, 4, A)
    boxes = jnp.transpose(boxes, (0, 1, 2, 4, 3)).reshape(N, H * W * A, 4)

    # TODO(synk): find_top_rpn_proposals (per-frame top-k + NMS) is not implemented;
    # all decoded proposals are returned with their objectness logits.
    # TODO(synk): organ-specific RPN-cls head switching (ORGAN_SPECIFIC) is a
    # parameter-selection branch with no compute and is not modeled.
    return boxes, logits


if __name__ == "__main__":
    key = jax.random.PRNGKey(0)
    k_img, k_par = jax.random.split(key)

    # small shapes: num_frames=2, channels=4, spatial 16x16, feature dim 32, 3 anchors
    N, C, H, W = 2, 4, 16, 16
    C_feat, A = 32, 3
    anchor_sizes = (4.0, 8.0, 16.0)
    out_hw = (64, 64)   # frame_input["height"], frame_input["width"]

    images = 255.0 * jax.random.uniform(k_img, (N, C, H, W), dtype=jnp.float32)
    pixel_mean = jnp.array([110.0, 115.0, 120.0, 125.0], dtype=jnp.float32)
    pixel_std = jnp.array([55.0, 57.0, 58.0, 60.0], dtype=jnp.float32)
    params = init_params(k_par, C, C_feat, A)

    forward = jax.jit(temporal_proposal_network_forward,
                      static_argnames=("anchor_sizes", "out_hw"))
    boxes, scores = forward(images, params, pixel_mean, pixel_std,
                            anchor_sizes=anchor_sizes, out_hw=out_hw)
    jax.block_until_ready((boxes, scores))

    assert boxes.shape == (N, H * W * A, 4)
    assert scores.shape == (N, H * W * A)
    assert bool(jnp.all(jnp.isfinite(boxes))) and bool(jnp.all(jnp.isfinite(scores)))
    print("KERNEL_OK")
</pallas_src>

<mosaic_0001>
module attributes {stable_mosaic.version = 11 : i64} {
  func.func @_fused_rpn_kernel(%arg0: i32, %arg1: memref<1x360x4xf32, #tpu.memory_space<vmem>>, %arg2: memref<9x4x32xbf16, #tpu.memory_space<vmem>>, %arg3: memref<1x32xf32, #tpu.memory_space<vmem>>, %arg4: memref<9x32x32xbf16, #tpu.memory_space<vmem>>, %arg5: memref<1x32xf32, #tpu.memory_space<vmem>>, %arg6: memref<32x3xbf16, #tpu.memory_space<vmem>>, %arg7: memref<1x3xf32, #tpu.memory_space<vmem>>, %arg8: memref<32x6xbf16, #tpu.memory_space<vmem>>, %arg9: memref<1x6xf32, #tpu.memory_space<vmem>>, %arg10: memref<32x6xbf16, #tpu.memory_space<vmem>>, %arg11: memref<1x6xf32, #tpu.memory_space<vmem>>, %arg12: memref<288x1xf32, #tpu.memory_space<vmem>>, %arg13: memref<288x6xf32, #tpu.memory_space<vmem>>, %arg14: memref<1x6xf32, #tpu.memory_space<vmem>>, %arg15: memref<3x6xf32, #tpu.memory_space<vmem>>, %arg16: memref<1x288x3xf32, #tpu.memory_space<vmem>>, %arg17: memref<1x288x6xf32, #tpu.memory_space<vmem>>, %arg18: memref<1x288x6xf32, #tpu.memory_space<vmem>>, %arg19: memref<360x32xf32, #tpu.memory_space<vmem>>) attributes {dimension_semantics = [#tpu.dimension_semantics<parallel>], iteration_bounds = array<i64: 2>, scalar_prefetch = 0 : i64, scratch_operands = 1 : i64, tpu.core_type = #tpu.core_type<tc>, window_params = [{transform_indices = @transform_0, window_bounds = array<i64: 1, 360, 4>}, {pipeline_mode = #tpu.pipeline_mode<synchronous>, transform_indices = @transform_1, window_bounds = array<i64: 9, 4, 32>}, {pipeline_mode = #tpu.pipeline_mode<synchronous>, transform_indices = @transform_2, window_bounds = array<i64: 1, 32>}, {pipeline_mode = #tpu.pipeline_mode<synchronous>, transform_indices = @transform_3, window_bounds = array<i64: 9, 32, 32>}, {pipeline_mode = #tpu.pipeline_mode<synchronous>, transform_indices = @transform_4, window_bounds = array<i64: 1, 32>}, {pipeline_mode = #tpu.pipeline_mode<synchronous>, transform_indices = @transform_5, window_bounds = array<i64: 32, 3>}, {pipeline_mode = #tpu.pipeline_mode<synchronous>, transform_indices = @transform_6, window_bounds = array<i64: 1, 3>}, {pipeline_mode = #tpu.pipeline_mode<synchronous>, transform_indices = @transform_7, window_bounds = array<i64: 32, 6>}, {pipeline_mode = #tpu.pipeline_mode<synchronous>, transform_indices = @transform_8, window_bounds = array<i64: 1, 6>}, {pipeline_mode = #tpu.pipeline_mode<synchronous>, transform_indices = @transform_9, window_bounds = array<i64: 32, 6>}, {pipeline_mode = #tpu.pipeline_mode<synchronous>, transform_indices = @transform_10, window_bounds = array<i64: 1, 6>}, {pipeline_mode = #tpu.pipeline_mode<synchronous>, transform_indices = @transform_11, window_bounds = array<i64: 288, 1>}, {pipeline_mode = #tpu.pipeline_mode<synchronous>, transform_indices = @transform_12, window_bounds = array<i64: 288, 6>}, {pipeline_mode = #tpu.pipeline_mode<synchronous>, transform_indices = @transform_13, window_bounds = array<i64: 1, 6>}, {pipeline_mode = #tpu.pipeline_mode<synchronous>, transform_indices = @transform_14, window_bounds = array<i64: 3, 6>}, {transform_indices = @transform_15, window_bounds = array<i64: 1, 288, 3>}, {transform_indices = @transform_16, window_bounds = array<i64: 1, 288, 6>}, {transform_indices = @transform_17, window_bounds = array<i64: 1, 288, 6>}]} {
    %c0_i32 = arith.constant 0 : i32
    %0 = arith.cmpi eq, %arg0, %c0_i32 : i32
    %1 = arith.extui %0 : i1 to i32
    %c0_i32_0 = arith.constant 0 : i32
    %2 = arith.cmpi ne, %1, %c0_i32_0 : i32
    scf.if %2 {
      %cst_151 = arith.constant 0.000000e+00 : f32
      %198 = vector.broadcast %cst_151 : f32 to vector<360x32xf32>
      %c0_152 = arith.constant 0 : index
      %c0_153 = arith.constant 0 : index
      %199 = vector.load %arg19[%c0_152, %c0_153] : memref<360x32xf32, #tpu.memory_space<vmem>>, vector<360x32xf32>
      tpu.vector_store %arg19[%c0_152, %c0_153], %198 {strides = array<i32>} : memref<360x32xf32, #tpu.memory_space<vmem>>, vector<360x32xf32>,
    } else {
    }
    %cst = arith.constant 0.000000e+00 : f32
    %3 = vector.broadcast %cst : f32 to vector<288x32xf32>
    %c0 = arith.constant 0 : index
    %c17 = arith.constant 17 : index
    %c0_1 = arith.constant 0 : index
    %4 = vector.load %arg1[%c0, %c17, %c0_1] : memref<1x360x4xf32, #tpu.memory_space<vmem>>, vector<1x288x4xf32>
    %5 = vector.shape_cast %4 : vector<1x288x4xf32> to vector<288x4xf32>
    %6 = arith.truncf %5 : vector<288x4xf32> to vector<288x4xbf16>
    %c0_2 = arith.constant 0 : index
    %c0_3 = arith.constant 0 : index
    %c0_4 = arith.constant 0 : index
    %7 = vector.load %arg2[%c0_2, %c0_3, %c0_4] : memref<9x4x32xbf16, #tpu.memory_space<vmem>>, vector<1x4x32xbf16>
    %8 = vector.shape_cast %7 : vector<1x4x32xbf16> to vector<4x32xbf16>
    %cst_5 = arith.constant dense<0.000000e+00> : vector<288x32xf32>
    %9 = tpu.matmul %6, %8, %cst_5 {dimension_numbers = #tpu.dot_dimension_numbers<[1], [0], [0], [1], [0, 0, 1, 1], [], []>} : vector<288x4xbf16>, vector<4x32xbf16>, vector<288x32xf32> -> vector<288x32xf32>
    %10 = arith.addf %3, %9 : vector<288x32xf32>
    %c0_6 = arith.constant 0 : index
    %c18 = arith.constant 18 : index
    %c0_7 = arith.constant 0 : index
    %11 = vector.load %arg1[%c0_6, %c18, %c0_7] : memref<1x360x4xf32, #tpu.memory_space<vmem>>, vector<1x288x4xf32>
    %12 = vector.shape_cast %11 : vector<1x288x4xf32> to vector<288x4xf32>
    %13 = arith.truncf %12 : vector<288x4xf32> to vector<288x4xbf16>
    %c1 = arith.constant 1 : index
    %c0_8 = arith.constant 0 : index
    %c0_9 = arith.constant 0 : index
    %14 = vector.load %arg2[%c1, %c0_8, %c0_9] : memref<9x4x32xbf16, #tpu.memory_space<vmem>>, vector<1x4x32xbf16>
    %15 = vector.shape_cast %14 : vector<1x4x32xbf16> to vector<4x32xbf16>
    %cst_10 = arith.constant dense<0.000000e+00> : vector<288x32xf32>
    %16 = tpu.matmul %13, %15, %cst_10 {dimension_numbers = #tpu.dot_dimension_numbers<[1], [0], [0], [1], [0, 0, 1, 1], [], []>} : vector<288x4xbf16>, vector<4x32xbf16>, vector<288x32xf32> -> vector<288x32xf32>
    %17 = arith.addf %10, %16 : vector<288x32xf32>
    %c0_11 = arith.constant 0 : index
    %c19 = arith.constant 19 : index
    %c0_12 = arith.constant 0 : index
    %18 = vector.load %arg1[%c0_11, %c19, %c0_12] : memref<1x360x4xf32, #tpu.memory_space<vmem>>, vector<1x288x4xf32>
    %19 = vector.shape_cast %18 : vector<1x288x4xf32> to vector<288x4xf32>
    %20 = arith.truncf %19 : vector<288x4xf32> to vector<288x4xbf16>
    %c2 = arith.constant 2 : index
    %c0_13 = arith.constant 0 : index
    %c0_14 = arith.constant 0 : index
    %21 = vector.load %arg2[%c2, %c0_13, %c0_14] : memref<9x4x32xbf16, #tpu.memory_space<vmem>>, vector<1x4x32xbf16>
    %22 = vector.shape_cast %21 : vector<1x4x32xbf16> to vector<4x32xbf16>
    %cst_15 = arith.constant dense<0.000000e+00> : vector<288x32xf32>
    %23 = tpu.matmul %20, %22, %cst_15 {dimension_numbers = #tpu.dot_dimension_numbers<[1], [0], [0], [1], [0, 0, 1, 1], [], []>} : vector<288x4xbf16>, vector<4x32xbf16>, vector<288x32xf32> -> vector<288x32xf32>
    %24 = arith.addf %17, %23 : vector<288x32xf32>
    %c0_16 = arith.constant 0 : index
    %c35 = arith.constant 35 : index
    %c0_17 = arith.constant 0 : index
    %25 = vector.load %arg1[%c0_16, %c35, %c0_17] : memref<1x360x4xf32, #tpu.memory_space<vmem>>, vector<1x288x4xf32>
    %26 = vector.shape_cast %25 : vector<1x288x4xf32> to vector<288x4xf32>
    %27 = arith.truncf %26 : vector<288x4xf32> to vector<288x4xbf16>
    %c3 = arith.constant 3 : index
    %c0_18 = arith.constant 0 : index
    %c0_19 = arith.constant 0 : index
    %28 = vector.load %arg2[%c3, %c0_18, %c0_19] : memref<9x4x32xbf16, #tpu.memory_space<vmem>>, vector<1x4x32xbf16>
    %29 = vector.shape_cast %28 : vector<1x4x32xbf16> to vector<4x32xbf16>
    %cst_20 = arith.constant dense<0.000000e+00> : vector<288x32xf32>
    %30 = tpu.matmul %27, %29, %cst_20 {dimension_numbers = #tpu.dot_dimension_numbers<[1], [0], [0], [1], [0, 0, 1, 1], [], []>} : vector<288x4xbf16>, vector<4x32xbf16>, vector<288x32xf32> -> vector<288x32xf32>
    %31 = arith.addf %24, %30 : vector<288x32xf32>
    %c0_21 = arith.constant 0 : index
    %c36 = arith.constant 36 : index
    %c0_22 = arith.constant 0 : index
    %32 = vector.load %arg1[%c0_21, %c36, %c0_22] : memref<1x360x4xf32, #tpu.memory_space<vmem>>, vector<1x288x4xf32>
    %33 = vector.shape_cast %32 : vector<1x288x4xf32> to vector<288x4xf32>
    %34 = arith.truncf %33 : vector<288x4xf32> to vector<288x4xbf16>
    %c4 = arith.constant 4 : index
    %c0_23 = arith.constant 0 : index
    %c0_24 = arith.constant 0 : index
    %35 = vector.load %arg2[%c4, %c0_23, %c0_24] : memref<9x4x32xbf16, #tpu.memory_space<vmem>>, vector<1x4x32xbf16>
    %36 = vector.shape_cast %35 : vector<1x4x32xbf16> to vector<4x32xbf16>
    %cst_25 = arith.constant dense<0.000000e+00> : vector<288x32xf32>
    %37 = tpu.matmul %34, %36, %cst_25 {dimension_numbers = #tpu.dot_dimension_numbers<[1], [0], [0], [1], [0, 0, 1, 1], [], []>} : vector<288x4xbf16>, vector<4x32xbf16>, vector<288x32xf32> -> vector<288x32xf32>
    %38 = arith.addf %31, %37 : vector<288x32xf32>
    %c0_26 = arith.constant 0 : index
    %c37 = arith.constant 37 : index
    %c0_27 = arith.constant 0 : index
    %39 = vector.load %arg1[%c0_26, %c37, %c0_27] : memref<1x360x4xf32, #tpu.memory_space<vmem>>, vector<1x288x4xf32>
    %40 = vector.shape_cast %39 : vector<1x288x4xf32> to vector<288x4xf32>
    %41 = arith.truncf %40 : vector<288x4xf32> to vector<288x4xbf16>
    %c5 = arith.constant 5 : index
    %c0_28 = arith.constant 0 : index
    %c0_29 = arith.constant 0 : index
    %42 = vector.load %arg2[%c5, %c0_28, %c0_29] : memref<9x4x32xbf16, #tpu.memory_space<vmem>>, vector<1x4x32xbf16>
    %43 = vector.shape_cast %42 : vector<1x4x32xbf16> to vector<4x32xbf16>
    %cst_30 = arith.constant dense<0.000000e+00> : vector<288x32xf32>
    %44 = tpu.matmul %41, %43, %cst_30 {dimension_numbers = #tpu.dot_dimension_numbers<[1], [0], [0], [1], [0, 0, 1, 1], [], []>} : vector<288x4xbf16>, vector<4x32xbf16>, vector<288x32xf32> -> vector<288x32xf32>
    %45 = arith.addf %38, %44 : vector<288x32xf32>
    %c0_31 = arith.constant 0 : index
    %c53 = arith.constant 53 : index
    %c0_32 = arith.constant 0 : index
    %46 = vector.load %arg1[%c0_31, %c53, %c0_32] : memref<1x360x4xf32, #tpu.memory_space<vmem>>, vector<1x288x4xf32>
    %47 = vector.shape_cast %46 : vector<1x288x4xf32> to vector<288x4xf32>
    %48 = arith.truncf %47 : vector<288x4xf32> to vector<288x4xbf16>
    %c6 = arith.constant 6 : index
    %c0_33 = arith.constant 0 : index
    %c0_34 = arith.constant 0 : index
    %49 = vector.load %arg2[%c6, %c0_33, %c0_34] : memref<9x4x32xbf16, #tpu.memory_space<vmem>>, vector<1x4x32xbf16>
    %50 = vector.shape_cast %49 : vector<1x4x32xbf16> to vector<4x32xbf16>
    %cst_35 = arith.constant dense<0.000000e+00> : vector<288x32xf32>
    %51 = tpu.matmul %48, %50, %cst_35 {dimension_numbers = #tpu.dot_dimension_numbers<[1], [0], [0], [1], [0, 0, 1, 1], [], []>} : vector<288x4xbf16>, vector<4x32xbf16>, vector<288x32xf32> -> vector<288x32xf32>
    %52 = arith.addf %45, %51 : vector<288x32xf32>
    %c0_36 = arith.constant 0 : index
    %c54 = arith.constant 54 : index
    %c0_37 = arith.constant 0 : index
    %53 = vector.load %arg1[%c0_36, %c54, %c0_37] : memref<1x360x4xf32, #tpu.memory_space<vmem>>, vector<1x288x4xf32>
    %54 = vector.shape_cast %53 : vector<1x288x4xf32> to vector<288x4xf32>
    %55 = arith.truncf %54 : vector<288x4xf32> to vector<288x4xbf16>
    %c7 = arith.constant 7 : index
    %c0_38 = arith.constant 0 : index
    %c0_39 = arith.constant 0 : index
    %56 = vector.load %arg2[%c7, %c0_38, %c0_39] : memref<9x4x32xbf16, #tpu.memory_space<vmem>>, vector<1x4x32xbf16>
    %57 = vector.shape_cast %56 : vector<1x4x32xbf16> to vector<4x32xbf16>
    %cst_40 = arith.constant dense<0.000000e+00> : vector<288x32xf32>
    %58 = tpu.matmul %55, %57, %cst_40 {dimension_numbers = #tpu.dot_dimension_numbers<[1], [0], [0], [1], [0, 0, 1, 1], [], []>} : vector<288x4xbf16>, vector<4x32xbf16>, vector<288x32xf32> -> vector<288x32xf32>
    %59 = arith.addf %52, %58 : vector<288x32xf32>
    %c0_41 = arith.constant 0 : index
    %c55 = arith.constant 55 : index
    %c0_42 = arith.constant 0 : index
    %60 = vector.load %arg1[%c0_41, %c55, %c0_42] : memref<1x360x4xf32, #tpu.memory_space<vmem>>, vector<1x288x4xf32>
    %61 = vector.shape_cast %60 : vector<1x288x4xf32> to vector<288x4xf32>
    %62 = arith.truncf %61 : vector<288x4xf32> to vector<288x4xbf16>
    %c8 = arith.constant 8 : index
    %c0_43 = arith.constant 0 : index
    %c0_44 = arith.constant 0 : index
    %63 = vector.load %arg2[%c8, %c0_43, %c0_44] : memref<9x4x32xbf16, #tpu.memory_space<vmem>>, vector<1x4x32xbf16>
    %64 = vector.shape_cast %63 : vector<1x4x32xbf16> to vector<4x32xbf16>
    %cst_45 = arith.constant dense<0.000000e+00> : vector<288x32xf32>
    %65 = tpu.matmul %62, %64, %cst_45 {dimension_numbers = #tpu.dot_dimension_numbers<[1], [0], [0], [1], [0, 0, 1, 1], [], []>} : vector<288x4xbf16>, vector<4x32xbf16>, vector<288x32xf32> -> vector<288x32xf32>
    %66 = arith.addf %59, %65 : vector<288x32xf32>
    %c0_46 = arith.constant 0 : index
    %c0_47 = arith.constant 0 : index
    %67 = vector.load %arg3[%c0_46, %c0_47] : memref<1x32xf32, #tpu.memory_space<vmem>>, vector<1x32xf32>
    %68 = vector.broadcast %67 : vector<1x32xf32> to vector<288x32xf32>
    %69 = arith.addf %66, %68 : vector<288x32xf32>
    %cst_48 = arith.constant 0.000000e+00 : f32
    %70 = vector.broadcast %cst_48 : f32 to vector<288x32xf32>
    %71 = arith.maximumf %69, %70 : vector<288x32xf32>
    %c0_49 = arith.constant 0 : index
    %c0_50 = arith.constant 0 : index
    %72 = vector.load %arg12[%c0_49, %c0_50] : memref<288x1xf32, #tpu.memory_space<vmem>>, vector<288x1xf32>
    %73 = vector.broadcast %72 : vector<288x1xf32> to vector<288x32xf32>
    %74 = arith.mulf %71, %73 : vector<288x32xf32>
    %c36_51 = arith.constant 36 : index
    %c0_52 = arith.constant 0 : index
    %75 = vector.load %arg19[%c36_51, %c0_52] : memref<360x32xf32, #tpu.memory_space<vmem>>, vector<288x32xf32>
    tpu.vector_store %arg19[%c36_51, %c0_52], %74 {strides = array<i32>} : memref<360x32xf32, #tpu.memory_space<vmem>>, vector<288x32xf32>,
    %cst_53 = arith.constant 0.000000e+00 : f32
    %76 = vector.broadcast %cst_53 : f32 to vector<288x32xf32>
    %c17_54 = arith.constant 17 : index
    %c0_55 = arith.constant 0 : index
    %77 = vector.load %arg19[%c17_54, %c0_55] : memref<360x32xf32, #tpu.memory_space<vmem>>, vector<288x32xf32>
    %78 = arith.truncf %77 : vector<288x32xf32> to vector<288x32xbf16>
    %c0_56 = arith.constant 0 : index
    %c0_57 = arith.constant 0 : index
    %c0_58 = arith.constant 0 : index
    %79 = vector.load %arg4[%c0_56, %c0_57, %c0_58] : memref<9x32x32xbf16, #tpu.memory_space<vmem>>, vector<1x32x32xbf16>
    %80 = vector.shape_cast %79 : vector<1x32x32xbf16> to vector<32x32xbf16>
    %cst_59 = arith.constant dense<0.000000e+00> : vector<288x32xf32>
    %81 = tpu.matmul %78, %80, %cst_59 {dimension_numbers = #tpu.dot_dimension_numbers<[1], [0], [0], [1], [0, 0, 1, 1], [], []>} : vector<288x32xbf16>, vector<32x32xbf16>, vector<288x32xf32> -> vector<288x32xf32>
    %82 = arith.addf %76, %81 : vector<288x32xf32>
    %c18_60 = arith.constant 18 : index
    %c0_61 = arith.constant 0 : index
    %83 = vector.load %arg19[%c18_60, %c0_61] : memref<360x32xf32, #tpu.memory_space<vmem>>, vector<288x32xf32>
    %84 = arith.truncf %83 : vector<288x32xf32> to vector<288x32xbf16>
    %c1_62 = arith.constant 1 : index
    %c0_63 = arith.constant 0 : index
    %c0_64 = arith.constant 0 : index
    %85 = vector.load %arg4[%c1_62, %c0_63, %c0_64] : memref<9x32x32xbf16, #tpu.memory_space<vmem>>, vector<1x32x32xbf16>
    %86 = vector.shape_cast %85 : vector<1x32x32xbf16> to vector<32x32xbf16>
    %cst_65 = arith.constant dense<0.000000e+00> : vector<288x32xf32>
    %87 = tpu.matmul %84, %86, %cst_65 {dimension_numbers = #tpu.dot_dimension_numbers<[1], [0], [0], [1], [0, 0, 1, 1], [], []>} : vector<288x32xbf16>, vector<32x32xbf16>, vector<288x32xf32> -> vector<288x32xf32>
    %88 = arith.addf %82, %87 : vector<288x32xf32>
    %c19_66 = arith.constant 19 : index
    %c0_67 = arith.constant 0 : index
    %89 = vector.load %arg19[%c19_66, %c0_67] : memref<360x32xf32, #tpu.memory_space<vmem>>, vector<288x32xf32>
    %90 = arith.truncf %89 : vector<288x32xf32> to vector<288x32xbf16>
    %c2_68 = arith.constant 2 : index
    %c0_69 = arith.constant 0 : index
    %c0_70 = arith.constant 0 : index
    %91 = vector.load %arg4[%c2_68, %c0_69, %c0_70] : memref<9x32x32xbf16, #tpu.memory_space<vmem>>, vector<1x32x32xbf16>
    %92 = vector.shape_cast %91 : vector<1x32x32xbf16> to vector<32x32xbf16>
    %cst_71 = arith.constant dense<0.000000e+00> : vector<288x32xf32>
    %93 = tpu.matmul %90, %92, %cst_71 {dimension_numbers = #tpu.dot_dimension_numbers<[1], [0], [0], [1], [0, 0, 1, 1], [], []>} : vector<288x32xbf16>, vector<32x32xbf16>, vector<288x32xf32> -> vector<288x32xf32>
    %94 = arith.addf %88, %93 : vector<288x32xf32>
    %c35_72 = arith.constant 35 : index
    %c0_73 = arith.constant 0 : index
    %95 = vector.load %arg19[%c35_72, %c0_73] : memref<360x32xf32, #tpu.memory_space<vmem>>, vector<288x32xf32>
    %96 = arith.truncf %95 : vector<288x32xf32> to vector<288x32xbf16>
    %c3_74 = arith.constant 3 : index
    %c0_75 = arith.constant 0 : index
    %c0_76 = arith.constant 0 : index
    %97 = vector.load %arg4[%c3_74, %c0_75, %c0_76] : memref<9x32x32xbf16, #tpu.memory_space<vmem>>, vector<1x32x32xbf16>
    %98 = vector.shape_cast %97 : vector<1x32x32xbf16> to vector<32x32xbf16>
    %cst_77 = arith.constant dense<0.000000e+00> : vector<288x32xf32>
    %99 = tpu.matmul %96, %98, %cst_77 {dimension_numbers = #tpu.dot_dimension_numbers<[1], [0], [0], [1], [0, 0, 1, 1], [], []>} : vector<288x32xbf16>, vector<32x32xbf16>, vector<288x32xf32> -> vector<288x32xf32>
    %100 = arith.addf %94, %99 : vector<288x32xf32>
    %c36_78 = arith.constant 36 : index
    %c0_79 = arith.constant 0 : index
    %101 = vector.load %arg19[%c36_78, %c0_79] : memref<360x32xf32, #tpu.memory_space<vmem>>, vector<288x32xf32>
    %102 = arith.truncf %101 : vector<288x32xf32> to vector<288x32xbf16>
    %c4_80 = arith.constant 4 : index
    %c0_81 = arith.constant 0 : index
    %c0_82 = arith.constant 0 : index
    %103 = vector.load %arg4[%c4_80, %c0_81, %c0_82] : memref<9x32x32xbf16, #tpu.memory_space<vmem>>, vector<1x32x32xbf16>
    %104 = vector.shape_cast %103 : vector<1x32x32xbf16> to vector<32x32xbf16>
    %cst_83 = arith.constant dense<0.000000e+00> : vector<288x32xf32>
    %105 = tpu.matmul %102, %104, %cst_83 {dimension_numbers = #tpu.dot_dimension_numbers<[1], [0], [0], [1], [0, 0, 1, 1], [], []>} : vector<288x32xbf16>, vector<32x32xbf16>, vector<288x32xf32> -> vector<288x32xf32>
    %106 = arith.addf %100, %105 : vector<288x32xf32>
    %c37_84 = arith.constant 37 : index
    %c0_85 = arith.constant 0 : index
    %107 = vector.load %arg19[%c37_84, %c0_85] : memref<360x32xf32, #tpu.memory_space<vmem>>, vector<288x32xf32>
    %108 = arith.truncf %107 : vector<288x32xf32> to vector<288x32xbf16>
    %c5_86 = arith.constant 5 : index
    %c0_87 = arith.constant 0 : index
    %c0_88 = arith.constant 0 : index
    %109 = vector.load %arg4[%c5_86, %c0_87, %c0_88] : memref<9x32x32xbf16, #tpu.memory_space<vmem>>, vector<1x32x32xbf16>
    %110 = vector.shape_cast %109 : vector<1x32x32xbf16> to vector<32x32xbf16>
    %cst_89 = arith.constant dense<0.000000e+00> : vector<288x32xf32>
    %111 = tpu.matmul %108, %110, %cst_89 {dimension_numbers = #tpu.dot_dimension_numbers<[1], [0], [0], [1], [0, 0, 1, 1], [], []>} : vector<288x32xbf16>, vector<32x32xbf16>, vector<288x32xf32> -> vector<288x32xf32>
    %112 = arith.addf %106, %111 : vector<288x32xf32>
    %c53_90 = arith.constant 53 : index
    %c0_91 = arith.constant 0 : index
    %113 = vector.load %arg19[%c53_90, %c0_91] : memref<360x32xf32, #tpu.memory_space<vmem>>, vector<288x32xf32>
    %114 = arith.truncf %113 : vector<288x32xf32> to vector<288x32xbf16>
    %c6_92 = arith.constant 6 : index
    %c0_93 = arith.constant 0 : index
    %c0_94 = arith.constant 0 : index
    %115 = vector.load %arg4[%c6_92, %c0_93, %c0_94] : memref<9x32x32xbf16, #tpu.memory_space<vmem>>, vector<1x32x32xbf16>
    %116 = vector.shape_cast %115 : vector<1x32x32xbf16> to vector<32x32xbf16>
    %cst_95 = arith.constant dense<0.000000e+00> : vector<288x32xf32>
    %117 = tpu.matmul %114, %116, %cst_95 {dimension_numbers = #tpu.dot_dimension_numbers<[1], [0], [0], [1], [0, 0, 1, 1], [], []>} : vector<288x32xbf16>, vector<32x32xbf16>, vector<288x32xf32> -> vector<288x32xf32>
    %118 = arith.addf %112, %117 : vector<288x32xf32>
    %c54_96 = arith.constant 54 : index
    %c0_97 = arith.constant 0 : index
    %119 = vector.load %arg19[%c54_96, %c0_97] : memref<360x32xf32, #tpu.memory_space<vmem>>, vector<288x32xf32>
    %120 = arith.truncf %119 : vector<288x32xf32> to vector<288x32xbf16>
    %c7_98 = arith.constant 7 : index
    %c0_99 = arith.constant 0 : index
    %c0_100 = arith.constant 0 : index
    %121 = vector.load %arg4[%c7_98, %c0_99, %c0_100] : memref<9x32x32xbf16, #tpu.memory_space<vmem>>, vector<1x32x32xbf16>
    %122 = vector.shape_cast %121 : vector<1x32x32xbf16> to vector<32x32xbf16>
    %cst_101 = arith.constant dense<0.000000e+00> : vector<288x32xf32>
    %123 = tpu.matmul %120, %122, %cst_101 {dimension_numbers = #tpu.dot_dimension_numbers<[1], [0], [0], [1], [0, 0, 1, 1], [], []>} : vector<288x32xbf16>, vector<32x32xbf16>, vector<288x32xf32> -> vector<288x32xf32>
    %124 = arith.addf %118, %123 : vector<288x32xf32>
    %c55_102 = arith.constant 55 : index
    %c0_103 = arith.constant 0 : index
    %125 = vector.load %arg19[%c55_102, %c0_103] : memref<360x32xf32, #tpu.memory_space<vmem>>, vector<288x32xf32>
    %126 = arith.truncf %125 : vector<288x32xf32> to vector<288x32xbf16>
    %c8_104 = arith.constant 8 : index
    %c0_105 = arith.constant 0 : index
    %c0_106 = arith.constant 0 : index
    %127 = vector.load %arg4[%c8_104, %c0_105, %c0_106] : memref<9x32x32xbf16, #tpu.memory_space<vmem>>, vector<1x32x32xbf16>
    %128 = vector.shape_cast %127 : vector<1x32x32xbf16> to vector<32x32xbf16>
    %cst_107 = arith.constant dense<0.000000e+00> : vector<288x32xf32>
    %129 = tpu.matmul %126, %128, %cst_107 {dimension_numbers = #tpu.dot_dimension_numbers<[1], [0], [0], [1], [0, 0, 1, 1], [], []>} : vector<288x32xbf16>, vector<32x32xbf16>, vector<288x32xf32> -> vector<288x32xf32>
    %130 = arith.addf %124, %129 : vector<288x32xf32>
    %c0_108 = arith.constant 0 : index
    %c0_109 = arith.constant 0 : index
    %131 = vector.load %arg5[%c0_108, %c0_109] : memref<1x32xf32, #tpu.memory_space<vmem>>, vector<1x32xf32>
    %132 = vector.broadcast %131 : vector<1x32xf32> to vector<288x32xf32>
    %133 = arith.addf %130, %132 : vector<288x32xf32>
    %cst_110 = arith.constant 0.000000e+00 : f32
    %134 = vector.broadcast %cst_110 : f32 to vector<288x32xf32>
    %135 = arith.maximumf %133, %134 : vector<288x32xf32>
    %136 = arith.truncf %135 : vector<288x32xf32> to vector<288x32xbf16>
    %c0_111 = arith.constant 0 : index
    %c0_112 = arith.constant 0 : index
    %137 = vector.load %arg6[%c0_111, %c0_112] : memref<32x3xbf16, #tpu.memory_space<vmem>>, vector<32x3xbf16>
    %cst_113 = arith.constant dense<0.000000e+00> : vector<288x3xf32>
    %138 = tpu.matmul %136, %137, %cst_113 {dimension_numbers = #tpu.dot_dimension_numbers<[1], [0], [0], [1], [0, 0, 1, 1], [], []>} : vector<288x32xbf16>, vector<32x3xbf16>, vector<288x3xf32> -> vector<288x3xf32>
    %c0_114 = arith.constant 0 : index
    %c0_115 = arith.constant 0 : index
    %139 = vector.load %arg7[%c0_114, %c0_115] : memref<1x3xf32, #tpu.memory_space<vmem>>, vector<1x3xf32>
    %140 = vector.broadcast %139 : vector<1x3xf32> to vector<288x3xf32>
    %141 = arith.addf %138, %140 : vector<288x3xf32>
    %c0_116 = arith.constant 0 : index
    %c0_117 = arith.constant 0 : index
    %142 = vector.load %arg8[%c0_116, %c0_117] : memref<32x6xbf16, #tpu.memory_space<vmem>>, vector<32x6xbf16>
    %cst_118 = arith.constant dense<0.000000e+00> : vector<288x6xf32>
    %143 = tpu.matmul %136, %142, %cst_118 {dimension_numbers = #tpu.dot_dimension_numbers<[1], [0], [0], [1], [0, 0, 1, 1], [], []>} : vector<288x32xbf16>, vector<32x6xbf16>, vector<288x6xf32> -> vector<288x6xf32>
    %c0_119 = arith.constant 0 : index
    %c0_120 = arith.constant 0 : index
    %144 = vector.load %arg9[%c0_119, %c0_120] : memref<1x6xf32, #tpu.memory_space<vmem>>, vector<1x6xf32>
    %145 = vector.broadcast %144 : vector<1x6xf32> to vector<288x6xf32>
    %146 = arith.addf %143, %145 : vector<288x6xf32>
    %c0_121 = arith.constant 0 : index
    %c0_122 = arith.constant 0 : index
    %147 = vector.load %arg10[%c0_121, %c0_122] : memref<32x6xbf16, #tpu.memory_space<vmem>>, vector<32x6xbf16>
    %cst_123 = arith.constant dense<0.000000e+00> : vector<288x6xf32>
    %148 = tpu.matmul %136, %147, %cst_123 {dimension_numbers = #tpu.dot_dimension_numbers<[1], [0], [0], [1], [0, 0, 1, 1], [], []>} : vector<288x32xbf16>, vector<32x6xbf16>, vector<288x6xf32> -> vector<288x6xf32>
    %c0_124 = arith.constant 0 : index
    %c0_125 = arith.constant 0 : index
    %149 = vector.load %arg11[%c0_124, %c0_125] : memref<1x6xf32, #tpu.memory_space<vmem>>, vector<1x6xf32>
    %150 = vector.broadcast %149 : vector<1x6xf32> to vector<288x6xf32>
    %151 = arith.addf %148, %150 : vector<288x6xf32>
    %c0_126 = arith.constant 0 : index
    %c0_127 = arith.constant 0 : index
    %152 = vector.load %arg14[%c0_126, %c0_127] : memref<1x6xf32, #tpu.memory_space<vmem>>, vector<1x6xf32>
    %c0_128 = arith.constant 0 : index
    %c0_129 = arith.constant 0 : index
    %153 = vector.load %arg13[%c0_128, %c0_129] : memref<288x6xf32, #tpu.memory_space<vmem>>, vector<288x6xf32>
    %154 = vector.broadcast %152 : vector<1x6xf32> to vector<288x6xf32>
    %155 = arith.mulf %146, %154 : vector<288x6xf32>
    %156 = arith.addf %155, %153 : vector<288x6xf32>
    %cst_130 = arith.constant 4.13516665 : f32
    %157 = vector.broadcast %cst_130 : f32 to vector<288x6xf32>
    %158 = arith.minimumf %151, %157 : vector<288x6xf32>
    %159 = math.exp %158 : vector<288x6xf32>
    %160 = vector.broadcast %152 : vector<1x6xf32> to vector<288x6xf32>
    %161 = arith.mulf %159, %160 : vector<288x6xf32>
    %cst_131 = arith.constant 5.000000e-01 : f32
    %162 = vector.broadcast %cst_131 : f32 to vector<288x6xf32>
    %163 = arith.mulf %162, %161 : vector<288x6xf32>
    %164 = arith.subf %156, %163 : vector<288x6xf32>
    %165 = arith.addf %156, %163 : vector<288x6xf32>
    %c0_132 = arith.constant 0 : index
    %c0_133 = arith.constant 0 : index
    %166 = vector.load %arg15[%c0_132, %c0_133] : memref<3x6xf32, #tpu.memory_space<vmem>>, vector<1x6xf32>
    %c1_134 = arith.constant 1 : index
    %c0_135 = arith.constant 0 : index
    %167 = vector.load %arg15[%c1_134, %c0_135] : memref<3x6xf32, #tpu.memory_space<vmem>>, vector<1x6xf32>
    %c2_136 = arith.constant 2 : index
    %c0_137 = arith.constant 0 : index
    %168 = vector.load %arg15[%c2_136, %c0_137] : memref<3x6xf32, #tpu.memory_space<vmem>>, vector<1x6xf32>
    %cst_138 = arith.constant 0.000000e+00 : f32
    %169 = vector.broadcast %cst_138 : f32 to vector<288x6xf32>
    %170 = arith.maximumf %164, %169 : vector<288x6xf32>
    %171 = vector.broadcast %166 : vector<1x6xf32> to vector<288x6xf32>
    %172 = arith.minimumf %170, %171 : vector<288x6xf32>
    %cst_139 = arith.constant 0.000000e+00 : f32
    %173 = vector.broadcast %cst_139 : f32 to vector<288x6xf32>
    %174 = arith.maximumf %165, %173 : vector<288x6xf32>
    %175 = vector.broadcast %166 : vector<1x6xf32> to vector<288x6xf32>
    %176 = arith.minimumf %174, %175 : vector<288x6xf32>
    %177 = vector.broadcast %167 : vector<1x6xf32> to vector<288x6xf32>
    %178 = arith.mulf %172, %177 : vector<288x6xf32>
    %cst_140 = arith.constant 0.000000e+00 : f32
    %179 = vector.broadcast %cst_140 : f32 to vector<288x6xf32>
    %180 = arith.maximumf %178, %179 : vector<288x6xf32>
    %181 = vector.broadcast %168 : vector<1x6xf32> to vector<288x6xf32>
    %182 = arith.minimumf %180, %181 : vector<288x6xf32>
    %183 = vector.broadcast %167 : vector<1x6xf32> to vector<288x6xf32>
    %184 = arith.mulf %176, %183 : vector<288x6xf32>
    %cst_141 = arith.constant 0.000000e+00 : f32
    %185 = vector.broadcast %cst_141 : f32 to vector<288x6xf32>
    %186 = arith.maximumf %184, %185 : vector<288x6xf32>
    %187 = vector.broadcast %168 : vector<1x6xf32> to vector<288x6xf32>
    %188 = arith.minimumf %186, %187 : vector<288x6xf32>
    %c0_142 = arith.constant 0 : index
    %c0_143 = arith.constant 0 : index
    %c0_144 = arith.constant 0 : index
    %189 = vector.load %arg16[%c0_142, %c0_143, %c0_144] : memref<1x288x3xf32, #tpu.memory_space<vmem>>, vector<1x288x3xf32>
    %190 = vector.shape_cast %189 : vector<1x288x3xf32> to vector<288x3xf32>
    %191 = vector.shape_cast %141 : vector<288x3xf32> to vector<1x288x3xf32>
    tpu.vector_store %arg16[%c0_142, %c0_143, %c0_144], %191 {strides = array<i32>} : memref<1x288x3xf32, #tpu.memory_space<vmem>>, vector<1x288x3xf32>,
    %c0_145 = arith.constant 0 : index
    %c0_146 = arith.constant 0 : index
    %c0_147 = arith.constant 0 : index
    %192 = vector.load %arg17[%c0_145, %c0_146, %c0_147] : memref<1x288x6xf32, #tpu.memory_space<vmem>>, vector<1x288x6xf32>
    %193 = vector.shape_cast %192 : vector<1x288x6xf32> to vector<288x6xf32>
    %194 = vector.shape_cast %182 : vector<288x6xf32> to vector<1x288x6xf32>
    tpu.vector_store %arg17[%c0_145, %c0_146, %c0_147], %194 {strides = array<i32>} : memref<1x288x6xf32, #tpu.memory_space<vmem>>, vector<1x288x6xf32>,
    %c0_148 = arith.constant 0 : index
    %c0_149 = arith.constant 0 : index
    %c0_150 = arith.constant 0 : index
    %195 = vector.load %arg18[%c0_148, %c0_149, %c0_150] : memref<1x288x6xf32, #tpu.memory_space<vmem>>, vector<1x288x6xf32>
    %196 = vector.shape_cast %195 : vector<1x288x6xf32> to vector<288x6xf32>
    %197 = vector.shape_cast %188 : vector<288x6xf32> to vector<1x288x6xf32>
    tpu.vector_store %arg18[%c0_148, %c0_149, %c0_150], %197 {strides = array<i32>} : memref<1x288x6xf32, #tpu.memory_space<vmem>>, vector<1x288x6xf32>,
    return
  }
  func.func @transform_0(%arg0: i32) -> (i32, i32, i32) {
    %c0_i32 = arith.constant 0 : i32
    %c0_i32_0 = arith.constant 0 : i32
    %c0_i32_1 = arith.constant 0 : i32
    return %arg0, %c0_i32, %c0_i32_0 : i32, i32, i32
  }
  func.func @transform_1(%arg0: i32) -> (i32, i32, i32) {
    %c0_i32 = arith.constant 0 : i32
    %c0_i32_0 = arith.constant 0 : i32
    %c0_i32_1 = arith.constant 0 : i32
    %c0_i32_2 = arith.constant 0 : i32
    return %c0_i32, %c0_i32_0, %c0_i32_1 : i32, i32, i32
  }
  func.func @transform_2(%arg0: i32) -> (i32, i32) {
    %c0_i32 = arith.constant 0 : i32
    %c0_i32_0 = arith.constant 0 : i32
    %c0_i32_1 = arith.constant 0 : i32
    return %c0_i32, %c0_i32_0 : i32, i32
  }
  func.func @transform_3(%arg0: i32) -> (i32, i32, i32) {
    %c0_i32 = arith.constant 0 : i32
    %c0_i32_0 = arith.constant 0 : i32
    %c0_i32_1 = arith.constant 0 : i32
    %c0_i32_2 = arith.constant 0 : i32
    return %c0_i32, %c0_i32_0, %c0_i32_1 : i32, i32, i32
  }
  func.func @transform_4(%arg0: i32) -> (i32, i32) {
    %c0_i32 = arith.constant 0 : i32
    %c0_i32_0 = arith.constant 0 : i32
    %c0_i32_1 = arith.constant 0 : i32
    return %c0_i32, %c0_i32_0 : i32, i32
  }
  func.func @transform_5(%arg0: i32) -> (i32, i32) {
    %c0_i32 = arith.constant 0 : i32
    %c0_i32_0 = arith.constant 0 : i32
    %c0_i32_1 = arith.constant 0 : i32
    return %c0_i32, %c0_i32_0 : i32, i32
  }
  func.func @transform_6(%arg0: i32) -> (i32, i32) {
    %c0_i32 = arith.constant 0 : i32
    %c0_i32_0 = arith.constant 0 : i32
    %c0_i32_1 = arith.constant 0 : i32
    return %c0_i32, %c0_i32_0 : i32, i32
  }
  func.func @transform_7(%arg0: i32) -> (i32, i32) {
    %c0_i32 = arith.constant 0 : i32
    %c0_i32_0 = arith.constant 0 : i32
    %c0_i32_1 = arith.constant 0 : i32
    return %c0_i32, %c0_i32_0 : i32, i32
  }
  func.func @transform_8(%arg0: i32) -> (i32, i32) {
    %c0_i32 = arith.constant 0 : i32
    %c0_i32_0 = arith.constant 0 : i32
    %c0_i32_1 = arith.constant 0 : i32
    return %c0_i32, %c0_i32_0 : i32, i32
  }
  func.func @transform_9(%arg0: i32) -> (i32, i32) {
    %c0_i32 = arith.constant 0 : i32
    %c0_i32_0 = arith.constant 0 : i32
    %c0_i32_1 = arith.constant 0 : i32
    return %c0_i32, %c0_i32_0 : i32, i32
  }
  func.func @transform_10(%arg0: i32) -> (i32, i32) {
    %c0_i32 = arith.constant 0 : i32
    %c0_i32_0 = arith.constant 0 : i32
    %c0_i32_1 = arith.constant 0 : i32
    return %c0_i32, %c0_i32_0 : i32, i32
  }
  func.func @transform_11(%arg0: i32) -> (i32, i32) {
    %c0_i32 = arith.constant 0 : i32
    %c0_i32_0 = arith.constant 0 : i32
    %c0_i32_1 = arith.constant 0 : i32
    return %c0_i32, %c0_i32_0 : i32, i32
  }
  func.func @transform_12(%arg0: i32) -> (i32, i32) {
    %c0_i32 = arith.constant 0 : i32
    %c0_i32_0 = arith.constant 0 : i32
    %c0_i32_1 = arith.constant 0 : i32
    return %c0_i32, %c0_i32_0 : i32, i32
  }
  func.func @transform_13(%arg0: i32) -> (i32, i32) {
    %c0_i32 = arith.constant 0 : i32
    %c0_i32_0 = arith.constant 0 : i32
    %c0_i32_1 = arith.constant 0 : i32
    return %c0_i32, %c0_i32_0 : i32, i32
  }
  func.func @transform_14(%arg0: i32) -> (i32, i32) {
    %c0_i32 = arith.constant 0 : i32
    %c0_i32_0 = arith.constant 0 : i32
    %c0_i32_1 = arith.constant 0 : i32
    return %c0_i32, %c0_i32_0 : i32, i32
  }
  func.func @transform_15(%arg0: i32) -> (i32, i32, i32) {
    %c0_i32 = arith.constant 0 : i32
    %c0_i32_0 = arith.constant 0 : i32
    %c0_i32_1 = arith.constant 0 : i32
    return %arg0, %c0_i32, %c0_i32_0 : i32, i32, i32
  }
  func.func @transform_16(%arg0: i32) -> (i32, i32, i32) {
    %c0_i32 = arith.constant 0 : i32
    %c0_i32_0 = arith.constant 0 : i32
    %c0_i32_1 = arith.constant 0 : i32
    return %arg0, %c0_i32, %c0_i32_0 : i32, i32, i32
  }
  func.func @transform_17(%arg0: i32) -> (i32, i32, i32) {
    %c0_i32 = arith.constant 0 : i32
    %c0_i32_0 = arith.constant 0 : i32
    %c0_i32_1 = arith.constant 0 : i32
    return %arg0, %c0_i32, %c0_i32_0 : i32, i32, i32
  }
}

</mosaic_0001>

<bundles_post_ra>
// kernel: tile.24
= control target key start
LH: loop header
LB: loop body
LE: loop exit
PB: predicated region body
PF: predicated region fallthrough
CT: control target
= control target key end

     0   :  { %s28_s0 = inlined_call_operand.vmem [shape: f32[18], index: 0, kind: input, shape index: {}]   ;;  %s29_s1 = inlined_call_operand.vmem [shape: f32[16,18], index: 1, kind: output, shape index: {}]  }
   0x1   :  { %v4_v0 = vld [vmem:[%s28_s0] ss:$0 sm:$0xff] }
   0x2   :  { %5 = vst [vmem:[%s29_s1] sm:$0xff] %v4_v0 }
   0x3   :  { %8 = vst [vmem:[%s29_s1 + $0x8] sm:$0xff] %v4_v0 }

// kernel: tile.0
= control target key start
LH: loop header
LB: loop body
LE: loop exit
PB: predicated region body
PF: predicated region fallthrough
CT: control target
= control target key end

     0   :  { %s607_s10 = smov 127   ;;  %s608_s11 = smov 126   ;;  %vm3_vm0 = vcmask 7168   ;;  %s1245_s0 = inlined_call_operand.vmem [shape: f32[16,18], index: 0, kind: input, shape index: {}]   ;;  %s1246_s1 = inlined_call_operand.vmem [shape: f32[288,1], index: 1, kind: output, shape index: {}]  }
   0x1   :  { %v637_v0 = vld.sshfl [vmem:[%s1245_s0] sm:$0xff pattern:$0xf6d4b290]   ;;  %s609_s12 = smov 125   ;;  %s610_s21 = smov 124  }
   0x2   :  { %v35_v1 = vld.sshfl [vmem:[%s1245_s0] sm:$0xff pattern:$0x6d4b2907]   ;;  %11 = vrot.lane.b32.xlu0 %v637_v0, %s607_s10  ;;  %v450_v3 = vld.sshfl [vmem:[%s1245_s0 + $0x1] sm:$0xff pattern:$0xd4b2907e]  }
   0x3   :  { %36 = vrot.lane.b32.xlu1 %v35_v1, %s608_s11  ;;  %61 = vrot.lane.b32.xlu2 %v35_v1, %s609_s12  ;;  %v441_v2 = vld.sshfl [vmem:[%s1245_s0 + $0x1] sm:$0xff pattern:$0x6d4b2907]   ;;  %s611_s22 = smov 123   ;;  %s612_s25 = smov 122  }
   0x4   :  { %v85_v4 = vld.sshfl [vmem:[%s1245_s0] sm:$0xff pattern:$0xd4b2907e]   ;;  %v468_v5 = vld.sshfl [vmem:[%s1245_s0 + $0x1] sm:$0xff pattern:$0x4b2907e5]  }
   0x5   :  { %v135_v6 = vld.sshfl [vmem:[%s1245_s0] sm:$0xff pattern:$0x4b2907e5]   ;;  %v495_v7 = vld.sshfl [vmem:[%s1245_s0 + $0x1] sm:$0xff pattern:$0xb2907e5c]  }
   0x6   :  { %s613_s28 = smov 121   ;;  %v210_v8 = vld.sshfl [vmem:[%s1245_s0] sm:$0xff pattern:$0xb2907e5c]   ;;  %s614_s2 = smov 120  }
   0x7   :  { %v504_v9 = vld.sshfl [vmem:[%s1245_s0 + $0x1] sm:$0xff pattern:$0x2907e5c3]   ;;  %s615_s5 = smov 119   ;;  %s618_s14 = smov 116  }
   0x8   :  { %v235_v10 = vld.sshfl [vmem:[%s1245_s0] sm:$0xff pattern:$0x2907e5c3]   ;;  %v522_v11 = vld.sshfl [vmem:[%s1245_s0 + $0x1] sm:$0xff pattern:$0x907e5c3a]  }
   0x9   :  { %v285_v12 = vld.sshfl [vmem:[%s1245_s0] sm:$0xff pattern:$0x907e5c3a]   ;;  %v549_v13 = vld.sshfl [vmem:[%s1245_s0 + $0x1] sm:$0xff pattern:$0x7e5c3a1]  }
   0xa   :  { %24 = vrot.lane.b32.xlu0 %v441_v2, %s607_s10  ;;  %s616_s10 = smov 118   ;;  %s619_s17 = smov 115   ;;  %v360_v14 = vld.sshfl [vmem:[%s1245_s0] sm:$0xff pattern:$0x7e5c3a1]  }
   0xb   :  { %49 = vrot.lane.b32.xlu1 %v450_v3, %s608_s11  ;;  %74 = vrot.lane.b32.xlu2 %v450_v3, %s609_s12  ;;  %s617_s11 = smov 117   ;;  %s620_s20 = smov 114   ;;  %v558_v15 = vld.sshfl [vmem:[%s1245_s0 + $0x2] sm:$0xff pattern:$0x6d4b2907]  }
   0xc   :  { %s621_s23 = smov 113   ;;  %s622_s24 = smov 112   ;;  %v2_v50 = vld [vmem:[%s1245_s0] sm:$0xff]   ;;  %v435_v51 = vld [vmem:[%s1245_s0 + $0x8] sm:$0xff]  }
   0xd   :  { %4 = vst.msk [vmem:[%s1246_s1] ss:$18 sm:$0xff] %vm3_vm0, %v2_v50  }
   0xe   :  { %436 = vst.msk [vmem:[%s1246_s1 + $0x90] ss:$18 sm:$0xff] %vm3_vm0, %v435_v51  }
  0x12   :  { %86 = vrot.lane.b32.xlu0 %v85_v4, %s610_s21 }
  0x13   :  { %99 = vrot.lane.b32.xlu1 %v468_v5, %s610_s21  ;;  %111 = vrot.lane.b32.xlu2 %v85_v4, %s611_s22 }
  0x1a   :  { %124 = vrot.lane.b32.xlu0 %v468_v5, %s611_s22 }
  0x1b   :  { %136 = vrot.lane.b32.xlu1 %v135_v6, %s612_s25  ;;  %149 = vrot.lane.b32.xlu2 %v495_v7, %s612_s25  ;;  %s623_s25 = smov 111  }
  0x22   :  { %161 = vrot.lane.b32.xlu0 %v135_v6, %s613_s28 }
  0x23   :  { %174 = vrot.lane.b32.xlu1 %v495_v7, %s613_s28  ;;  %186 = vrot.lane.b32.xlu2 %v210_v8, %s614_s2 }
  0x2a   :  { %199 = vrot.lane.b32.xlu0 %v504_v9, %s614_s2 }
  0x2b   :  { %211 = vrot.lane.b32.xlu1 %v210_v8, %s615_s5  ;;  %224 = vrot.lane.b32.xlu2 %v504_v9, %s615_s5 }
  0x32   :  { %236 = vrot.lane.b32.xlu0 %v235_v10, %s616_s10 }
  0x33   :  { %249 = vrot.lane.b32.xlu1 %v522_v11, %s616_s10  ;;  %261 = vrot.lane.b32.xlu2 %v235_v10, %s617_s11 }
  0x3a   :  { %274 = vrot.lane.b32.xlu0 %v522_v11, %s617_s11 }
  0x3b   :  { %286 = vrot.lane.b32.xlu1 %v285_v12, %s618_s14  ;;  %299 = vrot.lane.b32.xlu2 %v549_v13, %s618_s14 }
  0x42   :  { %311 = vrot.lane.b32.xlu0 %v285_v12, %s619_s17 }
  0x43   :  { %324 = vrot.lane.b32.xlu1 %v549_v13, %s619_s17  ;;  %336 = vrot.lane.b32.xlu2 %v360_v14, %s620_s20 }
  0x4a   :  { %349 = vrot.lane.b32.xlu0 %v558_v15, %s620_s20 }
  0x4b   :  { %361 = vrot.lane.b32.xlu1 %v360_v14, %s621_s23  ;;  %374 = vrot.lane.b32.xlu2 %v558_v15, %s621_s23 }
  0x52   :  { %387 = vrot.lane.b32.xlu0 %v441_v2, %s622_s24 }
  0x53   :  { %399 = vrot.lane.b32.xlu1 %v637_v0, %s622_s24  ;;  %412 = vrot.lane.b32.xlu2 %v441_v2, %s623_s25 }
  0x5a   :  { %424 = vrot.lane.b32.xlu0 %v637_v0, %s623_s25 }
  0x5d   :  { %v62_v16 = vpop.permute.xlu2 %61  }
  0x5e   :  { %455 = vst.msk [vmem:[%s1246_s1 + $0x81] ss:$-126 sm:$0x3] %vm3_vm0, %v62_v16  }
  0x5f   :  { %456 = vst.msk [vmem:[%s1246_s1 + $0x1a1] ss:$-126 sm:$0xc] %vm3_vm0, %v62_v16  }
  0x60   :  { %457 = vst.msk [vmem:[%s1246_s1 + $0x2c1] ss:$-126 sm:$0x30] %vm3_vm0, %v62_v16  }
  0x61   :  { %458 = vst.msk [vmem:[%s1246_s1 + $0x3e1] ss:$-126 sm:$0xc0] %vm3_vm0, %v62_v16  }
  0x65   :  { %v75_v17 = vpop.permute.xlu2 %74  }
  0x66   :  { %460 = vst.msk [vmem:[%s1246_s1 + $0x111] ss:$-126 sm:$0x7] %vm3_vm0, %v75_v17  }
  0x67   :  { %461 = vst.msk [vmem:[%s1246_s1 + $0x231] ss:$-126 sm:$0x18] %vm3_vm0, %v75_v17  }
  0x68   :  { %462 = vst.msk [vmem:[%s1246_s1 + $0x351] ss:$-126 sm:$0x60] %vm3_vm0, %v75_v17  }
  0x69   :  { %463 = vst.msk [vmem:[%s1246_s1 + $0xf8] sm:$0x80] %vm3_vm0, %v75_v17  }
  0x6d   :  { %v112_v18 = vpop.permute.xlu2 %111  }
  0x6e   :  { %473 = vst.msk [vmem:[%s1246_s1 + $0x101] ss:$-126 sm:$0x7] %vm3_vm0, %v112_v18  }
  0x6f   :  { %474 = vst.msk [vmem:[%s1246_s1 + $0x221] ss:$-126 sm:$0x18] %vm3_vm0, %v112_v18  }
  0x70   :  { %475 = vst.msk [vmem:[%s1246_s1 + $0x341] ss:$-126 sm:$0x60] %vm3_vm0, %v112_v18  }
  0x71   :  { %476 = vst.msk [vmem:[%s1246_s1 + $0xe8] sm:$0x80] %vm3_vm0, %v112_v18  }
  0x74   :  { %v12_v19 = vpop.permute.xlu0 %11  }
  0x75   :  { %v37_v20 = vpop.permute.xlu1 %36   ;;  %437 = vst.msk [vmem:[%s1246_s1 + $0x1] ss:$162 sm:$0x3] %vm3_vm0, %v12_v19   ;;  %v150_v21 = vpop.permute.xlu2 %149  }
  0x76   :  { %438 = vst.msk [vmem:[%s1246_s1 - $0x11f] ss:$162 sm:$0xc] %vm3_vm0, %v12_v19  }
  0x77   :  { %439 = vst.msk [vmem:[%s1246_s1 - $0x23f] ss:$162 sm:$0x30] %vm3_vm0, %v12_v19  }
  0x78   :  { %440 = vst.msk [vmem:[%s1246_s1 - $0x35f] ss:$162 sm:$0xc0] %vm3_vm0, %v12_v19  }
  0x79   :  { %446 = vst.msk [vmem:[%s1246_s1 + $0x80] ss:$-126 sm:$0x3] %vm3_vm0, %v37_v20  }
  0x7a   :  { %447 = vst.msk [vmem:[%s1246_s1 + $0x1a0] ss:$-126 sm:$0xc] %vm3_vm0, %v37_v20  }
  0x7b   :  { %448 = vst.msk [vmem:[%s1246_s1 + $0x2c0] ss:$-126 sm:$0x30] %vm3_vm0, %v37_v20  }
  0x7c   :  { %449 = vst.msk [vmem:[%s1246_s1 + $0x3e0] ss:$-126 sm:$0xc0] %vm3_vm0, %v37_v20   ;;  %v25_v22 = vpop.permute.xlu0 %24  }
  0x7d   :  { %v50_v23 = vpop.permute.xlu1 %49   ;;  %442 = vst.msk [vmem:[%s1246_s1 + $0x91] ss:$-126 sm:$0x3] %vm3_vm0, %v25_v22   ;;  %v187_v24 = vpop.permute.xlu2 %186  }
  0x7e   :  { %443 = vst.msk [vmem:[%s1246_s1 + $0x1b1] ss:$-126 sm:$0xc] %vm3_vm0, %v25_v22  }
  0x7f   :  { %444 = vst.msk [vmem:[%s1246_s1 + $0x2d1] ss:$-126 sm:$0x30] %vm3_vm0, %v25_v22  }
  0x80   :  { %445 = vst.msk [vmem:[%s1246_s1 + $0x3f1] ss:$-126 sm:$0xc0] %vm3_vm0, %v25_v22  }
  0x81   :  { %451 = vst.msk [vmem:[%s1246_s1 + $0x110] ss:$-126 sm:$0x7] %vm3_vm0, %v50_v23  }
  0x82   :  { %452 = vst.msk [vmem:[%s1246_s1 + $0x230] ss:$-126 sm:$0x18] %vm3_vm0, %v50_v23  }
  0x83   :  { %453 = vst.msk [vmem:[%s1246_s1 + $0x350] ss:$-126 sm:$0x60] %vm3_vm0, %v50_v23  }
  0x84   :  { %454 = vst.msk [vmem:[%s1246_s1 + $0xf7] sm:$0x80] %vm3_vm0, %v50_v23   ;;  %v87_v25 = vpop.permute.xlu0 %86  }
  0x85   :  { %v100_v26 = vpop.permute.xlu1 %99   ;;  %464 = vst.msk [vmem:[%s1246_s1 + $0x100] ss:$-126 sm:$0x7] %vm3_vm0, %v87_v25   ;;  %v225_v27 = vpop.permute.xlu2 %224  }
  0x86   :  { %465 = vst.msk [vmem:[%s1246_s1 + $0x220] ss:$-126 sm:$0x18] %vm3_vm0, %v87_v25  }
  0x87   :  { %466 = vst.msk [vmem:[%s1246_s1 + $0x340] ss:$-126 sm:$0x60] %vm3_vm0, %v87_v25  }
  0x88   :  { %467 = vst.msk [vmem:[%s1246_s1 + $0xe7] sm:$0x80] %vm3_vm0, %v87_v25  }
  0x89   :  { %469 = vst.msk [vmem:[%s1246_s1 + $0x70] ss:$162 sm:$0x3] %vm3_vm0, %v100_v26  }
  0x8a   :  { %470 = vst.msk [vmem:[%s1246_s1 + $0x190] ss:$-126 sm:$0xc] %vm3_vm0, %v100_v26  }
  0x8b   :  { %471 = vst.msk [vmem:[%s1246_s1 + $0x2b0] ss:$-126 sm:$0x30] %vm3_vm0, %v100_v26  }
  0x8c   :  { %472 = vst.msk [vmem:[%s1246_s1 + $0x3d0] ss:$-126 sm:$0xc0] %vm3_vm0, %v100_v26   ;;  %v125_v28 = vpop.permute.xlu0 %124  }
  0x8d   :  { %v137_v29 = vpop.permute.xlu1 %136   ;;  %478 = vst.msk [vmem:[%s1246_s1 + $0x71] ss:$162 sm:$0x3] %vm3_vm0, %v125_v28   ;;  %v262_v32 = vpop.permute.xlu2 %261  }
  0x8e   :  { %479 = vst.msk [vmem:[%s1246_s1 + $0x191] ss:$-126 sm:$0xc] %vm3_vm0, %v125_v28  }
  0x8f   :  { %480 = vst.msk [vmem:[%s1246_s1 + $0x2b1] ss:$-126 sm:$0x30] %vm3_vm0, %v125_v28  }
  0x90   :  { %481 = vst.msk [vmem:[%s1246_s1 + $0x3d1] ss:$-126 sm:$0xc0] %vm3_vm0, %v125_v28  }
  0x91   :  { %487 = vst.msk [vmem:[%s1246_s1 + $0xf0] ss:$-126 sm:$0x3] %vm3_vm0, %v150_v21  }
  0x92   :  { %488 = vst.msk [vmem:[%s1246_s1 + $0x210] ss:$-126 sm:$0x1c] %vm3_vm0, %v150_v21  }
  0x93   :  { %489 = vst.msk [vmem:[%s1246_s1 + $0x330] ss:$-126 sm:$0x60] %vm3_vm0, %v150_v21  }
  0x94   :  { %490 = vst.msk [vmem:[%s1246_s1 + $0xd7] sm:$0x80] %vm3_vm0, %v150_v21   ;;  %v162_v30 = vpop.permute.xlu0 %161  }
  0x95   :  { %v175_v31 = vpop.permute.xlu1 %174   ;;  %482 = vst.msk [vmem:[%s1246_s1 + $0x60] ss:$162 sm:$0x3] %vm3_vm0, %v137_v29   ;;  %v300_v35 = vpop.permute.xlu2 %299  }
  0x96   :  { %483 = vst.msk [vmem:[%s1246_s1 + $0x180] ss:$-126 sm:$0xc] %vm3_vm0, %v137_v29  }
  0x97   :  { %484 = vst.msk [vmem:[%s1246_s1 + $0x2a0] ss:$-126 sm:$0x30] %vm3_vm0, %v137_v29  }
  0x98   :  { %485 = vst.msk [vmem:[%s1246_s1 + $0x3c0] ss:$-126 sm:$0xc0] %vm3_vm0, %v137_v29  }
  0x99   :  { %491 = vst.msk [vmem:[%s1246_s1 + $0x61] ss:$162 sm:$0x3] %vm3_vm0, %v162_v30  }
  0x9a   :  { %492 = vst.msk [vmem:[%s1246_s1 + $0x181] ss:$-126 sm:$0xc] %vm3_vm0, %v162_v30  }
  0x9b   :  { %493 = vst.msk [vmem:[%s1246_s1 + $0x2a1] ss:$-126 sm:$0x30] %vm3_vm0, %v162_v30  }
  0x9c   :  { %494 = vst.msk [vmem:[%s1246_s1 + $0x3c1] ss:$-126 sm:$0xc0] %vm3_vm0, %v162_v30   ;;  %v200_v33 = vpop.permute.xlu0 %199  }
  0x9d   :  { %v212_v34 = vpop.permute.xlu1 %211   ;;  %500 = vst.msk [vmem:[%s1246_s1 + $0xe0] ss:$-126 sm:$0x3] %vm3_vm0, %v187_v24   ;;  %v337_v40 = vpop.permute.xlu2 %336  }
  0x9e   :  { %501 = vst.msk [vmem:[%s1246_s1 + $0x200] ss:$-126 sm:$0x1c] %vm3_vm0, %v187_v24  }
  0x9f   :  { %502 = vst.msk [vmem:[%s1246_s1 + $0x320] ss:$-126 sm:$0x60] %vm3_vm0, %v187_v24  }
  0xa0   :  { %503 = vst.msk [vmem:[%s1246_s1 + $0xc7] sm:$0x80] %vm3_vm0, %v187_v24  }
  0xa1   :  { %496 = vst.msk [vmem:[%s1246_s1 + $0xf1] ss:$-126 sm:$0x3] %vm3_vm0, %v175_v31  }
  0xa2   :  { %497 = vst.msk [vmem:[%s1246_s1 + $0x211] ss:$-126 sm:$0x1c] %vm3_vm0, %v175_v31  }
  0xa3   :  { %498 = vst.msk [vmem:[%s1246_s1 + $0x331] ss:$-126 sm:$0x60] %vm3_vm0, %v175_v31  }
  0xa4   :  { %499 = vst.msk [vmem:[%s1246_s1 + $0xd8] sm:$0x80] %vm3_vm0, %v175_v31   ;;  %v237_v36 = vpop.permute.xlu0 %236  }
  0xa5   :  { %v250_v37 = vpop.permute.xlu1 %249   ;;  %505 = vst.msk [vmem:[%s1246_s1 + $0x50] ss:$162 sm:$0x3] %vm3_vm0, %v200_v33   ;;  %v375_v43 = vpop.permute.xlu2 %374  }
  0xa6   :  { %506 = vst.msk [vmem:[%s1246_s1 - $0xd0] ss:$162 sm:$0xc] %vm3_vm0, %v200_v33  }
  0xa7   :  { %507 = vst.msk [vmem:[%s1246_s1 + $0x290] ss:$-126 sm:$0x30] %vm3_vm0, %v200_v33  }
  0xa8   :  { %508 = vst.msk [vmem:[%s1246_s1 + $0x3b0] ss:$-126 sm:$0xc0] %vm3_vm0, %v200_v33  }
  0xa9   :  { %514 = vst.msk [vmem:[%s1246_s1 + $0x51] ss:$162 sm:$0x3] %vm3_vm0, %v225_v27  }
  0xaa   :  { %515 = vst.msk [vmem:[%s1246_s1 - $0xcf] ss:$162 sm:$0xc] %vm3_vm0, %v225_v27  }
  0xab   :  { %516 = vst.msk [vmem:[%s1246_s1 + $0x291] ss:$-126 sm:$0x30] %vm3_vm0, %v225_v27  }
  0xac   :  { %517 = vst.msk [vmem:[%s1246_s1 + $0x3b1] ss:$-126 sm:$0xc0] %vm3_vm0, %v225_v27   ;;  %v275_v38 = vpop.permute.xlu0 %274  }
  0xad   :  { %v287_v39 = vpop.permute.xlu1 %286   ;;  %509 = vst.msk [vmem:[%s1246_s1 + $0xe1] ss:$-126 sm:$0x3] %vm3_vm0, %v212_v34   ;;  %v413_v47 = vpop.permute.xlu2 %412  }
  0xae   :  { %510 = vst.msk [vmem:[%s1246_s1 + $0x201] ss:$-126 sm:$0x1c] %vm3_vm0, %v212_v34  }
  0xaf   :  { %511 = vst.msk [vmem:[%s1246_s1 + $0x321] ss:$-126 sm:$0x60] %vm3_vm0, %v212_v34  }
  0xb0   :  { %512 = vst.msk [vmem:[%s1246_s1 + $0xc8] sm:$0x80] %vm3_vm0, %v212_v34  }
  0xb1   :  { %518 = vst.msk [vmem:[%s1246_s1 + $0x40] ss:$162 sm:$0x3] %vm3_vm0, %v237_v36  }
  0xb2   :  { %519 = vst.msk [vmem:[%s1246_s1 - $0xe0] ss:$162 sm:$0xc] %vm3_vm0, %v237_v36  }
  0xb3   :  { %520 = vst.msk [vmem:[%s1246_s1 + $0x280] ss:$-126 sm:$0x30] %vm3_vm0, %v237_v36  }
  0xb4   :  { %521 = vst.msk [vmem:[%s1246_s1 + $0x3a0] ss:$-126 sm:$0xc0] %vm3_vm0, %v237_v36   ;;  %v312_v41 = vpop.permute.xlu0 %311  }
  0xb5   :  { %v325_v42 = vpop.permute.xlu1 %324   ;;  %527 = vst.msk [vmem:[%s1246_s1 + $0x41] ss:$162 sm:$0x3] %vm3_vm0, %v262_v32  }
  0xb6   :  { %528 = vst.msk [vmem:[%s1246_s1 - $0xdf] ss:$162 sm:$0xc] %vm3_vm0, %v262_v32  }
  0xb7   :  { %529 = vst.msk [vmem:[%s1246_s1 + $0x281] ss:$-126 sm:$0x30] %vm3_vm0, %v262_v32  }
  0xb8   :  { %530 = vst.msk [vmem:[%s1246_s1 + $0x3a1] ss:$-126 sm:$0xc0] %vm3_vm0, %v262_v32  }
  0xb9   :  { %523 = vst.msk [vmem:[%s1246_s1 + $0xd0] ss:$-126 sm:$0x3] %vm3_vm0, %v250_v37  }
  0xba   :  { %524 = vst.msk [vmem:[%s1246_s1 + $0x1f0] ss:$-126 sm:$0xc] %vm3_vm0, %v250_v37  }
  0xbb   :  { %525 = vst.msk [vmem:[%s1246_s1 + $0x310] ss:$-126 sm:$0x70] %vm3_vm0, %v250_v37  }
  0xbc   :  { %526 = vst.msk [vmem:[%s1246_s1 + $0xb7] sm:$0x80] %vm3_vm0, %v250_v37   ;;  %v350_v44 = vpop.permute.xlu0 %349  }
  0xbd   :  { %v362_v45 = vpop.permute.xlu1 %361   ;;  %532 = vst.msk [vmem:[%s1246_s1 + $0xd1] ss:$-126 sm:$0x3] %vm3_vm0, %v275_v38  }
  0xbe   :  { %533 = vst.msk [vmem:[%s1246_s1 + $0x1f1] ss:$-126 sm:$0xc] %vm3_vm0, %v275_v38  }
  0xbf   :  { %534 = vst.msk [vmem:[%s1246_s1 + $0x311] ss:$-126 sm:$0x70] %vm3_vm0, %v275_v38  }
  0xc0   :  { %535 = vst.msk [vmem:[%s1246_s1 + $0xb8] sm:$0x80] %vm3_vm0, %v275_v38  }
  0xc1   :  { %541 = vst.msk [vmem:[%s1246_s1 + $0x30] ss:$162 sm:$0x3] %vm3_vm0, %v300_v35  }
  0xc2   :  { %542 = vst.msk [vmem:[%s1246_s1 - $0xf0] ss:$162 sm:$0xc] %vm3_vm0, %v300_v35  }
  0xc3   :  { %543 = vst.msk [vmem:[%s1246_s1 - $0x210] ss:$162 sm:$0x30] %vm3_vm0, %v300_v35  }
  0xc4   :  { %544 = vst.msk [vmem:[%s1246_s1 + $0x390] ss:$-126 sm:$0xc0] %vm3_vm0, %v300_v35   ;;  %v388_v46 = vpop.permute.xlu0 %387  }
  0xc5   :  { %536 = vst.msk [vmem:[%s1246_s1 + $0xc0] ss:$-126 sm:$0x3] %vm3_vm0, %v287_v39   ;;  %v400_v48 = vpop.permute.xlu1 %399  }
  0xc6   :  { %537 = vst.msk [vmem:[%s1246_s1 + $0x1e0] ss:$-126 sm:$0xc] %vm3_vm0, %v287_v39  }
  0xc7   :  { %538 = vst.msk [vmem:[%s1246_s1 + $0x300] ss:$-126 sm:$0x70] %vm3_vm0, %v287_v39  }
  0xc8   :  { %539 = vst.msk [vmem:[%s1246_s1 + $0xa7] sm:$0x80] %vm3_vm0, %v287_v39  }
  0xc9   :  { %545 = vst.msk [vmem:[%s1246_s1 + $0xc1] ss:$-126 sm:$0x3] %vm3_vm0, %v312_v41  }
  0xca   :  { %546 = vst.msk [vmem:[%s1246_s1 + $0x1e1] ss:$-126 sm:$0xc] %vm3_vm0, %v312_v41  }
  0xcb   :  { %547 = vst.msk [vmem:[%s1246_s1 + $0x301] ss:$-126 sm:$0x70] %vm3_vm0, %v312_v41  }
  0xcc   :  { %548 = vst.msk [vmem:[%s1246_s1 + $0xa8] sm:$0x80] %vm3_vm0, %v312_v41   ;;  %v425_v49 = vpop.permute.xlu0 %424  }
  0xcd   :  { %554 = vst.msk [vmem:[%s1246_s1 + $0x20] ss:$162 sm:$0x3] %vm3_vm0, %v337_v40  }
  0xce   :  { %555 = vst.msk [vmem:[%s1246_s1 - $0x100] ss:$162 sm:$0xc] %vm3_vm0, %v337_v40  }
  0xcf   :  { %556 = vst.msk [vmem:[%s1246_s1 - $0x220] ss:$162 sm:$0x30] %vm3_vm0, %v337_v40  }
  0xd0   :  { %557 = vst.msk [vmem:[%s1246_s1 + $0x380] ss:$-126 sm:$0xc0] %vm3_vm0, %v337_v40  }
  0xd1   :  { %550 = vst.msk [vmem:[%s1246_s1 + $0x31] ss:$162 sm:$0x3] %vm3_vm0, %v325_v42  }
  0xd2   :  { %551 = vst.msk [vmem:[%s1246_s1 - $0xef] ss:$162 sm:$0xc] %vm3_vm0, %v325_v42  }
  0xd3   :  { %552 = vst.msk [vmem:[%s1246_s1 - $0x20f] ss:$162 sm:$0x30] %vm3_vm0, %v325_v42  }
  0xd4   :  { %553 = vst.msk [vmem:[%s1246_s1 + $0x391] ss:$-126 sm:$0xc0] %vm3_vm0, %v325_v42  }
  0xd5   :  { %559 = vst.msk [vmem:[%s1246_s1 + $0xb0] ss:$-126 sm:$0x3] %vm3_vm0, %v350_v44  }
  0xd6   :  { %560 = vst.msk [vmem:[%s1246_s1 + $0x1d0] ss:$-126 sm:$0xc] %vm3_vm0, %v350_v44  }
  0xd7   :  { %561 = vst.msk [vmem:[%s1246_s1 + $0x2f0] ss:$-126 sm:$0x30] %vm3_vm0, %v350_v44  }
  0xd8   :  { %562 = vst.msk [vmem:[%s1246_s1 + $0x410] ss:$-126 sm:$0xc0] %vm3_vm0, %v350_v44  }
  0xd9   :  { %568 = vst.msk [vmem:[%s1246_s1 + $0xb1] ss:$-126 sm:$0x3] %vm3_vm0, %v375_v43  }
  0xda   :  { %569 = vst.msk [vmem:[%s1246_s1 + $0x1d1] ss:$-126 sm:$0xc] %vm3_vm0, %v375_v43  }
  0xdb   :  { %570 = vst.msk [vmem:[%s1246_s1 + $0x2f1] ss:$-126 sm:$0x30] %vm3_vm0, %v375_v43  }
  0xdc   :  { %571 = vst.msk [vmem:[%s1246_s1 + $0x411] ss:$-126 sm:$0xc0] %vm3_vm0, %v375_v43  }
  0xdd   :  { %563 = vst.msk [vmem:[%s1246_s1 + $0x21] ss:$162 sm:$0x3] %vm3_vm0, %v362_v45  }
  0xde   :  { %564 = vst.msk [vmem:[%s1246_s1 - $0xff] ss:$162 sm:$0xc] %vm3_vm0, %v362_v45  }
  0xdf   :  { %565 = vst.msk [vmem:[%s1246_s1 - $0x21f] ss:$162 sm:$0x30] %vm3_vm0, %v362_v45  }
  0xe0   :  { %566 = vst.msk [vmem:[%s1246_s1 + $0x381] ss:$-126 sm:$0xc0] %vm3_vm0, %v362_v45  }
  0xe1   :  { %573 = vst.msk [vmem:[%s1246_s1 + $0xa0] ss:$-126 sm:$0x3] %vm3_vm0, %v388_v46  }
  0xe2   :  { %574 = vst.msk [vmem:[%s1246_s1 + $0x1c0] ss:$-126 sm:$0xc] %vm3_vm0, %v388_v46  }
  0xe3   :  { %575 = vst.msk [vmem:[%s1246_s1 + $0x2e0] ss:$-126 sm:$0x30] %vm3_vm0, %v388_v46  }
  0xe4   :  { %576 = vst.msk [vmem:[%s1246_s1 + $0x400] ss:$-126 sm:$0xc0] %vm3_vm0, %v388_v46  }
  0xe5   :  { %582 = vst.msk [vmem:[%s1246_s1 + $0xa1] ss:$-126 sm:$0x3] %vm3_vm0, %v413_v47  }
  0xe6   :  { %583 = vst.msk [vmem:[%s1246_s1 + $0x1c1] ss:$-126 sm:$0xc] %vm3_vm0, %v413_v47  }
  0xe7   :  { %584 = vst.msk [vmem:[%s1246_s1 + $0x2e1] ss:$-126 sm:$0x30] %vm3_vm0, %v413_v47  }
  0xe8   :  { %585 = vst.msk [vmem:[%s1246_s1 + $0x401] ss:$-126 sm:$0xc0] %vm3_vm0, %v413_v47  }
  0xe9   :  { %577 = vst.msk [vmem:[%s1246_s1 + $0x10] ss:$162 sm:$0x3] %vm3_vm0, %v400_v48  }
  0xea   :  { %578 = vst.msk [vmem:[%s1246_s1 - $0x110] ss:$162 sm:$0xc] %vm3_vm0, %v400_v48  }
  0xeb   :  { %579 = vst.msk [vmem:[%s1246_s1 - $0x230] ss:$162 sm:$0x30] %vm3_vm0, %v400_v48  }
  0xec   :  { %580 = vst.msk [vmem:[%s1246_s1 - $0x350] ss:$162 sm:$0xc0] %vm3_vm0, %v400_v48  }
  0xed   :  { %586 = vst.msk [vmem:[%s1246_s1 + $0x11] ss:$162 sm:$0x3] %vm3_vm0, %v425_v49  }
  0xee   :  { %587 = vst.msk [vmem:[%s1246_s1 - $0x10f] ss:$162 sm:$0xc] %vm3_vm0, %v425_v49  }
  0xef   :  { %588 = vst.msk [vmem:[%s1246_s1 - $0x22f] ss:$162 sm:$0x30] %vm3_vm0, %v425_v49  }
  0xf0   :  { %589 = vst.msk [vmem:[%s1246_s1 - $0x34f] ss:$162 sm:$0xc0] %vm3_vm0, %v425_v49  }

// kernel: temporal_proposal_network_forward.1
= control target key start
LH: loop header
LB: loop body
LE: loop exit
PB: predicated region body
PF: predicated region fallthrough
CT: control target
= control target key end

     0   :  { %s7649_s24 = smov 0   ;;  %s10480_s0 = inlined_call_operand.vmem [shape: f32[2,360,4], index: 0, kind: input, shape index: {}]   ;;  %s10481_s1 = inlined_call_operand.vmem [shape: bf16[9,4,32], index: 1, kind: input, shape index: {}]   ;;  %s10482_s2 = inlined_call_operand.vmem [shape: f32[1,32], index: 2, kind: input, shape index: {}]   ;;  %s10483_s3 = inlined_call_operand.vmem [shape: bf16[9,32,32], index: 3, kind: input, shape index: {}]   ;;  %s10484_s4 = inlined_call_operand.vmem [shape: f32[1,32], index: 4, kind: input, shape index: {}]   ;;  %s10485_s5 = inlined_call_operand.vmem [shape: bf16[32,3], index: 5, kind: input, shape index: {}]   ;;  %s10486_s6 = inlined_call_operand.vmem [shape: f32[1,3], index: 6, kind: input, shape index: {}]   ;;  %s10487_s7 = inlined_call_operand.vmem [shape: bf16[32,6], index: 7, kind: input, shape index: {}]   ;;  %s10488_s8 = inlined_call_operand.vmem [shape: f32[1,6], index: 8, kind: input, shape index: {}]   ;;  %s10489_s9 = inlined_call_operand.vmem [shape: bf16[32,6], index: 9, kind: input, shape index: {}]   ;;  %s10490_s10 = inlined_call_operand.vmem [shape: f32[1,6], index: 10, kind: input, shape index: {}]   ;;  %s10491_s11 = inlined_call_operand.vmem [shape: f32[288,1], index: 11, kind: input, shape index: {}]   ;;  %s10492_s12 = inlined_call_operand.vmem [shape: f32[288,6], index: 12, kind: input, shape index: {}]   ;;  %s10493_s13 = inlined_call_operand.vmem [shape: f32[1,6], index: 13, kind: input, shape index: {}]   ;;  %s10494_s14 = inlined_call_operand.vmem [shape: f32[3,6], index: 14, kind: input, shape index: {}]   ;;  %s10495_s15 = inlined_call_operand.vmem [shape: f32[2,288,3], index: 15, kind: output, shape index: {0}]   ;;  %s10496_s16 = inlined_call_operand.vmem [shape: f32[2,288,6], index: 16, kind: output, shape index: {1}]   ;;  %s10497_s17 = inlined_call_operand.vmem [shape: f32[2,288,6], index: 17, kind: output, shape index: {2}]  }
   0x1   :  { %10502 = sst [smem:[#allocation26_spill]] %s10480_s0 }
   0x2   :  { %10503 = sst [smem:[#allocation27_spill]] %s10481_s1 }
   0x3   :  { %10504 = sst [smem:[#allocation28_spill]] %s10492_s12 }
   0x4   :  { %10505 = sst [smem:[#allocation29_spill]] %s10494_s14 }
   0x5 LB: > { %10506 = sst [smem:[#allocation3_spill]] %s7555_s24  ;;  %s6884_s25 = sadd.s32 4294967295, %s7555_s24   ;;  %s7555_s24 = sphi %s7649_s24, %s28_s24  }
   0x6   : > { %p6888_p0 = scmp.ge.s32.totalorder %s7555_s24, 1  ;;  %p492_p1 = scmp.lt.s32.totalorder %s7555_s24, 3 }
   0x8   : > { %p493_p2 = pnand %p6888_p0, %p492_p1 }
   0xa   : > { %496 = sbr.rel (%p493_p2) target bundleno = 1893 (0x765), region = 80 }
   0xf   : > { %p554_p3 = scmp.lt.s32.totalorder %s6884_s25, 1  ;;  %s10507_s30 = sld [smem:[#allocation26_spill]] }
  0x10   : > { %p6893_p4 = scmp.ne.s32.totalorder %s6884_s25, 0 }
  0x11   : > { %s555_s26 = scalar_select %p554_p3, %s6884_s25, 1 }
  0x13   : > { %s7437_s27 = smul.u32 360, %s555_s26 }
  0x14   : > { %s7438_s28 = smul.u32 288, %s555_s26 }
  0x15   : > { %s7660_s18 = scalar_lea.vmem %s10507_s30, %s7437_s27  ;;  %578 = sbr.rel (%p6893_p4) target bundleno = 68 (0x44), region = 84 }
  0x16   : > { %s7665_s20 = scalar_lea.vmem %s10495_s15, %s7438_s28  ;;  %s7670_s23 = scalar_lea.vmem %s10496_s16, %s7438_s28 }
  0x17   : > { %s7675_s12 = scalar_lea.vmem %s10497_s17, %s7438_s28 }
  0x1a   : > { %vm579_vm0 = vcmask 261120   ;;  %v7557_v0 = vmov 0.0  }
  0x1b   : > { %582 = vst.msk [vmem:[#allocation2 + $0x10] sm:$0xff] %vm579_vm0, %v7557_v0 }
  0x1c   : > { %583 = vst.msk [vmem:[#allocation2 + $0x18] sm:$0xff] %vm579_vm0, %v7557_v0 }
  0x1d   : > { %584 = vst.msk [vmem:[#allocation2 + $0x20] sm:$0xff] %vm579_vm0, %v7557_v0 }
  0x1e   : > { %585 = vst.msk [vmem:[#allocation2 + $0x28] sm:$0xff] %vm579_vm0, %v7557_v0 }
  0x1f   : > { %586 = vst.msk [vmem:[#allocation2 + $0x30] sm:$0xff] %vm579_vm0, %v7557_v0 }
  0x20   : > { %587 = vst.msk [vmem:[#allocation2 + $0x38] sm:$0xff] %vm579_vm0, %v7557_v0 }
  0x21   : > { %588 = vst.msk [vmem:[#allocation2 + $0x40] sm:$0xff] %vm579_vm0, %v7557_v0 }
  0x22   : > { %589 = vst.msk [vmem:[#allocation2 + $0x48] sm:$0xff] %vm579_vm0, %v7557_v0 }
  0x23   : > { %590 = vst.msk [vmem:[#allocation2 + $0x50] sm:$0xff] %vm579_vm0, %v7557_v0 }
  0x24   : > { %591 = vst.msk [vmem:[#allocation2 + $0x58] sm:$0xff] %vm579_vm0, %v7557_v0 }
  0x25   : > { %592 = vst.msk [vmem:[#allocation2 + $0x60] sm:$0xff] %vm579_vm0, %v7557_v0 }
  0x26   : > { %593 = vst.msk [vmem:[#allocation2 + $0x68] sm:$0xff] %vm579_vm0, %v7557_v0 }
  0x27   : > { %594 = vst.msk [vmem:[#allocation2 + $0x70] sm:$0xff] %vm579_vm0, %v7557_v0 }
  0x28   : > { %595 = vst.msk [vmem:[#allocation2 + $0x78] sm:$0xff] %vm579_vm0, %v7557_v0 }
  0x29   : > { %596 = vst.msk [vmem:[#allocation2 + $0x80] sm:$0xff] %vm579_vm0, %v7557_v0 }
  0x2a   : > { %597 = vst.msk [vmem:[#allocation2 + $0x88] sm:$0xff] %vm579_vm0, %v7557_v0 }
  0x2b   : > { %598 = vst.msk [vmem:[#allocation2 + $0x90] sm:$0xff] %vm579_vm0, %v7557_v0 }
  0x2c   : > { %599 = vst.msk [vmem:[#allocation2 + $0x98] sm:$0xff] %vm579_vm0, %v7557_v0 }
  0x2d   : > { %600 = vst.msk [vmem:[#allocation2 + $0xa0] sm:$0xff] %vm579_vm0, %v7557_v0 }
  0x2e   : > { %601 = vst.msk [vmem:[#allocation2 + $0xa8] sm:$0xff] %vm579_vm0, %v7557_v0 }
  0x2f   : > { %602 = vst.msk [vmem:[#allocation2 + $0xb0] sm:$0xff] %vm579_vm0, %v7557_v0 }
  0x30   : > { %603 = vst.msk [vmem:[#allocation2 + $0xb8] sm:$0xff] %vm579_vm0, %v7557_v0 }
  0x31   : > { %604 = vst.msk [vmem:[#allocation2 + $0xc0] sm:$0xff] %vm579_vm0, %v7557_v0 }
  0x32   : > { %605 = vst.msk [vmem:[#allocation2 + $0xc8] sm:$0xff] %vm579_vm0, %v7557_v0 }
  0x33   : > { %606 = vst.msk [vmem:[#allocation2 + $0xd0] sm:$0xff] %vm579_vm0, %v7557_v0 }
  0x34   : > { %607 = vst.msk [vmem:[#allocation2 + $0xd8] sm:$0xff] %vm579_vm0, %v7557_v0 }
  0x35   : > { %608 = vst.msk [vmem:[#allocation2 + $0xe0] sm:$0xff] %vm579_vm0, %v7557_v0 }
  0x36   : > { %609 = vst.msk [vmem:[#allocation2 + $0xe8] sm:$0xff] %vm579_vm0, %v7557_v0 }
  0x37   : > { %610 = vst.msk [vmem:[#allocation2 + $0xf0] sm:$0xff] %vm579_vm0, %v7557_v0 }
  0x38   : > { %611 = vst.msk [vmem:[#allocation2 + $0xf8] sm:$0xff] %vm579_vm0, %v7557_v0 }
  0x39   : > { %612 = vst.msk [vmem:[#allocation2 + $0x100] sm:$0xff] %vm579_vm0, %v7557_v0 }
  0x3a   : > { %613 = vst.msk [vmem:[#allocation2 + $0x108] sm:$0xff] %vm579_vm0, %v7557_v0 }
  0x3b   : > { %614 = vst.msk [vmem:[#allocation2 + $0x110] sm:$0xff] %vm579_vm0, %v7557_v0 }
  0x3c   : > { %615 = vst.msk [vmem:[#allocation2 + $0x118] sm:$0xff] %vm579_vm0, %v7557_v0 }
  0x3d   : > { %616 = vst.msk [vmem:[#allocation2 + $0x120] sm:$0xff] %vm579_vm0, %v7557_v0 }
  0x3e   : > { %617 = vst.msk [vmem:[#allocation2 + $0x128] sm:$0xff] %vm579_vm0, %v7557_v0 }
  0x3f   : > { %618 = vst.msk [vmem:[#allocation2 + $0x130] sm:$0xff] %vm579_vm0, %v7557_v0 }
  0x40   : > { %619 = vst.msk [vmem:[#allocation2 + $0x138] sm:$0xff] %vm579_vm0, %v7557_v0 }
  0x41   : > { %620 = vst.msk [vmem:[#allocation2 + $0x140] sm:$0xff] %vm579_vm0, %v7557_v0 }
  0x42   : > { %621 = vst.msk [vmem:[#allocation2 + $0x148] sm:$0xff] %vm579_vm0, %v7557_v0 }
  0x43   : > { %622 = vst.msk [vmem:[#allocation2 + $0x150] sm:$0xff] %vm579_vm0, %v7557_v0 }
  0x44 PF: > { %s10508_s25 = sld [smem:[#allocation27_spill]]  ;;  %vm791_vm1 = vcmask 1041408   ;;  %v680_v2 = vld [vmem:[%s7660_s18 + $0x12] sm:$0xff]  ;;  %v681_v3 = vld [vmem:[%s7660_s18 + $0x1a] sm:$0xff]  ;;  %v690_v6 = vld [vmem:[%s7660_s18 + $0x62] sm:$0xff]  ;;  %vm736_vm2 = vcmask 31744  }
  0x45   : > { %v716_v5 = vpack.c.bf16 %v681_v3, %v680_v2  ;;  %v691_v7 = vld [vmem:[%s7660_s18 + $0x6a] sm:$0xff]  ;;  %v700_v8 = vld [vmem:[%s7660_s18 + $0xb2] sm:$0xff]  ;;  %v701_v10 = vld [vmem:[%s7660_s18 + $0xba] sm:$0xff]  ;;  %vm3114_vm3 = vcmask 261120   ;;  %vm6653_vm4 = vcmask 23552   ;;  %s10537_s0 = sld [smem:[#allocation28_spill]] }
  0x46   : > { %v721_v9 = vpack.c.bf16 %v691_v7, %v690_v6  ;;  %v710_v11 = vld [vmem:[%s7660_s18 + $0x102] sm:$0xff]  ;;  %v711_v12 = vld [vmem:[%s7660_s18 + $0x10a] sm:$0xff]  ;;  %v726_v13 = vpack.c.bf16 %v701_v10, %v700_v8  ;;  %v692_v21 = vld [vmem:[%s7660_s18 + $0x72] sm:$0xff]  ;;  %s10538_s1 = sld [smem:[#allocation29_spill]]  ;;  %vm6690_vm5 = vcmask 48128  }
  0x47   : > { %v731_v14 = vpack.c.bf16 %v711_v12, %v710_v11  ;;  %v682_v19 = vld [vmem:[%s7660_s18 + $0x22] sm:$0xff]  ;;  %v683_v20 = vld [vmem:[%s7660_s18 + $0x2a] sm:$0xff]  ;;  %v693_v22 = vld [vmem:[%s7660_s18 + $0x7a] sm:$0xff] }
  0x48   : > { %v702_v23 = vld [vmem:[%s7660_s18 + $0xc2] sm:$0xff]  ;;  %v703_v24 = vld [vmem:[%s7660_s18 + $0xca] sm:$0xff]  ;;  %v712_v25 = vld [vmem:[%s7660_s18 + $0x112] sm:$0xff]  ;;  %v717_v27 = vpack.c.bf16 %v683_v20, %v682_v19  ;;  %v722_v28 = vpack.c.bf16 %v693_v22, %v692_v21 }
  0x49   : > { %v713_v26 = vld [vmem:[%s7660_s18 + $0x11a] sm:$0xff]  ;;  %v727_v29 = vpack.c.bf16 %v703_v24, %v702_v23  ;;  %v684_v31 = vld [vmem:[%s7660_s18 + $0x32] sm:$0xff]  ;;  %v694_v33 = vld [vmem:[%s7660_s18 + $0x82] sm:$0xff] }
  0x4a   : > { %v6894_v1 = vld [vmem:[%s10508_s25 + $0x2] sm:$0x3]  ;;  %v679_v15 = vld [vmem:[%s10508_s25] sm:$0x3]  ;;  %v6950_v17 = vld [vmem:[%s10508_s25 + $0x6] sm:$0x3]  ;;  %v732_v30 = vpack.c.bf16 %v713_v26, %v712_v25 }
  0x4b   : > { %v793_v4 = vsel %vm791_vm1, %v6894_v1, 0  ;;  %v949_v16 = vsel %vm791_vm1, %v679_v15, 0  ;;  %v1409_v18 = vsel %vm791_vm1, %v6950_v17, 0  ;;  %v685_v32 = vld [vmem:[%s7660_s18 + $0x3a] sm:$0xff]  ;;  %v695_v34 = vld [vmem:[%s7660_s18 + $0x8a] sm:$0xff]  ;;  %v704_v35 = vld [vmem:[%s7660_s18 + $0xd2] sm:$0xff] }
  0x4c   : > { %802 = vmatpush.bf16.msra.mxu0 %v793_v4  ;;  %7434 = vmatpush.bf16.msra.mxu1 %v793_v4  ;;  %v705_v36 = vld [vmem:[%s7660_s18 + $0xda] sm:$0xff]  ;;  %v714_v37 = vld [vmem:[%s7660_s18 + $0x122] sm:$0xff]  ;;  %v715_v38 = vld [vmem:[%s7660_s18 + $0x12a] sm:$0xff]  ;;  %v718_v39 = vpack.c.bf16 %v685_v32, %v684_v31  ;;  %v723_v40 = vpack.c.bf16 %v695_v34, %v694_v33 }
  0x4d   : > { %7435 = vmatpush.bf16.msra.mxu2 %v793_v4  ;;  %7436 = vmatpush.bf16.msra.mxu3 %v793_v4  ;;  %v728_v41 = vpack.c.bf16 %v705_v36, %v704_v35  ;;  %v733_v42 = vpack.c.bf16 %v715_v38, %v714_v37  ;;  %v6931_v43 = vld [vmem:[%s10508_s25 + $0x4] sm:$0x3]  ;;  %v6969_v44 = vld [vmem:[%s10508_s25 + $0x8] sm:$0x3]  ;;  %v687_v48 = vld [vmem:[%s7660_s18 + $0x4a] sm:$0xff] }
  0x4e   : > { %v1161_v45 = vsel %vm791_vm1, %v6931_v43, 0  ;;  %v1657_v46 = vsel %vm791_vm1, %v6969_v44, 0  ;;  %v686_v47 = vld [vmem:[%s7660_s18 + $0x42] sm:$0xff]  ;;  %v696_v49 = vld [vmem:[%s7660_s18 + $0x92] sm:$0xff]  ;;  %v697_v50 = vld [vmem:[%s7660_s18 + $0x9a] sm:$0xff] }
  0x4f   : > { %6895 = vmatmul.msk.bf16.vlgmr.msra.gmra.mxu0 %vm736_vm2, %v716_v5  ;;  %6900 = vmatmul.msk.bf16.vlgmr.msra.gmra.mxu1 %vm736_vm2, %v721_v9  ;;  %v706_v51 = vld [vmem:[%s7660_s18 + $0xe2] sm:$0xff]  ;;  %v707_v52 = vld [vmem:[%s7660_s18 + $0xea] sm:$0xff]  ;;  %v719_v55 = vpack.c.bf16 %v687_v48, %v686_v47  ;;  %v724_v56 = vpack.c.bf16 %v697_v50, %v696_v49  ;;  %v688_v61 = vld [vmem:[%s7660_s18 + $0x52] sm:$0xff] }
  0x50   : > { %6905 = vmatmul.msk.bf16.vlgmr.msra.gmra.mxu2 %vm736_vm2, %v726_v13  ;;  %6910 = vmatmul.msk.bf16.vlgmr.msra.gmra.mxu3 %vm736_vm2, %v731_v14  ;;  %v1298_v53 = vld [vmem:[%s7660_s18 + $0x23] sm:$0xff]  ;;  %v1299_v54 = vld [vmem:[%s7660_s18 + $0x2b] sm:$0xff]  ;;  %v729_v57 = vpack.c.bf16 %v707_v52, %v706_v51  ;;  %v689_v62 = vld [vmem:[%s7660_s18 + $0x5a] sm:$0xff] }
  0x51   : > { %958 = vmatpush.bf16.msrb.mxu1 %v949_v16  ;;  %1418 = vmatpush.bf16.msrb.mxu3 %v1409_v18  ;;  %v1334_v58 = vpack.c.bf16 %v1299_v54, %v1298_v53  ;;  %v6988_v59 = vld [vmem:[%s10508_s25 + $0xa] sm:$0x3]  ;;  %v698_v63 = vld [vmem:[%s7660_s18 + $0xa2] sm:$0xff]  ;;  %v708_v1 = vld [vmem:[%s7660_s18 + $0xf2] sm:$0xff]  ;;  %v720_v5 = vpack.c.bf16 %v689_v62, %v688_v61 }
  0x52   : > { %1170 = vmatpush.bf16.msrb.mxu2 %v1161_v45  ;;  %1666 = vmatpush.bf16.msrb.mxu0 %v1657_v46  ;;  %v1905_v60 = vsel %vm791_vm1, %v6988_v59, 0  ;;  %v699_v0 = vld [vmem:[%s7660_s18 + $0xaa] sm:$0xff]  ;;  %v709_v2 = vld [vmem:[%s7660_s18 + $0xfa] sm:$0xff] }
  0x53   : > { %v1300_v3 = vld [vmem:[%s7660_s18 + $0x33] sm:$0xff]  ;;  %v1301_v4 = vld [vmem:[%s7660_s18 + $0x3b] sm:$0xff]  ;;  %v725_v6 = vpack.c.bf16 %v699_v0, %v698_v63  ;;  %v730_v7 = vpack.c.bf16 %v709_v2, %v708_v1  ;;  %v1546_v12 = vld [vmem:[%s7660_s18 + $0x24] sm:$0xff] }
  0x54   : > { %v1335_v8 = vpack.c.bf16 %v1301_v4, %v1300_v3  ;;  %v625_v9 = vld [vmem:[%s7660_s18 + $0x11] sm:$0xff]  ;;  %v626_v10 = vld [vmem:[%s7660_s18 + $0x19] sm:$0xff]  ;;  %v1302_v15 = vld [vmem:[%s7660_s18 + $0x43] sm:$0xff] }
  0x55   : > { %1914 = vmatpush.bf16.msra.mxu1 %v1905_v60  ;;  %v1050_v11 = vld [vmem:[%s7660_s18 + $0x13] sm:$0xff]  ;;  %v1051_v14 = vld [vmem:[%s7660_s18 + $0x1b] sm:$0xff]  ;;  %v1303_v16 = vld [vmem:[%s7660_s18 + $0x4b] sm:$0xff]  ;;  %v661_v17 = vpack.c.bf16 %v626_v10, %v625_v9 }
  0x56   : > { %v1547_v13 = vld [vmem:[%s7660_s18 + $0x2c] sm:$0xff]  ;;  %v1086_v19 = vpack.c.bf16 %v1051_v14, %v1050_v11  ;;  %v1336_v20 = vpack.c.bf16 %v1303_v16, %v1302_v15  ;;  %v627_v21 = vld [vmem:[%s7660_s18 + $0x21] sm:$0xff]  ;;  %v1548_v23 = vld [vmem:[%s7660_s18 + $0x34] sm:$0xff] }
  0x57   : > { %v1582_v18 = vpack.c.bf16 %v1547_v13, %v1546_v12  ;;  %v628_v22 = vld [vmem:[%s7660_s18 + $0x29] sm:$0xff]  ;;  %v1549_v24 = vld [vmem:[%s7660_s18 + $0x3c] sm:$0xff]  ;;  %v1304_v25 = vld [vmem:[%s7660_s18 + $0x53] sm:$0xff] }
  0x58   : > { %v1305_v26 = vld [vmem:[%s7660_s18 + $0x5b] sm:$0xff]  ;;  %v1550_v32 = vld [vmem:[%s7660_s18 + $0x44] sm:$0xff]  ;;  %v1551_v33 = vld [vmem:[%s7660_s18 + $0x4c] sm:$0xff] }
  0x59   : > { %v630_v31 = vld [vmem:[%s7660_s18 + $0x39] sm:$0xff]  ;;  %v1306_v34 = vld [vmem:[%s7660_s18 + $0x63] sm:$0xff]  ;;  %v1307_v35 = vld [vmem:[%s7660_s18 + $0x6b] sm:$0xff]  ;;  %v1584_v37 = vpack.c.bf16 %v1551_v33, %v1550_v32 }
  0x5a   : > { %v1338_v38 = vpack.c.bf16 %v1307_v35, %v1306_v34  ;;  %v1308_v43 = vld [vmem:[%s7660_s18 + $0x73] sm:$0xff]  ;;  %v1309_v44 = vld [vmem:[%s7660_s18 + $0x7b] sm:$0xff]  ;;  %v1311_v59 = vld [vmem:[%s7660_s18 + $0x8b] sm:$0xff] }
  0x5b   : > { %v7844_v49 = vpack.c.bf16 %v1309_v44, %v1308_v43  ;;  %v633_v54 = vld [vmem:[%s7660_s18 + $0x51] sm:$0xff]  ;;  %v1557_v10 = vld [vmem:[%s7660_s18 + $0x7c] sm:$0xff] }
  0x5c   : > { %v1556_v9 = vld [vmem:[%s7660_s18 + $0x74] sm:$0xff]  ;;  %v1561_v44 = vld [vmem:[%s7660_s18 + $0x9c] sm:$0xff] }
  0x5d   : > { %v1312_v11 = vld [vmem:[%s7660_s18 + $0x93] sm:$0xff]  ;;  %v1313_v12 = vld [vmem:[%s7660_s18 + $0x9b] sm:$0xff]  ;;  %v1587_v16 = vpack.c.bf16 %v1557_v10, %v1556_v9  ;;  %v7026_v9 = vld [vmem:[%s10508_s25 + $0xe] sm:$0x3] }
  0x5e   : > { %v1560_v43 = vld [vmem:[%s7660_s18 + $0x94] sm:$0xff]  ;;  %v2401_v10 = vsel %vm791_vm1, %v7026_v9, 0  ;;  %v644_v9 = vld [vmem:[%s7660_s18 + $0xa9] sm:$0xff] }
  0x5f   : > { %6896 = vmatmul.msk.bf16.gmra.mxu0 %vm736_vm2, %v717_v27  ;;  %6901 = vmatmul.msk.bf16.gmra.mxu1 %vm736_vm2, %v722_v28  ;;  %v662_v27 = vpack.c.bf16 %v628_v22, %v627_v21  ;;  %v1583_v28 = vpack.c.bf16 %v1549_v24, %v1548_v23  ;;  %v637_v24 = vld [vmem:[%s7660_s18 + $0x71] sm:$0xff] }
  0x60   : > { %6906 = vmatmul.msk.bf16.gmra.mxu2 %vm736_vm2, %v727_v29  ;;  %6911 = vmatmul.msk.bf16.gmra.mxu3 %vm736_vm2, %v732_v30  ;;  %v1337_v29 = vpack.c.bf16 %v1305_v26, %v1304_v25  ;;  %v629_v30 = vld [vmem:[%s7660_s18 + $0x31] sm:$0xff]  ;;  %v638_v25 = vld [vmem:[%s7660_s18 + $0x79] sm:$0xff]  ;;  %v1558_v26 = vld [vmem:[%s7660_s18 + $0x84] sm:$0xff] }
  0x61   : > { %v663_v36 = vpack.c.bf16 %v630_v31, %v629_v30  ;;  %v667_v32 = vpack.c.bf16 %v638_v25, %v637_v24  ;;  %2410 = vmatpush.bf16.msra.mxu3 %v2401_v10  ;;  %v642_v24 = vld [vmem:[%s7660_s18 + $0x99] sm:$0xff]  ;;  %v1562_v25 = vld [vmem:[%s7660_s18 + $0xa4] sm:$0xff] }
  0x62   : > { %v1564_v10 = vld [vmem:[%s7660_s18 + $0xb4] sm:$0xff] }
  0x6f   : > { %6897 = vmatmul.msk.bf16.gmra.mxu0 %vm736_vm2, %v718_v39  ;;  %6902 = vmatmul.msk.bf16.gmra.mxu1 %vm736_vm2, %v723_v40  ;;  %v631_v39 = vld [vmem:[%s7660_s18 + $0x41] sm:$0xff]  ;;  %v632_v40 = vld [vmem:[%s7660_s18 + $0x49] sm:$0xff] }
  0x70   : > { %6907 = vmatmul.msk.bf16.gmra.mxu2 %vm736_vm2, %v728_v41  ;;  %6912 = vmatmul.msk.bf16.gmra.mxu3 %vm736_vm2, %v733_v42  ;;  %v1552_v41 = vld [vmem:[%s7660_s18 + $0x54] sm:$0xff]  ;;  %v1553_v42 = vld [vmem:[%s7660_s18 + $0x5c] sm:$0xff]  ;;  %v664_v45 = vpack.c.bf16 %v632_v40, %v631_v39 }
  0x71   : > { %v1585_v46 = vpack.c.bf16 %v1553_v42, %v1552_v41  ;;  %v639_v41 = vld [vmem:[%s7660_s18 + $0x81] sm:$0xff]  ;;  %v640_v42 = vld [vmem:[%s7660_s18 + $0x89] sm:$0xff] }
  0x7f   : > { %6898 = vmatmul.msk.bf16.gmra.mxu0 %vm736_vm2, %v719_v55  ;;  %6903 = vmatmul.msk.bf16.gmra.mxu1 %vm736_vm2, %v724_v56  ;;  %v634_v55 = vld [vmem:[%s7660_s18 + $0x59] sm:$0xff]  ;;  %v1554_v56 = vld [vmem:[%s7660_s18 + $0x64] sm:$0xff] }
  0x80   : > { %6908 = vmatmul.msk.bf16.gmra.mxu2 %vm736_vm2, %v729_v57  ;;  %6951 = vmatmul.msk.bf16.vlgmr.msrb.gmra.mxu3 %vm736_vm2, %v1334_v58  ;;  %v1555_v57 = vld [vmem:[%s7660_s18 + $0x6c] sm:$0xff]  ;;  %v665_v62 = vpack.c.bf16 %v634_v55, %v633_v54 }
  0x81   : > { %v1586_v63 = vpack.c.bf16 %v1555_v57, %v1554_v56  ;;  %v1589_v56 = vpack.c.bf16 %v1561_v44, %v1560_v43 }
  0x8f   : > { %6899 = vmatmul.msk.bf16.gmra.mxu0 %vm736_vm2, %v720_v5  ;;  %6904 = vmatmul.msk.bf16.gmra.mxu1 %vm736_vm2, %v725_v6 }
  0x90   : > { %6909 = vmatmul.msk.bf16.gmra.mxu2 %vm736_vm2, %v730_v7  ;;  %6952 = vmatmul.msk.bf16.gmra.mxu3 %vm736_vm2, %v1335_v8  ;;  %v635_v7 = vld [vmem:[%s7660_s18 + $0x61] sm:$0xff] }
  0x9f   : > { %6913 = vmatmul.msk.bf16.vlgmr.msrb.gmra.mxu1 %vm736_vm2, %v661_v17  ;;  %6970 = vmatmul.msk.bf16.vlgmr.msrb.gmra.mxu0 %vm736_vm2, %v1582_v18 }
  0xa0   : > { %6932 = vmatmul.msk.bf16.vlgmr.msrb.gmra.mxu2 %vm736_vm2, %v1086_v19  ;;  %6953 = vmatmul.msk.bf16.gmra.mxu3 %vm736_vm2, %v1336_v20  ;;  %v7902_v19 = vpack.c.bf16 %v1313_v12, %v1312_v11 }
  0xaf   : > { %6914 = vmatmul.msk.bf16.gmra.mxu1 %vm736_vm2, %v662_v27  ;;  %6971 = vmatmul.msk.bf16.gmra.mxu0 %vm736_vm2, %v1583_v28  ;;  %v1559_v27 = vld [vmem:[%s7660_s18 + $0x8c] sm:$0xff]  ;;  %v1314_v28 = vld [vmem:[%s7660_s18 + $0xa3] sm:$0xff] }
  0xb0   : > { %6933 = vmatmul.msk.bf16.gmra.mxu2 %vm736_vm2, %v1334_v58  ;;  %6954 = vmatmul.msk.bf16.gmra.mxu3 %vm736_vm2, %v1337_v29  ;;  %v1310_v58 = vld [vmem:[%s7660_s18 + $0x83] sm:$0xff]  ;;  %v1588_v33 = vpack.c.bf16 %v1559_v27, %v1558_v26  ;;  %v1563_v26 = vld [vmem:[%s7660_s18 + $0xac] sm:$0xff] }
  0xb1   : > { %v7873_v2 = vpack.c.bf16 %v1311_v59, %v1310_v58  ;;  %v1318_v27 = vld [vmem:[%s7660_s18 + $0xc3] sm:$0xff] }
  0xbf   : > { %6915 = vmatmul.msk.bf16.gmra.mxu1 %vm736_vm2, %v663_v36  ;;  %6972 = vmatmul.msk.bf16.gmra.mxu0 %vm736_vm2, %v1584_v37 }
  0xc0   : > { %6934 = vmatmul.msk.bf16.gmra.mxu2 %vm736_vm2, %v1335_v8  ;;  %6955 = vmatmul.msk.bf16.gmra.mxu3 %vm736_vm2, %v1338_v38  ;;  %v636_v8 = vld [vmem:[%s7660_s18 + $0x69] sm:$0xff] }
  0xc1   : > { %v666_v15 = vpack.c.bf16 %v636_v8, %v635_v7 }
  0xcc   : > { %v7840_v47 = vpop.f32.mrf.mxu0  ;;  %v7842_v48 = vpop.f32.mrf.mxu1 }
  0xcf   : > { %6916 = vmatmul.msk.bf16.gmra.mxu1 %vm736_vm2, %v664_v45  ;;  %6973 = vmatmul.msk.bf16.gmra.mxu0 %vm736_vm2, %v1585_v46  ;;  %v1316_v45 = vld [vmem:[%s7660_s18 + $0xb3] sm:$0xff]  ;;  %v1317_v46 = vld [vmem:[%s7660_s18 + $0xbb] sm:$0xff] }
  0xd0   : > { %6935 = vmatmul.msk.bf16.gmra.mxu2 %vm736_vm2, %v1336_v20  ;;  %6956 = vmatmul.msk.bf16.gmra.mxu3 %vm736_vm2, %v7844_v49  ;;  %v7959_v59 = vpack.c.bf16 %v1317_v46, %v1316_v45 }
  0xd3   : > { %v7851_v50 = vpop.f32.mrf.mxu2  ;;  %v7853_v51 = vpop.f32.mrf.mxu3 }
  0xd4   : > { %v7855_v52 = vpop.f32.mrf.mxu0  ;;  %v7857_v53 = vpop.f32.mrf.mxu1 }
  0xdb   : > { %v7865_v60 = vpop.f32.mrf.mxu2  ;;  %v7867_v61 = vpop.f32.mrf.mxu3 }
  0xdc   : > { %v7869_v0 = vpop.f32.mrf.mxu0  ;;  %v7871_v1 = vpop.f32.mrf.mxu1 }
  0xdf   : > { %6917 = vmatmul.msk.bf16.gmra.mxu1 %vm736_vm2, %v665_v62  ;;  %6974 = vmatmul.msk.bf16.gmra.mxu0 %vm736_vm2, %v1586_v63  ;;  %v7007_v62 = vld [vmem:[%s10508_s25 + $0xc] sm:$0x3]  ;;  %v7045_v63 = vld [vmem:[%s10508_s25 + $0x10] sm:$0x3] }
  0xe0   : > { %6936 = vmatmul.msk.bf16.gmra.mxu2 %vm736_vm2, %v1337_v29  ;;  %6957 = vmatmul.msk.bf16.gmra.mxu3 %vm736_vm2, %v7873_v2  ;;  %v1315_v29 = vld [vmem:[%s7660_s18 + $0xab] sm:$0xff]  ;;  %v2153_v7 = vsel %vm791_vm1, %v7007_v62, 0  ;;  %v2649_v8 = vsel %vm791_vm1, %v7045_v63, 0 }
  0xe1   : > { %v7931_v36 = vpack.c.bf16 %v1315_v29, %v1314_v28  ;;  %2162 = vmatpush.bf16.msra.mxu2 %v2153_v7  ;;  %2658 = vmatpush.bf16.msra.mxu0 %v2649_v8  ;;  %v1319_v28 = vld [vmem:[%s7660_s18 + $0xcb] sm:$0xff]  ;;  %v643_v8 = vld [vmem:[%s7660_s18 + $0xa1] sm:$0xff] }
  0xe2   : > { %v7993_v44 = vpack.c.bf16 %v1319_v28, %v1318_v27 }
  0xe3   : > { %v7880_v3 = vpop.f32.mrf.mxu2  ;;  %v7882_v4 = vpop.f32.mrf.mxu3 }
  0xe4   : > { %v7884_v5 = vpop.f32.mrf.mxu0  ;;  %v7886_v6 = vpop.f32.mrf.mxu1 }
  0xeb   : > { %v7894_v13 = vpop.f32.mrf.mxu2  ;;  %v7896_v14 = vpop.f32.mrf.mxu3 }
  0xec   : > { %v7898_v17 = vpop.f32.mrf.mxu0  ;;  %v7900_v18 = vpop.f32.mrf.mxu1 }
  0xef   : > { %6918 = vmatmul.msk.bf16.gmra.mxu1 %vm736_vm2, %v666_v15  ;;  %6975 = vmatmul.msk.bf16.gmra.mxu0 %vm736_vm2, %v1587_v16 }
  0xf0   : > { %6937 = vmatmul.msk.bf16.gmra.mxu2 %vm736_vm2, %v1338_v38  ;;  %6958 = vmatmul.msk.bf16.gmra.mxu3 %vm736_vm2, %v7902_v19 }
  0xf3   : > { %v7909_v20 = vpop.f32.mrf.mxu2  ;;  %v7911_v21 = vpop.f32.mrf.mxu3 }
  0xf4   : > { %v7913_v22 = vpop.f32.mrf.mxu0  ;;  %v7915_v23 = vpop.f32.mrf.mxu1 }
  0xfb   : > { %v7923_v30 = vpop.f32.mrf.mxu2  ;;  %v7925_v31 = vpop.f32.mrf.mxu3 }
  0xfc   : > { %v7927_v34 = vpop.f32.mrf.mxu0  ;;  %v7929_v35 = vpop.f32.mrf.mxu1 }
  0xff   : > { %6919 = vmatmul.msk.bf16.gmra.mxu1 %vm736_vm2, %v667_v32  ;;  %6976 = vmatmul.msk.bf16.gmra.mxu0 %vm736_vm2, %v1588_v33 }
 0x100   : > { %6938 = vmatmul.msk.bf16.gmra.mxu2 %vm736_vm2, %v7844_v49  ;;  %6959 = vmatmul.msk.bf16.gmra.mxu3 %vm736_vm2, %v7931_v36  ;;  %v668_v49 = vpack.c.bf16 %v640_v42, %v639_v41  ;;  %v1590_v41 = vpack.c.bf16 %v1563_v26, %v1562_v25  ;;  %v1320_v25 = vld [vmem:[%s7660_s18 + $0xd3] sm:$0xff]  ;;  %v1321_v26 = vld [vmem:[%s7660_s18 + $0xdb] sm:$0xff] }
 0x103   : > { %v7939_v37 = vpop.f32.mrf.mxu2  ;;  %v1420_v38 = vpop.f32.mrf.mxu3 }
 0x104   : > { %v7941_v39 = vpop.f32.mrf.mxu0  ;;  %v7943_v40 = vpop.f32.mrf.mxu1 }
 0x10b   : > { %v7951_v54 = vpop.f32.mrf.mxu2  ;;  %v7953_v55 = vpop.f32.mrf.mxu3 }
 0x10c   : > { %v7955_v57 = vpop.f32.mrf.mxu0  ;;  %v7957_v58 = vpop.f32.mrf.mxu1 }
 0x10f   : > { %6920 = vmatmul.msk.bf16.gmra.mxu1 %vm736_vm2, %v668_v49  ;;  %6977 = vmatmul.msk.bf16.gmra.mxu0 %vm736_vm2, %v1589_v56 }
 0x110   : > { %6939 = vmatmul.msk.bf16.gmra.mxu2 %vm736_vm2, %v7873_v2  ;;  %6960 = vmatmul.msk.bf16.gmra.mxu3 %vm736_vm2, %v7959_v59  ;;  %v641_v2 = vld [vmem:[%s7660_s18 + $0x91] sm:$0xff] }
 0x111   : > { %v669_v33 = vpack.c.bf16 %v642_v24, %v641_v2  ;;  %v1565_v2 = vld [vmem:[%s7660_s18 + $0xbc] sm:$0xff] }
 0x113   : > { %v7979_v11 = vpop.f32.mrf.mxu2  ;;  %v1425_v12 = vpop.f32.mrf.mxu3 }
 0x114   : > { %v7981_v15 = vpop.f32.mrf.mxu0  ;;  %v7983_v16 = vpop.f32.mrf.mxu1 }
 0x11b   : > { %v7991_v29 = vpop.f32.mrf.mxu2  ;;  %v1427_v32 = vpop.f32.mrf.mxu3 }
 0x11c   : > { %v960_v42 = vpop.f32.mrf.mxu1  ;;  %v1668_v43 = vpop.f32.mrf.mxu0 }
 0x11d   : > { %v961_v45 = vadd.f32 %v960_v42, %v7840_v47  ;;  %v670_v47 = vpack.c.bf16 %v644_v9, %v643_v8 }
 0x11f   : > { %6921 = vmatmul.msk.bf16.gmra.mxu1 %vm736_vm2, %v669_v33  ;;  %6978 = vmatmul.msk.bf16.gmra.mxu0 %vm736_vm2, %v1590_v41  ;;  %v1591_v33 = vpack.c.bf16 %v1565_v2, %v1564_v10  ;;  %v645_v10 = vld [vmem:[%s7660_s18 + $0xb1] sm:$0xff]  ;;  %v646_v2 = vld [vmem:[%s7660_s18 + $0xb9] sm:$0xff] }
 0x120   : > { %6940 = vmatmul.msk.bf16.gmra.mxu2 %vm736_vm2, %v7902_v19  ;;  %6961 = vmatmul.msk.bf16.gmra.mxu3 %vm736_vm2, %v7993_v44 }
 0x123   : > { %v1172_v46 = vpop.f32.mrf.mxu2  ;;  %v1430_v49 = vpop.f32.mrf.mxu3 }
 0x124   : > { %v1262_v56 = vadd.f32 %v1172_v46, %v961_v45  ;;  %v962_v62 = vpop.f32.mrf.mxu1  ;;  %v1670_v63 = vpop.f32.mrf.mxu0 }
 0x125   : > { %v963_v19 = vadd.f32 %v962_v62, %v7855_v52 }
 0x126   : > { %v1510_v7 = vadd.f32 %v1420_v38, %v1262_v56  ;;  %v8013_v38 = vpack.c.bf16 %v1321_v26, %v1320_v25  ;;  %v1566_v25 = vld [vmem:[%s7660_s18 + $0xc4] sm:$0xff]  ;;  %v1567_v26 = vld [vmem:[%s7660_s18 + $0xcc] sm:$0xff] }
 0x128   : > { %v8006_v24 = vadd.f32 %v1668_v43, %v1510_v7 }
 0x12b   : > { %v1174_v27 = vpop.f32.mrf.mxu2  ;;  %v8011_v28 = vpop.f32.mrf.mxu3 }
 0x12c   : > { %v1263_v41 = vadd.f32 %v1174_v27, %v963_v19  ;;  %v965_v42 = vpop.f32.mrf.mxu1  ;;  %v1673_v45 = vpop.f32.mrf.mxu0  ;;  %v1323_v27 = vld [vmem:[%s7660_s18 + $0xeb] sm:$0xff] }
 0x12d   : > { %v966_v46 = vadd.f32 %v965_v42, %v7869_v0  ;;  %v671_v0 = vpack.c.bf16 %v646_v2, %v645_v10 }
 0x12e   : > { %v1511_v43 = vadd.f32 %v7953_v55, %v1263_v41  ;;  %v1592_v41 = vpack.c.bf16 %v1567_v26, %v1566_v25  ;;  %v647_v25 = vld [vmem:[%s7660_s18 + $0xc1] sm:$0xff]  ;;  %v648_v26 = vld [vmem:[%s7660_s18 + $0xc9] sm:$0xff] }
 0x12f   : > { %6922 = vmatmul.msk.bf16.gmra.mxu1 %vm736_vm2, %v670_v47  ;;  %6979 = vmatmul.msk.bf16.gmra.mxu0 %vm736_vm2, %v1591_v33 }
 0x130   : > { %6941 = vmatmul.msk.bf16.gmra.mxu2 %vm736_vm2, %v7931_v36  ;;  %6962 = vmatmul.msk.bf16.gmra.mxu3 %vm736_vm2, %v8013_v38  ;;  %v8022_v52 = vadd.f32 %v1670_v63, %v1511_v43  ;;  %v1322_v36 = vld [vmem:[%s7660_s18 + $0xe3] sm:$0xff] }
 0x133   : > { %v1177_v56 = vpop.f32.mrf.mxu2  ;;  %v1435_v62 = vpop.f32.mrf.mxu3 }
 0x134   : > { %v1264_v55 = vadd.f32 %v1177_v56, %v966_v46  ;;  %v967_v7 = vpop.f32.mrf.mxu1  ;;  %v1675_v8 = vpop.f32.mrf.mxu0 }
 0x135   : > { %v968_v47 = vadd.f32 %v967_v7, %v7884_v5 }
 0x136   : > { %v1512_v9 = vadd.f32 %v1425_v12, %v1264_v55  ;;  %v8036_v12 = vpack.c.bf16 %v1323_v27, %v1322_v36  ;;  %v1568_v36 = vld [vmem:[%s7660_s18 + $0xd4] sm:$0xff]  ;;  %v1569_v27 = vld [vmem:[%s7660_s18 + $0xdc] sm:$0xff] }
 0x138   : > { %v8029_v19 = vadd.f32 %v1673_v45, %v1512_v9 }
 0x13b   : > { %v1179_v63 = vpop.f32.mrf.mxu2  ;;  %v8034_v33 = vpop.f32.mrf.mxu3 }
 0x13c   : > { %v1265_v42 = vadd.f32 %v1179_v63, %v968_v47  ;;  %v970_v43 = vpop.f32.mrf.mxu1  ;;  %v1678_v46 = vpop.f32.mrf.mxu0  ;;  %v1325_v63 = vld [vmem:[%s7660_s18 + $0xfb] sm:$0xff] }
 0x13d   : > { %v971_v45 = vadd.f32 %v970_v43, %v7898_v17  ;;  %v672_v17 = vpack.c.bf16 %v648_v26, %v647_v25 }
 0x13e   : > { %v1513_v56 = vadd.f32 %v1427_v32, %v1265_v42  ;;  %v1593_v42 = vpack.c.bf16 %v1569_v27, %v1568_v36  ;;  %v649_v36 = vld [vmem:[%s7660_s18 + $0xd1] sm:$0xff]  ;;  %v650_v27 = vld [vmem:[%s7660_s18 + $0xd9] sm:$0xff] }
 0x13f   : > { %6923 = vmatmul.msk.bf16.gmra.mxu1 %vm736_vm2, %v671_v0  ;;  %6980 = vmatmul.msk.bf16.gmra.mxu0 %vm736_vm2, %v1592_v41 }
 0x140   : > { %6942 = vmatmul.msk.bf16.gmra.mxu2 %vm736_vm2, %v7959_v59  ;;  %6963 = vmatmul.msk.bf16.gmra.mxu3 %vm736_vm2, %v8036_v12  ;;  %v8044_v5 = vadd.f32 %v1675_v8, %v1513_v56  ;;  %v1324_v59 = vld [vmem:[%s7660_s18 + $0xf3] sm:$0xff] }
 0x143   : > { %v1182_v55 = vpop.f32.mrf.mxu2  ;;  %v1440_v7 = vpop.f32.mrf.mxu3 }
 0x144   : > { %v1266_v32 = vadd.f32 %v1182_v55, %v971_v45  ;;  %v972_v9 = vpop.f32.mrf.mxu1  ;;  %v1680_v10 = vpop.f32.mrf.mxu0 }
 0x145   : > { %v973_v0 = vadd.f32 %v972_v9, %v7913_v22 }
 0x146   : > { %v1514_v2 = vadd.f32 %v1430_v49, %v1266_v32  ;;  %v8058_v49 = vpack.c.bf16 %v1325_v63, %v1324_v59  ;;  %v1570_v59 = vld [vmem:[%s7660_s18 + $0xe4] sm:$0xff]  ;;  %v1571_v63 = vld [vmem:[%s7660_s18 + $0xec] sm:$0xff] }
 0x148   : > { %v8051_v47 = vadd.f32 %v1678_v46, %v1514_v2 }
 0x14b   : > { %v1184_v8 = vpop.f32.mrf.mxu2  ;;  %v8056_v41 = vpop.f32.mrf.mxu3 }
 0x14c   : > { %v1267_v43 = vadd.f32 %v1184_v8, %v973_v0  ;;  %v975_v56 = vpop.f32.mrf.mxu1  ;;  %v1683_v45 = vpop.f32.mrf.mxu0  ;;  %v1327_v8 = vld [vmem:[%s7660_s18 + $0x10b] sm:$0xff] }
 0x14d   : > { %v976_v55 = vadd.f32 %v975_v56, %v7927_v34  ;;  %v673_v34 = vpack.c.bf16 %v650_v27, %v649_v36 }
 0x14e   : > { %v1515_v46 = vadd.f32 %v8011_v28, %v1267_v43  ;;  %v1594_v43 = vpack.c.bf16 %v1571_v63, %v1570_v59  ;;  %v651_v59 = vld [vmem:[%s7660_s18 + $0xe1] sm:$0xff]  ;;  %v652_v63 = vld [vmem:[%s7660_s18 + $0xe9] sm:$0xff] }
 0x14f   : > { %6924 = vmatmul.msk.bf16.gmra.mxu1 %vm736_vm2, %v672_v17  ;;  %6981 = vmatmul.msk.bf16.gmra.mxu0 %vm736_vm2, %v1593_v42 }
 0x150   : > { %6943 = vmatmul.msk.bf16.gmra.mxu2 %vm736_vm2, %v7993_v44  ;;  %6964 = vmatmul.msk.bf16.gmra.mxu3 %vm736_vm2, %v8058_v49  ;;  %v8067_v22 = vadd.f32 %v1680_v10, %v1515_v46  ;;  %v1326_v44 = vld [vmem:[%s7660_s18 + $0x103] sm:$0xff] }
 0x153   : > { %v1187_v32 = vpop.f32.mrf.mxu2  ;;  %v1445_v9 = vpop.f32.mrf.mxu3 }
 0x154   : > { %v1268_v28 = vadd.f32 %v1187_v32, %v976_v55  ;;  %v977_v2 = vpop.f32.mrf.mxu1  ;;  %v1685_v25 = vpop.f32.mrf.mxu0 }
 0x155   : > { %v978_v17 = vadd.f32 %v977_v2, %v7941_v39 }
 0x156   : > { %v1516_v26 = vadd.f32 %v1435_v62, %v1268_v28  ;;  %v8081_v62 = vpack.c.bf16 %v1327_v8, %v1326_v44  ;;  %v1572_v44 = vld [vmem:[%s7660_s18 + $0xf4] sm:$0xff]  ;;  %v1573_v8 = vld [vmem:[%s7660_s18 + $0xfc] sm:$0xff] }
 0x158   : > { %v8074_v0 = vadd.f32 %v1683_v45, %v1516_v26 }
 0x15b   : > { %v1189_v10 = vpop.f32.mrf.mxu2  ;;  %v8079_v42 = vpop.f32.mrf.mxu3 }
 0x15c   : > { %v1269_v56 = vadd.f32 %v1189_v10, %v978_v17  ;;  %v980_v46 = vpop.f32.mrf.mxu1  ;;  %v1688_v55 = vpop.f32.mrf.mxu0  ;;  %v1329_v10 = vld [vmem:[%s7660_s18 + $0x11b] sm:$0xff] }
 0x15d   : > { %v981_v32 = vadd.f32 %v980_v46, %v7955_v57  ;;  %v674_v57 = vpack.c.bf16 %v652_v63, %v651_v59 }
 0x15e   : > { %v1517_v45 = vadd.f32 %v8034_v33, %v1269_v56  ;;  %v1595_v56 = vpack.c.bf16 %v1573_v8, %v1572_v44  ;;  %v653_v44 = vld [vmem:[%s7660_s18 + $0xf1] sm:$0xff]  ;;  %v654_v8 = vld [vmem:[%s7660_s18 + $0xf9] sm:$0xff] }
 0x15f   : > { %6925 = vmatmul.msk.bf16.gmra.mxu1 %vm736_vm2, %v673_v34  ;;  %6982 = vmatmul.msk.bf16.gmra.mxu0 %vm736_vm2, %v1594_v43 }
 0x160   : > { %6944 = vmatmul.msk.bf16.gmra.mxu2 %vm736_vm2, %v8013_v38  ;;  %6965 = vmatmul.msk.bf16.gmra.mxu3 %vm736_vm2, %v8081_v62  ;;  %v8090_v39 = vadd.f32 %v1685_v25, %v1517_v45  ;;  %v1328_v38 = vld [vmem:[%s7660_s18 + $0x113] sm:$0xff] }
 0x163   : > { %v1192_v28 = vpop.f32.mrf.mxu2  ;;  %v1450_v2 = vpop.f32.mrf.mxu3 }
 0x164   : > { %v1270_v33 = vadd.f32 %v1192_v28, %v981_v32  ;;  %v982_v26 = vpop.f32.mrf.mxu1  ;;  %v1690_v36 = vpop.f32.mrf.mxu0 }
 0x165   : > { %v983_v34 = vadd.f32 %v982_v26, %v7981_v15 }
 0x166   : > { %v1518_v27 = vadd.f32 %v1440_v7, %v1270_v33  ;;  %v8104_v7 = vpack.c.bf16 %v1329_v10, %v1328_v38  ;;  %v1574_v38 = vld [vmem:[%s7660_s18 + $0x104] sm:$0xff]  ;;  %v1575_v10 = vld [vmem:[%s7660_s18 + $0x10c] sm:$0xff] }
 0x168   : > { %v8097_v17 = vadd.f32 %v1688_v55, %v1518_v27 }
 0x16b   : > { %v1194_v25 = vpop.f32.mrf.mxu2  ;;  %v8102_v43 = vpop.f32.mrf.mxu3 }
 0x16c   : > { %v1271_v46 = vadd.f32 %v1194_v25, %v983_v34  ;;  %v985_v45 = vpop.f32.mrf.mxu1  ;;  %v1693_v32 = vpop.f32.mrf.mxu0  ;;  %v1331_v25 = vld [vmem:[%s7660_s18 + $0x12b] sm:$0xff] }
 0x16d   : > { %v986_v28 = vadd.f32 %v985_v45, %v7842_v48  ;;  %v675_v48 = vpack.c.bf16 %v654_v8, %v653_v44 }
 0x16e   : > { %v1519_v55 = vadd.f32 %v8056_v41, %v1271_v46  ;;  %v1596_v46 = vpack.c.bf16 %v1575_v10, %v1574_v38  ;;  %v655_v38 = vld [vmem:[%s7660_s18 + $0x101] sm:$0xff]  ;;  %v656_v10 = vld [vmem:[%s7660_s18 + $0x109] sm:$0xff] }
 0x16f   : > { %6926 = vmatmul.msk.bf16.gmra.mxu1 %vm736_vm2, %v674_v57  ;;  %6983 = vmatmul.msk.bf16.gmra.mxu0 %vm736_vm2, %v1595_v56 }
 0x170   : > { %6945 = vmatmul.msk.bf16.gmra.mxu2 %vm736_vm2, %v8036_v12  ;;  %6966 = vmatmul.msk.bf16.gmra.mxu3 %vm736_vm2, %v8104_v7  ;;  %v8113_v15 = vadd.f32 %v1690_v36, %v1519_v55  ;;  %v1330_v12 = vld [vmem:[%s7660_s18 + $0x123] sm:$0xff] }
 0x173   : > { %v1197_v33 = vpop.f32.mrf.mxu2  ;;  %v1455_v26 = vpop.f32.mrf.mxu3 }
 0x174   : > { %v1272_v41 = vadd.f32 %v1197_v33, %v986_v28  ;;  %v987_v27 = vpop.f32.mrf.mxu1  ;;  %v1695_v59 = vpop.f32.mrf.mxu0 }
 0x175   : > { %v988_v57 = vadd.f32 %v987_v27, %v7857_v53 }
 0x176   : > { %v1520_v63 = vadd.f32 %v1445_v9, %v1272_v41  ;;  %v8127_v9 = vpack.c.bf16 %v1331_v25, %v1330_v12  ;;  %v1576_v12 = vld [vmem:[%s7660_s18 + $0x114] sm:$0xff]  ;;  %v1577_v25 = vld [vmem:[%s7660_s18 + $0x11c] sm:$0xff] }
 0x178   : > { %v8120_v34 = vadd.f32 %v1693_v32, %v1520_v63 }
 0x17b   : > { %v1199_v36 = vpop.f32.mrf.mxu2  ;;  %v8125_v56 = vpop.f32.mrf.mxu3 }
 0x17c   : > { %v1273_v45 = vadd.f32 %v1199_v36, %v988_v57  ;;  %v990_v55 = vpop.f32.mrf.mxu1  ;;  %v1698_v28 = vpop.f32.mrf.mxu0  ;;  %v1332_v57 = vld [vmem:[%s7660_s18 + $0x133] sm:$0xff]  ;;  %v1333_v36 = vld [vmem:[%s7660_s18 + $0x13b] sm:$0xff] }
 0x17d   : > { %v991_v33 = vadd.f32 %v990_v55, %v7871_v1  ;;  %v676_v1 = vpack.c.bf16 %v656_v10, %v655_v38 }
 0x17e   : > { %v1521_v32 = vadd.f32 %v8079_v42, %v1273_v45  ;;  %v1597_v45 = vpack.c.bf16 %v1577_v25, %v1576_v12  ;;  %v657_v12 = vld [vmem:[%s7660_s18 + $0x111] sm:$0xff]  ;;  %v658_v25 = vld [vmem:[%s7660_s18 + $0x119] sm:$0xff] }
 0x17f   : > { %6927 = vmatmul.msk.bf16.gmra.mxu1 %vm736_vm2, %v675_v48  ;;  %6984 = vmatmul.msk.bf16.gmra.mxu0 %vm736_vm2, %v1596_v46 }
 0x180   : > { %6946 = vmatmul.msk.bf16.gmra.mxu2 %vm736_vm2, %v8058_v49  ;;  %6967 = vmatmul.msk.bf16.gmra.mxu3 %vm736_vm2, %v8127_v9  ;;  %v8136_v53 = vadd.f32 %v1695_v59, %v1521_v32 }
 0x183   : > { %v1202_v41 = vpop.f32.mrf.mxu2  ;;  %v8139_v27 = vpop.f32.mrf.mxu3 }
 0x184   : > { %v1274_v42 = vadd.f32 %v1202_v41, %v991_v33  ;;  %v992_v63 = vpop.f32.mrf.mxu1  ;;  %v1700_v44 = vpop.f32.mrf.mxu0 }
 0x185   : > { %v993_v59 = vadd.f32 %v992_v63, %v7886_v6 }
 0x186   : > { %v1522_v8 = vadd.f32 %v1450_v2, %v1274_v42  ;;  %v1351_v2 = vpack.c.bf16 %v1333_v36, %v1332_v57  ;;  %v1578_v57 = vld [vmem:[%s7660_s18 + $0x124] sm:$0xff]  ;;  %v1579_v36 = vld [vmem:[%s7660_s18 + $0x12c] sm:$0xff] }
 0x188   : > { %v8145_v49 = vadd.f32 %v1698_v28, %v1522_v8 }
 0x18b   : > { %v1204_v48 = vpop.f32.mrf.mxu2  ;;  %v8150_v46 = vpop.f32.mrf.mxu3 }
 0x18c   : > { %v1275_v55 = vadd.f32 %v1204_v48, %v993_v59  ;;  %v995_v32 = vpop.f32.mrf.mxu1  ;;  %v1703_v33 = vpop.f32.mrf.mxu0  ;;  %v2291_v48 = vld [vmem:[%s7660_s18 + $0x3e] sm:$0xff] }
 0x18d   : > { %v996_v28 = vadd.f32 %v995_v32, %v7900_v18  ;;  %v677_v18 = vpack.c.bf16 %v658_v25, %v657_v12  ;;  %v659_v25 = vld [vmem:[%s7660_s18 + $0x121] sm:$0xff] }
 0x18e   : > { %v1523_v41 = vadd.f32 %v8102_v43, %v1275_v55  ;;  %v1598_v55 = vpack.c.bf16 %v1579_v36, %v1578_v57  ;;  %v660_v57 = vld [vmem:[%s7660_s18 + $0x129] sm:$0xff]  ;;  %v1580_v36 = vld [vmem:[%s7660_s18 + $0x134] sm:$0xff] }
 0x18f   : > { %6928 = vmatmul.msk.bf16.gmra.mxu1 %vm736_vm2, %v676_v1  ;;  %6985 = vmatmul.msk.bf16.gmra.mxu0 %vm736_vm2, %v1597_v45 }
 0x190   : > { %6947 = vmatmul.msk.bf16.gmra.mxu2 %vm736_vm2, %v8081_v62  ;;  %6968 = vmatmul.msk.bf16.gmra.mxu3 %vm736_vm2, %v1351_v2  ;;  %v8158_v6 = vadd.f32 %v1700_v44, %v1523_v41  ;;  %v2290_v62 = vld [vmem:[%s7660_s18 + $0x36] sm:$0xff] }
 0x193   : > { %v1207_v42 = vpop.f32.mrf.mxu2  ;;  %v8161_v63 = vpop.f32.mrf.mxu3 }
 0x194   : > { %v1276_v43 = vadd.f32 %v1207_v42, %v996_v28  ;;  %v997_v8 = vpop.f32.mrf.mxu1  ;;  %v1705_v38 = vpop.f32.mrf.mxu0  ;;  %v2326_v28 = vpack.c.bf16 %v2291_v48, %v2290_v62  ;;  %v1581_v62 = vld [vmem:[%s7660_s18 + $0x13c] sm:$0xff] }
 0x195   : > { %v998_v44 = vadd.f32 %v997_v8, %v7915_v23  ;;  %v7413_v23 = vld [vmem:[%s10483_s3 + $0x18] sm:$0xff] }
 0x196   : > { %v1524_v10 = vadd.f32 %v1455_v26, %v1276_v43  ;;  %3340 = vmatpush.bf16.msrb.mxu1 %v7413_v23 }
 0x198   : > { %v8167_v59 = vadd.f32 %v1703_v33, %v1524_v10 }
 0x19b   : > { %v1209_v1 = vpop.f32.mrf.mxu2  ;;  %v8172_v45 = vpop.f32.mrf.mxu3 }
 0x19c   : > { %v1277_v32 = vadd.f32 %v1209_v1, %v998_v44  ;;  %v1000_v2 = vpop.f32.mrf.mxu1  ;;  %v1708_v41 = vpop.f32.mrf.mxu0  ;;  %v2292_v44 = vld [vmem:[%s7660_s18 + $0x46] sm:$0xff] }
 0x19e   : > { %v1525_v26 = vadd.f32 %v8125_v56, %v1277_v32  ;;  %v1001_v56 = vadd.f32 %v1000_v2, %v7929_v35  ;;  %v1599_v32 = vpack.c.bf16 %v1581_v62, %v1580_v36  ;;  %v2538_v36 = vld [vmem:[%s7660_s18 + $0x37] sm:$0xff]  ;;  %v2539_v62 = vld [vmem:[%s7660_s18 + $0x3f] sm:$0xff] }
 0x19f   : > { %6929 = vmatmul.msk.bf16.gmra.mxu1 %vm736_vm2, %v677_v18  ;;  %6986 = vmatmul.msk.bf16.gmra.mxu0 %vm736_vm2, %v1598_v55  ;;  %v678_v55 = vpack.c.bf16 %v660_v57, %v659_v25  ;;  %v1795_v25 = vld [vmem:[%s7660_s18 + $0x2d] sm:$0xff]  ;;  %v7558_v57 = vmov 0  }
 0x1a0   : > { %6948 = vmatmul.msk.bf16.gmra.mxu2 %vm736_vm2, %v8104_v7  ;;  %7027 = vmatmul.msk.bf16.vlgmr.msra.gmra.mxu3 %vm736_vm2, %v2326_v28  ;;  %v8183_v33 = vadd.f32 %v1705_v38, %v1525_v26  ;;  %v2293_v38 = vld [vmem:[%s7660_s18 + $0x4e] sm:$0xff] }
 0x1a1   : > { %7449 = vset.pattern.permute.xlu0 %v7558_v57  ;;  %7450 = vset.pattern.permute.xlu1 %v7558_v57 }
 0x1a2   : > { %7451 = vset.pattern.permute.xlu2 %v7558_v57 }
 0x1a3   : > { %v1212_v42 = vpop.f32.mrf.mxu2  ;;  %v8186_v43 = vpop.f32.mrf.mxu3 }
 0x1a4   : > { %v1278_v8 = vadd.f32 %v1212_v42, %v1001_v56  ;;  %v1002_v10 = vpop.f32.mrf.mxu1  ;;  %v1710_v12 = vpop.f32.mrf.mxu0 }
 0x1a5   : > { %v1003_v1 = vadd.f32 %v1002_v10, %v7943_v40 }
 0x1a6   : > { %v1526_v7 = vadd.f32 %v8139_v27, %v1278_v8  ;;  %v2327_v27 = vpack.c.bf16 %v2293_v38, %v2292_v44  ;;  %v2043_v38 = vld [vmem:[%s7660_s18 + $0x3d] sm:$0xff] }
 0x1a8   : > { %v8193_v48 = vadd.f32 %v1708_v41, %v1526_v7  ;;  %v2862_v7 = vld [vmem:[%s10491_s11] sm:$0xff] }
 0x1a9   : > { %2900 = vperm.xlu0 %7449, %v2862_v7  }
 0x1ab   : > { %v1214_v35 = vpop.f32.mrf.mxu2  ;;  %v8198_v18 = vpop.f32.mrf.mxu3 }
 0x1ac   : > { %v1279_v2 = vadd.f32 %v1214_v35, %v1003_v1  ;;  %v1005_v28 = vpop.f32.mrf.mxu1  ;;  %v1713_v26 = vpop.f32.mrf.mxu0  ;;  %v2294_v1 = vld [vmem:[%s7660_s18 + $0x56] sm:$0xff]  ;;  %v2295_v35 = vld [vmem:[%s7660_s18 + $0x5e] sm:$0xff] }
 0x1ad   : > { %v1006_v41 = vadd.f32 %v1005_v28, %v7957_v58  ;;  %v2042_v58 = vld [vmem:[%s7660_s18 + $0x35] sm:$0xff]  ;;  %v2574_v28 = vpack.c.bf16 %v2539_v62, %v2538_v36  ;;  %v2540_v62 = vld [vmem:[%s7660_s18 + $0x47] sm:$0xff] }
 0x1ae   : > { %v1527_v23 = vadd.f32 %v8150_v46, %v1279_v2  ;;  %v2864_v36 = vld [vmem:[%s10491_s11 + $0x10] sm:$0xff] }
 0x1af   : > { %6930 = vmatmul.msk.bf16.gmra.mxu1 %vm736_vm2, %v678_v55  ;;  %6987 = vmatmul.msk.bf16.gmra.mxu0 %vm736_vm2, %v1599_v32 }
 0x1b0   : > { %6949 = vmatmul.msk.bf16.gmra.mxu2 %vm736_vm2, %v8127_v9  ;;  %7028 = vmatmul.msk.bf16.gmra.mxu3 %vm736_vm2, %v2327_v27  ;;  %v8206_v40 = vadd.f32 %v1710_v12, %v1527_v23  ;;  %v1794_v12 = vld [vmem:[%s7660_s18 + $0x25] sm:$0xff] }
 0x1b1   : > { %v1830_v2 = vpack.c.bf16 %v1795_v25, %v1794_v12  ;;  %2910 = vperm.xlu1 %7450, %v2864_v36  }
 0x1b3   : > { %v1217_v56 = vpop.f32.mrf.mxu2  ;;  %v8209_v42 = vpop.f32.mrf.mxu3 }
 0x1b4   : > { %v1280_v46 = vadd.f32 %v1217_v56, %v1006_v41  ;;  %v1007_v8 = vpop.f32.mrf.mxu1  ;;  %v1715_v10 = vpop.f32.mrf.mxu0  ;;  %v2078_v56 = vpack.c.bf16 %v2043_v38, %v2042_v58  ;;  %v2541_v38 = vld [vmem:[%s7660_s18 + $0x4f] sm:$0xff] }
 0x1b6   : > { %v1528_v9 = vadd.f32 %v8161_v63, %v1280_v46  ;;  %v1008_v63 = vadd.f32 %v1007_v8, %v7983_v16  ;;  %v2328_v46 = vpack.c.bf16 %v2295_v35, %v2294_v1  ;;  %v2863_v16 = vld [vmem:[%s10491_s11 + $0x8] sm:$0xff] }
 0x1b7   : > { %2905 = vperm.xlu0 %7449, %v2863_v16   ;;  %v2045_v35 = vld [vmem:[%s7660_s18 + $0x4d] sm:$0xff] }
 0x1b8   : > { %v8220_v44 = vadd.f32 %v1713_v26, %v1528_v9 }
 0x1bb   : > { %v1219_v55 = vpop.f32.mrf.mxu2  ;;  %v8226_v32 = vpop.f32.mrf.mxu3 }
 0x1bc   : > { %v1281_v27 = vadd.f32 %v1219_v55, %v1008_v63  ;;  %v1010_v23 = vpop.f32.mrf.mxu1  ;;  %v1718_v41 = vpop.f32.mrf.mxu0  ;;  %v2297_v63 = vld [vmem:[%s7660_s18 + $0x6e] sm:$0xff] }
 0x1be   : > { %v1529_v7 = vadd.f32 %v8172_v45, %v1281_v27  ;;  %v1011_v45 = vadd.f32 %v1010_v23, %v7851_v50  ;;  %v2296_v50 = vld [vmem:[%s7660_s18 + $0x66] sm:$0xff]  ;;  %v2575_v27 = vpack.c.bf16 %v2541_v38, %v2540_v62  ;;  %v2542_v62 = vld [vmem:[%s7660_s18 + $0x57] sm:$0xff] }
 0x1bf   : > { %6989 = vmatmul.msk.bf16.vlgmr.msra.gmra.mxu1 %vm736_vm2, %v1830_v2  ;;  %7046 = vmatmul.msk.bf16.vlgmr.msra.gmra.mxu0 %vm736_vm2, %v2574_v28  ;;  %v2329_v16 = vpack.c.bf16 %v2297_v63, %v2296_v50  ;;  %v2543_v38 = vld [vmem:[%s7660_s18 + $0x5f] sm:$0xff]  ;;  %v2298_v63 = vld [vmem:[%s7660_s18 + $0x76] sm:$0xff] }
 0x1c0   : > { %7008 = vmatmul.msk.bf16.vlgmr.msra.gmra.mxu2 %vm736_vm2, %v2078_v56  ;;  %7029 = vmatmul.msk.bf16.gmra.mxu3 %vm736_vm2, %v2328_v46  ;;  %v8236_v26 = vadd.f32 %v1715_v10, %v1529_v7  ;;  %v2044_v10 = vld [vmem:[%s7660_s18 + $0x45] sm:$0xff]  ;;  %v2047_v50 = vld [vmem:[%s7660_s18 + $0x5d] sm:$0xff] }
 0x1c1   : > { %v2079_v7 = vpack.c.bf16 %v2045_v35, %v2044_v10  ;;  %v2046_v10 = vld [vmem:[%s7660_s18 + $0x55] sm:$0xff] }
 0x1c3   : > { %v1222_v8 = vpop.f32.mrf.mxu2  ;;  %v8239_v9 = vpop.f32.mrf.mxu3 }
 0x1c4   : > { %v1282_v12 = vadd.f32 %v1222_v8, %v1011_v45  ;;  %v1012_v25 = vpop.f32.mrf.mxu1  ;;  %v1720_v57 = vpop.f32.mrf.mxu0 }
 0x1c5   : > { %v1013_v55 = vadd.f32 %v1012_v25, %v7865_v60  ;;  %v2865_v60 = vld [vmem:[%s10491_s11 + $0x18] sm:$0xff] }
 0x1c6   : > { %v1530_v58 = vadd.f32 %v8186_v43, %v1282_v12  ;;  %2915 = vperm.xlu1 %7450, %v2865_v60  }
 0x1c8   : > { %v8248_v1 = vadd.f32 %v1718_v41, %v1530_v58 }
 0x1cb   : > { %v1224_v2 = vpop.f32.mrf.mxu2  ;;  %v8254_v28 = vpop.f32.mrf.mxu3 }
 0x1cc   : > { %v1283_v43 = vadd.f32 %v1224_v2, %v1013_v55  ;;  %v1015_v23 = vpop.f32.mrf.mxu1  ;;  %v1723_v46 = vpop.f32.mrf.mxu0 }
 0x1ce   : > { %v1531_v45 = vadd.f32 %v8198_v18, %v1283_v43  ;;  %v1016_v18 = vadd.f32 %v1015_v23, %v7880_v3 }
 0x1cf   : > { %6990 = vmatmul.msk.bf16.gmra.mxu1 %vm736_vm2, %v2078_v56  ;;  %7047 = vmatmul.msk.bf16.gmra.mxu0 %vm736_vm2, %v2575_v27  ;;  %v2576_v27 = vpack.c.bf16 %v2543_v38, %v2542_v62  ;;  %v2544_v62 = vld [vmem:[%s7660_s18 + $0x67] sm:$0xff] }
 0x1d0   : > { %7009 = vmatmul.msk.bf16.gmra.mxu2 %vm736_vm2, %v2079_v7  ;;  %7030 = vmatmul.msk.bf16.gmra.mxu3 %vm736_vm2, %v2329_v16  ;;  %v8264_v41 = vadd.f32 %v1720_v57, %v1531_v45  ;;  %v2299_v57 = vld [vmem:[%s7660_s18 + $0x7e] sm:$0xff]  ;;  %v2080_v45 = vpack.c.bf16 %v2047_v50, %v2046_v10  ;;  %v2049_v50 = vld [vmem:[%s7660_s18 + $0x6d] sm:$0xff] }
 0x1d1   : > { %v2330_v60 = vpack.c.bf16 %v2299_v57, %v2298_v63  ;;  %v2048_v10 = vld [vmem:[%s7660_s18 + $0x65] sm:$0xff]  ;;  %v2301_v63 = vld [vmem:[%s7660_s18 + $0x8e] sm:$0xff] }
 0x1d3   : > { %v1227_v56 = vpop.f32.mrf.mxu2  ;;  %v8267_v8 = vpop.f32.mrf.mxu3 }
 0x1d4   : > { %v1284_v12 = vadd.f32 %v1227_v56, %v1016_v18  ;;  %v1017_v25 = vpop.f32.mrf.mxu1  ;;  %v1725_v58 = vpop.f32.mrf.mxu0 }
 0x1d5   : > { %v1018_v55 = vadd.f32 %v1017_v25, %v7894_v13 }
 0x1d6   : > { %v1532_v36 = vadd.f32 %v8209_v42, %v1284_v12 }
 0x1d8   : > { %v8273_v35 = vadd.f32 %v1723_v46, %v1532_v36  ;;  %v2868_v36 = vld [vmem:[%s10491_s11 + $0x30] sm:$0xff] }
 0x1d9   : > { %2930 = vperm.xlu0 %7449, %v2868_v36  }
 0x1db   : > { %v1229_v2 = vpop.f32.mrf.mxu2  ;;  %v8279_v3 = vpop.f32.mrf.mxu3 }
 0x1dc   : > { %v1285_v43 = vadd.f32 %v1229_v2, %v1018_v55  ;;  %v1020_v23 = vpop.f32.mrf.mxu1  ;;  %v1728_v16 = vpop.f32.mrf.mxu0 }
 0x1dd   : > { %v1021_v46 = vadd.f32 %v1020_v23, %v7909_v20  ;;  %v2300_v20 = vld [vmem:[%s7660_s18 + $0x86] sm:$0xff] }
 0x1de   : > { %v1533_v42 = vadd.f32 %v8226_v32, %v1285_v43 }
 0x1df   : > { %6991 = vmatmul.msk.bf16.gmra.mxu1 %vm736_vm2, %v2079_v7  ;;  %7048 = vmatmul.msk.bf16.gmra.mxu0 %vm736_vm2, %v2576_v27 }
 0x1e0   : > { %7010 = vmatmul.msk.bf16.gmra.mxu2 %vm736_vm2, %v2080_v45  ;;  %7031 = vmatmul.msk.bf16.gmra.mxu3 %vm736_vm2, %v2330_v60  ;;  %v8286_v13 = vadd.f32 %v1725_v58, %v1533_v42  ;;  %v2545_v58 = vld [vmem:[%s7660_s18 + $0x6f] sm:$0xff]  ;;  %v2081_v60 = vpack.c.bf16 %v2049_v50, %v2048_v10  ;;  %v2331_v42 = vpack.c.bf16 %v2301_v63, %v2300_v20  ;;  %v2547_v50 = vld [vmem:[%s7660_s18 + $0x7f] sm:$0xff] }
 0x1e1   : > { %v2577_v27 = vpack.c.bf16 %v2545_v58, %v2544_v62  ;;  %v2867_v62 = vld [vmem:[%s10491_s11 + $0x28] sm:$0xff]  ;;  %v2546_v58 = vld [vmem:[%s7660_s18 + $0x77] sm:$0xff] }
 0x1e2   : > { %v2051_v63 = vld [vmem:[%s7660_s18 + $0x7d] sm:$0xff] }
 0x1e3   : > { %v1232_v18 = vpop.f32.mrf.mxu2  ;;  %v8289_v56 = vpop.f32.mrf.mxu3 }
 0x1e4   : > { %v1286_v32 = vadd.f32 %v1232_v18, %v1021_v46  ;;  %v1022_v12 = vpop.f32.mrf.mxu1  ;;  %v1730_v7 = vpop.f32.mrf.mxu0 }
 0x1e5   : > { %v1023_v57 = vadd.f32 %v1022_v12, %v7923_v30  ;;  %v2866_v30 = vld [vmem:[%s10491_s11 + $0x20] sm:$0xff] }
 0x1e6   : > { %v1534_v25 = vadd.f32 %v8239_v9, %v1286_v32  ;;  %2920 = vperm.xlu2 %7451, %v2866_v30  }
 0x1e8   : > { %v8298_v38 = vadd.f32 %v1728_v16, %v1534_v25  ;;  %v2869_v16 = vld [vmem:[%s10491_s11 + $0x38] sm:$0xff] }
 0x1e9   : > { %2935 = vperm.xlu1 %7450, %v2869_v16  }
 0x1eb   : > { %v1234_v55 = vpop.f32.mrf.mxu2  ;;  %v8304_v2 = vpop.f32.mrf.mxu3 }
 0x1ec   : > { %v1287_v9 = vadd.f32 %v1234_v55, %v1023_v57  ;;  %v1025_v43 = vpop.f32.mrf.mxu1  ;;  %v1733_v23 = vpop.f32.mrf.mxu0  ;;  %v2302_v57 = vld [vmem:[%s7660_s18 + $0x96] sm:$0xff] }
 0x1ee   : > { %v1535_v46 = vadd.f32 %v8254_v28, %v1287_v9  ;;  %2925 = vperm.xlu2 %7451, %v2867_v62  }
 0x1ef   : > { %6992 = vmatmul.msk.bf16.gmra.mxu1 %vm736_vm2, %v2080_v45  ;;  %7049 = vmatmul.msk.bf16.gmra.mxu0 %vm736_vm2, %v2577_v27  ;;  %v1026_v45 = vadd.f32 %v1025_v43, %v7939_v37  ;;  %v2303_v37 = vld [vmem:[%s7660_s18 + $0x9e] sm:$0xff]  ;;  %v2578_v43 = vpack.c.bf16 %v2547_v50, %v2546_v58  ;;  %v2548_v58 = vld [vmem:[%s7660_s18 + $0x87] sm:$0xff]  ;;  %v2549_v50 = vld [vmem:[%s7660_s18 + $0x8f] sm:$0xff] }
 0x1f0   : > { %7011 = vmatmul.msk.bf16.gmra.mxu2 %vm736_vm2, %v2081_v60  ;;  %7032 = vmatmul.msk.bf16.gmra.mxu3 %vm736_vm2, %v2331_v42  ;;  %v8317_v28 = vadd.f32 %v1730_v7, %v1535_v46  ;;  %v2050_v7 = vld [vmem:[%s7660_s18 + $0x75] sm:$0xff]  ;;  %v2332_v16 = vpack.c.bf16 %v2303_v37, %v2302_v57  ;;  %v2053_v57 = vld [vmem:[%s7660_s18 + $0x8d] sm:$0xff] }
 0x1f1   : > { %v2082_v30 = vpack.c.bf16 %v2051_v63, %v2050_v7  ;;  %v2872_v7 = vld [vmem:[%s10491_s11 + $0x50] sm:$0xff] }
 0x1f2   : > { %2950 = vperm.xlu1 %7450, %v2872_v7   ;;  %v2305_v37 = vld [vmem:[%s7660_s18 + $0xae] sm:$0xff] }
 0x1f3   : > { %v1237_v18 = vpop.f32.mrf.mxu2  ;;  %v8320_v32 = vpop.f32.mrf.mxu3 }
 0x1f4   : > { %v1288_v12 = vadd.f32 %v1237_v18, %v1026_v45  ;;  %v1027_v25 = vpop.f32.mrf.mxu1  ;;  %v1735_v36 = vpop.f32.mrf.mxu0 }
 0x1f5   : > { %v1028_v55 = vadd.f32 %v1027_v25, %v7951_v54  ;;  %v2871_v54 = vld [vmem:[%s10491_s11 + $0x48] sm:$0xff] }
 0x1f6   : > { %v1536_v10 = vadd.f32 %v8267_v8, %v1288_v12  ;;  %2945 = vperm.xlu0 %7449, %v2871_v54  }
 0x1f8   : > { %v8329_v20 = vadd.f32 %v1733_v23, %v1536_v10 }
 0x1fb   : > { %v1239_v27 = vpop.f32.mrf.mxu2  ;;  %v8335_v9 = vpop.f32.mrf.mxu3 }
 0x1fc   : > { %v1289_v8 = vadd.f32 %v1239_v27, %v1028_v55  ;;  %v1030_v42 = vpop.f32.mrf.mxu1  ;;  %v1738_v46 = vpop.f32.mrf.mxu0 }
 0x1fe   : > { %v1537_v45 = vadd.f32 %v8279_v3, %v1289_v8  ;;  %v1031_v3 = vadd.f32 %v1030_v42, %v7979_v11  ;;  %v2304_v11 = vld [vmem:[%s7660_s18 + $0xa6] sm:$0xff]  ;;  %v2579_v8 = vpack.c.bf16 %v2549_v50, %v2548_v58  ;;  %v2877_v58 = vld [vmem:[%s10491_s11 + $0x78] sm:$0xff] }
 0x1ff   : > { %6993 = vmatmul.msk.bf16.gmra.mxu1 %vm736_vm2, %v2081_v60  ;;  %7050 = vmatmul.msk.bf16.gmra.mxu0 %vm736_vm2, %v2578_v43  ;;  %v2333_v54 = vpack.c.bf16 %v2305_v37, %v2304_v11  ;;  %v2550_v50 = vld [vmem:[%s7660_s18 + $0x97] sm:$0xff] }
 0x200   : > { %7012 = vmatmul.msk.bf16.gmra.mxu2 %vm736_vm2, %v2082_v30  ;;  %7033 = vmatmul.msk.bf16.gmra.mxu3 %vm736_vm2, %v2332_v16  ;;  %v8345_v23 = vadd.f32 %v1735_v36, %v1537_v45  ;;  %v2052_v36 = vld [vmem:[%s7660_s18 + $0x85] sm:$0xff]  ;;  %v2055_v37 = vld [vmem:[%s7660_s18 + $0x9d] sm:$0xff] }
 0x201   : > { %v2083_v45 = vpack.c.bf16 %v2053_v57, %v2052_v36  ;;  %v2551_v57 = vld [vmem:[%s7660_s18 + $0x9f] sm:$0xff] }
 0x203   : > { %v1242_v60 = vpop.f32.mrf.mxu2  ;;  %v8348_v18 = vpop.f32.mrf.mxu3 }
 0x204   : > { %v1290_v12 = vadd.f32 %v1242_v60, %v1031_v3  ;;  %v1032_v25 = vpop.f32.mrf.mxu1  ;;  %v1740_v10 = vpop.f32.mrf.mxu0 }
 0x205   : > { %v1033_v55 = vadd.f32 %v1032_v25, %v7991_v29  ;;  %v2874_v29 = vld [vmem:[%s10491_s11 + $0x60] sm:$0xff] }
 0x206   : > { %v1538_v62 = vadd.f32 %v8289_v56, %v1290_v12  ;;  %2960 = vperm.xlu0 %7449, %v2874_v29  }
 0x208   : > { %v8357_v63 = vadd.f32 %v1738_v46, %v1538_v62  ;;  %v2870_v46 = vld [vmem:[%s10491_s11 + $0x40] sm:$0xff] }
 0x209   : > { %2940 = vperm.xlu2 %7451, %v2870_v46  }
 0x20b   : > { %v1244_v27 = vpop.f32.mrf.mxu2  ;;  %v8363_v43 = vpop.f32.mrf.mxu3 }
 0x20c   : > { %v1291_v56 = vadd.f32 %v1244_v27, %v1033_v55  ;;  %v1035_v42 = vpop.f32.mrf.mxu1  ;;  %v1743_v16 = vpop.f32.mrf.mxu0  ;;  %v2306_v55 = vld [vmem:[%s7660_s18 + $0xb6] sm:$0xff] }
 0x20e   : > { %v1539_v3 = vadd.f32 %v8304_v2, %v1291_v56  ;;  %2975 = vperm.xlu0 %7449, %v2877_v58  }
 0x20f   : > { %6994 = vmatmul.msk.bf16.gmra.mxu1 %vm736_vm2, %v2082_v30  ;;  %7051 = vmatmul.msk.bf16.gmra.mxu0 %vm736_vm2, %v2579_v8  ;;  %v1036_v30 = vadd.f32 %v1035_v42, %v7853_v51  ;;  %v2307_v51 = vld [vmem:[%s7660_s18 + $0xbe] sm:$0xff]  ;;  %v2580_v42 = vpack.c.bf16 %v2551_v57, %v2550_v50  ;;  %v2552_v57 = vld [vmem:[%s7660_s18 + $0xa7] sm:$0xff] }
 0x210   : > { %7013 = vmatmul.msk.bf16.gmra.mxu2 %vm736_vm2, %v2083_v45  ;;  %7034 = vmatmul.msk.bf16.gmra.mxu3 %vm736_vm2, %v2333_v54  ;;  %v8376_v2 = vadd.f32 %v1740_v10, %v1539_v3  ;;  %v2054_v10 = vld [vmem:[%s7660_s18 + $0x95] sm:$0xff]  ;;  %v2334_v46 = vpack.c.bf16 %v2307_v51, %v2306_v55  ;;  %v2056_v50 = vld [vmem:[%s7660_s18 + $0xa5] sm:$0xff] }
 0x211   : > { %v2084_v29 = vpack.c.bf16 %v2055_v37, %v2054_v10  ;;  %v2553_v37 = vld [vmem:[%s7660_s18 + $0xaf] sm:$0xff]  ;;  %v2873_v55 = vld [vmem:[%s10491_s11 + $0x58] sm:$0xff] }
 0x212   : > { %2955 = vperm.xlu2 %7451, %v2873_v55   ;;  %v2058_v55 = vld [vmem:[%s7660_s18 + $0xb5] sm:$0xff] }
 0x213   : > { %v1247_v60 = vpop.f32.mrf.mxu2  ;;  %v8379_v12 = vpop.f32.mrf.mxu3 }
 0x214   : > { %v1292_v25 = vadd.f32 %v1247_v60, %v1036_v30  ;;  %v1037_v62 = vpop.f32.mrf.mxu1  ;;  %v1745_v7 = vpop.f32.mrf.mxu0 }
 0x215   : > { %v1038_v27 = vadd.f32 %v1037_v62, %v7867_v61  ;;  %v2875_v61 = vld [vmem:[%s10491_s11 + $0x68] sm:$0xff] }
 0x216   : > { %v1540_v36 = vadd.f32 %v8320_v32, %v1292_v25  ;;  %2965 = vperm.xlu1 %7450, %v2875_v61  }
 0x218   : > { %v8388_v11 = vadd.f32 %v1743_v16, %v1540_v36  ;;  %v2880_v16 = vld [vmem:[%s10491_s11 + $0x90] sm:$0xff] }
 0x219   : > { %2990 = vperm.xlu0 %7449, %v2880_v16  }
 0x21b   : > { %v1249_v8 = vpop.f32.mrf.mxu2  ;;  %v8394_v56 = vpop.f32.mrf.mxu3 }
 0x21c   : > { %v1293_v32 = vadd.f32 %v1249_v8, %v1038_v27  ;;  %v1040_v54 = vpop.f32.mrf.mxu1  ;;  %v1748_v3 = vpop.f32.mrf.mxu0  ;;  %v2057_v27 = vld [vmem:[%s7660_s18 + $0xad] sm:$0xff] }
 0x21d   : > { %v2308_v8 = vld [vmem:[%s7660_s18 + $0xc6] sm:$0xff] }
 0x21e   : > { %v1541_v30 = vadd.f32 %v8335_v9, %v1293_v32 }
 0x21f   : > { %6995 = vmatmul.msk.bf16.gmra.mxu1 %vm736_vm2, %v2083_v45  ;;  %7052 = vmatmul.msk.bf16.gmra.mxu0 %vm736_vm2, %v2580_v42  ;;  %v1041_v45 = vadd.f32 %v1040_v54, %v7882_v4  ;;  %v2883_v4 = vld [vmem:[%s10491_s11 + $0xa8] sm:$0xff] }
 0x220   : > { %7014 = vmatmul.msk.bf16.gmra.mxu2 %vm736_vm2, %v2084_v29  ;;  %7035 = vmatmul.msk.bf16.gmra.mxu3 %vm736_vm2, %v2334_v46  ;;  %v8407_v9 = vadd.f32 %v1745_v7, %v1541_v30  ;;  %v2878_v7 = vld [vmem:[%s10491_s11 + $0x80] sm:$0xff]  ;;  %v2581_v46 = vpack.c.bf16 %v2553_v37, %v2552_v57 }
 0x221   : > { %2980 = vperm.xlu1 %7450, %v2878_v7   ;;  %3005 = vperm.xlu0 %7449, %v2883_v4  }
 0x223   : > { %v1252_v60 = vpop.f32.mrf.mxu2  ;;  %v8410_v25 = vpop.f32.mrf.mxu3 }
 0x224   : > { %v1294_v62 = vadd.f32 %v1252_v60, %v1041_v45  ;;  %v1042_v36 = vpop.f32.mrf.mxu1  ;;  %v1750_v58 = vpop.f32.mrf.mxu0  ;;  %v2085_v45 = vpack.c.bf16 %v2057_v27, %v2056_v50  ;;  %v2554_v27 = vld [vmem:[%s7660_s18 + $0xb7] sm:$0xff] }
 0x225   : > { %v1043_v42 = vadd.f32 %v1042_v36, %v7896_v14  ;;  %v7417_v14 = vld [vmem:[%s10483_s3 + $0x38] sm:$0xff]  ;;  %v2886_v36 = vld [vmem:[%s10491_s11 + $0xc0] sm:$0xff] }
 0x226   : > { %v1542_v10 = vadd.f32 %v8348_v18, %v1294_v62  ;;  %v2309_v18 = vld [vmem:[%s7660_s18 + $0xce] sm:$0xff]  ;;  %3989 = vmatpush.bf16.msrb.mxu0 %v7417_v14 }
 0x227   : > { %v2335_v60 = vpack.c.bf16 %v2309_v18, %v2308_v8  ;;  %v7412_v62 = vld [vmem:[%s10483_s3 + $0x10] sm:$0xff]  ;;  %v2555_v8 = vld [vmem:[%s7660_s18 + $0xbf] sm:$0xff] }
 0x228   : > { %v8425_v51 = vadd.f32 %v1748_v3, %v1542_v10  ;;  %3341 = vmatpush.bf16.msrb.mxu1 %v7412_v62  ;;  %v2884_v18 = vld [vmem:[%s10491_s11 + $0xb0] sm:$0xff]  ;;  %v2582_v14 = vpack.c.bf16 %v2555_v8, %v2554_v27 }
 0x229   : > { %3020 = vperm.xlu0 %7449, %v2886_v36  }
 0x22b   : > { %v1254_v32 = vpop.f32.mrf.mxu2  ;;  %v8431_v54 = vpop.f32.mrf.mxu3 }
 0x22c   : > { %v1295_v30 = vadd.f32 %v1254_v32, %v1043_v42  ;;  %v1045_v61 = vpop.f32.mrf.mxu1  ;;  %v1753_v16 = vpop.f32.mrf.mxu0  ;;  %v2889_v42 = vld [vmem:[%s10491_s11 + $0xd8] sm:$0xff] }
 0x22d   : > { %v1046_v10 = vadd.f32 %v1045_v61, %v7911_v21  ;;  %v7415_v21 = vld [vmem:[%s10483_s3 + $0x28] sm:$0xff] }
 0x22e   : > { %v1543_v3 = vadd.f32 %v8363_v43, %v1295_v30  ;;  %v2881_v43 = vld [vmem:[%s10491_s11 + $0x98] sm:$0xff]  ;;  %3729 = vmatpush.bf16.msrb.mxu3 %v7415_v21 }
 0x22f   : > { %6996 = vmatmul.msk.bf16.gmra.mxu1 %vm736_vm2, %v2084_v29  ;;  %7053 = vmatmul.msk.bf16.gmra.mxu0 %vm736_vm2, %v2581_v46  ;;  %v2059_v46 = vld [vmem:[%s7660_s18 + $0xbd] sm:$0xff] }
 0x230   : > { %7015 = vmatmul.msk.bf16.gmra.mxu2 %vm736_vm2, %v2085_v45  ;;  %7036 = vmatmul.msk.bf16.gmra.mxu3 %vm736_vm2, %v2335_v60  ;;  %v8447_v29 = vadd.f32 %v1750_v58, %v1543_v3  ;;  %v2310_v30 = vld [vmem:[%s7660_s18 + $0xd6] sm:$0xff] }
 0x231   : > { %2995 = vperm.xlu1 %7450, %v2881_v43   ;;  %3035 = vperm.xlu0 %7449, %v2889_v42   ;;  %v2060_v42 = vld [vmem:[%s7660_s18 + $0xc5] sm:$0xff] }
 0x233   : > { %v1257_v50 = vpop.f32.mrf.mxu2  ;;  %v8453_v57 = vpop.f32.mrf.mxu3 }
 0x234   : > { %v1296_v37 = vadd.f32 %v1257_v50, %v1046_v10  ;;  %v1047_v7 = vpop.f32.mrf.mxu1  ;;  %v1755_v58 = vpop.f32.mrf.mxu0  ;;  %v2086_v10 = vpack.c.bf16 %v2059_v46, %v2058_v55  ;;  %v2556_v46 = vld [vmem:[%s7660_s18 + $0xc7] sm:$0xff] }
 0x235   : > { %v1048_v61 = vadd.f32 %v1047_v7, %v7925_v31  ;;  %v2887_v31 = vld [vmem:[%s10491_s11 + $0xc8] sm:$0xff] }
 0x236   : > { %v1544_v4 = vadd.f32 %v8379_v12, %v1296_v37  ;;  %v2311_v12 = vld [vmem:[%s7660_s18 + $0xde] sm:$0xff]  ;;  %v2892_v37 = vld [vmem:[%s10491_s11 + $0xf0] sm:$0xff] }
 0x237   : > { %v2336_v50 = vpack.c.bf16 %v2311_v12, %v2310_v30  ;;  %v2901_v12 = vpop.permute.xlu0 %2900 }
 0x238   : > { %v8468_v32 = vadd.f32 %v1753_v16, %v1544_v4 }
 0x239   : > { %3010 = vperm.xlu1 %7450, %v2884_v18   ;;  %3050 = vperm.xlu0 %7449, %v2892_v37  }
 0x23a   : > { %10509 = vst [vmem:[#allocation4_spill] sm:$0xff] %v8468_v32 }
 0x23b   : > { %v1259_v60 = vpop.f32.mrf.mxu2  ;;  %v8474_v3 = vpop.f32.mrf.mxu3 }
 0x23c   : > { %v1297_v62 = vadd.f32 %v1259_v60, %v1048_v61  ;;  %v1916_v43 = vpop.f32.mrf.mxu1  ;;  %v2660_v36 = vpop.f32.mrf.mxu0  ;;  %v7411_v61 = vld [vmem:[%s10483_s3 + $0x8] sm:$0xff]  ;;  %v2890_v60 = vld [vmem:[%s10491_s11 + $0xe0] sm:$0xff] }
 0x23d   : > { %v2006_v7 = vadd.f32 %v1916_v43, %v8006_v24  ;;  %v2557_v24 = vld [vmem:[%s7660_s18 + $0xcf] sm:$0xff]  ;;  %3505 = vmatpush.bf16.msrb.mxu2 %v7411_v61 }
 0x23e   : > { %v1545_v16 = vadd.f32 %v8394_v56, %v1297_v62  ;;  %v2876_v56 = vld [vmem:[%s10491_s11 + $0x70] sm:$0xff]  ;;  %v2312_v62 = vld [vmem:[%s7660_s18 + $0xe6] sm:$0xff]  ;;  %v2583_v37 = vpack.c.bf16 %v2557_v24, %v2556_v46 }
 0x23f   : > { %6997 = vmatmul.msk.bf16.gmra.mxu1 %vm736_vm2, %v2085_v45  ;;  %7054 = vmatmul.msk.bf16.gmra.mxu0 %vm736_vm2, %v2582_v14  ;;  %v2061_v14 = vld [vmem:[%s7660_s18 + $0xcd] sm:$0xff] }
 0x240   : > { %7016 = vmatmul.msk.bf16.gmra.mxu2 %vm736_vm2, %v2086_v10  ;;  %7037 = vmatmul.msk.bf16.gmra.mxu3 %vm736_vm2, %v2336_v50  ;;  %v8490_v45 = vadd.f32 %v1755_v58, %v1545_v16  ;;  %v8499_v58 = vld [vmem:[%s10482_s2] ss:$0 sm:$0xff]  ;;  %v2313_v43 = vld [vmem:[%s7660_s18 + $0xee] sm:$0xff] }
 0x241   : > { %3025 = vperm.xlu1 %7450, %v2887_v31   ;;  %2970 = vperm.xlu2 %7451, %v2876_v56  }
 0x242   : > { %10510 = vst [vmem:[#allocation5_spill] sm:$0xff] %v8490_v45  ;;  %v2337_v45 = vpack.c.bf16 %v2313_v43, %v2312_v62  ;;  %v2558_v62 = vld [vmem:[%s7660_s18 + $0xd7] sm:$0xff]  ;;  %v2911_v43 = vpop.permute.xlu1 %2910 }
 0x243   : > { %v2164_v4 = vpop.f32.mrf.mxu2  ;;  %v8493_v55 = vpop.f32.mrf.mxu3 }
 0x244   : > { %v2254_v27 = vadd.f32 %v2164_v4, %v2006_v7  ;;  %v1918_v8 = vpop.f32.mrf.mxu1  ;;  %v2662_v21 = vpop.f32.mrf.mxu0 }
 0x245   : > { %v2007_v50 = vadd.f32 %v1918_v8, %v8022_v52  ;;  %v2879_v8 = vld [vmem:[%s10491_s11 + $0x88] sm:$0xff] }
 0x246   : > { %v2502_v18 = vadd.f32 %v8410_v25, %v2254_v27  ;;  %v2895_v25 = vld [vmem:[%s10491_s11 + $0x108] sm:$0xff] }
 0x247   : > { %3065 = vperm.xlu0 %7449, %v2895_v25  }
 0x248   : > { %v2750_v30 = vadd.f32 %v2660_v36, %v2502_v18  ;;  %v2087_v18 = vpack.c.bf16 %v2061_v14, %v2060_v42  ;;  %v2906_v42 = vpop.permute.xlu0 %2905  ;;  %v2062_v14 = vld [vmem:[%s7660_s18 + $0xd5] sm:$0xff] }
 0x249   : > { %3040 = vperm.xlu1 %7450, %v2890_v60   ;;  %2985 = vperm.xlu2 %7451, %v2879_v8  }
 0x24a   : > { %v2790_v36 = vadd.f32 %v8499_v58, %v2750_v30 }
 0x24b   : > { %v2166_v16 = vpop.f32.mrf.mxu2  ;;  %v8518_v31 = vpop.f32.mrf.mxu3 }
 0x24c   : > { %v2255_v56 = vadd.f32 %v2166_v16, %v2007_v50  ;;  %v2826_v7 = vmax.f32 %v2790_v36, 0.0  ;;  %v1921_v4 = vpop.f32.mrf.mxu1  ;;  %v2665_v27 = vpop.f32.mrf.mxu0  ;;  %v2559_v50 = vld [vmem:[%s7660_s18 + $0xdf] sm:$0xff]  ;;  %v2896_v16 = vld [vmem:[%s10491_s11 + $0x110] sm:$0xff] }
 0x24d   : > { %v2882_v36 = vld [vmem:[%s10491_s11 + $0xa0] sm:$0xff] }
 0x24e   : > { %v2503_v32 = vadd.f32 %v8431_v54, %v2255_v56  ;;  %v3078_v60 = vmul.f32 %v2901_v12, %v2826_v7  ;;  %v2893_v54 = vld [vmem:[%s10491_s11 + $0xf8] sm:$0xff] }
 0x24f   : > { %6998 = vmatmul.msk.bf16.gmra.mxu1 %vm736_vm2, %v2086_v10  ;;  %7055 = vmatmul.msk.bf16.gmra.mxu0 %vm736_vm2, %v2583_v37  ;;  %v2008_v10 = vadd.f32 %v1921_v4, %v8029_v19  ;;  %v2063_v37 = vld [vmem:[%s7660_s18 + $0xdd] sm:$0xff] }
 0x250   : > { %3115 = vst.msk [vmem:[#allocation2 + $0x24] sm:$0xff] %vm3114_vm3, %v3078_v60  ;;  %7017 = vmatmul.msk.bf16.gmra.mxu2 %vm736_vm2, %v2087_v18  ;;  %7038 = vmatmul.msk.bf16.gmra.mxu3 %vm736_vm2, %v2337_v45  ;;  %v2751_v52 = vadd.f32 %v2662_v21, %v2503_v32  ;;  %v2314_v56 = vld [vmem:[%s7660_s18 + $0xf6] sm:$0xff]  ;;  %v2315_v7 = vld [vmem:[%s7660_s18 + $0xfe] sm:$0xff] }
 0x251   : > { %3055 = vperm.xlu1 %7450, %v2893_v54   ;;  %3000 = vperm.xlu2 %7451, %v2882_v36  }
 0x252   : > { %v2791_v46 = vadd.f32 %v8499_v58, %v2751_v52  ;;  %v2584_v52 = vpack.c.bf16 %v2559_v50, %v2558_v62 }
 0x253   : > { %v2169_v45 = vpop.f32.mrf.mxu2  ;;  %v8534_v32 = vpop.f32.mrf.mxu3 }
 0x254   : > { %v2256_v21 = vadd.f32 %v2169_v45, %v2008_v10  ;;  %v2827_v24 = vmax.f32 %v2791_v46, 0.0  ;;  %v1923_v30 = vpop.f32.mrf.mxu1  ;;  %v2667_v12 = vpop.f32.mrf.mxu0  ;;  %v2088_v46 = vpack.c.bf16 %v2063_v37, %v2062_v14  ;;  %v2338_v45 = vpack.c.bf16 %v2315_v7, %v2314_v56  ;;  %v2560_v56 = vld [vmem:[%s7660_s18 + $0xe7] sm:$0xff]  ;;  %v2561_v7 = vld [vmem:[%s7660_s18 + $0xef] sm:$0xff] }
 0x256   : > { %v2504_v61 = vadd.f32 %v8453_v57, %v2256_v21  ;;  %v3079_v25 = vmul.f32 %v2906_v42, %v2827_v24  ;;  %v2009_v57 = vadd.f32 %v1923_v30, %v8044_v5  ;;  %v2885_v30 = vld [vmem:[%s10491_s11 + $0xb8] sm:$0xff] }
 0x258   : > { %v2752_v19 = vadd.f32 %v2665_v27, %v2504_v61  ;;  %3116 = vst.msk [vmem:[#allocation2 + $0x2c] sm:$0xff] %vm3114_vm3, %v3079_v25 }
 0x259   : > { %3070 = vperm.xlu1 %7450, %v2896_v16   ;;  %3015 = vperm.xlu2 %7451, %v2885_v30   ;;  %v2064_v16 = vld [vmem:[%s7660_s18 + $0xe5] sm:$0xff] }
 0x25a   : > { %v2792_v4 = vadd.f32 %v8499_v58, %v2752_v19 }
 0x25b   : > { %v2171_v27 = vpop.f32.mrf.mxu2  ;;  %v8552_v60 = vpop.f32.mrf.mxu3 }
 0x25c   : > { %v2257_v8 = vadd.f32 %v2171_v27, %v2009_v57  ;;  %v2828_v54 = vmax.f32 %v2792_v4, 0.0  ;;  %v1926_v10 = vpop.f32.mrf.mxu1  ;;  %v2670_v42 = vpop.f32.mrf.mxu0  ;;  %v2888_v57 = vld [vmem:[%s10491_s11 + $0xd0] sm:$0xff]  ;;  %v2316_v27 = vld [vmem:[%s7660_s18 + $0x106] sm:$0xff] }
 0x25d   : > { %v2065_v4 = vld [vmem:[%s7660_s18 + $0xed] sm:$0xff] }
 0x25e   : > { %v2505_v21 = vadd.f32 %v8474_v3, %v2257_v8  ;;  %v3080_v24 = vmul.f32 %v2911_v43, %v2828_v54  ;;  %v2010_v3 = vadd.f32 %v1926_v10, %v8051_v47  ;;  %v2921_v47 = vpop.permute.xlu2 %2920  ;;  %v2089_v30 = vpack.c.bf16 %v2065_v4, %v2064_v16  ;;  %v2894_v4 = vld [vmem:[%s10491_s11 + $0x100] sm:$0xff] }
 0x25f   : > { %6999 = vmatmul.msk.bf16.gmra.mxu1 %vm736_vm2, %v2087_v18  ;;  %7056 = vmatmul.msk.bf16.gmra.mxu0 %vm736_vm2, %v2584_v52  ;;  %v2916_v18 = vpop.permute.xlu1 %2915  ;;  %v2317_v52 = vld [vmem:[%s7660_s18 + $0x10e] sm:$0xff] }
 0x260   : > { %3117 = vst.msk [vmem:[#allocation2 + $0x34] sm:$0xff] %vm3114_vm3, %v3080_v24  ;;  %7018 = vmatmul.msk.bf16.gmra.mxu2 %vm736_vm2, %v2088_v46  ;;  %7039 = vmatmul.msk.bf16.gmra.mxu3 %vm736_vm2, %v2338_v45  ;;  %v2753_v5 = vadd.f32 %v2667_v12, %v2505_v21 }
 0x261   : > { %3030 = vperm.xlu2 %7451, %v2888_v57   ;;  %v2563_v57 = vld [vmem:[%s7660_s18 + $0xff] sm:$0xff] }
 0x262   : > { %v2793_v61 = vadd.f32 %v8499_v58, %v2753_v5 }
 0x263   : > { %v2174_v25 = vpop.f32.mrf.mxu2  ;;  %v8565_v14 = vpop.f32.mrf.mxu3 }
 0x264   : > { %v2258_v62 = vadd.f32 %v2174_v25, %v2010_v3  ;;  %v2829_v12 = vmax.f32 %v2793_v61, 0.0  ;;  %v1928_v19 = vpop.f32.mrf.mxu1  ;;  %v2672_v43 = vpop.f32.mrf.mxu0  ;;  %v2339_v3 = vpack.c.bf16 %v2317_v52, %v2316_v27  ;;  %v2891_v25 = vld [vmem:[%s10491_s11 + $0xe8] sm:$0xff]  ;;  %v2067_v27 = vld [vmem:[%s7660_s18 + $0xfd] sm:$0xff] }
 0x265   : > { %v2011_v8 = vadd.f32 %v1928_v19, %v8067_v22  ;;  %v2318_v52 = vld [vmem:[%s7660_s18 + $0x116] sm:$0xff] }
 0x266   : > { %v2506_v50 = vadd.f32 %v8493_v55, %v2258_v62  ;;  %v3081_v36 = vmul.f32 %v2916_v18, %v2829_v12 }
 0x268   : > { %v2754_v37 = vadd.f32 %v2670_v42, %v2506_v50  ;;  %3118 = vst.msk [vmem:[#allocation2 + $0x3c] sm:$0xff] %vm3114_vm3, %v3081_v36  ;;  %v2585_v42 = vpack.c.bf16 %v2561_v7, %v2560_v56  ;;  %v2066_v56 = vld [vmem:[%s7660_s18 + $0xf5] sm:$0xff] }
 0x269   : > { %3045 = vperm.xlu2 %7451, %v2891_v25  }
 0x26a   : > { %v2794_v55 = vadd.f32 %v8499_v58, %v2754_v37 }
 0x26b   : > { %v2176_v54 = vpop.f32.mrf.mxu2  ;;  %v8580_v10 = vpop.f32.mrf.mxu3 }
 0x26c   : > { %v2259_v45 = vadd.f32 %v2176_v54, %v2011_v8  ;;  %v2830_v21 = vmax.f32 %v2794_v55, 0.0  ;;  %v1931_v24 = vpop.f32.mrf.mxu1  ;;  %v2675_v5 = vpop.f32.mrf.mxu0  ;;  %v2319_v8 = vld [vmem:[%s7660_s18 + $0x11e] sm:$0xff] }
 0x26d   : > { %v2931_v54 = vpop.permute.xlu0 %2930 }
 0x26e   : > { %v2507_v18 = vadd.f32 %v8518_v31, %v2259_v45  ;;  %v3082_v61 = vmul.f32 %v2921_v47, %v2830_v21  ;;  %v2012_v31 = vadd.f32 %v1931_v24, %v8074_v0  ;;  %v2562_v0 = vld [vmem:[%s7660_s18 + $0xf7] sm:$0xff] }
 0x26f   : > { %7000 = vmatmul.msk.bf16.gmra.mxu1 %vm736_vm2, %v2088_v46  ;;  %7057 = vmatmul.msk.bf16.gmra.mxu0 %vm736_vm2, %v2585_v42  ;;  %v2926_v46 = vpop.permute.xlu2 %2925  ;;  %v2586_v21 = vpack.c.bf16 %v2563_v57, %v2562_v0  ;;  %v2564_v0 = vld [vmem:[%s7660_s18 + $0x107] sm:$0xff]  ;;  %v2565_v57 = vld [vmem:[%s7660_s18 + $0x10f] sm:$0xff] }
 0x270   : > { %3119 = vst.msk [vmem:[#allocation2 + $0x44] sm:$0xff] %vm3114_vm3, %v3082_v61  ;;  %7019 = vmatmul.msk.bf16.gmra.mxu2 %vm736_vm2, %v2089_v30  ;;  %7040 = vmatmul.msk.bf16.gmra.mxu3 %vm736_vm2, %v2339_v3  ;;  %v2755_v22 = vadd.f32 %v2672_v43, %v2507_v18  ;;  %v2090_v61 = vpack.c.bf16 %v2067_v27, %v2066_v56  ;;  %v2320_v27 = vld [vmem:[%s7660_s18 + $0x126] sm:$0xff] }
 0x271   : > { %3060 = vperm.xlu2 %7451, %v2894_v4   ;;  %v2069_v4 = vld [vmem:[%s7660_s18 + $0x10d] sm:$0xff] }
 0x272   : > { %v2795_v62 = vadd.f32 %v8499_v58, %v2755_v22  ;;  %v2340_v22 = vpack.c.bf16 %v2319_v8, %v2318_v52  ;;  %v2321_v52 = vld [vmem:[%s7660_s18 + $0x12e] sm:$0xff] }
 0x273   : > { %v2179_v12 = vpop.f32.mrf.mxu2  ;;  %v8593_v19 = vpop.f32.mrf.mxu3 }
 0x274   : > { %v2260_v50 = vadd.f32 %v2179_v12, %v2012_v31  ;;  %v2831_v43 = vmax.f32 %v2795_v62, 0.0  ;;  %v1933_v36 = vpop.f32.mrf.mxu1  ;;  %v2677_v16 = vpop.f32.mrf.mxu0 }
 0x275   : > { %v2013_v55 = vadd.f32 %v1933_v36, %v8090_v39 }
 0x276   : > { %v2508_v37 = vadd.f32 %v8534_v32, %v2260_v50  ;;  %v3083_v47 = vmul.f32 %v2926_v46, %v2831_v43  ;;  %v2897_v46 = vld [vmem:[%s10491_s11 + $0x118] sm:$0xff] }
 0x278   : > { %v2756_v7 = vadd.f32 %v2675_v5, %v2508_v37  ;;  %3120 = vst.msk [vmem:[#allocation2 + $0x4c] sm:$0xff] %vm3114_vm3, %v3083_v47 }
 0x279   : > { %3075 = vperm.xlu2 %7451, %v2897_v46   ;;  %v2946_v46 = vpop.permute.xlu0 %2945 }
 0x27a   : > { %v2796_v32 = vadd.f32 %v8499_v58, %v2756_v7 }
 0x27b   : > { %v2181_v42 = vpop.f32.mrf.mxu2  ;;  %v8608_v45 = vpop.f32.mrf.mxu3 }
 0x27c   : > { %v2261_v24 = vadd.f32 %v2181_v42, %v2013_v55  ;;  %v2832_v5 = vmax.f32 %v2796_v32, 0.0  ;;  %v1936_v3 = vpop.f32.mrf.mxu1  ;;  %v2680_v18 = vpop.f32.mrf.mxu0 }
 0x27d   : > { %v2941_v55 = vpop.permute.xlu2 %2940 }
 0x27e   : > { %v2509_v25 = vadd.f32 %v8552_v60, %v2261_v24  ;;  %v3084_v31 = vmul.f32 %v2931_v54, %v2832_v5  ;;  %v2014_v60 = vadd.f32 %v1936_v3, %v8097_v17  ;;  %v2068_v17 = vld [vmem:[%s7660_s18 + $0x105] sm:$0xff] }
 0x27f   : > { %7001 = vmatmul.msk.bf16.gmra.mxu1 %vm736_vm2, %v2089_v30  ;;  %7058 = vmatmul.msk.bf16.gmra.mxu0 %vm736_vm2, %v2586_v21  ;;  %v2936_v30 = vpop.permute.xlu1 %2935  ;;  %v2587_v21 = vpack.c.bf16 %v2565_v57, %v2564_v0  ;;  %v2323_v0 = vld [vmem:[%s7660_s18 + $0x13e] sm:$0xff] }
 0x280   : > { %3121 = vst.msk [vmem:[#allocation2 + $0x54] sm:$0xff] %vm3114_vm3, %v3084_v31  ;;  %7020 = vmatmul.msk.bf16.gmra.mxu2 %vm736_vm2, %v2090_v61  ;;  %7041 = vmatmul.msk.bf16.gmra.mxu3 %vm736_vm2, %v2340_v22  ;;  %v2757_v39 = vadd.f32 %v2677_v16, %v2509_v25  ;;  %v2341_v22 = vpack.c.bf16 %v2321_v52, %v2320_v27 }
 0x282   : > { %v2797_v62 = vadd.f32 %v8499_v58, %v2757_v39 }
 0x283   : > { %v2184_v12 = vpop.f32.mrf.mxu2  ;;  %v8621_v50 = vpop.f32.mrf.mxu3 }
 0x284   : > { %v2262_v43 = vadd.f32 %v2184_v12, %v2014_v60  ;;  %v2833_v36 = vmax.f32 %v2797_v62, 0.0  ;;  %v1938_v16 = vpop.f32.mrf.mxu1  ;;  %v2682_v37 = vpop.f32.mrf.mxu0 }
 0x285   : > { %v2015_v8 = vadd.f32 %v1938_v16, %v8113_v15 }
 0x286   : > { %v2510_v47 = vadd.f32 %v8565_v14, %v2262_v43  ;;  %v3085_v56 = vmul.f32 %v2936_v30, %v2833_v36 }
 0x288   : > { %v2758_v7 = vadd.f32 %v2680_v18, %v2510_v47  ;;  %3122 = vst.msk [vmem:[#allocation2 + $0x5c] sm:$0xff] %vm3114_vm3, %v3085_v56  ;;  %v2091_v18 = vpack.c.bf16 %v2069_v4, %v2068_v17  ;;  %v2566_v47 = vld [vmem:[%s7660_s18 + $0x117] sm:$0xff]  ;;  %v2567_v56 = vld [vmem:[%s7660_s18 + $0x11f] sm:$0xff]  ;;  %v2951_v4 = vpop.permute.xlu1 %2950 }
 0x289   : > { %v2322_v17 = vld [vmem:[%s7660_s18 + $0x136] sm:$0xff] }
 0x28a   : > { %v2798_v54 = vadd.f32 %v8499_v58, %v2758_v7  ;;  %v2071_v7 = vld [vmem:[%s7660_s18 + $0x11d] sm:$0xff] }
 0x28b   : > { %v2186_v32 = vpop.f32.mrf.mxu2  ;;  %v8633_v42 = vpop.f32.mrf.mxu3 }
 0x28c   : > { %v2263_v14 = vadd.f32 %v2186_v32, %v2015_v8  ;;  %v2834_v24 = vmax.f32 %v2798_v54, 0.0  ;;  %v1941_v5 = vpop.f32.mrf.mxu1  ;;  %v2685_v3 = vpop.f32.mrf.mxu0 }
 0x28d   : > { %v2016_v39 = vadd.f32 %v1941_v5, %v8120_v34  ;;  %v2070_v34 = vld [vmem:[%s7660_s18 + $0x115] sm:$0xff]  ;;  %v2342_v5 = vpack.c.bf16 %v2323_v0, %v2322_v17 }
 0x28e   : > { %v2511_v25 = vadd.f32 %v8580_v10, %v2263_v14  ;;  %v3086_v31 = vmul.f32 %v2941_v55, %v2834_v24  ;;  %v2588_v55 = vpack.c.bf16 %v2567_v56, %v2566_v47  ;;  %v2092_v24 = vpack.c.bf16 %v2071_v7, %v2070_v34  ;;  %v2325_v34 = vld [vmem:[%s7660_s18 + $0x14e] sm:$0xff] }
 0x28f   : > { %7002 = vmatmul.msk.bf16.gmra.mxu1 %vm736_vm2, %v2090_v61  ;;  %7059 = vmatmul.msk.bf16.gmra.mxu0 %vm736_vm2, %v2587_v21 }
 0x290   : > { %3123 = vst.msk [vmem:[#allocation2 + $0x64] sm:$0xff] %vm3114_vm3, %v3086_v31  ;;  %7021 = vmatmul.msk.bf16.gmra.mxu2 %vm736_vm2, %v2091_v18  ;;  %7042 = vmatmul.msk.bf16.gmra.mxu3 %vm736_vm2, %v2341_v22  ;;  %v2759_v15 = vadd.f32 %v2682_v37, %v2511_v25  ;;  %v2956_v31 = vpop.permute.xlu2 %2955 }
 0x292   : > { %v2799_v10 = vadd.f32 %v8499_v58, %v2759_v15 }
 0x293   : > { %v2189_v61 = vpop.f32.mrf.mxu2  ;;  %v8643_v60 = vpop.f32.mrf.mxu3 }
 0x294   : > { %v2264_v30 = vadd.f32 %v2189_v61, %v2016_v39  ;;  %v2835_v62 = vmax.f32 %v2799_v10, 0.0  ;;  %v1943_v12 = vpop.f32.mrf.mxu1  ;;  %v2687_v43 = vpop.f32.mrf.mxu0 }
 0x295   : > { %v2017_v57 = vadd.f32 %v1943_v12, %v8136_v53 }
 0x296   : > { %v2512_v36 = vadd.f32 %v8593_v19, %v2264_v30  ;;  %v3087_v16 = vmul.f32 %v2946_v46, %v2835_v62  ;;  %v7414_v19 = vld [vmem:[%s10483_s3 + $0x20] sm:$0xff] }
 0x297   : > { %3730 = vmatpush.bf16.msrb.mxu3 %v7414_v19  ;;  %v2961_v19 = vpop.permute.xlu0 %2960 }
 0x298   : > { %v2760_v37 = vadd.f32 %v2685_v3, %v2512_v36  ;;  %3124 = vst.msk [vmem:[#allocation2 + $0x6c] sm:$0xff] %vm3114_vm3, %v3087_v16  ;;  %v2569_v36 = vld [vmem:[%s7660_s18 + $0x12f] sm:$0xff] }
 0x299   : > { %v2073_v16 = vld [vmem:[%s7660_s18 + $0x12d] sm:$0xff] }
 0x29a   : > { %v2800_v27 = vadd.f32 %v8499_v58, %v2760_v37  ;;  %v2324_v37 = vld [vmem:[%s7660_s18 + $0x146] sm:$0xff] }
 0x29b   : > { %v2191_v52 = vpop.f32.mrf.mxu2  ;;  %v8655_v8 = vpop.f32.mrf.mxu3 }
 0x29c   : > { %v2265_v54 = vadd.f32 %v2191_v52, %v2017_v57  ;;  %v2836_v32 = vmax.f32 %v2800_v27, 0.0  ;;  %v1946_v21 = vpop.f32.mrf.mxu1  ;;  %v2690_v14 = vpop.f32.mrf.mxu0 }
 0x29d   : > { %v2018_v25 = vadd.f32 %v1946_v21, %v8145_v49  ;;  %v2072_v49 = vld [vmem:[%s7660_s18 + $0x125] sm:$0xff] }
 0x29e   : > { %v2513_v53 = vadd.f32 %v8608_v45, %v2265_v54  ;;  %v3088_v3 = vmul.f32 %v2951_v4, %v2836_v32  ;;  %v2093_v52 = vpack.c.bf16 %v2073_v16, %v2072_v49 }
 0x29f   : > { %7003 = vmatmul.msk.bf16.gmra.mxu1 %vm736_vm2, %v2091_v18  ;;  %7060 = vmatmul.msk.bf16.gmra.mxu0 %vm736_vm2, %v2588_v55  ;;  %v2343_v55 = vpack.c.bf16 %v2325_v34, %v2324_v37  ;;  %v7416_v37 = vld [vmem:[%s10483_s3 + $0x30] sm:$0xff] }
 0x2a0   : > { %3125 = vst.msk [vmem:[#allocation2 + $0x74] sm:$0xff] %vm3114_vm3, %v3088_v3  ;;  %7022 = vmatmul.msk.bf16.gmra.mxu2 %vm736_vm2, %v2092_v24  ;;  %7043 = vmatmul.msk.bf16.gmra.mxu3 %vm736_vm2, %v2342_v5  ;;  %v2761_v22 = vadd.f32 %v2687_v43, %v2513_v53  ;;  %v2568_v43 = vld [vmem:[%s7660_s18 + $0x127] sm:$0xff] }
 0x2a1   : > { %v2589_v0 = vpack.c.bf16 %v2569_v36, %v2568_v43  ;;  %3990 = vmatpush.bf16.msrb.mxu0 %v7416_v37 }
 0x2a2   : > { %v2801_v45 = vadd.f32 %v8499_v58, %v2761_v22 }
 0x2a3   : > { %v2194_v18 = vpop.f32.mrf.mxu2  ;;  %v8668_v15 = vpop.f32.mrf.mxu3 }
 0x2a4   : > { %v2266_v39 = vadd.f32 %v2194_v18, %v2018_v25  ;;  %v2837_v46 = vmax.f32 %v2801_v45, 0.0  ;;  %v1948_v10 = vpop.f32.mrf.mxu1  ;;  %v2692_v61 = vpop.f32.mrf.mxu0 }
 0x2a5   : > { %v2019_v56 = vadd.f32 %v1948_v10, %v8158_v6  ;;  %v2966_v25 = vpop.permute.xlu1 %2965  ;;  %v2075_v10 = vld [vmem:[%s7660_s18 + $0x13d] sm:$0xff] }
 0x2a6   : > { %v2514_v30 = vadd.f32 %v8621_v50, %v2266_v39  ;;  %v3089_v62 = vmul.f32 %v2956_v31, %v2837_v46  ;;  %v2074_v39 = vld [vmem:[%s7660_s18 + $0x135] sm:$0xff] }
 0x2a7   : > { %v2570_v46 = vld [vmem:[%s7660_s18 + $0x137] sm:$0xff] }
 0x2a8   : > { %v2762_v12 = vadd.f32 %v2690_v14, %v2514_v30  ;;  %3126 = vst.msk [vmem:[#allocation2 + $0x7c] sm:$0xff] %vm3114_vm3, %v3089_v62  ;;  %v3599_v30 = vld [vmem:[#allocation2 + $0x1b] sm:$0xff] }
 0x2aa   : > { %v2802_v47 = vadd.f32 %v8499_v58, %v2762_v12  ;;  %v2971_v12 = vpop.permute.xlu2 %2970 }
 0x2ab   : > { %v2196_v7 = vpop.f32.mrf.mxu2  ;;  %v8680_v17 = vpop.f32.mrf.mxu3 }
 0x2ac   : > { %v2838_v57 = vmax.f32 %v2802_v47, 0.0  ;;  %v2267_v50 = vadd.f32 %v2196_v7, %v2019_v56  ;;  %v1951_v4 = vpop.f32.mrf.mxu1  ;;  %v2695_v27 = vpop.f32.mrf.mxu0 }
 0x2ad   : > { %v2020_v21 = vadd.f32 %v1951_v4, %v8167_v59  ;;  %v2571_v59 = vld [vmem:[%s7660_s18 + $0x13f] sm:$0xff] }
 0x2ae   : > { %v3090_v54 = vmul.f32 %v2961_v19, %v2838_v57  ;;  %v2515_v32 = vadd.f32 %v8633_v42, %v2267_v50  ;;  %v2590_v16 = vpack.c.bf16 %v2571_v59, %v2570_v46  ;;  %v3601_v46 = vld [vmem:[#allocation2 + $0x2b] sm:$0xff] }
 0x2af   : > { %7004 = vmatmul.msk.bf16.gmra.mxu1 %vm736_vm2, %v2092_v24  ;;  %7061 = vmatmul.msk.bf16.gmra.mxu0 %vm736_vm2, %v2589_v0 }
 0x2b0   : > { %3127 = vst.msk [vmem:[#allocation2 + $0x84] sm:$0xff] %vm3114_vm3, %v3090_v54  ;;  %7023 = vmatmul.msk.bf16.gmra.mxu2 %vm736_vm2, %v2093_v52  ;;  %7044 = vmatmul.msk.bf16.gmra.mxu3 %vm736_vm2, %v2343_v55  ;;  %v2763_v6 = vadd.f32 %v2692_v61, %v2515_v32  ;;  %v3598_v61 = vld [vmem:[#allocation2 + $0x13] sm:$0xff] }
 0x2b1   : > { %v3634_v0 = vpack.c.bf16 %v3599_v30, %v3598_v61 }
 0x2b2   : > { %v2803_v14 = vadd.f32 %v8499_v58, %v2763_v6 }
 0x2b3   : > { %v2199_v42 = vpop.f32.mrf.mxu2  ;;  %v8690_v5 = vpop.f32.mrf.mxu3 }
 0x2b4   : > { %v2839_v24 = vmax.f32 %v2803_v14, 0.0  ;;  %v2268_v53 = vadd.f32 %v2199_v42, %v2020_v21  ;;  %v1953_v3 = vpop.f32.mrf.mxu1  ;;  %v2697_v22 = vpop.f32.mrf.mxu0 }
 0x2b5   : > { %v2021_v62 = vadd.f32 %v1953_v3, %v8183_v33  ;;  %v2094_v33 = vpack.c.bf16 %v2075_v10, %v2074_v39  ;;  %v2976_v21 = vpop.permute.xlu0 %2975  ;;  %v2573_v3 = vld [vmem:[%s7660_s18 + $0x14f] sm:$0xff] }
 0x2b6   : > { %v3091_v31 = vmul.f32 %v2966_v25, %v2839_v24  ;;  %v2516_v45 = vadd.f32 %v8643_v60, %v2268_v53  ;;  %v7410_v60 = vld [vmem:[%s10483_s3] sm:$0xff]  ;;  %v2077_v25 = vld [vmem:[%s7660_s18 + $0x14d] sm:$0xff] }
 0x2b7   : > { %3506 = vmatpush.bf16.msrb.mxu2 %v7410_v60  ;;  %v2572_v53 = vld [vmem:[%s7660_s18 + $0x147] sm:$0xff] }
 0x2b8   : > { %3128 = vst.msk [vmem:[#allocation2 + $0x8c] sm:$0xff] %vm3114_vm3, %v3091_v31  ;;  %v2764_v18 = vadd.f32 %v2695_v27, %v2516_v45 }
 0x2ba   : > { %v2804_v49 = vadd.f32 %v8499_v58, %v2764_v18 }
 0x2bb   : > { %v2201_v43 = vpop.f32.mrf.mxu2  ;;  %v8700_v36 = vpop.f32.mrf.mxu3 }
 0x2bc   : > { %v2269_v34 = vadd.f32 %v2201_v43, %v2021_v62  ;;  %v2840_v47 = vmax.f32 %v2804_v49, 0.0  ;;  %v1956_v56 = vpop.f32.mrf.mxu1  ;;  %v2700_v7 = vpop.f32.mrf.mxu0  ;;  %v3600_v49 = vld [vmem:[#allocation2 + $0x23] sm:$0xff] }
 0x2bd   : > { %v2022_v55 = vadd.f32 %v1956_v56, %v8193_v48  ;;  %v7419_v48 = vld [vmem:[%s10483_s3 + $0x48] sm:$0xff]  ;;  %v3635_v60 = vpack.c.bf16 %v3601_v46, %v3600_v49 }
 0x2be   : > { %v2517_v57 = vadd.f32 %v8655_v8, %v2269_v34  ;;  %v3092_v50 = vmul.f32 %v2971_v12, %v2840_v47  ;;  %4249 = vmatpush.bf16.msra.mxu1 %v7419_v48  ;;  %v2981_v12 = vpop.permute.xlu1 %2980 }
 0x2bf   : > { %7005 = vmatmul.msk.bf16.gmra.mxu1 %vm736_vm2, %v2093_v52  ;;  %7062 = vmatmul.msk.bf16.gmra.mxu0 %vm736_vm2, %v2590_v16 }
 0x2c0   : > { %v2765_v4 = vadd.f32 %v2697_v22, %v2517_v57  ;;  %3129 = vst.msk [vmem:[#allocation2 + $0x94] sm:$0xff] %vm3114_vm3, %v3092_v50  ;;  %7024 = vmatmul.msk.bf16.gmra.mxu2 %vm736_vm2, %v2094_v33  ;;  %7132 = vmatmul.msk.bf16.vlgmr.msrb.gmra.mxu3 %vm3114_vm3, %v3634_v0  ;;  %v2076_v22 = vld [vmem:[%s7660_s18 + $0x145] sm:$0xff]  ;;  %v2986_v57 = vpop.permute.xlu2 %2985 }
 0x2c1   : > { %v2095_v62 = vpack.c.bf16 %v2077_v25, %v2076_v22  ;;  %v2991_v22 = vpop.permute.xlu0 %2990  ;;  %v3602_v25 = vld [vmem:[#allocation2 + $0x33] sm:$0xff] }
 0x2c2   : > { %v2805_v27 = vadd.f32 %v8499_v58, %v2765_v4 }
 0x2c3   : > { %v2204_v8 = vpop.f32.mrf.mxu2  ;;  %v8716_v19 = vpop.f32.mrf.mxu3 }
 0x2c4   : > { %v2841_v52 = vmax.f32 %v2805_v27, 0.0  ;;  %v2270_v54 = vadd.f32 %v2204_v8, %v2022_v55  ;;  %v1958_v32 = vpop.f32.mrf.mxu1  ;;  %v2702_v6 = vpop.f32.mrf.mxu0  ;;  %v3209_v55 = vld [vmem:[#allocation2 + $0x12] sm:$0xff]  ;;  %v3210_v8 = vld [vmem:[#allocation2 + $0x1a] sm:$0xff] }
 0x2c5   : > { %v2023_v45 = vadd.f32 %v1958_v32, %v8206_v40 }
 0x2c6   : > { %v3093_v14 = vmul.f32 %v2976_v21, %v2841_v52  ;;  %v2518_v42 = vadd.f32 %v8668_v15, %v2270_v54  ;;  %v2591_v15 = vpack.c.bf16 %v2573_v3, %v2572_v53  ;;  %v3151_v52 = vld [vmem:[#allocation2 + $0x11] sm:$0xff]  ;;  %v3152_v54 = vld [vmem:[#allocation2 + $0x19] sm:$0xff] }
 0x2c7   : > { %v3187_v48 = vpack.c.bf16 %v3152_v54, %v3151_v52 }
 0x2c8   : > { %3130 = vst.msk [vmem:[#allocation2 + $0x9c] sm:$0xff] %vm3114_vm3, %v3093_v14  ;;  %v2766_v24 = vadd.f32 %v2700_v7, %v2518_v42  ;;  %v3245_v14 = vpack.c.bf16 %v3210_v8, %v3209_v55  ;;  %v3603_v42 = vld [vmem:[#allocation2 + $0x3b] sm:$0xff]  ;;  %v3604_v55 = vld [vmem:[#allocation2 + $0x43] sm:$0xff] }
 0x2ca   : > { %v2806_v31 = vadd.f32 %v8499_v58, %v2766_v24 }
 0x2cb   : > { %v2206_v18 = vpop.f32.mrf.mxu2  ;;  %v8729_v39 = vpop.f32.mrf.mxu3 }
 0x2cc   : > { %v2842_v59 = vmax.f32 %v2806_v31, 0.0  ;;  %v2271_v10 = vadd.f32 %v2206_v18, %v2023_v45  ;;  %v1961_v61 = vpop.f32.mrf.mxu1  ;;  %v2705_v30 = vpop.f32.mrf.mxu0  ;;  %v3636_v18 = vpack.c.bf16 %v3603_v42, %v3602_v25 }
 0x2cd   : > { %v2024_v34 = vadd.f32 %v1961_v61, %v8220_v44 }
 0x2ce   : > { %v3094_v43 = vmul.f32 %v2981_v12, %v2842_v59  ;;  %v2519_v16 = vadd.f32 %v8680_v17, %v2271_v10  ;;  %v2996_v12 = vpop.permute.xlu1 %2995 }
 0x2cf   : > { %7006 = vmatmul.msk.bf16.gmra.mxu1 %vm736_vm2, %v2094_v33  ;;  %7063 = vmatmul.msk.bf16.gmra.mxu0 %vm736_vm2, %v2591_v15 }
 0x2d0   : > { %3131 = vst.msk [vmem:[#allocation2 + $0xa4] sm:$0xff] %vm3114_vm3, %v3094_v43  ;;  %v2767_v40 = vadd.f32 %v2702_v6, %v2519_v16  ;;  %7025 = vmatmul.msk.bf16.gmra.mxu2 %vm736_vm2, %v2095_v62  ;;  %7133 = vmatmul.msk.bf16.gmra.mxu3 %vm3114_vm3, %v3635_v60 }
 0x2d2   : > { %v2807_v37 = vadd.f32 %v8499_v58, %v2767_v40 }
 0x2d3   : > { %v2209_v47 = vpop.f32.mrf.mxu2  ;;  %v8739_v56 = vpop.f32.mrf.mxu3 }
 0x2d4   : > { %v2843_v17 = vmax.f32 %v2807_v37, 0.0  ;;  %v2272_v7 = vadd.f32 %v2209_v47, %v2024_v34  ;;  %v1963_v0 = vpop.f32.mrf.mxu1  ;;  %v2707_v33 = vpop.f32.mrf.mxu0  ;;  %v3212_v37 = vld [vmem:[#allocation2 + $0x2a] sm:$0xff] }
 0x2d5   : > { %v2025_v32 = vadd.f32 %v1963_v0, %v8236_v26  ;;  %v3154_v47 = vld [vmem:[#allocation2 + $0x29] sm:$0xff] }
 0x2d6   : > { %v3095_v50 = vmul.f32 %v2986_v57, %v2843_v17  ;;  %v2520_v4 = vadd.f32 %v8690_v5, %v2272_v7  ;;  %v3605_v17 = vld [vmem:[#allocation2 + $0x4b] sm:$0xff] }
 0x2d8   : > { %3132 = vst.msk [vmem:[#allocation2 + $0xac] sm:$0xff] %vm3114_vm3, %v3095_v50  ;;  %v2768_v27 = vadd.f32 %v2705_v30, %v2520_v4  ;;  %v3211_v50 = vld [vmem:[#allocation2 + $0x22] sm:$0xff]  ;;  %v3001_v4 = vpop.permute.xlu2 %3000 }
 0x2da   : > { %v2808_v44 = vadd.f32 %v8499_v58, %v2768_v27  ;;  %v3153_v27 = vld [vmem:[#allocation2 + $0x21] sm:$0xff] }
 0x2db   : > { %v2211_v6 = vpop.f32.mrf.mxu2  ;;  %v8745_v21 = vpop.f32.mrf.mxu3  ;;  %v3188_v54 = vpack.c.bf16 %v3154_v47, %v3153_v27 }
 0x2dc   : > { %v2844_v24 = vmax.f32 %v2808_v44, 0.0  ;;  %v2273_v53 = vadd.f32 %v2211_v6, %v2025_v32  ;;  %v1966_v3 = vpop.f32.mrf.mxu1  ;;  %v2710_v5 = vpop.f32.mrf.mxu0 }
 0x2dd   : > { %v2026_v46 = vadd.f32 %v1966_v3, %v8248_v1 }
 0x2de   : > { %v3096_v31 = vmul.f32 %v2991_v22, %v2844_v24  ;;  %v2521_v45 = vadd.f32 %v8700_v36, %v2273_v53 }
 0x2df   : > { %7076 = vmatmul.msk.bf16.vlgmr.msrb.gmra.mxu1 %vm3114_vm3, %v3245_v14  ;;  %7162 = vmatmul.msk.bf16.vlgmr.msrb.gmra.mxu0 %vm3114_vm3, %v3635_v60 }
 0x2e0   : > { %3133 = vst.msk [vmem:[#allocation2 + $0xb4] sm:$0xff] %vm3114_vm3, %v3096_v31  ;;  %v2769_v26 = vadd.f32 %v2707_v33, %v2521_v45  ;;  %7102 = vmatmul.msk.bf16.vlgmr.msrb.gmra.mxu2 %vm3114_vm3, %v3187_v48  ;;  %7134 = vmatmul.msk.bf16.gmra.mxu3 %vm3114_vm3, %v3636_v18 }
 0x2e2   : > { %v2809_v15 = vadd.f32 %v8499_v58, %v2769_v26 }
 0x2e3   : > { %v2214_v59 = vpop.f32.mrf.mxu2  ;;  %v8755_v10 = vpop.f32.mrf.mxu3 }
 0x2e4   : > { %v2845_v36 = vmax.f32 %v2809_v15, 0.0  ;;  %v2274_v61 = vadd.f32 %v2214_v59, %v2026_v46  ;;  %v1968_v30 = vpop.f32.mrf.mxu1  ;;  %v2712_v62 = vpop.f32.mrf.mxu0  ;;  %v3156_v15 = vld [vmem:[#allocation2 + $0x39] sm:$0xff] }
 0x2e5   : > { %v2027_v40 = vadd.f32 %v1968_v30, %v8264_v41  ;;  %v3637_v41 = vpack.c.bf16 %v3605_v17, %v3604_v55  ;;  %v3607_v46 = vld [vmem:[#allocation2 + $0x5b] sm:$0xff] }
 0x2e6   : > { %v3097_v49 = vmul.f32 %v2996_v12, %v2845_v36  ;;  %v2522_v43 = vadd.f32 %v8716_v19, %v2274_v61  ;;  %v3246_v19 = vpack.c.bf16 %v3212_v37, %v3211_v50  ;;  %v3011_v12 = vpop.permute.xlu1 %3010  ;;  %v3016_v50 = vpop.permute.xlu2 %3015 }
 0x2e8   : > { %3134 = vst.msk [vmem:[#allocation2 + $0xbc] sm:$0xff] %vm3114_vm3, %v3097_v49  ;;  %v2770_v16 = vadd.f32 %v2710_v5, %v2522_v43  ;;  %v3006_v5 = vpop.permute.xlu0 %3005  ;;  %v3155_v49 = vld [vmem:[#allocation2 + $0x31] sm:$0xff] }
 0x2e9   : > { %v3606_v43 = vld [vmem:[#allocation2 + $0x53] sm:$0xff] }
 0x2ea   : > { %v2810_v60 = vadd.f32 %v8499_v58, %v2770_v16 }
 0x2eb   : > { %v2216_v1 = vpop.f32.mrf.mxu2  ;;  %v8761_v34 = vpop.f32.mrf.mxu3 }
 0x2ec   : > { %v2846_v7 = vmax.f32 %v2810_v60, 0.0  ;;  %v2275_v0 = vadd.f32 %v2216_v1, %v2027_v40  ;;  %v1971_v33 = vpop.f32.mrf.mxu1  ;;  %v2715_v57 = vpop.f32.mrf.mxu0  ;;  %v3189_v40 = vpack.c.bf16 %v3156_v15, %v3155_v49 }
 0x2ed   : > { %v2028_v6 = vadd.f32 %v1971_v33, %v8273_v35 }
 0x2ee   : > { %v3098_v8 = vmul.f32 %v3001_v4, %v2846_v7  ;;  %v2523_v52 = vadd.f32 %v8729_v39, %v2275_v0 }
 0x2ef   : > { %7077 = vmatmul.msk.bf16.gmra.mxu1 %vm3114_vm3, %v3246_v19  ;;  %7163 = vmatmul.msk.bf16.gmra.mxu0 %vm3114_vm3, %v3636_v18  ;;  %v3214_v18 = vld [vmem:[#allocation2 + $0x3a] sm:$0xff] }
 0x2f0   : > { %3135 = vst.msk [vmem:[#allocation2 + $0xc4] sm:$0xff] %vm3114_vm3, %v3098_v8  ;;  %v2771_v44 = vadd.f32 %v2712_v62, %v2523_v52  ;;  %7103 = vmatmul.msk.bf16.gmra.mxu2 %vm3114_vm3, %v3188_v54  ;;  %7135 = vmatmul.msk.bf16.gmra.mxu3 %vm3114_vm3, %v3637_v41  ;;  %v3213_v62 = vld [vmem:[#allocation2 + $0x32] sm:$0xff]  ;;  %v3216_v52 = vld [vmem:[#allocation2 + $0x4a] sm:$0xff] }
 0x2f2   : > { %v2811_v32 = vadd.f32 %v8499_v58, %v2771_v44  ;;  %v3609_v44 = vld [vmem:[#allocation2 + $0x6b] sm:$0xff] }
 0x2f3   : > { %v2219_v14 = vpop.f32.mrf.mxu2  ;;  %v8771_v42 = vpop.f32.mrf.mxu3 }
 0x2f4   : > { %v2847_v39 = vmax.f32 %v2811_v32, 0.0  ;;  %v2276_v24 = vadd.f32 %v2219_v14, %v2028_v6  ;;  %v1973_v53 = vpop.f32.mrf.mxu1  ;;  %v2717_v3 = vpop.f32.mrf.mxu0 }
 0x2f5   : > { %v2029_v45 = vadd.f32 %v1973_v53, %v8286_v13  ;;  %v3638_v13 = vpack.c.bf16 %v3607_v46, %v3606_v43  ;;  %v3021_v53 = vpop.permute.xlu0 %3020  ;;  %v3218_v43 = vld [vmem:[#allocation2 + $0x5a] sm:$0xff] }
 0x2f6   : > { %v3099_v48 = vmul.f32 %v3006_v5, %v2847_v39  ;;  %v2524_v22 = vadd.f32 %v8739_v56, %v2276_v24  ;;  %v3247_v56 = vpack.c.bf16 %v3214_v18, %v3213_v62  ;;  %v3215_v24 = vld [vmem:[#allocation2 + $0x42] sm:$0xff] }
 0x2f7   : > { %v3608_v5 = vld [vmem:[#allocation2 + $0x63] sm:$0xff] }
 0x2f8   : > { %3136 = vst.msk [vmem:[#allocation2 + $0xcc] sm:$0xff] %vm3114_vm3, %v3099_v48  ;;  %v2772_v25 = vadd.f32 %v2715_v57, %v2524_v22 }
 0x2fa   : > { %v2812_v31 = vadd.f32 %v8499_v58, %v2772_v25 }
 0x2fb   : > { %v2221_v35 = vpop.f32.mrf.mxu2  ;;  %v8777_v26 = vpop.f32.mrf.mxu3 }
 0x2fc   : > { %v2848_v59 = vmax.f32 %v2812_v31, 0.0  ;;  %v2277_v36 = vadd.f32 %v2221_v35, %v2029_v45  ;;  %v1976_v61 = vpop.f32.mrf.mxu1  ;;  %v2720_v30 = vpop.f32.mrf.mxu0  ;;  %v8804_v31 = vld [vmem:[%s10482_s2] ss:$0 sm:$0xff] }
 0x2fd   : > { %v2030_v47 = vadd.f32 %v1976_v61, %v8298_v38  ;;  %v3026_v61 = vpop.permute.xlu1 %3025 }
 0x2fe   : > { %v3100_v16 = vmul.f32 %v3011_v12, %v2848_v59  ;;  %v2525_v60 = vadd.f32 %v8745_v21, %v2277_v36 }
 0x2ff   : > { %7078 = vmatmul.msk.bf16.gmra.mxu1 %vm3114_vm3, %v3247_v56  ;;  %7164 = vmatmul.msk.bf16.gmra.mxu0 %vm3114_vm3, %v3637_v41  ;;  %v3158_v41 = vld [vmem:[#allocation2 + $0x49] sm:$0xff] }
 0x300   : > { %3137 = vst.msk [vmem:[#allocation2 + $0xd4] sm:$0xff] %vm3114_vm3, %v3100_v16  ;;  %v2773_v37 = vadd.f32 %v2717_v3, %v2525_v60  ;;  %7104 = vmatmul.msk.bf16.gmra.mxu2 %vm3114_vm3, %v3189_v40  ;;  %7136 = vmatmul.msk.bf16.gmra.mxu3 %vm3114_vm3, %v3638_v13  ;;  %v3157_v3 = vld [vmem:[#allocation2 + $0x41] sm:$0xff]  ;;  %v3160_v60 = vld [vmem:[#allocation2 + $0x59] sm:$0xff] }
 0x301   : > { %v3190_v22 = vpack.c.bf16 %v3158_v41, %v3157_v3  ;;  %v3611_v40 = vld [vmem:[#allocation2 + $0x7b] sm:$0xff] }
 0x302   : > { %v2813_v1 = vadd.f32 %v8499_v58, %v2773_v37 }
 0x303   : > { %v2224_v17 = vpop.f32.mrf.mxu2  ;;  %v8787_v7 = vpop.f32.mrf.mxu3 }
 0x304   : > { %v2849_v21 = vmax.f32 %v2813_v1, 0.0  ;;  %v2278_v0 = vadd.f32 %v2224_v17, %v2030_v47  ;;  %v1978_v33 = vpop.f32.mrf.mxu1  ;;  %v2722_v57 = vpop.f32.mrf.mxu0  ;;  %v3217_v17 = vld [vmem:[#allocation2 + $0x52] sm:$0xff] }
 0x305   : > { %v2031_v8 = vadd.f32 %v1978_v33, %v8317_v28  ;;  %v3639_v28 = vpack.c.bf16 %v3609_v44, %v3608_v5  ;;  %v3610_v33 = vld [vmem:[#allocation2 + $0x73] sm:$0xff]  ;;  %v3162_v5 = vld [vmem:[#allocation2 + $0x69] sm:$0xff] }
 0x306   : > { %v3101_v4 = vmul.f32 %v3016_v50, %v2849_v21  ;;  %v2526_v19 = vadd.f32 %v8755_v10, %v2278_v0  ;;  %v3248_v10 = vpack.c.bf16 %v3216_v52, %v3215_v24  ;;  %v3031_v21 = vpop.permute.xlu2 %3030  ;;  %v3159_v0 = vld [vmem:[#allocation2 + $0x51] sm:$0xff] }
 0x308   : > { %3138 = vst.msk [vmem:[#allocation2 + $0xdc] sm:$0xff] %vm3114_vm3, %v3101_v4  ;;  %v2774_v27 = vadd.f32 %v2720_v30, %v2526_v19  ;;  %v3191_v4 = vpack.c.bf16 %v3160_v60, %v3159_v0  ;;  %v3615_v0 = vld [vmem:[#allocation2 + $0x9b] sm:$0xff] }
 0x30a   : > { %v2814_v55 = vadd.f32 %v8499_v58, %v2774_v27 }
 0x30b   : > { %v2226_v38 = vpop.f32.mrf.mxu2  ;;  %v8793_v54 = vpop.f32.mrf.mxu3 }
 0x30c   : > { %v2850_v32 = vmax.f32 %v2814_v55, 0.0  ;;  %v2279_v6 = vadd.f32 %v2226_v38, %v2031_v8  ;;  %v1981_v14 = vpop.f32.mrf.mxu1  ;;  %v2725_v39 = vpop.f32.mrf.mxu0 }
 0x30d   : > { %v2032_v45 = vadd.f32 %v1981_v14, %v8329_v20 }
 0x30e   : > { %v3102_v48 = vmul.f32 %v3021_v53, %v2850_v32  ;;  %v2527_v58 = vadd.f32 %v8761_v34, %v2279_v6  ;;  %v3036_v32 = vpop.permute.xlu0 %3035  ;;  %v3046_v60 = vpop.permute.xlu2 %3045 }
 0x30f   : > { %7079 = vmatmul.msk.bf16.gmra.mxu1 %vm3114_vm3, %v3248_v10  ;;  %7165 = vmatmul.msk.bf16.gmra.mxu0 %vm3114_vm3, %v3638_v13  ;;  %v3220_v10 = vld [vmem:[#allocation2 + $0x6a] sm:$0xff] }
 0x310   : > { %3139 = vst.msk [vmem:[#allocation2 + $0xe4] sm:$0xff] %vm3114_vm3, %v3102_v48  ;;  %v2775_v25 = vadd.f32 %v2722_v57, %v2527_v58  ;;  %7105 = vmatmul.msk.bf16.gmra.mxu2 %vm3114_vm3, %v3190_v22  ;;  %7137 = vmatmul.msk.bf16.gmra.mxu3 %vm3114_vm3, %v3639_v28  ;;  %v3613_v48 = vld [vmem:[#allocation2 + $0x8b] sm:$0xff] }
 0x312   : > { %v2815_v34 = vadd.f32 %v8804_v31, %v2775_v25 }
 0x313   : > { %v2229_v18 = vpop.f32.mrf.mxu2  ;;  %v8808_v35 = vpop.f32.mrf.mxu3 }
 0x314   : > { %v2851_v15 = vmax.f32 %v2815_v34, 0.0  ;;  %v2280_v46 = vadd.f32 %v2229_v18, %v2032_v45  ;;  %v1983_v59 = vpop.f32.mrf.mxu1  ;;  %v2727_v36 = vpop.f32.mrf.mxu0  ;;  %v3219_v34 = vld [vmem:[#allocation2 + $0x62] sm:$0xff] }
 0x315   : > { %v2033_v49 = vadd.f32 %v1983_v59, %v8345_v23  ;;  %v3640_v23 = vpack.c.bf16 %v3611_v40, %v3610_v33  ;;  %v3041_v45 = vpop.permute.xlu1 %3040  ;;  %v3161_v18 = vld [vmem:[#allocation2 + $0x61] sm:$0xff] }
 0x316   : > { %v3103_v30 = vmul.f32 %v3026_v61, %v2851_v15  ;;  %v2528_v62 = vadd.f32 %v8771_v42, %v2280_v46  ;;  %v3249_v42 = vpack.c.bf16 %v3218_v43, %v3217_v17  ;;  %v3612_v15 = vld [vmem:[#allocation2 + $0x83] sm:$0xff]  ;;  %v3222_v17 = vld [vmem:[#allocation2 + $0x7a] sm:$0xff] }
 0x318   : > { %3140 = vst.msk [vmem:[#allocation2 + $0xec] sm:$0xff] %vm3114_vm3, %v3103_v30  ;;  %v2776_v12 = vadd.f32 %v2725_v39, %v2528_v62 }
 0x31a   : > { %v2816_v56 = vadd.f32 %v8804_v31, %v2776_v12 }
 0x31b   : > { %v2231_v20 = vpop.f32.mrf.mxu2  ;;  %v8814_v16 = vpop.f32.mrf.mxu3 }
 0x31c   : > { %v2852_v13 = vmax.f32 %v2816_v56, 0.0  ;;  %v2281_v37 = vadd.f32 %v2231_v20, %v2033_v49  ;;  %v1986_v1 = vpop.f32.mrf.mxu1  ;;  %v2730_v47 = vpop.f32.mrf.mxu0 }
 0x31d   : > { %v2034_v55 = vadd.f32 %v1986_v1, %v8357_v63 }
 0x31e   : > { %v3104_v57 = vmul.f32 %v3031_v21, %v2852_v13  ;;  %v2529_v50 = vadd.f32 %v8777_v26, %v2281_v37 }
 0x31f   : > { %7080 = vmatmul.msk.bf16.gmra.mxu1 %vm3114_vm3, %v3249_v42  ;;  %7166 = vmatmul.msk.bf16.gmra.mxu0 %vm3114_vm3, %v3639_v28  ;;  %v3164_v42 = vld [vmem:[#allocation2 + $0x79] sm:$0xff] }
 0x320   : > { %3141 = vst.msk [vmem:[#allocation2 + $0xf4] sm:$0xff] %vm3114_vm3, %v3104_v57  ;;  %v2777_v19 = vadd.f32 %v2727_v36, %v2529_v50  ;;  %7106 = vmatmul.msk.bf16.gmra.mxu2 %vm3114_vm3, %v3191_v4  ;;  %7138 = vmatmul.msk.bf16.gmra.mxu3 %vm3114_vm3, %v3640_v23  ;;  %v3192_v36 = vpack.c.bf16 %v3162_v5, %v3161_v18 }
 0x322   : > { %v2817_v27 = vadd.f32 %v8804_v31, %v2777_v19  ;;  %v3051_v19 = vpop.permute.xlu0 %3050 }
 0x323   : > { %v2234_v8 = vpop.f32.mrf.mxu2  ;;  %v8824_v52 = vpop.f32.mrf.mxu3 }
 0x324   : > { %v2853_v26 = vmax.f32 %v2817_v27, 0.0  ;;  %v2282_v38 = vadd.f32 %v2234_v8, %v2034_v55  ;;  %v1988_v41 = vpop.f32.mrf.mxu1  ;;  %v2732_v44 = vpop.f32.mrf.mxu0  ;;  %v3163_v27 = vld [vmem:[#allocation2 + $0x71] sm:$0xff] }
 0x325   : > { %v2035_v53 = vadd.f32 %v1988_v41, %v8376_v2  ;;  %v3641_v2 = vpack.c.bf16 %v3613_v48, %v3612_v15  ;;  %v3614_v55 = vld [vmem:[#allocation2 + $0x93] sm:$0xff] }
 0x326   : > { %v3105_v6 = vmul.f32 %v3036_v32, %v2853_v26  ;;  %v2530_v14 = vadd.f32 %v8787_v7, %v2282_v38  ;;  %v3250_v7 = vpack.c.bf16 %v3220_v10, %v3219_v34  ;;  %v3193_v38 = vpack.c.bf16 %v3164_v42, %v3163_v27  ;;  %v3056_v10 = vpop.permute.xlu1 %3055  ;;  %v3166_v34 = vld [vmem:[#allocation2 + $0x89] sm:$0xff] }
 0x328   : > { %3142 = vst.msk [vmem:[#allocation2 + $0xfc] sm:$0xff] %vm3114_vm3, %v3105_v6  ;;  %v2778_v39 = vadd.f32 %v2730_v47, %v2530_v14 }
 0x32a   : > { %v2818_v24 = vadd.f32 %v8804_v31, %v2778_v39 }
 0x32b   : > { %v2236_v63 = vpop.f32.mrf.mxu2  ;;  %v8830_v3 = vpop.f32.mrf.mxu3 }
 0x32c   : > { %v2854_v58 = vmax.f32 %v2818_v24, 0.0  ;;  %v2283_v22 = vadd.f32 %v2236_v63, %v2035_v53  ;;  %v1991_v28 = vpop.f32.mrf.mxu1  ;;  %v2735_v25 = vpop.f32.mrf.mxu0 }
 0x32d   : > { %v2036_v62 = vadd.f32 %v1991_v28, %v8388_v11  ;;  %v3224_v28 = vld [vmem:[#allocation2 + $0x8a] sm:$0xff] }
 0x32e   : > { %v3106_v46 = vmul.f32 %v3041_v45, %v2854_v58  ;;  %v2531_v59 = vadd.f32 %v8793_v54, %v2283_v22  ;;  %v3617_v45 = vld [vmem:[#allocation2 + $0xab] sm:$0xff] }
 0x32f   : > { %7081 = vmatmul.msk.bf16.gmra.mxu1 %vm3114_vm3, %v3250_v7  ;;  %7167 = vmatmul.msk.bf16.gmra.mxu0 %vm3114_vm3, %v3640_v23  ;;  %v3221_v23 = vld [vmem:[#allocation2 + $0x72] sm:$0xff] }
 0x330   : > { %3143 = vst.msk [vmem:[#allocation2 + $0x104] sm:$0xff] %vm3114_vm3, %v3106_v46  ;;  %v2779_v61 = vadd.f32 %v2732_v44, %v2531_v59  ;;  %7107 = vmatmul.msk.bf16.gmra.mxu2 %vm3114_vm3, %v3192_v36  ;;  %7139 = vmatmul.msk.bf16.gmra.mxu3 %vm3114_vm3, %v3641_v2  ;;  %v3223_v59 = vld [vmem:[#allocation2 + $0x82] sm:$0xff]  ;;  %v3061_v36 = vpop.permute.xlu2 %3060 }
 0x332   : > { %v2819_v30 = vadd.f32 %v8804_v31, %v2779_v61  ;;  %v3616_v61 = vld [vmem:[#allocation2 + $0xa3] sm:$0xff] }
 0x333   : > { %v2239_v12 = vpop.f32.mrf.mxu2  ;;  %v8840_v56 = vpop.f32.mrf.mxu3 }
 0x334   : > { %v2855_v54 = vmax.f32 %v2819_v30, 0.0  ;;  %v2284_v49 = vadd.f32 %v2239_v12, %v2036_v62  ;;  %v1993_v43 = vpop.f32.mrf.mxu1  ;;  %v2737_v20 = vpop.f32.mrf.mxu0 }
 0x335   : > { %v2037_v47 = vadd.f32 %v1993_v43, %v8407_v9  ;;  %v3642_v9 = vpack.c.bf16 %v3615_v0, %v3614_v55  ;;  %v3168_v55 = vld [vmem:[#allocation2 + $0x99] sm:$0xff] }
 0x336   : > { %v3107_v40 = vmul.f32 %v3046_v60, %v2855_v54  ;;  %v2532_v13 = vadd.f32 %v8808_v35, %v2284_v49  ;;  %v3251_v35 = vpack.c.bf16 %v3222_v17, %v3221_v23  ;;  %v7425_v54 = vld [vmem:[%s10483_s3 + $0x78] sm:$0xff] }
 0x337   : > { %5029 = vmatpush.bf16.msra.mxu0 %v7425_v54 }
 0x338   : > { %3144 = vst.msk [vmem:[#allocation2 + $0x10c] sm:$0xff] %vm3114_vm3, %v3107_v40  ;;  %v2780_v37 = vadd.f32 %v2735_v25, %v2532_v13 }
 0x33a   : > { %v2820_v1 = vadd.f32 %v8804_v31, %v2780_v37 }
 0x33b   : > { %v2241_v11 = vpop.f32.mrf.mxu2  ;;  %v8846_v21 = vpop.f32.mrf.mxu3 }
 0x33c   : > { %v2856_v33 = vmax.f32 %v2820_v1, 0.0  ;;  %v2285_v57 = vadd.f32 %v2241_v11, %v2037_v47  ;;  %v1996_v50 = vpop.f32.mrf.mxu1  ;;  %v2740_v4 = vpop.f32.mrf.mxu0 }
 0x33d   : > { %v2038_v32 = vadd.f32 %v1996_v50, %v8425_v51  ;;  %v3066_v11 = vpop.permute.xlu0 %3065 }
 0x33e   : > { %v3108_v8 = vmul.f32 %v3051_v19, %v2856_v33  ;;  %v2533_v26 = vadd.f32 %v8814_v16, %v2285_v57  ;;  %v7423_v33 = vld [vmem:[%s10483_s3 + $0x68] sm:$0xff]  ;;  %v3226_v19 = vld [vmem:[#allocation2 + $0x9a] sm:$0xff] }
 0x33f   : > { %7082 = vmatmul.msk.bf16.gmra.mxu1 %vm3114_vm3, %v3251_v35  ;;  %7168 = vmatmul.msk.bf16.gmra.mxu0 %vm3114_vm3, %v3641_v2  ;;  %v3165_v2 = vld [vmem:[#allocation2 + $0x81] sm:$0xff] }
 0x340   : > { %3145 = vst.msk [vmem:[#allocation2 + $0x114] sm:$0xff] %vm3114_vm3, %v3108_v8  ;;  %v2781_v41 = vadd.f32 %v2737_v20, %v2533_v26  ;;  %7108 = vmatmul.msk.bf16.gmra.mxu2 %vm3114_vm3, %v3193_v38  ;;  %7140 = vmatmul.msk.bf16.gmra.mxu3 %vm3114_vm3, %v3642_v9  ;;  %v3194_v12 = vpack.c.bf16 %v3166_v34, %v3165_v2  ;;  %v10511_v20 = vld [vmem:[#allocation4_spill] sm:$0xff]  ;;  %v3619_v8 = vld [vmem:[#allocation2 + $0xbb] sm:$0xff]  ;;  %v3076_v34 = vpop.permute.xlu2 %3075 }
 0x341   : > { %4769 = vmatpush.bf16.msra.mxu3 %v7423_v33  ;;  %v3623_v33 = vld [vmem:[#allocation2 + $0xdb] sm:$0xff] }
 0x342   : > { %v2821_v44 = vadd.f32 %v8804_v31, %v2781_v41  ;;  %v3225_v41 = vld [vmem:[#allocation2 + $0x92] sm:$0xff] }
 0x343   : > { %v2244_v6 = vpop.f32.mrf.mxu2  ;;  %v8856_v14 = vpop.f32.mrf.mxu3 }
 0x344   : > { %v2857_v16 = vmax.f32 %v2821_v44, 0.0  ;;  %v2286_v39 = vadd.f32 %v2244_v6, %v2038_v32  ;;  %v1998_v24 = vpop.f32.mrf.mxu1  ;;  %v2742_v53 = vpop.f32.mrf.mxu0  ;;  %v3253_v32 = vpack.c.bf16 %v3226_v19, %v3225_v41  ;;  %v3167_v6 = vld [vmem:[#allocation2 + $0x91] sm:$0xff] }
 0x345   : > { %v2039_v22 = vadd.f32 %v1998_v24, %v8447_v29  ;;  %v3643_v29 = vpack.c.bf16 %v3617_v45, %v3616_v61  ;;  %v3071_v44 = vpop.permute.xlu1 %3070 }
 0x346   : > { %v3109_v63 = vmul.f32 %v3056_v10, %v2857_v16  ;;  %v2534_v5 = vadd.f32 %v8824_v52, %v2286_v39  ;;  %v3252_v52 = vpack.c.bf16 %v3224_v28, %v3223_v59  ;;  %v3618_v16 = vld [vmem:[#allocation2 + $0xb3] sm:$0xff] }
 0x347   : > { %v3644_v10 = vpack.c.bf16 %v3619_v8, %v3618_v16  ;;  %v3232_v16 = vld [vmem:[#allocation2 + $0xca] sm:$0xff] }
 0x348   : > { %3146 = vst.msk [vmem:[#allocation2 + $0x11c] sm:$0xff] %vm3114_vm3, %v3109_v63  ;;  %v2782_v48 = vadd.f32 %v2740_v4, %v2534_v5  ;;  %v10512_v4 = vld [vmem:[#allocation5_spill] sm:$0xff] }
 0x34a   : > { %v2822_v58 = vadd.f32 %v8804_v31, %v2782_v48 }
 0x34b   : > { %v2246_v51 = vpop.f32.mrf.mxu2  ;;  %v8862_v25 = vpop.f32.mrf.mxu3 }
 0x34c   : > { %v2858_v7 = vmax.f32 %v2822_v58, 0.0  ;;  %v2287_v18 = vadd.f32 %v2246_v51, %v2039_v22  ;;  %v2001_v15 = vpop.f32.mrf.mxu1  ;;  %v2745_v46 = vpop.f32.mrf.mxu0 }
 0x34d   : > { %v2040_v60 = vadd.f32 %v2001_v15, %v10511_v20 }
 0x34e   : > { %v3110_v30 = vmul.f32 %v3061_v36, %v2858_v7  ;;  %v2535_v62 = vadd.f32 %v8830_v3, %v2287_v18  ;;  %v7418_v3 = vld [vmem:[%s10483_s3 + $0x40] sm:$0xff]  ;;  %v7421_v18 = vld [vmem:[%s10483_s3 + $0x58] sm:$0xff]  ;;  %v3170_v36 = vld [vmem:[#allocation2 + $0xa9] sm:$0xff] }
 0x34f   : > { %7083 = vmatmul.msk.bf16.gmra.mxu1 %vm3114_vm3, %v3252_v52  ;;  %7169 = vmatmul.msk.bf16.gmra.mxu0 %vm3114_vm3, %v3642_v9  ;;  %v3621_v52 = vld [vmem:[#allocation2 + $0xcb] sm:$0xff] }
 0x350   : > { %3147 = vst.msk [vmem:[#allocation2 + $0x124] sm:$0xff] %vm3114_vm3, %v3110_v30  ;;  %v2783_v49 = vadd.f32 %v2742_v53, %v2535_v62  ;;  %7109 = vmatmul.msk.bf16.gmra.mxu2 %vm3114_vm3, %v3194_v12  ;;  %7141 = vmatmul.msk.bf16.gmra.mxu3 %vm3114_vm3, %v3643_v29  ;;  %v3195_v53 = vpack.c.bf16 %v3168_v55, %v3167_v6  ;;  %v3227_v62 = vld [vmem:[#allocation2 + $0xa2] sm:$0xff]  ;;  %v3622_v55 = vld [vmem:[#allocation2 + $0xd3] sm:$0xff] }
 0x351   : > { %4250 = vmatpush.bf16.msra.mxu1 %v7418_v3  ;;  %4509 = vmatpush.bf16.msra.mxu2 %v7421_v18  ;;  %v3169_v12 = vld [vmem:[#allocation2 + $0xa1] sm:$0xff] }
 0x352   : > { %v2823_v43 = vadd.f32 %v8804_v31, %v2783_v49  ;;  %v3196_v49 = vpack.c.bf16 %v3170_v36, %v3169_v12  ;;  %v3627_v12 = vld [vmem:[#allocation2 + $0xfb] sm:$0xff] }
 0x353   : > { %v2249_v40 = vpop.f32.mrf.mxu2  ;;  %v8878_v13 = vpop.f32.mrf.mxu3 }
 0x354   : > { %v2859_v37 = vmax.f32 %v2823_v43, 0.0  ;;  %v2288_v1 = vadd.f32 %v2249_v40, %v2040_v60  ;;  %v2003_v47 = vpop.f32.mrf.mxu1  ;;  %v2747_v17 = vpop.f32.mrf.mxu0 }
 0x355   : > { %v2041_v23 = vadd.f32 %v2003_v47, %v10512_v4 }
 0x356   : > { %v3111_v42 = vmul.f32 %v3066_v11, %v2859_v37  ;;  %v2536_v0 = vadd.f32 %v8840_v56, %v2288_v1 }
 0x358   : > { %3148 = vst.msk [vmem:[#allocation2 + $0x12c] sm:$0xff] %vm3114_vm3, %v3111_v42  ;;  %v2784_v57 = vadd.f32 %v2745_v46, %v2536_v0  ;;  %v3172_v0 = vld [vmem:[#allocation2 + $0xb9] sm:$0xff] }
 0x35a   : > { %v2824_v50 = vadd.f32 %v8804_v31, %v2784_v57 }
 0x35b   : > { %v2251_v35 = vpop.f32.mrf.mxu2  ;;  %v8887_v27 = vpop.f32.mrf.mxu3 }
 0x35c   : > { %v2860_v26 = vmax.f32 %v2824_v50, 0.0  ;;  %v2289_v56 = vadd.f32 %v2251_v35, %v2041_v23  ;;  %v3343_v38 = vpop.f32.mrf.mxu1  ;;  %v3992_v9 = vpop.f32.mrf.mxu0  ;;  %v3229_v23 = vld [vmem:[#allocation2 + $0xb2] sm:$0xff] }
 0x35d   : > { %v3171_v35 = vld [vmem:[#allocation2 + $0xb1] sm:$0xff] }
 0x35e   : > { %v3112_v39 = vmul.f32 %v3071_v44, %v2860_v26  ;;  %v2537_v24 = vadd.f32 %v8846_v21, %v2289_v56  ;;  %v3197_v26 = vpack.c.bf16 %v3172_v0, %v3171_v35  ;;  %v3646_v56 = vpack.c.bf16 %v3623_v33, %v3622_v55  ;;  %v3178_v55 = vld [vmem:[#allocation2 + $0xe9] sm:$0xff] }
 0x35f   : > { %7084 = vmatmul.msk.bf16.gmra.mxu1 %vm3114_vm3, %v3253_v32  ;;  %7170 = vmatmul.msk.bf16.gmra.mxu0 %vm3114_vm3, %v3643_v29  ;;  %v3620_v29 = vld [vmem:[#allocation2 + $0xc3] sm:$0xff] }
 0x360   : > { %3149 = vst.msk [vmem:[#allocation2 + $0x134] sm:$0xff] %vm3114_vm3, %v3112_v39  ;;  %v2785_v63 = vadd.f32 %v2747_v17, %v2537_v24  ;;  %7110 = vmatmul.msk.bf16.gmra.mxu2 %vm3114_vm3, %v3195_v53  ;;  %7142 = vmatmul.msk.bf16.gmra.mxu3 %vm3114_vm3, %v3644_v10  ;;  %v3645_v3 = vpack.c.bf16 %v3621_v52, %v3620_v29  ;;  %v3230_v17 = vld [vmem:[#allocation2 + $0xba] sm:$0xff]  ;;  %v3174_v53 = vld [vmem:[#allocation2 + $0xc9] sm:$0xff] }
 0x361   : > { %v3255_v19 = vpack.c.bf16 %v3230_v17, %v3229_v23 }
 0x362   : > { %v2825_v5 = vadd.f32 %v8804_v31, %v2785_v63  ;;  %v3228_v31 = vld [vmem:[#allocation2 + $0xaa] sm:$0xff] }
 0x363   : > { %v3508_v48 = vpop.f32.mrf.mxu2  ;;  %v8896_v58 = vpop.f32.mrf.mxu3 }
 0x364   : > { %v2861_v22 = vmax.f32 %v2825_v5, 0.0  ;;  %v3509_v21 = vadd.f32 %v3508_v48, %v3343_v38  ;;  %v3345_v28 = vpop.f32.mrf.mxu1  ;;  %v3994_v51 = vpop.f32.mrf.mxu0 }
 0x366   : > { %v3113_v45 = vmul.f32 %v3076_v34, %v2861_v22  ;;  %v3822_v7 = vadd.f32 %v8856_v14, %v3509_v21  ;;  %v3254_v14 = vpack.c.bf16 %v3228_v31, %v3227_v62  ;;  %v3231_v22 = vld [vmem:[#allocation2 + $0xc2] sm:$0xff] }
 0x367   : > { %v3256_v21 = vpack.c.bf16 %v3232_v16, %v3231_v22 }
 0x368   : > { %3150 = vst.msk [vmem:[#allocation2 + $0x13c] sm:$0xff] %vm3114_vm3, %v3113_v45  ;;  %v8903_v15 = vadd.f32 %v3992_v9, %v3822_v7 }
 0x36b   : > { %v3510_v46 = vpop.f32.mrf.mxu2  ;;  %v8905_v59 = vpop.f32.mrf.mxu3 }
 0x36c   : > { %v3511_v2 = vadd.f32 %v3510_v46, %v3345_v28  ;;  %v3348_v61 = vpop.f32.mrf.mxu1  ;;  %v3997_v30 = vpop.f32.mrf.mxu0  ;;  %v3173_v28 = vld [vmem:[#allocation2 + $0xc1] sm:$0xff] }
 0x36d   : > { %v3198_v45 = vpack.c.bf16 %v3174_v53, %v3173_v28 }
 0x36e   : > { %v3823_v54 = vadd.f32 %v8862_v25, %v3511_v2 }
 0x36f   : > { %7085 = vmatmul.msk.bf16.gmra.mxu1 %vm3114_vm3, %v3254_v14  ;;  %7171 = vmatmul.msk.bf16.gmra.mxu0 %vm3114_vm3, %v3644_v10  ;;  %v3625_v10 = vld [vmem:[#allocation2 + $0xeb] sm:$0xff]  ;;  %v3176_v14 = vld [vmem:[#allocation2 + $0xd9] sm:$0xff] }
 0x370   : > { %7111 = vmatmul.msk.bf16.gmra.mxu2 %vm3114_vm3, %v3196_v49  ;;  %7143 = vmatmul.msk.bf16.gmra.mxu3 %vm3114_vm3, %v3645_v3  ;;  %v8912_v43 = vadd.f32 %v3994_v51, %v3823_v54  ;;  %v3624_v51 = vld [vmem:[#allocation2 + $0xe3] sm:$0xff] }
 0x371   : > { %v3647_v7 = vpack.c.bf16 %v3625_v10, %v3624_v51 }
 0x373   : > { %v3513_v20 = vpop.f32.mrf.mxu2  ;;  %v3747_v60 = vpop.f32.mrf.mxu3 }
 0x374   : > { %v3514_v40 = vadd.f32 %v3513_v20, %v3348_v61  ;;  %v3350_v37 = vpop.f32.mrf.mxu1  ;;  %v3999_v1 = vpop.f32.mrf.mxu0 }
 0x376   : > { %v3824_v47 = vadd.f32 %v8878_v13, %v3514_v40  ;;  %v3175_v40 = vld [vmem:[#allocation2 + $0xd1] sm:$0xff] }
 0x378   : > { %v8915_v25 = vadd.f32 %v3997_v30, %v3824_v47  ;;  %v3199_v47 = vpack.c.bf16 %v3176_v14, %v3175_v40  ;;  %v3630_v14 = vld [vmem:[#allocation2 + $0x113] sm:$0xff] }
 0x37b   : > { %v3515_v11 = vpop.f32.mrf.mxu2  ;;  %v8917_v42 = vpop.f32.mrf.mxu3 }
 0x37c   : > { %v3516_v57 = vadd.f32 %v3515_v11, %v3350_v37  ;;  %v3353_v50 = vpop.f32.mrf.mxu1  ;;  %v4002_v4 = vpop.f32.mrf.mxu0  ;;  %v3626_v37 = vld [vmem:[#allocation2 + $0xf3] sm:$0xff] }
 0x37d   : > { %v3648_v17 = vpack.c.bf16 %v3627_v12, %v3626_v37 }
 0x37e   : > { %v3825_v8 = vadd.f32 %v8887_v27, %v3516_v57 }
 0x37f   : > { %7086 = vmatmul.msk.bf16.gmra.mxu1 %vm3114_vm3, %v3255_v19  ;;  %7172 = vmatmul.msk.bf16.gmra.mxu0 %vm3114_vm3, %v3645_v3  ;;  %v3233_v3 = vld [vmem:[#allocation2 + $0xd2] sm:$0xff] }
 0x380   : > { %7112 = vmatmul.msk.bf16.gmra.mxu2 %vm3114_vm3, %v3197_v26  ;;  %7144 = vmatmul.msk.bf16.gmra.mxu3 %vm3114_vm3, %v3646_v56  ;;  %v8924_v13 = vadd.f32 %v3999_v1, %v3825_v8  ;;  %v3629_v8 = vld [vmem:[#allocation2 + $0x10b] sm:$0xff] }
 0x383   : > { %v3518_v38 = vpop.f32.mrf.mxu2  ;;  %v3752_v9 = vpop.f32.mrf.mxu3 }
 0x384   : > { %v3519_v41 = vadd.f32 %v3518_v38, %v3353_v50  ;;  %v3355_v44 = vpop.f32.mrf.mxu1  ;;  %v4004_v32 = vpop.f32.mrf.mxu0 }
 0x386   : > { %v3826_v6 = vadd.f32 %v8896_v58, %v3519_v41  ;;  %v3235_v41 = vld [vmem:[#allocation2 + $0xe2] sm:$0xff] }
 0x388   : > { %v8927_v27 = vadd.f32 %v4002_v4, %v3826_v6  ;;  %v3628_v6 = vld [vmem:[#allocation2 + $0x103] sm:$0xff] }
 0x389   : > { %v3649_v53 = vpack.c.bf16 %v3629_v8, %v3628_v6  ;;  %v3181_v8 = vld [vmem:[#allocation2 + $0x101] sm:$0xff] }
 0x38b   : > { %v3520_v39 = vpop.f32.mrf.mxu2  ;;  %v8929_v24 = vpop.f32.mrf.mxu3 }
 0x38c   : > { %v3521_v63 = vadd.f32 %v3520_v39, %v3355_v44  ;;  %v3358_v5 = vpop.f32.mrf.mxu1  ;;  %v4007_v48 = vpop.f32.mrf.mxu0 }
 0x38e   : > { %v3827_v34 = vadd.f32 %v8905_v59, %v3521_v63  ;;  %v3234_v59 = vld [vmem:[#allocation2 + $0xda] sm:$0xff] }
 0x38f   : > { %7087 = vmatmul.msk.bf16.gmra.mxu1 %vm3114_vm3, %v3256_v21  ;;  %7173 = vmatmul.msk.bf16.gmra.mxu0 %vm3114_vm3, %v3646_v56  ;;  %v3257_v20 = vpack.c.bf16 %v3234_v59, %v3233_v3 }
 0x390   : > { %7113 = vmatmul.msk.bf16.gmra.mxu2 %vm3114_vm3, %v3198_v45  ;;  %7145 = vmatmul.msk.bf16.gmra.mxu3 %vm3114_vm3, %v3647_v7  ;;  %v8936_v58 = vadd.f32 %v4004_v32, %v3827_v34  ;;  %v3177_v32 = vld [vmem:[#allocation2 + $0xe1] sm:$0xff]  ;;  %v3180_v45 = vld [vmem:[#allocation2 + $0xf9] sm:$0xff] }
 0x391   : > { %v3200_v39 = vpack.c.bf16 %v3178_v55, %v3177_v32 }
 0x393   : > { %v3523_v18 = vpop.f32.mrf.mxu2  ;;  %v3757_v31 = vpop.f32.mrf.mxu3 }
 0x394   : > { %v3524_v46 = vadd.f32 %v3523_v18, %v3358_v5  ;;  %v3360_v36 = vpop.f32.mrf.mxu1  ;;  %v4009_v52 = vpop.f32.mrf.mxu0 }
 0x396   : > { %v3828_v2 = vadd.f32 %v3747_v60, %v3524_v46 }
 0x398   : > { %v8938_v61 = vadd.f32 %v4007_v48, %v3828_v2  ;;  %v7422_v2 = vld [vmem:[%s10483_s3 + $0x60] sm:$0xff] }
 0x399   : > { %4770 = vmatpush.bf16.msra.mxu3 %v7422_v2 }
 0x39b   : > { %v3525_v30 = vpop.f32.mrf.mxu2  ;;  %v8940_v62 = vpop.f32.mrf.mxu3 }
 0x39c   : > { %v3526_v29 = vadd.f32 %v3525_v30, %v3360_v36  ;;  %v3363_v54 = vpop.f32.mrf.mxu1  ;;  %v4012_v49 = vpop.f32.mrf.mxu0  ;;  %v3179_v30 = vld [vmem:[#allocation2 + $0xf1] sm:$0xff] }
 0x39d   : > { %v3201_v12 = vpack.c.bf16 %v3180_v45, %v3179_v30 }
 0x39e   : > { %v3829_v1 = vadd.f32 %v8917_v42, %v3526_v29  ;;  %v3236_v42 = vld [vmem:[#allocation2 + $0xea] sm:$0xff] }
 0x39f   : > { %7088 = vmatmul.msk.bf16.gmra.mxu1 %vm3114_vm3, %v3257_v20  ;;  %7174 = vmatmul.msk.bf16.gmra.mxu0 %vm3114_vm3, %v3647_v7  ;;  %v3258_v44 = vpack.c.bf16 %v3236_v42, %v3235_v41  ;;  %v3631_v7 = vld [vmem:[#allocation2 + $0x11b] sm:$0xff] }
 0x3a0   : > { %7114 = vmatmul.msk.bf16.gmra.mxu2 %vm3114_vm3, %v3199_v47  ;;  %7146 = vmatmul.msk.bf16.gmra.mxu3 %vm3114_vm3, %v3648_v17  ;;  %v8947_v60 = vadd.f32 %v4009_v52, %v3829_v1  ;;  %v3237_v52 = vld [vmem:[#allocation2 + $0xf2] sm:$0xff]  ;;  %v3650_v29 = vpack.c.bf16 %v3631_v7, %v3630_v14  ;;  %v3240_v47 = vld [vmem:[#allocation2 + $0x10a] sm:$0xff] }
 0x3a1   : > { %v3241_v7 = vld [vmem:[#allocation2 + $0x112] sm:$0xff]  ;;  %v7427_v14 = vld [vmem:[%s10483_s3 + $0x88] sm:$0xff] }
 0x3a2   : > { %5289 = vmatpush.bf16.msrb.mxu1 %v7427_v14 }
 0x3a3   : > { %v3528_v11 = vpop.f32.mrf.mxu2  ;;  %v3762_v0 = vpop.f32.mrf.mxu3 }
 0x3a4   : > { %v3529_v33 = vadd.f32 %v3528_v11, %v3363_v54  ;;  %v3365_v57 = vpop.f32.mrf.mxu1  ;;  %v4014_v50 = vpop.f32.mrf.mxu0 }
 0x3a6   : > { %v3830_v4 = vadd.f32 %v3752_v9, %v3529_v33  ;;  %v3182_v33 = vld [vmem:[#allocation2 + $0x109] sm:$0xff] }
 0x3a8   : > { %v8949_v23 = vadd.f32 %v4012_v49, %v3830_v4 }
 0x3ab   : > { %v3530_v19 = vpop.f32.mrf.mxu2  ;;  %v8951_v35 = vpop.f32.mrf.mxu3 }
 0x3ac   : > { %v3531_v26 = vadd.f32 %v3530_v19, %v3365_v57  ;;  %v3368_v56 = vpop.f32.mrf.mxu1  ;;  %v4017_v38 = vpop.f32.mrf.mxu0  ;;  %v3633_v57 = vld [vmem:[#allocation2 + $0x12b] sm:$0xff]  ;;  %v3239_v19 = vld [vmem:[#allocation2 + $0x102] sm:$0xff] }
 0x3ad   : > { %v3260_v55 = vpack.c.bf16 %v3240_v47, %v3239_v19  ;;  %v3893_v47 = vld [vmem:[#allocation2 + $0x13b] sm:$0xff] }
 0x3ae   : > { %v3831_v16 = vadd.f32 %v8929_v24, %v3531_v26  ;;  %v3238_v24 = vld [vmem:[#allocation2 + $0xfa] sm:$0xff]  ;;  %v3632_v26 = vld [vmem:[#allocation2 + $0x123] sm:$0xff] }
 0x3af   : > { %7089 = vmatmul.msk.bf16.gmra.mxu1 %vm3114_vm3, %v3258_v44  ;;  %7175 = vmatmul.msk.bf16.gmra.mxu0 %vm3114_vm3, %v3648_v17  ;;  %v3259_v59 = vpack.c.bf16 %v3238_v24, %v3237_v52  ;;  %v3651_v41 = vpack.c.bf16 %v3633_v57, %v3632_v26  ;;  %v4638_v52 = vld [vmem:[#allocation2 + $0x35] sm:$0xff]  ;;  %v3186_v57 = vld [vmem:[#allocation2 + $0x129] sm:$0xff] }
 0x3b0   : > { %7115 = vmatmul.msk.bf16.gmra.mxu2 %vm3114_vm3, %v3200_v39  ;;  %7147 = vmatmul.msk.bf16.gmra.mxu3 %vm3114_vm3, %v3649_v53  ;;  %v8958_v9 = vadd.f32 %v4014_v50, %v3831_v16 }
 0x3b3   : > { %v3533_v10 = vpop.f32.mrf.mxu2  ;;  %v3767_v63 = vpop.f32.mrf.mxu3 }
 0x3b4   : > { %v3534_v5 = vadd.f32 %v3533_v10, %v3368_v56  ;;  %v3370_v48 = vpop.f32.mrf.mxu1  ;;  %v4019_v22 = vpop.f32.mrf.mxu0  ;;  %v3242_v10 = vld [vmem:[#allocation2 + $0x11a] sm:$0xff] }
 0x3b6   : > { %v3832_v21 = vadd.f32 %v3757_v31, %v3534_v5 }
 0x3b8   : > { %v8960_v28 = vadd.f32 %v4017_v38, %v3832_v21  ;;  %v3202_v38 = vpack.c.bf16 %v3182_v33, %v3181_v8  ;;  %v4639_v21 = vld [vmem:[#allocation2 + $0x3d] sm:$0xff]  ;;  %v3892_v8 = vld [vmem:[#allocation2 + $0x133] sm:$0xff] }
 0x3b9   : > { %v9000_v30 = vpack.c.bf16 %v4639_v21, %v4638_v52 }
 0x3bb   : > { %v3535_v51 = vpop.f32.mrf.mxu2  ;;  %v8962_v34 = vpop.f32.mrf.mxu3 }
 0x3bc   : > { %v3536_v18 = vadd.f32 %v3535_v51, %v3370_v48  ;;  %v3373_v46 = vpop.f32.mrf.mxu1  ;;  %v4022_v36 = vpop.f32.mrf.mxu0 }
 0x3be   : > { %v3833_v31 = vadd.f32 %v8940_v62, %v3536_v18  ;;  %v7420_v18 = vld [vmem:[%s10483_s3 + $0x50] sm:$0xff] }
 0x3bf   : > { %7090 = vmatmul.msk.bf16.gmra.mxu1 %vm3114_vm3, %v3259_v59  ;;  %7176 = vmatmul.msk.bf16.gmra.mxu0 %vm3114_vm3, %v3649_v53 }
 0x3c0   : > { %7116 = vmatmul.msk.bf16.gmra.mxu2 %vm3114_vm3, %v3201_v12  ;;  %7148 = vmatmul.msk.bf16.gmra.mxu3 %vm3114_vm3, %v3650_v29  ;;  %v8972_v54 = vadd.f32 %v4019_v22, %v3833_v31  ;;  %v3184_v22 = vld [vmem:[#allocation2 + $0x119] sm:$0xff] }
 0x3c1   : > { %4510 = vmatpush.bf16.msra.mxu2 %v7420_v18  ;;  %v4379_v18 = vld [vmem:[#allocation2 + $0x2d] sm:$0xff] }
 0x3c3   : > { %v3538_v49 = vpop.f32.mrf.mxu2  ;;  %v8974_v3 = vpop.f32.mrf.mxu3 }
 0x3c4   : > { %v3539_v20 = vadd.f32 %v3538_v49, %v3373_v46  ;;  %v3375_v40 = vpop.f32.mrf.mxu1  ;;  %v4024_v37 = vpop.f32.mrf.mxu0  ;;  %v3261_v46 = vpack.c.bf16 %v3242_v10, %v3241_v7 }
 0x3c6   : > { %v3834_v62 = vadd.f32 %v3762_v0, %v3539_v20 }
 0x3c8   : > { %v8976_v1 = vadd.f32 %v4022_v36, %v3834_v62  ;;  %v3183_v36 = vld [vmem:[#allocation2 + $0x111] sm:$0xff] }
 0x3c9   : > { %v3203_v59 = vpack.c.bf16 %v3184_v22, %v3183_v36  ;;  %v3244_v62 = vld [vmem:[#allocation2 + $0x12a] sm:$0xff] }
 0x3cb   : > { %v3540_v17 = vpop.f32.mrf.mxu2  ;;  %v8978_v11 = vpop.f32.mrf.mxu3 }
 0x3cc   : > { %v3541_v50 = vadd.f32 %v3540_v17, %v3375_v40  ;;  %v3378_v4 = vpop.f32.mrf.mxu1  ;;  %v4027_v42 = vpop.f32.mrf.mxu0 }
 0x3ce   : > { %v3835_v56 = vadd.f32 %v8951_v35, %v3541_v50  ;;  %v4641_v50 = vld [vmem:[#allocation2 + $0x4d] sm:$0xff] }
 0x3cf   : > { %7091 = vmatmul.msk.bf16.gmra.mxu1 %vm3114_vm3, %v3260_v55  ;;  %7177 = vmatmul.msk.bf16.gmra.mxu0 %vm3114_vm3, %v3650_v29  ;;  %v3243_v55 = vld [vmem:[#allocation2 + $0x122] sm:$0xff] }
 0x3d0   : > { %7117 = vmatmul.msk.bf16.gmra.mxu2 %vm3114_vm3, %v3202_v38  ;;  %7149 = vmatmul.msk.bf16.gmra.mxu3 %vm3114_vm3, %v3651_v41  ;;  %v8985_v0 = vadd.f32 %v4024_v37, %v3835_v56  ;;  %v3262_v26 = vpack.c.bf16 %v3244_v62, %v3243_v55  ;;  %v3185_v56 = vld [vmem:[#allocation2 + $0x121] sm:$0xff]  ;;  %v3911_v38 = vpack.c.bf16 %v3893_v47, %v3892_v8  ;;  %v4901_v55 = vld [vmem:[#allocation2 + $0x4e] sm:$0xff] }
 0x3d3   : > { %v3543_v44 = vpop.f32.mrf.mxu2  ;;  %v8987_v32 = vpop.f32.mrf.mxu3 }
 0x3d4   : > { %v3544_v6 = vadd.f32 %v3543_v44, %v3378_v4  ;;  %v3380_v16 = vpop.f32.mrf.mxu1  ;;  %v4029_v39 = vpop.f32.mrf.mxu0  ;;  %v3204_v44 = vpack.c.bf16 %v3186_v57, %v3185_v56  ;;  %v4645_v56 = vld [vmem:[#allocation2 + $0x6d] sm:$0xff] }
 0x3d6   : > { %v3836_v53 = vadd.f32 %v3767_v63, %v3544_v6  ;;  %v7424_v63 = vld [vmem:[%s10483_s3 + $0x70] sm:$0xff] }
 0x3d7   : > { %5030 = vmatpush.bf16.msra.mxu0 %v7424_v63  ;;  %v4643_v63 = vld [vmem:[#allocation2 + $0x5d] sm:$0xff] }
 0x3d8   : > { %v8989_v35 = vadd.f32 %v4027_v42, %v3836_v53 }
 0x3db   : > { %v3545_v5 = vpop.f32.mrf.mxu2  ;;  %v8991_v48 = vpop.f32.mrf.mxu3 }
 0x3dc   : > { %v3546_v24 = vadd.f32 %v3545_v5, %v3380_v16  ;;  %v3383_v51 = vpop.f32.mrf.mxu1  ;;  %v4032_v45 = vpop.f32.mrf.mxu0 }
 0x3de   : > { %v3837_v2 = vadd.f32 %v8962_v34, %v3546_v24  ;;  %v4119_v24 = vld [vmem:[#allocation2 + $0x2c] sm:$0xff] }
 0x3df   : > { %7092 = vmatmul.msk.bf16.gmra.mxu1 %vm3114_vm3, %v3261_v46  ;;  %7178 = vmatmul.msk.bf16.gmra.mxu0 %vm3114_vm3, %v3651_v41  ;;  %v4640_v41 = vld [vmem:[#allocation2 + $0x45] sm:$0xff] }
 0x3e0   : > { %7118 = vmatmul.msk.bf16.gmra.mxu2 %vm3114_vm3, %v3203_v59  ;;  %7252 = vmatmul.msk.bf16.vlgmr.msra.gmra.mxu3 %vm3114_vm3, %v9000_v30  ;;  %v9010_v31 = vadd.f32 %v4029_v39, %v3837_v2  ;;  %v9020_v6 = vpack.c.bf16 %v4641_v50, %v4640_v41  ;;  %v4118_v2 = vld [vmem:[#allocation2 + $0x24] sm:$0xff]  ;;  %v4898_v59 = vld [vmem:[#allocation2 + $0x36] sm:$0xff] }
 0x3e1   : > { %v4154_v14 = vpack.c.bf16 %v4119_v24, %v4118_v2  ;;  %v4903_v2 = vld [vmem:[#allocation2 + $0x5e] sm:$0xff] }
 0x3e3   : > { %v3548_v34 = vpop.f32.mrf.mxu2  ;;  %v9012_v12 = vpop.f32.mrf.mxu3 }
 0x3e4   : > { %v3549_v29 = vadd.f32 %v3548_v34, %v3383_v51  ;;  %v3385_v49 = vpop.f32.mrf.mxu1  ;;  %v4034_v20 = vpop.f32.mrf.mxu0  ;;  %v4899_v51 = vld [vmem:[#allocation2 + $0x3e] sm:$0xff] }
 0x3e5   : > { %v4378_v34 = vld [vmem:[#allocation2 + $0x25] sm:$0xff] }
 0x3e6   : > { %v3838_v40 = vadd.f32 %v8974_v3, %v3549_v29  ;;  %v4642_v29 = vld [vmem:[#allocation2 + $0x55] sm:$0xff] }
 0x3e8   : > { %v9015_v37 = vadd.f32 %v4032_v45, %v3838_v40  ;;  %v9035_v40 = vpack.c.bf16 %v4643_v63, %v4642_v29 }
 0x3eb   : > { %v3550_v17 = vpop.f32.mrf.mxu2  ;;  %v9017_v33 = vpop.f32.mrf.mxu3 }
 0x3ec   : > { %v3551_v4 = vadd.f32 %v3550_v17, %v3385_v49  ;;  %v3388_v42 = vpop.f32.mrf.mxu1  ;;  %v4037_v19 = vpop.f32.mrf.mxu0  ;;  %v4934_v49 = vpack.c.bf16 %v4899_v51, %v4898_v59 }
 0x3ee   : > { %v3839_v3 = vadd.f32 %v8978_v11, %v3551_v4 }
 0x3ef   : > { %7093 = vmatmul.msk.bf16.gmra.mxu1 %vm3114_vm3, %v3262_v26  ;;  %7179 = vmatmul.msk.bf16.gmra.mxu0 %vm3114_vm3, %v3911_v38 }
 0x3f0   : > { %7119 = vmatmul.msk.bf16.gmra.mxu2 %vm3114_vm3, %v3204_v44  ;;  %7253 = vmatmul.msk.bf16.gmra.mxu3 %vm3114_vm3, %v9020_v6  ;;  %v9027_v16 = vadd.f32 %v4034_v20, %v3839_v3  ;;  %v4414_v20 = vpack.c.bf16 %v4379_v18, %v4378_v34  ;;  %v4120_v44 = vld [vmem:[#allocation2 + $0x34] sm:$0xff]  ;;  %v4647_v34 = vld [vmem:[#allocation2 + $0x7d] sm:$0xff] }
 0x3f3   : > { %v3553_v39 = vpop.f32.mrf.mxu2  ;;  %v3787_v53 = vpop.f32.mrf.mxu3 }
 0x3f4   : > { %v3554_v10 = vadd.f32 %v3553_v39, %v3388_v42  ;;  %v3390_v5 = vpop.f32.mrf.mxu1  ;;  %v4039_v22 = vpop.f32.mrf.mxu0  ;;  %v4900_v39 = vld [vmem:[#allocation2 + $0x46] sm:$0xff] }
 0x3f6   : > { %v3840_v11 = vadd.f32 %v8987_v32, %v3554_v10 }
 0x3f8   : > { %v9030_v21 = vadd.f32 %v4037_v19, %v3840_v11  ;;  %v4121_v19 = vld [vmem:[#allocation2 + $0x3c] sm:$0xff] }
 0x3f9   : > { %v4155_v10 = vpack.c.bf16 %v4121_v19, %v4120_v44  ;;  %v4905_v44 = vld [vmem:[#allocation2 + $0x6e] sm:$0xff] }
 0x3fb   : > { %v3555_v45 = vpop.f32.mrf.mxu2  ;;  %v9032_v7 = vpop.f32.mrf.mxu3 }
 0x3fc   : > { %v3556_v46 = vadd.f32 %v3555_v45, %v3390_v5  ;;  %v3393_v36 = vpop.f32.mrf.mxu1  ;;  %v4042_v52 = vpop.f32.mrf.mxu0  ;;  %v4644_v5 = vld [vmem:[#allocation2 + $0x65] sm:$0xff] }
 0x3fd   : > { %v9050_v24 = vpack.c.bf16 %v4645_v56, %v4644_v5  ;;  %v4649_v5 = vld [vmem:[#allocation2 + $0x8d] sm:$0xff] }
 0x3fe   : > { %v3841_v32 = vadd.f32 %v8991_v48, %v3556_v46 }
 0x3ff   : > { %7192 = vmatmul.msk.bf16.vlgmr.msra.gmra.mxu1 %vm3114_vm3, %v4154_v14  ;;  %7282 = vmatmul.msk.bf16.vlgmr.msra.gmra.mxu0 %vm3114_vm3, %v4934_v49 }
 0x400   : > { %7222 = vmatmul.msk.bf16.vlgmr.msra.gmra.mxu2 %vm3114_vm3, %v4414_v20  ;;  %7254 = vmatmul.msk.bf16.gmra.mxu3 %vm3114_vm3, %v9035_v40  ;;  %v9042_v62 = vadd.f32 %v4039_v22, %v3841_v32  ;;  %v4935_v22 = vpack.c.bf16 %v4901_v55, %v4900_v39  ;;  %v4122_v32 = vld [vmem:[#allocation2 + $0x44] sm:$0xff]  ;;  %v4902_v20 = vld [vmem:[#allocation2 + $0x56] sm:$0xff] }
 0x403   : > { %v3558_v47 = vpop.f32.mrf.mxu2  ;;  %v3792_v17 = vpop.f32.mrf.mxu3 }
 0x404   : > { %v3559_v57 = vadd.f32 %v3558_v47, %v3393_v36  ;;  %v3395_v50 = vpop.f32.mrf.mxu1  ;;  %v4044_v4 = vpop.f32.mrf.mxu0 }
 0x406   : > { %v3842_v48 = vadd.f32 %v9012_v12, %v3559_v57  ;;  %v4646_v57 = vld [vmem:[#allocation2 + $0x75] sm:$0xff] }
 0x408   : > { %v9045_v42 = vadd.f32 %v4042_v52, %v3842_v48  ;;  %v4123_v52 = vld [vmem:[#allocation2 + $0x4c] sm:$0xff]  ;;  %v9065_v48 = vpack.c.bf16 %v4647_v34, %v4646_v57 }
 0x409   : > { %v4156_v47 = vpack.c.bf16 %v4123_v52, %v4122_v32 }
 0x40b   : > { %v3560_v8 = vpop.f32.mrf.mxu2  ;;  %v9047_v26 = vpop.f32.mrf.mxu3 }
 0x40c   : > { %v3561_v38 = vadd.f32 %v3560_v8, %v3395_v50  ;;  %v3398_v41 = vpop.f32.mrf.mxu1  ;;  %v4047_v3 = vpop.f32.mrf.mxu0  ;;  %v4936_v50 = vpack.c.bf16 %v4903_v2, %v4902_v20  ;;  %v4127_v20 = vld [vmem:[#allocation2 + $0x6c] sm:$0xff] }
 0x40e   : > { %v3843_v11 = vadd.f32 %v9017_v33, %v3561_v38 }
 0x40f   : > { %7193 = vmatmul.msk.bf16.gmra.mxu1 %vm3114_vm3, %v4155_v10  ;;  %7283 = vmatmul.msk.bf16.gmra.mxu0 %vm3114_vm3, %v4935_v22 }
 0x410   : > { %7223 = vmatmul.msk.bf16.gmra.mxu2 %vm3114_vm3, %v9000_v30  ;;  %7255 = vmatmul.msk.bf16.gmra.mxu3 %vm3114_vm3, %v9050_v24  ;;  %v9058_v12 = vadd.f32 %v4044_v4, %v3843_v11 }
 0x413   : > { %v3563_v51 = vpop.f32.mrf.mxu2  ;;  %v3797_v45 = vpop.f32.mrf.mxu3 }
 0x414   : > { %v3564_v18 = vadd.f32 %v3563_v51, %v3398_v41  ;;  %v3400_v63 = vpop.f32.mrf.mxu1  ;;  %v4049_v46 = vpop.f32.mrf.mxu0  ;;  %v4124_v51 = vld [vmem:[#allocation2 + $0x54] sm:$0xff] }
 0x416   : > { %v3844_v33 = vadd.f32 %v3787_v53, %v3564_v18  ;;  %v4904_v18 = vld [vmem:[#allocation2 + $0x66] sm:$0xff] }
 0x418   : > { %v9060_v36 = vadd.f32 %v4047_v3, %v3844_v33  ;;  %v4125_v3 = vld [vmem:[#allocation2 + $0x5c] sm:$0xff]  ;;  %v4937_v33 = vpack.c.bf16 %v4905_v44, %v4904_v18 }
 0x41b   : > { %v3565_v59 = vpop.f32.mrf.mxu2  ;;  %v9062_v14 = vpop.f32.mrf.mxu3 }
 0x41c   : > { %v3566_v30 = vadd.f32 %v3565_v59, %v3400_v63  ;;  %v3403_v29 = vpop.f32.mrf.mxu1  ;;  %v4052_v49 = vpop.f32.mrf.mxu0  ;;  %v4157_v63 = vpack.c.bf16 %v4125_v3, %v4124_v51  ;;  %v4650_v3 = vld [vmem:[#allocation2 + $0x95] sm:$0xff] }
 0x41e   : > { %v3845_v4 = vadd.f32 %v9032_v7, %v3566_v30 }
 0x41f   : > { %7194 = vmatmul.msk.bf16.gmra.mxu1 %vm3114_vm3, %v4156_v47  ;;  %7284 = vmatmul.msk.bf16.gmra.mxu0 %vm3114_vm3, %v4936_v50  ;;  %v4907_v47 = vld [vmem:[#allocation2 + $0x7e] sm:$0xff] }
 0x420   : > { %7224 = vmatmul.msk.bf16.gmra.mxu2 %vm3114_vm3, %v9020_v6  ;;  %7256 = vmatmul.msk.bf16.gmra.mxu3 %vm3114_vm3, %v9065_v48  ;;  %v9073_v53 = vadd.f32 %v4049_v46, %v3845_v4  ;;  %v4648_v46 = vld [vmem:[#allocation2 + $0x85] sm:$0xff]  ;;  %v4651_v4 = vld [vmem:[#allocation2 + $0x9d] sm:$0xff] }
 0x421   : > { %v9080_v2 = vpack.c.bf16 %v4649_v5, %v4648_v46  ;;  %v9095_v5 = vpack.c.bf16 %v4651_v4, %v4650_v3  ;;  %v4129_v46 = vld [vmem:[#allocation2 + $0x7c] sm:$0xff] }
 0x423   : > { %v3568_v19 = vpop.f32.mrf.mxu2  ;;  %v3802_v55 = vpop.f32.mrf.mxu3 }
 0x424   : > { %v3569_v8 = vadd.f32 %v3568_v19, %v3403_v29  ;;  %v3405_v56 = vpop.f32.mrf.mxu1  ;;  %v4054_v38 = vpop.f32.mrf.mxu0 }
 0x426   : > { %v3846_v7 = vadd.f32 %v3792_v17, %v3569_v8 }
 0x428   : > { %v9075_v41 = vadd.f32 %v4052_v49, %v3846_v7 }
 0x42b   : > { %v3570_v39 = vpop.f32.mrf.mxu2  ;;  %v9077_v10 = vpop.f32.mrf.mxu3 }
 0x42c   : > { %v3571_v6 = vadd.f32 %v3570_v39, %v3405_v56  ;;  %v3408_v22 = vpop.f32.mrf.mxu1  ;;  %v4057_v11 = vpop.f32.mrf.mxu0  ;;  %v4126_v56 = vld [vmem:[#allocation2 + $0x64] sm:$0xff] }
 0x42d   : > { %v4158_v7 = vpack.c.bf16 %v4127_v20, %v4126_v56  ;;  %v4128_v20 = vld [vmem:[#allocation2 + $0x74] sm:$0xff] }
 0x42e   : > { %v3847_v52 = vadd.f32 %v9047_v26, %v3571_v6 }
 0x42f   : > { %7195 = vmatmul.msk.bf16.gmra.mxu1 %vm3114_vm3, %v4157_v63  ;;  %7285 = vmatmul.msk.bf16.gmra.mxu0 %vm3114_vm3, %v4937_v33  ;;  %v4909_v33 = vld [vmem:[#allocation2 + $0x8e] sm:$0xff] }
 0x430   : > { %7225 = vmatmul.msk.bf16.gmra.mxu2 %vm3114_vm3, %v9035_v40  ;;  %7257 = vmatmul.msk.bf16.gmra.mxu3 %vm3114_vm3, %v9080_v2  ;;  %v9088_v17 = vadd.f32 %v4054_v38, %v3847_v52  ;;  %v4906_v38 = vld [vmem:[#allocation2 + $0x76] sm:$0xff] }
 0x431   : > { %v4938_v44 = vpack.c.bf16 %v4907_v47, %v4906_v38  ;;  %v4159_v47 = vpack.c.bf16 %v4129_v46, %v4128_v20 }
 0x433   : > { %v3573_v59 = vpop.f32.mrf.mxu2  ;;  %v3807_v34 = vpop.f32.mrf.mxu3 }
 0x434   : > { %v3574_v30 = vadd.f32 %v3573_v59, %v3408_v22  ;;  %v3410_v29 = vpop.f32.mrf.mxu1  ;;  %v4059_v49 = vpop.f32.mrf.mxu0 }
 0x436   : > { %v3848_v26 = vadd.f32 %v3797_v45, %v3574_v30  ;;  %v4653_v30 = vld [vmem:[#allocation2 + $0xad] sm:$0xff] }
 0x438   : > { %v9090_v32 = vadd.f32 %v4057_v11, %v3848_v26 }
 0x43b   : > { %v3575_v57 = vpop.f32.mrf.mxu2  ;;  %v9092_v50 = vpop.f32.mrf.mxu3 }
 0x43c   : > { %v3576_v40 = vadd.f32 %v3575_v57, %v3410_v29  ;;  %v3413_v19 = vpop.f32.mrf.mxu1  ;;  %v4062_v8 = vpop.f32.mrf.mxu0  ;;  %v4652_v57 = vld [vmem:[#allocation2 + $0xa5] sm:$0xff] }
 0x43e   : > { %v3849_v39 = vadd.f32 %v9062_v14, %v3576_v40 }
 0x43f   : > { %7196 = vmatmul.msk.bf16.gmra.mxu1 %vm3114_vm3, %v4158_v7  ;;  %7286 = vmatmul.msk.bf16.gmra.mxu0 %vm3114_vm3, %v4938_v44 }
 0x440   : > { %7226 = vmatmul.msk.bf16.gmra.mxu2 %vm3114_vm3, %v9050_v24  ;;  %7258 = vmatmul.msk.bf16.gmra.mxu3 %vm3114_vm3, %v9095_v5  ;;  %v9103_v45 = vadd.f32 %v4059_v49, %v3849_v39  ;;  %v4908_v49 = vld [vmem:[#allocation2 + $0x86] sm:$0xff] }
 0x441   : > { %v4939_v4 = vpack.c.bf16 %v4909_v33, %v4908_v49  ;;  %v4131_v39 = vld [vmem:[#allocation2 + $0x8c] sm:$0xff] }
 0x443   : > { %v3578_v6 = vpop.f32.mrf.mxu2  ;;  %v3812_v22 = vpop.f32.mrf.mxu3 }
 0x444   : > { %v3579_v11 = vadd.f32 %v3578_v6, %v3413_v19  ;;  %v3415_v51 = vpop.f32.mrf.mxu1  ;;  %v4064_v18 = vpop.f32.mrf.mxu0  ;;  %v9110_v19 = vpack.c.bf16 %v4653_v30, %v4652_v57  ;;  %v4911_v6 = vld [vmem:[#allocation2 + $0x9e] sm:$0xff] }
 0x446   : > { %v3850_v14 = vadd.f32 %v3802_v55, %v3579_v11 }
 0x448   : > { %v9105_v63 = vadd.f32 %v4062_v8, %v3850_v14  ;;  %v4655_v14 = vld [vmem:[#allocation2 + $0xbd] sm:$0xff] }
 0x44b   : > { %v3580_v52 = vpop.f32.mrf.mxu2  ;;  %v9107_v59 = vpop.f32.mrf.mxu3 }
 0x44c   : > { %v3581_v24 = vadd.f32 %v3580_v52, %v3415_v51  ;;  %v3418_v29 = vpop.f32.mrf.mxu1  ;;  %v4067_v26 = vpop.f32.mrf.mxu0  ;;  %v4130_v52 = vld [vmem:[#allocation2 + $0x84] sm:$0xff] }
 0x44d   : > { %v4160_v30 = vpack.c.bf16 %v4131_v39, %v4130_v52 }
 0x44e   : > { %v3851_v40 = vadd.f32 %v9077_v10, %v3581_v24  ;;  %v4654_v24 = vld [vmem:[#allocation2 + $0xb5] sm:$0xff] }
 0x44f   : > { %7197 = vmatmul.msk.bf16.gmra.mxu1 %vm3114_vm3, %v4159_v47  ;;  %7287 = vmatmul.msk.bf16.gmra.mxu0 %vm3114_vm3, %v4939_v4  ;;  %v9125_v49 = vpack.c.bf16 %v4655_v14, %v4654_v24 }
 0x450   : > { %7227 = vmatmul.msk.bf16.gmra.mxu2 %vm3114_vm3, %v9065_v48  ;;  %7259 = vmatmul.msk.bf16.gmra.mxu3 %vm3114_vm3, %v9110_v19  ;;  %v9118_v55 = vadd.f32 %v4064_v18, %v3851_v40  ;;  %v4910_v18 = vld [vmem:[#allocation2 + $0x96] sm:$0xff] }
 0x451   : > { %v4940_v20 = vpack.c.bf16 %v4911_v6, %v4910_v18  ;;  %v4656_v18 = vld [vmem:[#allocation2 + $0xc5] sm:$0xff] }
 0x453   : > { %v3583_v8 = vpop.f32.mrf.mxu2  ;;  %v3817_v56 = vpop.f32.mrf.mxu3 }
 0x454   : > { %v3584_v38 = vadd.f32 %v3583_v8, %v3418_v29  ;;  %v3420_v7 = vpop.f32.mrf.mxu1  ;;  %v4069_v3 = vpop.f32.mrf.mxu0 }
 0x456   : > { %v3852_v10 = vadd.f32 %v3807_v34, %v3584_v38  ;;  %v4133_v38 = vld [vmem:[#allocation2 + $0x9c] sm:$0xff] }
 0x458   : > { %v9120_v44 = vadd.f32 %v4067_v26, %v3852_v10 }
 0x45b   : > { %v3585_v11 = vpop.f32.mrf.mxu2  ;;  %v9122_v51 = vpop.f32.mrf.mxu3 }
 0x45c   : > { %v3586_v48 = vadd.f32 %v3585_v11, %v3420_v7  ;;  %v3423_v46 = vpop.f32.mrf.mxu1  ;;  %v4072_v33 = vpop.f32.mrf.mxu0  ;;  %v4913_v7 = vld [vmem:[#allocation2 + $0xae] sm:$0xff] }
 0x45e   : > { %v3853_v29 = vadd.f32 %v9092_v50, %v3586_v48  ;;  %v4912_v48 = vld [vmem:[#allocation2 + $0xa6] sm:$0xff] }
 0x45f   : > { %7198 = vmatmul.msk.bf16.gmra.mxu1 %vm3114_vm3, %v4160_v30  ;;  %7288 = vmatmul.msk.bf16.gmra.mxu0 %vm3114_vm3, %v4940_v20  ;;  %v4941_v30 = vpack.c.bf16 %v4913_v7, %v4912_v48  ;;  %v4135_v7 = vld [vmem:[#allocation2 + $0xac] sm:$0xff] }
 0x460   : > { %7228 = vmatmul.msk.bf16.gmra.mxu2 %vm3114_vm3, %v9080_v2  ;;  %7260 = vmatmul.msk.bf16.gmra.mxu3 %vm3114_vm3, %v9125_v49  ;;  %v9133_v34 = vadd.f32 %v4069_v3, %v3853_v29  ;;  %v4657_v2 = vld [vmem:[#allocation2 + $0xcd] sm:$0xff] }
 0x461   : > { %v4132_v3 = vld [vmem:[#allocation2 + $0x94] sm:$0xff]  ;;  %v9142_v24 = vpack.c.bf16 %v4657_v2, %v4656_v18 }
 0x462   : > { %v4161_v52 = vpack.c.bf16 %v4133_v38, %v4132_v3  ;;  %v4914_v18 = vld [vmem:[#allocation2 + $0xb6] sm:$0xff] }
 0x463   : > { %v3588_v26 = vpop.f32.mrf.mxu2  ;;  %v9135_v47 = vpop.f32.mrf.mxu3 }
 0x464   : > { %v3589_v57 = vadd.f32 %v3588_v26, %v3423_v46  ;;  %v3425_v4 = vpop.f32.mrf.mxu1  ;;  %v4074_v50 = vpop.f32.mrf.mxu0 }
 0x466   : > { %v3854_v40 = vadd.f32 %v3812_v22, %v3589_v57  ;;  %v7433_v22 = vld [vmem:[%s10489_s9 + $0x8] sm:$0xff] }
 0x467   : > { %5830 = vmatpush.bf16.msrb.mxu0 %v7433_v22 }
 0x468   : > { %v9137_v8 = vadd.f32 %v4072_v33, %v3854_v40 }
 0x46b   : > { %v3590_v10 = vpop.f32.mrf.mxu2  ;;  %v9139_v39 = vpop.f32.mrf.mxu3 }
 0x46c   : > { %v3591_v6 = vadd.f32 %v3590_v10, %v3425_v4  ;;  %v3428_v11 = vpop.f32.mrf.mxu1  ;;  %v4077_v14 = vpop.f32.mrf.mxu0  ;;  %v4915_v10 = vld [vmem:[#allocation2 + $0xbe] sm:$0xff] }
 0x46d   : > { %v4942_v22 = vpack.c.bf16 %v4915_v10, %v4914_v18  ;;  %v7429_v10 = vld [vmem:[%s10485_s5 + $0x8] sm:$0xff] }
 0x46e   : > { %v3855_v46 = vadd.f32 %v9107_v59, %v3591_v6  ;;  %v7426_v59 = vld [vmem:[%s10483_s3 + $0x80] sm:$0xff]  ;;  %5592 = vmatpush.bf16.msrb.mxu2 %v7429_v10 }
 0x46f   : > { %7199 = vmatmul.msk.bf16.gmra.mxu1 %vm3114_vm3, %v4161_v52  ;;  %7289 = vmatmul.msk.bf16.gmra.mxu0 %vm3114_vm3, %v4941_v30  ;;  %v4659_v6 = vld [vmem:[#allocation2 + $0xdd] sm:$0xff] }
 0x470   : > { %7229 = vmatmul.msk.bf16.gmra.mxu2 %vm3114_vm3, %v9095_v5  ;;  %7261 = vmatmul.msk.bf16.gmra.mxu3 %vm3114_vm3, %v9142_v24  ;;  %v9156_v33 = vadd.f32 %v4074_v50, %v3855_v46  ;;  %v7431_v5 = vld [vmem:[%s10487_s7 + $0x8] sm:$0xff]  ;;  %v4658_v46 = vld [vmem:[#allocation2 + $0xd5] sm:$0xff] }
 0x471   : > { %5290 = vmatpush.bf16.msrb.mxu1 %v7426_v59  ;;  %5711 = vmatpush.bf16.msrb.mxu3 %v7431_v5 }
 0x473   : > { %v3593_v20 = vpop.f32.mrf.mxu2  ;;  %v9158_v29 = vpop.f32.mrf.mxu3 }
 0x474   : > { %v3594_v26 = vadd.f32 %v3593_v20, %v3428_v11  ;;  %v3430_v57 = vpop.f32.mrf.mxu1  ;;  %v4079_v4 = vpop.f32.mrf.mxu0  ;;  %v4134_v11 = vld [vmem:[#allocation2 + $0xa4] sm:$0xff] }
 0x475   : > { %v4162_v30 = vpack.c.bf16 %v4135_v7, %v4134_v11 }
 0x476   : > { %v3856_v40 = vadd.f32 %v3817_v56, %v3594_v26 }
 0x478   : > { %v9163_v38 = vadd.f32 %v4077_v14, %v3856_v40  ;;  %v9169_v14 = vpack.c.bf16 %v4659_v6, %v4658_v46 }
 0x47b   : > { %v3595_v50 = vpop.f32.mrf.mxu2  ;;  %v9165_v2 = vpop.f32.mrf.mxu3 }
 0x47c   : > { %v3596_v3 = vadd.f32 %v3595_v50, %v3430_v57  ;;  %v4252_v48 = vpop.f32.mrf.mxu1  ;;  %v5032_v52 = vpop.f32.mrf.mxu0  ;;  %v4137_v50 = vld [vmem:[#allocation2 + $0xbc] sm:$0xff] }
 0x47d   : > { %v4342_v56 = vadd.f32 %v4252_v48, %v8903_v15  ;;  %v4661_v48 = vld [vmem:[#allocation2 + $0xed] sm:$0xff] }
 0x47e   : > { %v3857_v59 = vadd.f32 %v9122_v51, %v3596_v3 }
 0x47f   : > { %7200 = vmatmul.msk.bf16.gmra.mxu1 %vm3114_vm3, %v4162_v30  ;;  %7290 = vmatmul.msk.bf16.gmra.mxu0 %vm3114_vm3, %v4942_v22  ;;  %v4136_v30 = vld [vmem:[#allocation2 + $0xb4] sm:$0xff]  ;;  %v4660_v22 = vld [vmem:[#allocation2 + $0xe5] sm:$0xff] }
 0x480   : > { %7230 = vmatmul.msk.bf16.gmra.mxu2 %vm3114_vm3, %v9110_v19  ;;  %7262 = vmatmul.msk.bf16.gmra.mxu3 %vm3114_vm3, %v9169_v14  ;;  %v9177_v20 = vadd.f32 %v4079_v4, %v3857_v59  ;;  %v4917_v4 = vld [vmem:[#allocation2 + $0xce] sm:$0xff]  ;;  %v4163_v46 = vpack.c.bf16 %v4137_v50, %v4136_v30 }
 0x483   : > { %v4512_v15 = vpop.f32.mrf.mxu2  ;;  %v9179_v26 = vpop.f32.mrf.mxu3 }
 0x484   : > { %v4602_v57 = vadd.f32 %v4512_v15, %v4342_v56  ;;  %v4254_v40 = vpop.f32.mrf.mxu1  ;;  %v5034_v51 = vpop.f32.mrf.mxu0 }
 0x485   : > { %v4343_v5 = vadd.f32 %v4254_v40, %v8912_v43  ;;  %v4916_v43 = vld [vmem:[#allocation2 + $0xc6] sm:$0xff] }
 0x486   : > { %v4862_v7 = vadd.f32 %v9135_v47, %v4602_v57  ;;  %v4943_v59 = vpack.c.bf16 %v4917_v4, %v4916_v43 }
 0x488   : > { %v9186_v19 = vadd.f32 %v5032_v52, %v4862_v7  ;;  %v9192_v52 = vpack.c.bf16 %v4661_v48, %v4660_v22  ;;  %v4919_v48 = vld [vmem:[#allocation2 + $0xde] sm:$0xff]  ;;  %v4918_v22 = vld [vmem:[#allocation2 + $0xd6] sm:$0xff] }
 0x48b   : > { %v4514_v6 = vpop.f32.mrf.mxu2  ;;  %v9188_v3 = vpop.f32.mrf.mxu3 }
 0x48c   : > { %v4603_v11 = vadd.f32 %v4514_v6, %v4343_v5  ;;  %v4257_v18 = vpop.f32.mrf.mxu1  ;;  %v5037_v56 = vpop.f32.mrf.mxu0  ;;  %v4139_v6 = vld [vmem:[#allocation2 + $0xcc] sm:$0xff] }
 0x48d   : > { %v4344_v47 = vadd.f32 %v4257_v18, %v8915_v25  ;;  %v4663_v18 = vld [vmem:[#allocation2 + $0xfd] sm:$0xff] }
 0x48e   : > { %v4863_v15 = vadd.f32 %v9139_v39, %v4603_v11 }
 0x48f   : > { %7201 = vmatmul.msk.bf16.gmra.mxu1 %vm3114_vm3, %v4163_v46  ;;  %7291 = vmatmul.msk.bf16.gmra.mxu0 %vm3114_vm3, %v4943_v59  ;;  %v4138_v46 = vld [vmem:[#allocation2 + $0xc4] sm:$0xff] }
 0x490   : > { %7231 = vmatmul.msk.bf16.gmra.mxu2 %vm3114_vm3, %v9125_v49  ;;  %7263 = vmatmul.msk.bf16.gmra.mxu3 %vm3114_vm3, %v9192_v52  ;;  %v9200_v57 = vadd.f32 %v5034_v51, %v4863_v15  ;;  %v4164_v59 = vpack.c.bf16 %v4139_v6, %v4138_v46  ;;  %v4662_v15 = vld [vmem:[#allocation2 + $0xf5] sm:$0xff] }
 0x493   : > { %v4517_v25 = vpop.f32.mrf.mxu2  ;;  %v9202_v40 = vpop.f32.mrf.mxu3 }
 0x494   : > { %v4604_v5 = vadd.f32 %v4517_v25, %v4344_v47  ;;  %v4259_v7 = vpop.f32.mrf.mxu1  ;;  %v5039_v39 = vpop.f32.mrf.mxu0 }
 0x495   : > { %v4345_v10 = vadd.f32 %v4259_v7, %v8924_v13  ;;  %v4944_v13 = vpack.c.bf16 %v4919_v48, %v4918_v22 }
 0x496   : > { %v4864_v50 = vadd.f32 %v9158_v29, %v4604_v5 }
 0x498   : > { %v9206_v4 = vadd.f32 %v5037_v56, %v4864_v50  ;;  %v9212_v56 = vpack.c.bf16 %v4663_v18, %v4662_v15  ;;  %v4921_v18 = vld [vmem:[#allocation2 + $0xee] sm:$0xff]  ;;  %v4920_v15 = vld [vmem:[#allocation2 + $0xe6] sm:$0xff] }
 0x49b   : > { %v4519_v49 = vpop.f32.mrf.mxu2  ;;  %v9208_v11 = vpop.f32.mrf.mxu3 }
 0x49c   : > { %v4605_v51 = vadd.f32 %v4519_v49, %v4345_v10  ;;  %v4262_v30 = vpop.f32.mrf.mxu1  ;;  %v5042_v43 = vpop.f32.mrf.mxu0  ;;  %v4141_v49 = vld [vmem:[#allocation2 + $0xdc] sm:$0xff] }
 0x49d   : > { %v4346_v47 = vadd.f32 %v4262_v30, %v8927_v27  ;;  %v4665_v30 = vld [vmem:[#allocation2 + $0x10d] sm:$0xff] }
 0x49e   : > { %v4865_v29 = vadd.f32 %v9165_v2, %v4605_v51 }
 0x49f   : > { %7202 = vmatmul.msk.bf16.gmra.mxu1 %vm3114_vm3, %v4164_v59  ;;  %7292 = vmatmul.msk.bf16.gmra.mxu0 %vm3114_vm3, %v4944_v13  ;;  %v4140_v59 = vld [vmem:[#allocation2 + $0xd4] sm:$0xff] }
 0x4a0   : > { %7232 = vmatmul.msk.bf16.gmra.mxu2 %vm3114_vm3, %v9142_v24  ;;  %7264 = vmatmul.msk.bf16.gmra.mxu3 %vm3114_vm3, %v9212_v56  ;;  %v9220_v25 = vadd.f32 %v5039_v39, %v4865_v29  ;;  %v4165_v13 = vpack.c.bf16 %v4141_v49, %v4140_v59  ;;  %v4664_v29 = vld [vmem:[#allocation2 + $0x105] sm:$0xff] }
 0x4a3   : > { %v4522_v27 = vpop.f32.mrf.mxu2  ;;  %v9222_v5 = vpop.f32.mrf.mxu3 }
 0x4a4   : > { %v4606_v7 = vadd.f32 %v4522_v27, %v4346_v47  ;;  %v4264_v10 = vpop.f32.mrf.mxu1  ;;  %v5044_v2 = vpop.f32.mrf.mxu0 }
 0x4a5   : > { %v4347_v50 = vadd.f32 %v4264_v10, %v8936_v58  ;;  %v4945_v58 = vpack.c.bf16 %v4921_v18, %v4920_v15 }
 0x4a6   : > { %v4866_v6 = vadd.f32 %v9179_v26, %v4606_v7 }
 0x4a8   : > { %v9226_v48 = vadd.f32 %v5042_v43, %v4866_v6  ;;  %v9232_v43 = vpack.c.bf16 %v4665_v30, %v4664_v29  ;;  %v4923_v30 = vld [vmem:[#allocation2 + $0xfe] sm:$0xff]  ;;  %v4922_v29 = vld [vmem:[#allocation2 + $0xf6] sm:$0xff] }
 0x4ab   : > { %v4524_v24 = vpop.f32.mrf.mxu2  ;;  %v9228_v51 = vpop.f32.mrf.mxu3 }
 0x4ac   : > { %v4607_v39 = vadd.f32 %v4524_v24, %v4347_v50  ;;  %v4267_v46 = vpop.f32.mrf.mxu1  ;;  %v5047_v22 = vpop.f32.mrf.mxu0  ;;  %v4143_v24 = vld [vmem:[#allocation2 + $0xec] sm:$0xff] }
 0x4ad   : > { %v4348_v47 = vadd.f32 %v4267_v46, %v8938_v61  ;;  %v4667_v46 = vld [vmem:[#allocation2 + $0x11d] sm:$0xff] }
 0x4ae   : > { %v4867_v26 = vadd.f32 %v9188_v3, %v4607_v39 }
 0x4af   : > { %7203 = vmatmul.msk.bf16.gmra.mxu1 %vm3114_vm3, %v4165_v13  ;;  %7293 = vmatmul.msk.bf16.gmra.mxu0 %vm3114_vm3, %v4945_v58  ;;  %v4142_v13 = vld [vmem:[#allocation2 + $0xe4] sm:$0xff] }
 0x4b0   : > { %7233 = vmatmul.msk.bf16.gmra.mxu2 %vm3114_vm3, %v9169_v14  ;;  %7265 = vmatmul.msk.bf16.gmra.mxu3 %vm3114_vm3, %v9232_v43  ;;  %v9240_v27 = vadd.f32 %v5044_v2, %v4867_v26  ;;  %v4166_v58 = vpack.c.bf16 %v4143_v24, %v4142_v13  ;;  %v4666_v26 = vld [vmem:[#allocation2 + $0x115] sm:$0xff] }
 0x4b3   : > { %v4527_v61 = vpop.f32.mrf.mxu2  ;;  %v9242_v7 = vpop.f32.mrf.mxu3 }
 0x4b4   : > { %v4608_v10 = vadd.f32 %v4527_v61, %v4348_v47  ;;  %v4269_v50 = vpop.f32.mrf.mxu1  ;;  %v5049_v3 = vpop.f32.mrf.mxu0 }
 0x4b5   : > { %v4349_v6 = vadd.f32 %v4269_v50, %v8947_v60  ;;  %v4946_v60 = vpack.c.bf16 %v4923_v30, %v4922_v29 }
 0x4b6   : > { %v4868_v49 = vadd.f32 %v9202_v40, %v4608_v10 }
 0x4b8   : > { %v9246_v18 = vadd.f32 %v5047_v22, %v4868_v49  ;;  %v9252_v22 = vpack.c.bf16 %v4667_v46, %v4666_v26  ;;  %v4925_v46 = vld [vmem:[#allocation2 + $0x10e] sm:$0xff]  ;;  %v4924_v26 = vld [vmem:[#allocation2 + $0x106] sm:$0xff] }
 0x4bb   : > { %v4529_v14 = vpop.f32.mrf.mxu2  ;;  %v9248_v39 = vpop.f32.mrf.mxu3 }
 0x4bc   : > { %v4609_v2 = vadd.f32 %v4529_v14, %v4349_v6  ;;  %v4272_v59 = vpop.f32.mrf.mxu1  ;;  %v5052_v15 = vpop.f32.mrf.mxu0  ;;  %v4145_v14 = vld [vmem:[#allocation2 + $0xfc] sm:$0xff] }
 0x4bd   : > { %v4350_v47 = vadd.f32 %v4272_v59, %v8949_v23  ;;  %v4669_v59 = vld [vmem:[#allocation2 + $0x12d] sm:$0xff] }
 0x4be   : > { %v4869_v40 = vadd.f32 %v9208_v11, %v4609_v2 }
 0x4bf   : > { %7204 = vmatmul.msk.bf16.gmra.mxu1 %vm3114_vm3, %v4166_v58  ;;  %7294 = vmatmul.msk.bf16.gmra.mxu0 %vm3114_vm3, %v4946_v60  ;;  %v4144_v58 = vld [vmem:[#allocation2 + $0xf4] sm:$0xff] }
 0x4c0   : > { %7234 = vmatmul.msk.bf16.gmra.mxu2 %vm3114_vm3, %v9192_v52  ;;  %7266 = vmatmul.msk.bf16.gmra.mxu3 %vm3114_vm3, %v9252_v22  ;;  %v9260_v61 = vadd.f32 %v5049_v3, %v4869_v40  ;;  %v4167_v60 = vpack.c.bf16 %v4145_v14, %v4144_v58  ;;  %v4668_v40 = vld [vmem:[#allocation2 + $0x125] sm:$0xff]  ;;  %v4671_v58 = vld [vmem:[#allocation2 + $0x13d] sm:$0xff] }
 0x4c3   : > { %v4532_v23 = vpop.f32.mrf.mxu2  ;;  %v9262_v10 = vpop.f32.mrf.mxu3 }
 0x4c4   : > { %v4610_v50 = vadd.f32 %v4532_v23, %v4350_v47  ;;  %v4274_v6 = vpop.f32.mrf.mxu1  ;;  %v5054_v11 = vpop.f32.mrf.mxu0 }
 0x4c5   : > { %v4351_v49 = vadd.f32 %v4274_v6, %v8958_v9  ;;  %v4947_v9 = vpack.c.bf16 %v4925_v46, %v4924_v26 }
 0x4c6   : > { %v4870_v24 = vadd.f32 %v9222_v5, %v4610_v50 }
 0x4c8   : > { %v9266_v30 = vadd.f32 %v5052_v15, %v4870_v24  ;;  %v9272_v15 = vpack.c.bf16 %v4669_v59, %v4668_v40  ;;  %v4927_v59 = vld [vmem:[#allocation2 + $0x11e] sm:$0xff] }
 0x4c9   : > { %v4146_v40 = vld [vmem:[#allocation2 + $0x104] sm:$0xff] }
 0x4cb   : > { %v4534_v52 = vpop.f32.mrf.mxu2  ;;  %v9268_v2 = vpop.f32.mrf.mxu3 }
 0x4cc   : > { %v4611_v3 = vadd.f32 %v4534_v52, %v4351_v49  ;;  %v4277_v13 = vpop.f32.mrf.mxu1  ;;  %v5057_v29 = vpop.f32.mrf.mxu0  ;;  %v4147_v52 = vld [vmem:[#allocation2 + $0x10c] sm:$0xff] }
 0x4cd   : > { %v4352_v47 = vadd.f32 %v4277_v13, %v8960_v28  ;;  %v4670_v13 = vld [vmem:[#allocation2 + $0x135] sm:$0xff] }
 0x4ce   : > { %v4871_v5 = vadd.f32 %v9228_v51, %v4611_v3 }
 0x4cf   : > { %7205 = vmatmul.msk.bf16.gmra.mxu1 %vm3114_vm3, %v4167_v60  ;;  %7295 = vmatmul.msk.bf16.gmra.mxu0 %vm3114_vm3, %v4947_v9 }
 0x4d0   : > { %7235 = vmatmul.msk.bf16.gmra.mxu2 %vm3114_vm3, %v9212_v56  ;;  %7267 = vmatmul.msk.bf16.gmra.mxu3 %vm3114_vm3, %v9272_v15  ;;  %v9280_v23 = vadd.f32 %v5054_v11, %v4871_v5  ;;  %v4168_v5 = vpack.c.bf16 %v4147_v52, %v4146_v40  ;;  %v4928_v40 = vld [vmem:[#allocation2 + $0x126] sm:$0xff] }
 0x4d3   : > { %v4537_v28 = vpop.f32.mrf.mxu2  ;;  %v4807_v50 = vpop.f32.mrf.mxu3 }
 0x4d4   : > { %v4612_v6 = vadd.f32 %v4537_v28, %v4352_v47  ;;  %v4279_v49 = vpop.f32.mrf.mxu1  ;;  %v5059_v24 = vpop.f32.mrf.mxu0  ;;  %v4926_v47 = vld [vmem:[#allocation2 + $0x116] sm:$0xff] }
 0x4d5   : > { %v4353_v51 = vadd.f32 %v4279_v49, %v8972_v54  ;;  %v4948_v54 = vpack.c.bf16 %v4927_v59, %v4926_v47 }
 0x4d6   : > { %v4872_v14 = vadd.f32 %v9242_v7, %v4612_v6 }
 0x4d8   : > { %v9284_v46 = vadd.f32 %v5057_v29, %v4872_v14  ;;  %v9290_v29 = vpack.c.bf16 %v4671_v58, %v4670_v13 }
 0x4db   : > { %v4539_v3 = vpop.f32.mrf.mxu2  ;;  %v9286_v56 = vpop.f32.mrf.mxu3 }
 0x4dc   : > { %v4613_v11 = vadd.f32 %v4539_v3, %v4353_v51  ;;  %v4282_v26 = vpop.f32.mrf.mxu1  ;;  %v5062_v60 = vpop.f32.mrf.mxu0  ;;  %v4149_v3 = vld [vmem:[#allocation2 + $0x11c] sm:$0xff] }
 0x4dd   : > { %v4354_v9 = vadd.f32 %v4282_v26, %v8976_v1  ;;  %v4148_v26 = vld [vmem:[#allocation2 + $0x114] sm:$0xff] }
 0x4de   : > { %v4873_v7 = vadd.f32 %v9248_v39, %v4613_v11 }
 0x4df   : > { %7206 = vmatmul.msk.bf16.gmra.mxu1 %vm3114_vm3, %v4168_v5  ;;  %7296 = vmatmul.msk.bf16.gmra.mxu0 %vm3114_vm3, %v4948_v54 }
 0x4e0   : > { %7236 = vmatmul.msk.bf16.gmra.mxu2 %vm3114_vm3, %v9232_v43  ;;  %7268 = vmatmul.msk.bf16.gmra.mxu3 %vm3114_vm3, %v9290_v29  ;;  %v9298_v28 = vadd.f32 %v5059_v24, %v4873_v7  ;;  %v4929_v43 = vld [vmem:[#allocation2 + $0x12e] sm:$0xff] }
 0x4e1   : > { %v4949_v5 = vpack.c.bf16 %v4929_v43, %v4928_v40  ;;  %v4151_v43 = vld [vmem:[#allocation2 + $0x12c] sm:$0xff] }
 0x4e3   : > { %v4542_v6 = vpop.f32.mrf.mxu2  ;;  %v4812_v1 = vpop.f32.mrf.mxu3 }
 0x4e4   : > { %v4614_v49 = vadd.f32 %v4542_v6, %v4354_v9  ;;  %v4284_v51 = vpop.f32.mrf.mxu1  ;;  %v9300_v14 = vpop.f32.mrf.mxu0  ;;  %v4169_v9 = vpack.c.bf16 %v4149_v3, %v4148_v26 }
 0x4e5   : > { %v9303_v39 = vadd.f32 %v4284_v51, %v8985_v0  ;;  %v4672_v0 = vld [vmem:[#allocation2 + $0x145] sm:$0xff] }
 0x4e6   : > { %v4874_v52 = vadd.f32 %v9262_v10, %v4614_v49  ;;  %v4673_v10 = vld [vmem:[#allocation2 + $0x14d] sm:$0xff] }
 0x4e8   : > { %v9306_v59 = vadd.f32 %v5062_v60, %v4874_v52  ;;  %v4691_v60 = vpack.c.bf16 %v4673_v10, %v4672_v0 }
 0x4eb   : > { %v9308_v13 = vpop.f32.mrf.mxu2  ;;  %v9310_v58 = vpop.f32.mrf.mxu3 }
 0x4ec   : > { %v4287_v24 = vpop.f32.mrf.mxu1  ;;  %v5067_v11 = vpop.f32.mrf.mxu0 }
 0x4ed   : > { %v4356_v47 = vadd.f32 %v4287_v24, %v8989_v35  ;;  %v4930_v24 = vld [vmem:[#allocation2 + $0x136] sm:$0xff] }
 0x4ef   : > { %7207 = vmatmul.msk.bf16.gmra.mxu1 %vm3114_vm3, %v4169_v9  ;;  %7297 = vmatmul.msk.bf16.gmra.mxu0 %vm3114_vm3, %v4949_v5  ;;  %v4150_v5 = vld [vmem:[#allocation2 + $0x124] sm:$0xff] }
 0x4f0   : > { %7237 = vmatmul.msk.bf16.gmra.mxu2 %vm3114_vm3, %v9252_v22  ;;  %7269 = vmatmul.msk.bf16.gmra.mxu3 %vm3114_vm3, %v4691_v60  ;;  %v4931_v22 = vld [vmem:[#allocation2 + $0x13e] sm:$0xff]  ;;  %v4170_v0 = vpack.c.bf16 %v4151_v43, %v4150_v5  ;;  %v4932_v43 = vld [vmem:[#allocation2 + $0x146] sm:$0xff] }
 0x4f1   : > { %v4950_v10 = vpack.c.bf16 %v4931_v22, %v4930_v24  ;;  %v4933_v24 = vld [vmem:[#allocation2 + $0x14e] sm:$0xff] }
 0x4f3   : > { %v4547_v54 = vpop.f32.mrf.mxu2  ;;  %v4817_v35 = vpop.f32.mrf.mxu3 }
 0x4f4   : > { %v4616_v7 = vadd.f32 %v4547_v54, %v4356_v47  ;;  %v4289_v6 = vpop.f32.mrf.mxu1  ;;  %v9318_v49 = vpop.f32.mrf.mxu0 }
 0x4f5   : > { %v9321_v51 = vadd.f32 %v4289_v6, %v9010_v31  ;;  %v7432_v31 = vld [vmem:[%s10489_s9] sm:$0xff] }
 0x4f6   : > { %v4876_v52 = vadd.f32 %v4807_v50, %v4616_v7  ;;  %5831 = vmatpush.bf16.msrb.mxu0 %v7432_v31  ;;  %v4152_v31 = vld [vmem:[#allocation2 + $0x134] sm:$0xff] }
 0x4f8   : > { %v9323_v3 = vadd.f32 %v5067_v11, %v4876_v52  ;;  %v7430_v52 = vld [vmem:[%s10487_s7] sm:$0xff] }
 0x4f9   : > { %5712 = vmatpush.bf16.msrb.mxu3 %v7430_v52 }
 0x4fb   : > { %v9325_v26 = vpop.f32.mrf.mxu2  ;;  %v9331_v60 = vpop.f32.mrf.mxu3 }
 0x4fc   : > { %v4292_v40 = vpop.f32.mrf.mxu1  ;;  %v5072_v9 = vpop.f32.mrf.mxu0 }
 0x4fd   : > { %v4358_v47 = vadd.f32 %v4292_v40, %v9015_v37  ;;  %v4153_v40 = vld [vmem:[#allocation2 + $0x13c] sm:$0xff] }
 0x4ff   : > { %7208 = vmatmul.msk.bf16.gmra.mxu1 %vm3114_vm3, %v4170_v0  ;;  %7298 = vmatmul.msk.bf16.gmra.mxu0 %vm3114_vm3, %v4950_v10 }
 0x500   : > { %7238 = vmatmul.msk.bf16.gmra.mxu2 %vm3114_vm3, %v9272_v15 }
 0x503   : > { %v4552_v50 = vpop.f32.mrf.mxu2  ;;  %v4822_v15 = vpop.f32.mrf.mxu3 }
 0x504   : > { %v4618_v11 = vadd.f32 %v4552_v50, %v4358_v47  ;;  %v4294_v54 = vpop.f32.mrf.mxu1  ;;  %v9337_v37 = vpop.f32.mrf.mxu0  ;;  %v4951_v47 = vpack.c.bf16 %v4933_v24, %v4932_v43 }
 0x505   : > { %v9340_v7 = vadd.f32 %v4294_v54, %v9027_v16 }
 0x506   : > { %v4878_v6 = vadd.f32 %v4812_v1, %v4618_v11  ;;  %v4171_v1 = vpack.c.bf16 %v4153_v40, %v4152_v31  ;;  %v5159_v40 = vld [vmem:[#allocation2 + $0x3f] sm:$0xff]  ;;  %v5158_v31 = vld [vmem:[#allocation2 + $0x37] sm:$0xff] }
 0x508   : > { %v9345_v22 = vadd.f32 %v5072_v9, %v4878_v6 }
 0x50b   : > { %v9347_v5 = vpop.f32.mrf.mxu2  ;;  %v9354_v9 = vpop.f32.mrf.mxu3 }
 0x50c   : > { %v4297_v0 = vpop.f32.mrf.mxu1  ;;  %v5077_v10 = vpop.f32.mrf.mxu0  ;;  %10513 = vst [vmem:[#allocation4_spill] sm:$0xff] %v9354_v9 }
 0x50d   : > { %v4360_v16 = vadd.f32 %v4297_v0, %v9030_v21  ;;  %v7428_v21 = vld [vmem:[%s10485_s5] sm:$0xff] }
 0x50e   : > { %5593 = vmatpush.bf16.msrb.mxu2 %v7428_v21 }
 0x50f   : > { %7209 = vmatmul.msk.bf16.gmra.mxu1 %vm3114_vm3, %v4171_v1  ;;  %7299 = vmatmul.msk.bf16.gmra.mxu0 %vm3114_vm3, %v4951_v47 }
 0x510   : > { %7239 = vmatmul.msk.bf16.gmra.mxu2 %vm3114_vm3, %v9290_v29 }
 0x513   : > { %v4557_v50 = vpop.f32.mrf.mxu2 }
 0x514   : > { %v4620_v11 = vadd.f32 %v4557_v50, %v4360_v16  ;;  %v4299_v54 = vpop.f32.mrf.mxu1  ;;  %v9356_v6 = vpop.f32.mrf.mxu0  ;;  %v5194_v50 = vpack.c.bf16 %v5159_v40, %v5158_v31 }
 0x515   : > { %10514 = vst [vmem:[#allocation5_spill] sm:$0xff] %v9356_v6  ;;  %v9359_v52 = vadd.f32 %v4299_v54, %v9042_v62  ;;  %v4827_v16 = vpop.f32.mrf.mxu3  ;;  %v5161_v6 = vld [vmem:[#allocation2 + $0x4f] sm:$0xff] }
 0x516   : > { %v4880_v43 = vadd.f32 %v4817_v35, %v4620_v11 }
 0x518   : > { %v9364_v24 = vadd.f32 %v5077_v10, %v4880_v43 }
 0x51a   : > { %10515 = vst [vmem:[#allocation6_spill] sm:$0xff] %v9364_v24 }
 0x51b   : > { %v9366_v29 = vpop.f32.mrf.mxu2 }
 0x51c   : > { %v4302_v47 = vpop.f32.mrf.mxu1  ;;  %v5082_v0 = vpop.f32.mrf.mxu0 }
 0x51d   : > { %v4362_v1 = vadd.f32 %v4302_v47, %v9045_v42  ;;  %v9375_v21 = vpop.f32.mrf.mxu3  ;;  %v5160_v47 = vld [vmem:[#allocation2 + $0x47] sm:$0xff] }
 0x51e   : > { %10517 = vst [vmem:[#allocation8_spill] sm:$0xff] %v9375_v21  ;;  %v5163_v21 = vld [vmem:[#allocation2 + $0x5f] sm:$0xff] }
 0x51f   : > { %7312 = vmatmul.msk.bf16.vlgmr.msrb.gmra.mxu1 %vm3114_vm3, %v5194_v50 }
 0x523   : > { %v4562_v62 = vpop.f32.mrf.mxu2 }
 0x524   : > { %v4622_v35 = vadd.f32 %v4562_v62, %v4362_v1  ;;  %v4304_v11 = vpop.f32.mrf.mxu1  ;;  %v9370_v54 = vpop.f32.mrf.mxu0  ;;  %v5195_v1 = vpack.c.bf16 %v5161_v6, %v5160_v47 }
 0x525   : > { %10516 = vst [vmem:[#allocation7_spill] sm:$0xff] %v9370_v54  ;;  %v9373_v10 = vadd.f32 %v4304_v11, %v9058_v12  ;;  %v4832_v50 = vpop.f32.mrf.mxu3 }
 0x526   : > { %v4882_v43 = vadd.f32 %v4822_v15, %v4622_v35 }
 0x528   : > { %v9377_v9 = vadd.f32 %v5082_v0, %v4882_v43 }
 0x52a   : > { %10518 = vst [vmem:[#allocation9_spill] sm:$0xff] %v9377_v9 }
 0x52b   : > { %v9379_v24 = vpop.f32.mrf.mxu2 }
 0x52c   : > { %v4307_v42 = vpop.f32.mrf.mxu1  ;;  %v5087_v40 = vpop.f32.mrf.mxu0 }
 0x52d   : > { %v4364_v31 = vadd.f32 %v4307_v42, %v9060_v36  ;;  %v9390_v54 = vpop.f32.mrf.mxu3  ;;  %v5162_v42 = vld [vmem:[#allocation2 + $0x57] sm:$0xff] }
 0x52e   : > { %10521 = vst [vmem:[#allocation12_spill] sm:$0xff] %v9390_v54  ;;  %v5165_v54 = vld [vmem:[#allocation2 + $0x6f] sm:$0xff] }
 0x52f   : > { %7313 = vmatmul.msk.bf16.gmra.mxu1 %vm3114_vm3, %v5195_v1 }
 0x533   : > { %v4567_v62 = vpop.f32.mrf.mxu2 }
 0x534   : > { %v4624_v12 = vadd.f32 %v4567_v62, %v4364_v31  ;;  %v4309_v11 = vpop.f32.mrf.mxu1  ;;  %v9383_v15 = vpop.f32.mrf.mxu0  ;;  %v5196_v31 = vpack.c.bf16 %v5163_v21, %v5162_v42  ;;  %v5164_v21 = vld [vmem:[#allocation2 + $0x67] sm:$0xff] }
 0x535   : > { %10519 = vst [vmem:[#allocation10_spill] sm:$0xff] %v9383_v15  ;;  %v9386_v0 = vadd.f32 %v4309_v11, %v9073_v53  ;;  %v5197_v42 = vpack.c.bf16 %v5165_v54, %v5164_v21 }
 0x536   : > { %v4884_v35 = vadd.f32 %v4827_v16, %v4624_v12  ;;  %v4837_v16 = vpop.f32.mrf.mxu3 }
 0x538   : > { %v9388_v43 = vadd.f32 %v5087_v40, %v4884_v35 }
 0x53a   : > { %10520 = vst [vmem:[#allocation11_spill] sm:$0xff] %v9388_v43 }
 0x53b   : > { %v9392_v9 = vpop.f32.mrf.mxu2 }
 0x53c   : > { %v4312_v36 = vpop.f32.mrf.mxu1  ;;  %v5092_v6 = vpop.f32.mrf.mxu0 }
 0x53d   : > { %v4366_v47 = vadd.f32 %v4312_v36, %v9075_v41 }
 0x53f   : > { %7314 = vmatmul.msk.bf16.gmra.mxu1 %vm3114_vm3, %v5196_v31 }
 0x543   : > { %v4572_v1 = vpop.f32.mrf.mxu2 }
 0x544   : > { %v4626_v62 = vadd.f32 %v4572_v1, %v4366_v47  ;;  %v4314_v53 = vpop.f32.mrf.mxu1  ;;  %v9396_v11 = vpop.f32.mrf.mxu0 }
 0x545   : > { %10522 = vst [vmem:[#allocation13_spill] sm:$0xff] %v9396_v11  ;;  %v9399_v40 = vadd.f32 %v4314_v53, %v9088_v17  ;;  %v9406_v47 = vpop.f32.mrf.mxu3  ;;  %v5167_v11 = vld [vmem:[#allocation2 + $0x7f] sm:$0xff] }
 0x546   : > { %v4886_v12 = vadd.f32 %v4832_v50, %v4626_v62 }
 0x548   : > { %v9401_v35 = vadd.f32 %v5092_v6, %v4886_v12 }
 0x54a   : > { %10523 = vst [vmem:[#allocation14_spill] sm:$0xff] %v9401_v35 }
 0x54b   : > { %v9403_v15 = vpop.f32.mrf.mxu2 }
 0x54c   : > { %v4317_v43 = vpop.f32.mrf.mxu1  ;;  %v5097_v41 = vpop.f32.mrf.mxu0 }
 0x54d   : > { %v4368_v36 = vadd.f32 %v4317_v43, %v9090_v32  ;;  %v4842_v12 = vpop.f32.mrf.mxu3  ;;  %v5166_v43 = vld [vmem:[#allocation2 + $0x77] sm:$0xff] }
 0x54f   : > { %7315 = vmatmul.msk.bf16.gmra.mxu1 %vm3114_vm3, %v5197_v42  ;;  %v5198_v42 = vpack.c.bf16 %v5167_v11, %v5166_v43  ;;  %v5168_v11 = vld [vmem:[#allocation2 + $0x87] sm:$0xff] }
 0x553   : > { %v4577_v31 = vpop.f32.mrf.mxu2 }
 0x554   : > { %v4628_v1 = vadd.f32 %v4577_v31, %v4368_v36  ;;  %v4319_v17 = vpop.f32.mrf.mxu1  ;;  %v9409_v53 = vpop.f32.mrf.mxu0 }
 0x555   : > { %10524 = vst [vmem:[#allocation15_spill] sm:$0xff] %v9409_v53  ;;  %v9412_v50 = vadd.f32 %v4319_v17, %v9103_v45  ;;  %v9420_v36 = vpop.f32.mrf.mxu3  ;;  %v5169_v53 = vld [vmem:[#allocation2 + $0x8f] sm:$0xff] }
 0x556   : > { %v4888_v6 = vadd.f32 %v4837_v16, %v4628_v1  ;;  %10526 = vst [vmem:[#allocation17_spill] sm:$0xff] %v9420_v36 }
 0x558   : > { %v9414_v62 = vadd.f32 %v5097_v41, %v4888_v6 }
 0x55a   : > { %10525 = vst [vmem:[#allocation16_spill] sm:$0xff] %v9414_v62 }
 0x55b   : > { %v9416_v35 = vpop.f32.mrf.mxu2 }
 0x55c   : > { %v4322_v32 = vpop.f32.mrf.mxu1  ;;  %v5102_v54 = vpop.f32.mrf.mxu0 }
 0x55d   : > { %v4370_v21 = vadd.f32 %v4322_v32, %v9105_v63  ;;  %v4847_v32 = vpop.f32.mrf.mxu3 }
 0x55f   : > { %7316 = vmatmul.msk.bf16.gmra.mxu1 %vm3114_vm3, %v5198_v42  ;;  %v5199_v42 = vpack.c.bf16 %v5169_v53, %v5168_v11  ;;  %v5170_v53 = vld [vmem:[#allocation2 + $0x97] sm:$0xff] }
 0x563   : > { %v4582_v31 = vpop.f32.mrf.mxu2 }
 0x564   : > { %v4630_v45 = vadd.f32 %v4582_v31, %v4370_v21  ;;  %v4324_v17 = vpop.f32.mrf.mxu1  ;;  %v9425_v41 = vpop.f32.mrf.mxu0 }
 0x565   : > { %v9423_v16 = vadd.f32 %v4324_v17, %v9118_v55  ;;  %10527 = vst [vmem:[#allocation18_spill] sm:$0xff] %v9425_v41  ;;  %v5171_v41 = vld [vmem:[#allocation2 + $0x9f] sm:$0xff] }
 0x566   : > { %v4890_v1 = vadd.f32 %v4842_v12, %v4630_v45  ;;  %v5200_v11 = vpack.c.bf16 %v5171_v41, %v5170_v53  ;;  %v5172_v41 = vld [vmem:[#allocation2 + $0xa7] sm:$0xff] }
 0x568   : > { %v9427_v6 = vadd.f32 %v5102_v54, %v4890_v1  ;;  %v9436_v54 = vpop.f32.mrf.mxu3 }
 0x56a   : > { %10528 = vst [vmem:[#allocation19_spill] sm:$0xff] %v9427_v6 }
 0x56b   : > { %v9429_v62 = vpop.f32.mrf.mxu2 }
 0x56c   : > { %v4327_v63 = vpop.f32.mrf.mxu1  ;;  %v5107_v36 = vpop.f32.mrf.mxu0 }
 0x56d   : > { %v4372_v43 = vadd.f32 %v4327_v63, %v9120_v44 }
 0x56f   : > { %7317 = vmatmul.msk.bf16.gmra.mxu1 %vm3114_vm3, %v5199_v42 }
 0x573   : > { %v4587_v21 = vpop.f32.mrf.mxu2 }
 0x574   : > { %v4632_v55 = vadd.f32 %v4587_v21, %v4372_v43  ;;  %v4329_v31 = vpop.f32.mrf.mxu1  ;;  %v9440_v1 = vpop.f32.mrf.mxu0 }
 0x575   : > { %v9434_v17 = vadd.f32 %v4329_v31, %v9133_v34  ;;  %10530 = vst [vmem:[#allocation21_spill] sm:$0xff] %v9440_v1  ;;  %v4852_v43 = vpop.f32.mrf.mxu3 }
 0x576   : > { %v4892_v12 = vadd.f32 %v4847_v32, %v4632_v55 }
 0x578   : > { %v9438_v45 = vadd.f32 %v5107_v36, %v4892_v12  ;;  %v5173_v12 = vld [vmem:[#allocation2 + $0xaf] sm:$0xff] }
 0x57a   : > { %10529 = vst [vmem:[#allocation20_spill] sm:$0xff] %v9438_v45 }
 0x57b   : > { %v9442_v6 = vpop.f32.mrf.mxu2 }
 0x57c   : > { %v4332_v44 = vpop.f32.mrf.mxu1  ;;  %v5112_v34 = vpop.f32.mrf.mxu0 }
 0x57d   : > { %v4374_v63 = vadd.f32 %v4332_v44, %v9137_v8  ;;  %v9451_v1 = vpop.f32.mrf.mxu3 }
 0x57e   : > { %10532 = vst [vmem:[#allocation23_spill] sm:$0xff] %v9451_v1 }
 0x57f   : > { %7318 = vmatmul.msk.bf16.gmra.mxu1 %vm3114_vm3, %v5200_v11  ;;  %v5201_v11 = vpack.c.bf16 %v5173_v12, %v5172_v41  ;;  %v9469_v12 = vld [vmem:[%s10484_s4] ss:$0 sm:$0xff] }
 0x583   : > { %v4592_v42 = vpop.f32.mrf.mxu2 }
 0x584   : > { %v4634_v32 = vadd.f32 %v4592_v42, %v4374_v63  ;;  %v4334_v21 = vpop.f32.mrf.mxu1  ;;  %v9455_v44 = vpop.f32.mrf.mxu0 }
 0x585   : > { %v9447_v36 = vadd.f32 %v4334_v21, %v9156_v33  ;;  %10534 = vst [vmem:[#allocation25_spill] sm:$0xff] %v9455_v44  ;;  %v4857_v33 = vpop.f32.mrf.mxu3 }
 0x586   : > { %v4894_v55 = vadd.f32 %v4852_v43, %v4634_v32 }
 0x588   : > { %v9449_v31 = vadd.f32 %v5112_v34, %v4894_v55 }
 0x58a   : > { %10531 = vst [vmem:[#allocation22_spill] sm:$0xff] %v9449_v31  ;;  %v5175_v31 = vld [vmem:[#allocation2 + $0xbf] sm:$0xff] }
 0x58b   : > { %v9453_v45 = vpop.f32.mrf.mxu2 }
 0x58c   : > { %10533 = vst [vmem:[#allocation24_spill] sm:$0xff] %v9453_v45  ;;  %v4337_v8 = vpop.f32.mrf.mxu1  ;;  %v5117_v32 = vpop.f32.mrf.mxu0  ;;  %v5174_v45 = vld [vmem:[#allocation2 + $0xb7] sm:$0xff] }
 0x58d   : > { %v4376_v53 = vadd.f32 %v4337_v8, %v9163_v38  ;;  %v5202_v44 = vpack.c.bf16 %v5175_v31, %v5174_v45 }
 0x58f   : > { %7319 = vmatmul.msk.bf16.gmra.mxu1 %vm3114_vm3, %v5201_v11 }
 0x593   : > { %v4597_v63 = vpop.f32.mrf.mxu2 }
 0x594   : > { %v4636_v42 = vadd.f32 %v4597_v63, %v4376_v53  ;;  %v4339_v43 = vpop.f32.mrf.mxu1 }
 0x595   : > { %v9460_v34 = vadd.f32 %v4339_v43, %v9177_v20 }
 0x596   : > { %v4896_v21 = vadd.f32 %v4857_v33, %v4636_v42  ;;  %v5177_v33 = vld [vmem:[#allocation2 + $0xcf] sm:$0xff] }
 0x598   : > { %v9462_v55 = vadd.f32 %v5117_v32, %v4896_v21 }
 0x59c   : > { %v5292_v1 = vpop.f32.mrf.mxu1 }
 0x59d   : > { %v5382_v38 = vadd.f32 %v5292_v1, %v9186_v19 }
 0x59f   : > { %7320 = vmatmul.msk.bf16.gmra.mxu1 %vm3114_vm3, %v5202_v44  ;;  %v5422_v20 = vadd.f32 %v9469_v12, %v5382_v38  ;;  %v5176_v44 = vld [vmem:[#allocation2 + $0xc7] sm:$0xff] }
 0x5a0   : > { %v5203_v19 = vpack.c.bf16 %v5177_v33, %v5176_v44 }
 0x5a1   : > { %v5458_v11 = vmax.f32 %v5422_v20, 0.0 }
 0x5a4   : > { %v5294_v8 = vpop.f32.mrf.mxu1 }
 0x5a5   : > { %v5383_v41 = vadd.f32 %v5294_v8, %v9200_v57  ;;  %v5179_v8 = vld [vmem:[#allocation2 + $0xdf] sm:$0xff] }
 0x5a7   : > { %v5423_v53 = vadd.f32 %v9469_v12, %v5383_v41 }
 0x5a9   : > { %v5459_v63 = vmax.f32 %v5423_v53, 0.0  ;;  %v5178_v53 = vld [vmem:[#allocation2 + $0xd7] sm:$0xff] }
 0x5ab   : > { %v5494_v45 = vpack.c.bf16 %v5459_v63, %v5458_v11  ;;  %v5204_v11 = vpack.c.bf16 %v5179_v8, %v5178_v53 }
 0x5ac   : > { %v5297_v31 = vpop.f32.mrf.mxu1 }
 0x5ad   : > { %7338 = vmatmul.msk.bf16.vlgmr.msrb.gmra.mxu2 %vm3114_vm3, %v5494_v45  ;;  %7364 = vmatmul.msk.bf16.vlgmr.msrb.gmra.mxu3 %vm3114_vm3, %v5494_v45  ;;  %v5384_v1 = vadd.f32 %v5297_v31, %v9206_v4 }
 0x5ae   : > { %7390 = vmatmul.msk.bf16.vlgmr.msrb.gmra.mxu0 %vm3114_vm3, %v5494_v45 }
 0x5af   : > { %7321 = vmatmul.msk.bf16.gmra.mxu1 %vm3114_vm3, %v5203_v19  ;;  %v5424_v42 = vadd.f32 %v9469_v12, %v5384_v1  ;;  %v5181_v19 = vld [vmem:[#allocation2 + $0xef] sm:$0xff] }
 0x5b1   : > { %v5460_v21 = vmax.f32 %v5424_v42, 0.0  ;;  %v5180_v42 = vld [vmem:[#allocation2 + $0xe7] sm:$0xff] }
 0x5b4   : > { %v5299_v57 = vpop.f32.mrf.mxu1 }
 0x5b5   : > { %v5385_v43 = vadd.f32 %v5299_v57, %v9220_v25 }
 0x5b7   : > { %v5425_v32 = vadd.f32 %v9469_v12, %v5385_v43  ;;  %v5205_v43 = vpack.c.bf16 %v5181_v19, %v5180_v42  ;;  %v5185_v19 = vld [vmem:[#allocation2 + $0x10f] sm:$0xff]  ;;  %v5184_v42 = vld [vmem:[#allocation2 + $0x107] sm:$0xff] }
 0x5b9   : > { %v5461_v38 = vmax.f32 %v5425_v32, 0.0 }
 0x5bb   : > { %v5495_v20 = vpack.c.bf16 %v5461_v38, %v5460_v21 }
 0x5bc   : > { %v5302_v41 = vpop.f32.mrf.mxu1 }
 0x5bd   : > { %7339 = vmatmul.msk.bf16.gmra.mxu2 %vm3114_vm3, %v5495_v20  ;;  %7365 = vmatmul.msk.bf16.gmra.mxu3 %vm3114_vm3, %v5495_v20  ;;  %v5386_v4 = vadd.f32 %v5302_v41, %v9226_v48  ;;  %v5183_v41 = vld [vmem:[#allocation2 + $0xff] sm:$0xff] }
 0x5be   : > { %7391 = vmatmul.msk.bf16.gmra.mxu0 %vm3114_vm3, %v5495_v20 }
 0x5bf   : > { %7322 = vmatmul.msk.bf16.gmra.mxu1 %vm3114_vm3, %v5204_v11  ;;  %v5426_v63 = vadd.f32 %v9469_v12, %v5386_v4  ;;  %v5182_v4 = vld [vmem:[#allocation2 + $0xf7] sm:$0xff] }
 0x5c1   : > { %v5462_v31 = vmax.f32 %v5426_v63, 0.0 }
 0x5c4   : > { %v5304_v25 = vpop.f32.mrf.mxu1 }
 0x5c5   : > { %v5387_v33 = vadd.f32 %v5304_v25, %v9240_v27  ;;  %v5206_v25 = vpack.c.bf16 %v5183_v41, %v5182_v4 }
 0x5c7   : > { %v5427_v45 = vadd.f32 %v9469_v12, %v5387_v33 }
 0x5c9   : > { %v5463_v44 = vmax.f32 %v5427_v45, 0.0 }
 0x5cb   : > { %v5496_v1 = vpack.c.bf16 %v5463_v44, %v5462_v31 }
 0x5cc   : > { %v5307_v57 = vpop.f32.mrf.mxu1 }
 0x5cd   : > { %7340 = vmatmul.msk.bf16.gmra.mxu2 %vm3114_vm3, %v5496_v1  ;;  %7366 = vmatmul.msk.bf16.gmra.mxu3 %vm3114_vm3, %v5496_v1  ;;  %v5388_v48 = vadd.f32 %v5307_v57, %v9246_v18 }
 0x5ce   : > { %7392 = vmatmul.msk.bf16.gmra.mxu0 %vm3114_vm3, %v5496_v1 }
 0x5cf   : > { %7323 = vmatmul.msk.bf16.gmra.mxu1 %vm3114_vm3, %v5205_v43  ;;  %v5428_v32 = vadd.f32 %v9469_v12, %v5388_v48  ;;  %v5207_v43 = vpack.c.bf16 %v5185_v19, %v5184_v42  ;;  %v5188_v19 = vld [vmem:[#allocation2 + $0x127] sm:$0xff] }
 0x5d1   : > { %v5464_v8 = vmax.f32 %v5428_v32, 0.0 }
 0x5d4   : > { %v5309_v27 = vpop.f32.mrf.mxu1 }
 0x5d5   : > { %v5389_v21 = vadd.f32 %v5309_v27, %v9260_v61 }
 0x5d7   : > { %v5429_v38 = vadd.f32 %v9469_v12, %v5389_v21 }
 0x5d9   : > { %v5465_v20 = vmax.f32 %v5429_v38, 0.0 }
 0x5db   : > { %v5497_v53 = vpack.c.bf16 %v5465_v20, %v5464_v8  ;;  %v5187_v8 = vld [vmem:[#allocation2 + $0x11f] sm:$0xff]  ;;  %v4615_v20 = vadd.f32 %v9308_v13, %v9303_v39 }
 0x5dc   : > { %v5312_v11 = vpop.f32.mrf.mxu1 }
 0x5dd   : > { %7341 = vmatmul.msk.bf16.gmra.mxu2 %vm3114_vm3, %v5497_v53  ;;  %7367 = vmatmul.msk.bf16.gmra.mxu3 %vm3114_vm3, %v5497_v53  ;;  %v5390_v18 = vadd.f32 %v5312_v11, %v9266_v30  ;;  %v5186_v11 = vld [vmem:[#allocation2 + $0x117] sm:$0xff] }
 0x5de   : > { %7393 = vmatmul.msk.bf16.gmra.mxu0 %vm3114_vm3, %v5497_v53 }
 0x5df   : > { %7324 = vmatmul.msk.bf16.gmra.mxu1 %vm3114_vm3, %v5206_v25  ;;  %v5430_v63 = vadd.f32 %v9469_v12, %v5390_v18 }
 0x5e1   : > { %v5466_v31 = vmax.f32 %v5430_v63, 0.0 }
 0x5e4   : > { %v5314_v61 = vpop.f32.mrf.mxu1 }
 0x5e5   : > { %v5391_v33 = vadd.f32 %v5314_v61, %v9280_v23 }
 0x5e7   : > { %v5431_v45 = vadd.f32 %v9469_v12, %v5391_v33 }
 0x5e9   : > { %v5467_v44 = vmax.f32 %v5431_v45, 0.0  ;;  %v5189_v45 = vld [vmem:[#allocation2 + $0x12f] sm:$0xff] }
 0x5eb   : > { %v5498_v1 = vpack.c.bf16 %v5467_v44, %v5466_v31  ;;  %v4617_v31 = vadd.f32 %v9325_v26, %v9321_v51 }
 0x5ec   : > { %v5317_v57 = vpop.f32.mrf.mxu1 }
 0x5ed   : > { %7342 = vmatmul.msk.bf16.gmra.mxu2 %vm3114_vm3, %v5498_v1  ;;  %7368 = vmatmul.msk.bf16.gmra.mxu3 %vm3114_vm3, %v5498_v1  ;;  %v5392_v30 = vadd.f32 %v5317_v57, %v9284_v46  ;;  %v5208_v46 = vpack.c.bf16 %v5187_v8, %v5186_v11  ;;  %v9544_v8 = vpop.f32.mrf.mxu0  ;;  %v9549_v11 = vpop.f32.mrf.mxu2 }
 0x5ee   : > { %7394 = vmatmul.msk.bf16.gmra.mxu0 %vm3114_vm3, %v5498_v1 }
 0x5ef   : > { %7325 = vmatmul.msk.bf16.gmra.mxu1 %vm3114_vm3, %v5207_v43  ;;  %v5432_v48 = vadd.f32 %v9469_v12, %v5392_v30 }
 0x5f1   : > { %v5468_v21 = vmax.f32 %v5432_v48, 0.0  ;;  %v5190_v48 = vld [vmem:[#allocation2 + $0x137] sm:$0xff] }
 0x5f4   : > { %v5319_v23 = vpop.f32.mrf.mxu1 }
 0x5f5   : > { %v5393_v27 = vadd.f32 %v5319_v23, %v9298_v28  ;;  %v4875_v28 = vadd.f32 %v9268_v2, %v4615_v20 }
 0x5f7   : > { %v5433_v32 = vadd.f32 %v9469_v12, %v5393_v27  ;;  %v5135_v25 = vadd.f32 %v9300_v14, %v4875_v28  ;;  %v5209_v14 = vpack.c.bf16 %v5189_v45, %v5188_v19  ;;  %v5191_v27 = vld [vmem:[#allocation2 + $0x13f] sm:$0xff]  ;;  %v5193_v28 = vld [vmem:[#allocation2 + $0x14f] sm:$0xff] }
 0x5f8   : > { %v10535_v19 = vld [vmem:[#allocation6_spill] sm:$0xff] }
 0x5f9   : > { %v5469_v38 = vmax.f32 %v5433_v32, 0.0  ;;  %v4619_v32 = vadd.f32 %v9347_v5, %v9340_v7 }
 0x5fb   : > { %v5499_v41 = vpack.c.bf16 %v5469_v38, %v5468_v21 }
 0x5fc   : > { %v5322_v53 = vpop.f32.mrf.mxu1 }
 0x5fd   : > { %7343 = vmatmul.msk.bf16.gmra.mxu2 %vm3114_vm3, %v5499_v41  ;;  %7369 = vmatmul.msk.bf16.gmra.mxu3 %vm3114_vm3, %v5499_v41  ;;  %v5394_v4 = vadd.f32 %v5322_v53, %v9306_v59  ;;  %v4877_v59 = vadd.f32 %v9286_v56, %v4617_v31 }
 0x5fe   : > { %7395 = vmatmul.msk.bf16.gmra.mxu0 %vm3114_vm3, %v5499_v41 }
 0x5ff   : > { %7326 = vmatmul.msk.bf16.gmra.mxu1 %vm3114_vm3, %v5208_v46  ;;  %v5434_v39 = vadd.f32 %v9469_v12, %v5394_v4  ;;  %v5137_v57 = vadd.f32 %v9318_v49, %v4877_v59  ;;  %v5210_v49 = vpack.c.bf16 %v5191_v27, %v5190_v48  ;;  %v9551_v46 = vpop.f32.mrf.mxu3 }
 0x601   : > { %v5470_v63 = vmax.f32 %v5434_v39, 0.0 }
 0x604   : > { %v5324_v18 = vpop.f32.mrf.mxu1 }
 0x605   : > { %v5395_v13 = vadd.f32 %v5324_v18, %v5135_v25 }
 0x607   : > { %v5435_v61 = vadd.f32 %v9469_v12, %v5395_v13 }
 0x609   : > { %v5471_v33 = vmax.f32 %v5435_v61, 0.0 }
 0x60b   : > { %v5500_v44 = vpack.c.bf16 %v5471_v33, %v5470_v63  ;;  %v9566_v33 = vld [vmem:[%s10486_s6] ss:$0 sm:$0xff] }
 0x60c   : > { %v5327_v2 = vpop.f32.mrf.mxu1 }
 0x60d   : > { %7344 = vmatmul.msk.bf16.gmra.mxu2 %vm3114_vm3, %v5500_v44  ;;  %7370 = vmatmul.msk.bf16.gmra.mxu3 %vm3114_vm3, %v5500_v44  ;;  %v5396_v1 = vadd.f32 %v5327_v2, %v9323_v3  ;;  %v4879_v3 = vadd.f32 %v9310_v58, %v4619_v32  ;;  %v9556_v58 = vld [vmem:[%s10490_s10] ss:$0 sm:$0xff] }
 0x60e   : > { %7396 = vmatmul.msk.bf16.gmra.mxu0 %vm3114_vm3, %v5500_v44 }
 0x60f   : > { %7327 = vmatmul.msk.bf16.gmra.mxu1 %vm3114_vm3, %v5209_v14  ;;  %v5436_v51 = vadd.f32 %v9469_v12, %v5396_v1  ;;  %v5139_v20 = vadd.f32 %v9337_v37, %v4879_v3  ;;  %v4621_v37 = vadd.f32 %v9366_v29, %v9359_v52  ;;  %v9574_v29 = vld [vmem:[%s10488_s8] ss:$0 sm:$0xff] }
 0x610   : > { %v9584_v1 = vld [vmem:[%s10493_s13] ss:$0 sm:$0xff] }
 0x611   : > { %v5472_v30 = vmax.f32 %v5436_v51, 0.0  ;;  %v4881_v52 = vadd.f32 %v9331_v60, %v4621_v37  ;;  %v4623_v37 = vadd.f32 %v9379_v24, %v9373_v10  ;;  %v9613_v24 = vld [vmem:[%s10538_s1 + $0x1] ss:$0 sm:$0xff] }
 0x614   : > { %v5329_v42 = vpop.f32.mrf.mxu1 }
 0x615   : > { %v5397_v26 = vadd.f32 %v5329_v42, %v5137_v57  ;;  %v10536_v42 = vld [vmem:[#allocation5_spill] sm:$0xff] }
 0x616   : > { %v5141_v51 = vadd.f32 %v10536_v42, %v4881_v52 }
 0x617   : > { %v5437_v43 = vadd.f32 %v9469_v12, %v5397_v26 }
 0x619   : > { %v5473_v23 = vmax.f32 %v5437_v43, 0.0 }
 0x61b   : > { %v5501_v56 = vpack.c.bf16 %v5473_v23, %v5472_v30 }
 0x61c   : > { %v5332_v21 = vpop.f32.mrf.mxu1 }
 0x61d   : > { %7345 = vmatmul.msk.bf16.gmra.mxu2 %vm3114_vm3, %v5501_v56  ;;  %7371 = vmatmul.msk.bf16.gmra.mxu3 %vm3114_vm3, %v5501_v56  ;;  %v5398_v38 = vadd.f32 %v5332_v21, %v9345_v22  ;;  %v5192_v22 = vld [vmem:[#allocation2 + $0x147] sm:$0xff] }
 0x61e   : > { %7397 = vmatmul.msk.bf16.gmra.mxu0 %vm3114_vm3, %v5501_v56  ;;  %v5211_v13 = vpack.c.bf16 %v5193_v28, %v5192_v22  ;;  %v5924_v21 = vld [vmem:[%s10537_s0] sm:$0xff] }
 0x61f   : > { %7328 = vmatmul.msk.bf16.gmra.mxu1 %vm3114_vm3, %v5210_v49  ;;  %v5438_v5 = vadd.f32 %v9469_v12, %v5398_v38 }
 0x621   : > { %v5474_v4 = vmax.f32 %v5438_v5, 0.0 }
 0x624   : > { %v5334_v7 = vpop.f32.mrf.mxu1 }
 0x625   : > { %v5399_v41 = vadd.f32 %v5334_v7, %v5139_v20 }
 0x627   : > { %v5439_v53 = vadd.f32 %v9469_v12, %v5399_v41 }
 0x629   : > { %v5475_v25 = vmax.f32 %v5439_v53, 0.0 }
 0x62b   : > { %v5502_v18 = vpack.c.bf16 %v5475_v25, %v5474_v4  ;;  %v5833_v39 = vpop.f32.mrf.mxu0 }
 0x62c   : > { %v5834_v61 = vadd.f32 %v9556_v58, %v5833_v39  ;;  %v5337_v63 = vpop.f32.mrf.mxu1 }
 0x62d   : > { %7346 = vmatmul.msk.bf16.gmra.mxu2 %vm3114_vm3, %v5502_v18  ;;  %7372 = vmatmul.msk.bf16.gmra.mxu3 %vm3114_vm3, %v5502_v18  ;;  %v5400_v14 = vadd.f32 %v5337_v63, %v10535_v19  ;;  %v9605_v63 = vld [vmem:[%s10538_s1] ss:$0 sm:$0xff] }
 0x62e   : > { %v6035_v45 = vmin.f32 %v5834_v61, 4.1351666  ;;  %7398 = vmatmul.msk.bf16.gmra.mxu0 %vm3114_vm3, %v5502_v18 }
 0x62f   : > { %7329 = vmatmul.msk.bf16.gmra.mxu1 %vm3114_vm3, %v5211_v13  ;;  %v5440_v30 = vadd.f32 %v9469_v12, %v5400_v14  ;;  %v5925_v14 = vld [vmem:[%s10537_s0 + $0x8] sm:$0xff] }
 0x630   : > { %v6071_v31 = vmul.f32 1.442695, %v6035_v45  ;;  %v5595_v44 = vpop.f32.mrf.mxu2  ;;  %v5714_v2 = vpop.f32.mrf.mxu3 }
 0x631   : > { %v5596_v59 = vadd.f32 %v9566_v33, %v5595_v44  ;;  %v5715_v60 = vadd.f32 %v9574_v29, %v5714_v2  ;;  %v5476_v20 = vmax.f32 %v5440_v30, 0.0  ;;  %v10539_v2 = vld [vmem:[#allocation4_spill] sm:$0xff] }
 0x632   : > { %7461 = vpow2.f32 %v6071_v31  ;;  %v4883_v19 = vadd.f32 %v10539_v2, %v4623_v37 }
 0x633   : > { %6654 = vst.msk [vmem:[%s7665_s20] sm:$0xff] %vm6653_vm4, %v5596_v59  ;;  %v5835_v57 = vpop.f32.mrf.mxu0  ;;  %v5963_v27 = vmul.f32 %v9584_v1, %v5715_v60 }
 0x634   : > { %v5836_v26 = vadd.f32 %v9556_v58, %v5835_v57  ;;  %v5339_v43 = vpop.f32.mrf.mxu1 }
 0x635   : > { %v5401_v23 = vadd.f32 %v5339_v43, %v5141_v51  ;;  %v5999_v53 = vadd.f32 %v5963_v27, %v5924_v21  ;;  %v10540_v43 = vld [vmem:[#allocation9_spill] sm:$0xff] }
 0x636   : > { %v6036_v48 = vmin.f32 %v5836_v26, 4.1351666 }
 0x637   : > { %v5441_v32 = vadd.f32 %v9469_v12, %v5401_v23 }
 0x638   : > { %v7462_v56 = vpop.eup %7461  ;;  %v6073_v49 = vmul.f32 1.442695, %v6036_v48  ;;  %v5597_v3 = vpop.f32.mrf.mxu2 }
 0x639   : > { %v5716_v38 = vpop.f32.mrf.mxu3  ;;  %v6143_v7 = vmul.f32 %v7462_v56, %v9584_v1  ;;  %v5477_v5 = vmax.f32 %v5441_v32, 0.0  ;;  %v5598_v41 = vadd.f32 %v9566_v33, %v5597_v3  ;;  %v9630_v32 = vld [vmem:[%s10538_s1 + $0x2] ss:$0 sm:$0xff] }
 0x63a   : > { %7463 = vpow2.f32 %v6073_v49  ;;  %v5717_v4 = vadd.f32 %v9574_v29, %v5716_v38 }
 0x63b   : > { %v6179_v22 = vmul.f32 0.5, %v6143_v7  ;;  %v5503_v28 = vpack.c.bf16 %v5477_v5, %v5476_v20  ;;  %6655 = vst.msk [vmem:[%s7665_s20 + $0x8] sm:$0xff] %vm6653_vm4, %v5598_v41  ;;  %v5838_v25 = vpop.f32.mrf.mxu0  ;;  %v10541_v20 = vld [vmem:[#allocation7_spill] sm:$0xff] }
 0x63c   : > { %v5839_v18 = vadd.f32 %v9556_v58, %v5838_v25  ;;  %v5342_v39 = vpop.f32.mrf.mxu1  ;;  %v5964_v10 = vmul.f32 %v9584_v1, %v5717_v4  ;;  %v5143_v7 = vadd.f32 %v10541_v20, %v4883_v19 }
 0x63d   : > { %v6215_v13 = vsub.f32 %v5999_v53, %v6179_v22  ;;  %v6251_v61 = vadd.f32 %v6179_v22, %v5999_v53  ;;  %7347 = vmatmul.msk.bf16.gmra.mxu2 %vm3114_vm3, %v5503_v28  ;;  %7373 = vmatmul.msk.bf16.gmra.mxu3 %vm3114_vm3, %v5503_v28  ;;  %v5402_v30 = vadd.f32 %v5342_v39, %v10540_v43 }
 0x63e   : > { %v6037_v45 = vmin.f32 %v5839_v18, 4.1351666  ;;  %7399 = vmatmul.msk.bf16.gmra.mxu0 %vm3114_vm3, %v5503_v28  ;;  %v6000_v21 = vadd.f32 %v5964_v10, %v5925_v14 }
 0x63f   : > { %v6290_v52 = vmax.f32 %v6215_v13, 0.0  ;;  %v6363_v31 = vmax.f32 %v6251_v61, 0.0  ;;  %v5442_v4 = vadd.f32 %v9469_v12, %v5402_v30 }
 0x640   : > { %v7464_v44 = vpop.eup %7463  ;;  %v6075_v59 = vmul.f32 1.442695, %v6037_v45  ;;  %v5600_v60 = vpop.f32.mrf.mxu2 }
 0x641   : > { %v5719_v57 = vpop.f32.mrf.mxu3  ;;  %v6327_v42 = vmin.f32 %v6290_v52, %v9605_v63  ;;  %v6399_v51 = vmin.f32 %v6363_v31, %v9605_v63  ;;  %v6144_v26 = vmul.f32 %v7464_v44, %v9584_v1  ;;  %v5601_v23 = vadd.f32 %v9566_v33, %v5600_v60  ;;  %v5926_v31 = vld [vmem:[%s10537_s0 + $0x10] sm:$0xff] }
 0x642   : > { %7465 = vpow2.f32 %v6075_v59  ;;  %v5720_v48 = vadd.f32 %v9574_v29, %v5719_v57 }
 0x643   : > { %v6436_v27 = vmul.f32 %v9613_v24, %v6327_v42  ;;  %v6545_v56 = vmul.f32 %v9613_v24, %v6399_v51  ;;  %v6180_v49 = vmul.f32 0.5, %v6144_v26  ;;  %v5840_v3 = vpop.f32.mrf.mxu0  ;;  %6656 = vst.msk [vmem:[%s7665_s20 + $0x10] sm:$0xff] %vm6653_vm4, %v5601_v23  ;;  %v5478_v42 = vmax.f32 %v5442_v4, 0.0 }
 0x644   : > { %v5841_v38 = vadd.f32 %v9556_v58, %v5840_v3  ;;  %v5344_v5 = vpop.f32.mrf.mxu1  ;;  %v5965_v25 = vmul.f32 %v9584_v1, %v5720_v48 }
 0x645   : > { %v6472_v41 = vmax.f32 %v6436_v27, 0.0  ;;  %v6581_v53 = vmax.f32 %v6545_v56, 0.0  ;;  %v6216_v22 = vsub.f32 %v6000_v21, %v6180_v49  ;;  %v6252_v28 = vadd.f32 %v6180_v49, %v6000_v21 }
 0x646   : > { %v6038_v37 = vmin.f32 %v5841_v38, 4.1351666  ;;  %v5403_v18 = vadd.f32 %v5344_v5, %v5143_v7  ;;  %v6001_v23 = vadd.f32 %v5965_v25, %v5926_v31  ;;  %v4625_v56 = vadd.f32 %v9392_v9, %v9386_v0  ;;  %v10542_v25 = vld [vmem:[#allocation8_spill] sm:$0xff] }
 0x647   : > { %v6509_v39 = vmin.f32 %v6472_v41, %v9630_v32  ;;  %v6617_v13 = vmin.f32 %v6581_v53, %v9630_v32  ;;  %v6291_v61 = vmax.f32 %v6216_v22, 0.0  ;;  %v6364_v45 = vmax.f32 %v6252_v28, 0.0 }
 0x648   : > { %v7466_v52 = vpop.eup %7465  ;;  %v6077_v10 = vmul.f32 1.442695, %v6038_v37  ;;  %v5443_v44 = vadd.f32 %v9469_v12, %v5403_v18  ;;  %v5602_v2 = vpop.f32.mrf.mxu2  ;;  %v4885_v37 = vadd.f32 %v10542_v25, %v4625_v56  ;;  %v5927_v18 = vld [vmem:[%s10537_s0 + $0x18] sm:$0xff] }
 0x649   : > { %v5721_v19 = vpop.f32.mrf.mxu3  ;;  %6691 = vst.msk [vmem:[%s7670_s23] sm:$0xff] %vm6690_vm5, %v6509_v39  ;;  %v6328_v14 = vmin.f32 %v6291_v61, %v9605_v63  ;;  %v6400_v59 = vmin.f32 %v6364_v45, %v9605_v63  ;;  %v6145_v60 = vmul.f32 %v7466_v52, %v9584_v1  ;;  %v5603_v57 = vadd.f32 %v9566_v33, %v5602_v2 }
 0x64a   : > { %6727 = vst.msk [vmem:[%s7675_s12] sm:$0xff] %vm6690_vm5, %v6617_v13  ;;  %7467 = vpow2.f32 %v6077_v10  ;;  %v5479_v51 = vmax.f32 %v5443_v44, 0.0  ;;  %v5722_v26 = vadd.f32 %v9574_v29, %v5721_v19  ;;  %v10543_v44 = vld [vmem:[#allocation11_spill] sm:$0xff] }
 0x64b   : > { %v6437_v43 = vmul.f32 %v9613_v24, %v6328_v14  ;;  %v6546_v30 = vmul.f32 %v9613_v24, %v6400_v59  ;;  %v6181_v48 = vmul.f32 0.5, %v6145_v60  ;;  %6657 = vst.msk [vmem:[%s7665_s20 + $0x18] sm:$0xff] %vm6653_vm4, %v5603_v57  ;;  %v5843_v27 = vpop.f32.mrf.mxu0 }
 0x64c   : > { %v5504_v21 = vpack.c.bf16 %v5479_v51, %v5478_v42  ;;  %v5844_v49 = vadd.f32 %v9556_v58, %v5843_v27  ;;  %v5347_v3 = vpop.f32.mrf.mxu1  ;;  %v5966_v41 = vmul.f32 %v9584_v1, %v5722_v26  ;;  %v10544_v26 = vld [vmem:[#allocation10_spill] sm:$0xff] }
 0x64d   : > { %v6473_v38 = vmax.f32 %v6437_v43, 0.0  ;;  %v6582_v20 = vmax.f32 %v6546_v30, 0.0  ;;  %v6217_v7 = vsub.f32 %v6001_v23, %v6181_v48  ;;  %v6253_v5 = vadd.f32 %v6181_v48, %v6001_v23 }
 0x64e   : > { %v6039_v53 = vmin.f32 %v5844_v49, 4.1351666  ;;  %7348 = vmatmul.msk.bf16.gmra.mxu2 %vm3114_vm3, %v5504_v21  ;;  %7374 = vmatmul.msk.bf16.gmra.mxu3 %vm3114_vm3, %v5504_v21  ;;  %v5404_v2 = vadd.f32 %v5347_v3, %v10543_v44  ;;  %v6002_v60 = vadd.f32 %v5966_v41, %v5927_v18  ;;  %v5145_v43 = vadd.f32 %v10544_v26, %v4885_v37 }
 0x64f   : > { %v6510_v22 = vmin.f32 %v6473_v38, %v9630_v32  ;;  %v6618_v9 = vmin.f32 %v6582_v20, %v9630_v32  ;;  %v6292_v0 = vmax.f32 %v6217_v7, 0.0  ;;  %v6365_v28 = vmax.f32 %v6253_v5, 0.0  ;;  %7400 = vmatmul.msk.bf16.gmra.mxu0 %vm3114_vm3, %v5504_v21 }
 0x650   : > { %v7468_v4 = vpop.eup %7467  ;;  %v6079_v39 = vmul.f32 1.442695, %v6039_v53  ;;  %v5605_v13 = vpop.f32.mrf.mxu2  ;;  %v5444_v21 = vadd.f32 %v9469_v12, %v5404_v2 }
 0x651   : > { %v5724_v61 = vpop.f32.mrf.mxu3  ;;  %6692 = vst.msk [vmem:[%s7670_s23 + $0x8] sm:$0xff] %vm6690_vm5, %v6510_v22  ;;  %v6329_v45 = vmin.f32 %v6292_v0, %v9605_v63  ;;  %v6401_v52 = vmin.f32 %v6365_v28, %v9605_v63  ;;  %v6146_v31 = vmul.f32 %v7468_v4, %v9584_v1  ;;  %v5606_v10 = vadd.f32 %v9566_v33, %v5605_v13  ;;  %v5928_v22 = vld [vmem:[%s10537_s0 + $0x20] sm:$0xff] }
 0x652   : > { %6728 = vst.msk [vmem:[%s7675_s12 + $0x8] sm:$0xff] %vm6690_vm5, %v6618_v9  ;;  %7469 = vpow2.f32 %v6079_v39  ;;  %v5725_v19 = vadd.f32 %v9574_v29, %v5724_v61  ;;  %v5480_v13 = vmax.f32 %v5444_v21, 0.0 }
 0x653   : > { %v6438_v14 = vmul.f32 %v9613_v24, %v6329_v45  ;;  %v6547_v59 = vmul.f32 %v9613_v24, %v6401_v52  ;;  %v6182_v57 = vmul.f32 0.5, %v6146_v31  ;;  %6658 = vst.msk [vmem:[%s7665_s20 + $0x20] sm:$0xff] %vm6653_vm4, %v5606_v10  ;;  %v5845_v42 = vpop.f32.mrf.mxu0 }
 0x654   : > { %v5846_v51 = vadd.f32 %v9556_v58, %v5845_v42  ;;  %v5349_v30 = vpop.f32.mrf.mxu1  ;;  %v5967_v49 = vmul.f32 %v9584_v1, %v5725_v19  ;;  %v4627_v19 = vadd.f32 %v9403_v15, %v9399_v40 }
 0x655   : > { %v6474_v23 = vmax.f32 %v6438_v14, 0.0  ;;  %v6583_v48 = vmax.f32 %v6547_v59, 0.0  ;;  %v6218_v27 = vsub.f32 %v6002_v60, %v6182_v57  ;;  %v6254_v56 = vadd.f32 %v6182_v57, %v6002_v60 }
 0x656   : > { %v6040_v3 = vmin.f32 %v5846_v51, 4.1351666  ;;  %v5405_v38 = vadd.f32 %v5349_v30, %v5145_v43  ;;  %v6003_v10 = vadd.f32 %v5967_v49, %v5928_v22  ;;  %v5929_v49 = vld [vmem:[%s10537_s0 + $0x28] sm:$0xff]  ;;  %v10546_v22 = vld [vmem:[#allocation14_spill] sm:$0xff] }
 0x657   : > { %v6511_v20 = vmin.f32 %v6474_v23, %v9630_v32  ;;  %v6619_v7 = vmin.f32 %v6583_v48, %v9630_v32  ;;  %v6293_v5 = vmax.f32 %v6218_v27, 0.0  ;;  %v6366_v41 = vmax.f32 %v6254_v56, 0.0  ;;  %v10545_v56 = vld [vmem:[#allocation12_spill] sm:$0xff] }
 0x658   : > { %v7470_v53 = vpop.eup %7469  ;;  %v6081_v9 = vmul.f32 1.442695, %v6040_v3  ;;  %v5445_v0 = vadd.f32 %v9469_v12, %v5405_v38  ;;  %v5607_v28 = vpop.f32.mrf.mxu2  ;;  %v4887_v21 = vadd.f32 %v10545_v56, %v4627_v19 }
 0x659   : > { %v5726_v4 = vpop.f32.mrf.mxu3  ;;  %6693 = vst.msk [vmem:[%s7670_s23 + $0x10] sm:$0xff] %vm6690_vm5, %v6511_v20  ;;  %v6330_v25 = vmin.f32 %v6293_v5, %v9605_v63  ;;  %v6402_v37 = vmin.f32 %v6366_v41, %v9605_v63  ;;  %v6147_v18 = vmul.f32 %v7470_v53, %v9584_v1  ;;  %v5608_v39 = vadd.f32 %v9566_v33, %v5607_v28 }
 0x65a   : > { %6729 = vst.msk [vmem:[%s7675_s12 + $0x10] sm:$0xff] %vm6690_vm5, %v6619_v7  ;;  %7471 = vpow2.f32 %v6081_v9  ;;  %v5481_v61 = vmax.f32 %v5445_v0, 0.0  ;;  %v5727_v45 = vadd.f32 %v9574_v29, %v5726_v4 }
 0x65b   : > { %v6439_v52 = vmul.f32 %v9613_v24, %v6330_v25  ;;  %v6548_v31 = vmul.f32 %v9613_v24, %v6402_v37  ;;  %v6183_v44 = vmul.f32 0.5, %v6147_v18  ;;  %6659 = vst.msk [vmem:[%s7665_s20 + $0x28] sm:$0xff] %vm6653_vm4, %v5608_v39  ;;  %v5848_v2 = vpop.f32.mrf.mxu0 }
 0x65c   : > { %v5505_v14 = vpack.c.bf16 %v5481_v61, %v5480_v13  ;;  %v5849_v59 = vadd.f32 %v9556_v58, %v5848_v2  ;;  %v5352_v60 = vpop.f32.mrf.mxu1  ;;  %v5968_v43 = vmul.f32 %v9584_v1, %v5727_v45  ;;  %v10547_v13 = vld [vmem:[#allocation13_spill] sm:$0xff] }
 0x65d   : > { %v6475_v57 = vmax.f32 %v6439_v52, 0.0  ;;  %v6584_v42 = vmax.f32 %v6548_v31, 0.0  ;;  %v6219_v51 = vsub.f32 %v6003_v10, %v6183_v44  ;;  %v6255_v26 = vadd.f32 %v6183_v44, %v6003_v10 }
 0x65e   : > { %v6041_v30 = vmin.f32 %v5849_v59, 4.1351666  ;;  %7349 = vmatmul.msk.bf16.gmra.mxu2 %vm3114_vm3, %v5505_v14  ;;  %7375 = vmatmul.msk.bf16.gmra.mxu3 %vm3114_vm3, %v5505_v14  ;;  %v5406_v9 = vadd.f32 %v5352_v60, %v10546_v22  ;;  %v6004_v25 = vadd.f32 %v5968_v43, %v5929_v49  ;;  %v5147_v61 = vadd.f32 %v10547_v13, %v4887_v21  ;;  %v5930_v43 = vld [vmem:[%s10537_s0 + $0x30] sm:$0xff] }
 0x65f   : > { %v6512_v23 = vmin.f32 %v6475_v57, %v9630_v32  ;;  %v6620_v15 = vmin.f32 %v6584_v42, %v9630_v32  ;;  %v6294_v40 = vmax.f32 %v6219_v51, 0.0  ;;  %v6367_v48 = vmax.f32 %v6255_v26, 0.0  ;;  %7401 = vmatmul.msk.bf16.gmra.mxu0 %vm3114_vm3, %v5505_v14 }
 0x660   : > { %v7472_v27 = vpop.eup %7471  ;;  %v6083_v3 = vmul.f32 1.442695, %v6041_v30  ;;  %v5610_v38 = vpop.f32.mrf.mxu2  ;;  %v5446_v2 = vadd.f32 %v9469_v12, %v5406_v9  ;;  %v4629_v22 = vadd.f32 %v9416_v35, %v9412_v50 }
 0x661   : > { %v5729_v20 = vpop.f32.mrf.mxu3  ;;  %6694 = vst.msk [vmem:[%s7670_s23 + $0x18] sm:$0xff] %vm6690_vm5, %v6512_v23  ;;  %v6331_v7 = vmin.f32 %v6294_v40, %v9605_v63  ;;  %v6403_v5 = vmin.f32 %v6367_v48, %v9605_v63  ;;  %v6148_v41 = vmul.f32 %v7472_v27, %v9584_v1  ;;  %v5611_v53 = vadd.f32 %v9566_v33, %v5610_v38 }
 0x662   : > { %6730 = vst.msk [vmem:[%s7675_s12 + $0x18] sm:$0xff] %vm6690_vm5, %v6620_v15  ;;  %7473 = vpow2.f32 %v6083_v3  ;;  %v5730_v0 = vadd.f32 %v9574_v29, %v5729_v20  ;;  %v5482_v49 = vmax.f32 %v5446_v2, 0.0 }
 0x663   : > { %v6440_v28 = vmul.f32 %v9613_v24, %v6331_v7  ;;  %v6549_v4 = vmul.f32 %v9613_v24, %v6403_v5  ;;  %v6184_v37 = vmul.f32 0.5, %v6148_v41  ;;  %6660 = vst.msk [vmem:[%s7665_s20 + $0x30] sm:$0xff] %vm6653_vm4, %v5611_v53  ;;  %v5850_v18 = vpop.f32.mrf.mxu0 }
 0x664   : > { %v5851_v39 = vadd.f32 %v9556_v58, %v5850_v18  ;;  %v5354_v45 = vpop.f32.mrf.mxu1  ;;  %v5969_v19 = vmul.f32 %v9584_v1, %v5730_v0 }
 0x665   : > { %v6476_v52 = vmax.f32 %v6440_v28, 0.0  ;;  %v6585_v31 = vmax.f32 %v6549_v4, 0.0  ;;  %v6220_v10 = vsub.f32 %v6004_v25, %v6184_v37  ;;  %v6256_v44 = vadd.f32 %v6184_v37, %v6004_v25 }
 0x666   : > { %v6042_v14 = vmin.f32 %v5851_v39, 4.1351666  ;;  %v5407_v59 = vadd.f32 %v5354_v45, %v5147_v61  ;;  %v6005_v5 = vadd.f32 %v5969_v19, %v5930_v43 }
 0x667   : > { %v6513_v60 = vmin.f32 %v6476_v52, %v9630_v32  ;;  %v6621_v57 = vmin.f32 %v6585_v31, %v9630_v32  ;;  %v6295_v42 = vmax.f32 %v6220_v10, 0.0  ;;  %v6368_v51 = vmax.f32 %v6256_v44, 0.0  ;;  %v5931_v10 = vld [vmem:[%s10537_s0 + $0x38] sm:$0xff] }
 0x668   : > { %v7474_v26 = vpop.eup %7473  ;;  %v6085_v30 = vmul.f32 1.442695, %v6042_v14  ;;  %v5447_v23 = vadd.f32 %v9469_v12, %v5407_v59  ;;  %v5612_v15 = vpop.f32.mrf.mxu2  ;;  %v4889_v31 = vadd.f32 %v9406_v47, %v4629_v22  ;;  %v10548_v47 = vld [vmem:[#allocation16_spill] sm:$0xff] }
 0x669   : > { %v5731_v40 = vpop.f32.mrf.mxu3  ;;  %6695 = vst.msk [vmem:[%s7670_s23 + $0x20] sm:$0xff] %vm6690_vm5, %v6513_v60  ;;  %v6332_v48 = vmin.f32 %v6295_v42, %v9605_v63  ;;  %v6404_v27 = vmin.f32 %v6368_v51, %v9605_v63  ;;  %v6149_v56 = vmul.f32 %v7474_v26, %v9584_v1  ;;  %v5613_v21 = vadd.f32 %v9566_v33, %v5612_v15 }
 0x66a   : > { %6731 = vst.msk [vmem:[%s7675_s12 + $0x20] sm:$0xff] %vm6690_vm5, %v6621_v57  ;;  %7475 = vpow2.f32 %v6085_v30  ;;  %v5483_v3 = vmax.f32 %v5447_v23, 0.0  ;;  %v5732_v38 = vadd.f32 %v9574_v29, %v5731_v40 }
 0x66b   : > { %v6441_v20 = vmul.f32 %v9613_v24, %v6332_v48  ;;  %v6550_v7 = vmul.f32 %v9613_v24, %v6404_v27  ;;  %v6185_v41 = vmul.f32 0.5, %v6149_v56  ;;  %6661 = vst.msk [vmem:[%s7665_s20 + $0x38] sm:$0xff] %vm6653_vm4, %v5613_v21  ;;  %v5853_v53 = vpop.f32.mrf.mxu0  ;;  %v10549_v48 = vld [vmem:[#allocation15_spill] sm:$0xff] }
 0x66c   : > { %v5506_v9 = vpack.c.bf16 %v5483_v3, %v5482_v49  ;;  %v5854_v0 = vadd.f32 %v9556_v58, %v5853_v53  ;;  %v5357_v28 = vpop.f32.mrf.mxu1  ;;  %v5970_v39 = vmul.f32 %v9584_v1, %v5732_v38  ;;  %v5149_v27 = vadd.f32 %v10549_v48, %v4889_v31  ;;  %v10550_v48 = vld [vmem:[#allocation17_spill] sm:$0xff] }
 0x66d   : > { %v6477_v4 = vmax.f32 %v6441_v20, 0.0  ;;  %v6586_v25 = vmax.f32 %v6550_v7, 0.0  ;;  %v6221_v37 = vsub.f32 %v6005_v5, %v6185_v41  ;;  %v6257_v18 = vadd.f32 %v6185_v41, %v6005_v5 }
 0x66e   : > { %v6043_v13 = vmin.f32 %v5854_v0, 4.1351666  ;;  %7350 = vmatmul.msk.bf16.gmra.mxu2 %vm3114_vm3, %v5506_v9  ;;  %7376 = vmatmul.msk.bf16.gmra.mxu3 %vm3114_vm3, %v5506_v9  ;;  %v5408_v42 = vadd.f32 %v5357_v28, %v10548_v47  ;;  %v6006_v30 = vadd.f32 %v5970_v39, %v5931_v10 }
 0x66f   : > { %v6514_v61 = vmin.f32 %v6477_v4, %v9630_v32  ;;  %v6622_v35 = vmin.f32 %v6586_v25, %v9630_v32  ;;  %v6296_v50 = vmax.f32 %v6221_v37, 0.0  ;;  %v6369_v45 = vmax.f32 %v6257_v18, 0.0  ;;  %7402 = vmatmul.msk.bf16.gmra.mxu0 %vm3114_vm3, %v5506_v9  ;;  %v5932_v4 = vld [vmem:[%s10537_s0 + $0x40] sm:$0xff] }
 0x670   : > { %v7476_v52 = vpop.eup %7475  ;;  %v6087_v44 = vmul.f32 1.442695, %v6043_v13  ;;  %v5615_v2 = vpop.f32.mrf.mxu2  ;;  %v5448_v20 = vadd.f32 %v9469_v12, %v5408_v42 }
 0x671   : > { %v5734_v19 = vpop.f32.mrf.mxu3  ;;  %6696 = vst.msk [vmem:[%s7670_s23 + $0x28] sm:$0xff] %vm6690_vm5, %v6514_v61  ;;  %v6333_v14 = vmin.f32 %v6296_v50, %v9605_v63  ;;  %v6405_v59 = vmin.f32 %v6369_v45, %v9605_v63  ;;  %v6150_v60 = vmul.f32 %v7476_v52, %v9584_v1  ;;  %v5616_v57 = vadd.f32 %v9566_v33, %v5615_v2 }
 0x672   : > { %6732 = vst.msk [vmem:[%s7675_s12 + $0x28] sm:$0xff] %vm6690_vm5, %v6622_v35  ;;  %7477 = vpow2.f32 %v6087_v44  ;;  %v5735_v51 = vadd.f32 %v9574_v29, %v5734_v19  ;;  %v5484_v45 = vmax.f32 %v5448_v20, 0.0 }
 0x673   : > { %v6442_v26 = vmul.f32 %v9613_v24, %v6333_v14  ;;  %v6551_v43 = vmul.f32 %v9613_v24, %v6405_v59  ;;  %v6186_v23 = vmul.f32 0.5, %v6150_v60  ;;  %6662 = vst.msk [vmem:[%s7665_s20 + $0x40] sm:$0xff] %vm6653_vm4, %v5616_v57  ;;  %v5855_v15 = vpop.f32.mrf.mxu0  ;;  %v4631_v14 = vadd.f32 %v9429_v62, %v9423_v16 }
 0x674   : > { %v5856_v40 = vadd.f32 %v9556_v58, %v5855_v15  ;;  %v5359_v56 = vpop.f32.mrf.mxu1  ;;  %v5971_v7 = vmul.f32 %v9584_v1, %v5735_v51 }
 0x675   : > { %v6478_v21 = vmax.f32 %v6442_v26, 0.0  ;;  %v6587_v49 = vmax.f32 %v6551_v43, 0.0  ;;  %v6222_v3 = vsub.f32 %v6006_v30, %v6186_v23  ;;  %v6258_v38 = vadd.f32 %v6186_v23, %v6006_v30 }
 0x676   : > { %v6044_v5 = vmin.f32 %v5856_v40, 4.1351666  ;;  %v5409_v41 = vadd.f32 %v5359_v56, %v5149_v27  ;;  %v6007_v44 = vadd.f32 %v5971_v7, %v5932_v4  ;;  %v4891_v27 = vadd.f32 %v10550_v48, %v4631_v14  ;;  %v5933_v56 = vld [vmem:[%s10537_s0 + $0x48] sm:$0xff] }
 0x677   : > { %v6515_v53 = vmin.f32 %v6478_v21, %v9630_v32  ;;  %v6623_v22 = vmin.f32 %v6587_v49, %v9630_v32  ;;  %v6297_v9 = vmax.f32 %v6222_v3, 0.0  ;;  %v6370_v0 = vmax.f32 %v6258_v38, 0.0 }
 0x678   : > { %v7478_v28 = vpop.eup %7477  ;;  %v6089_v25 = vmul.f32 1.442695, %v6044_v5  ;;  %v5449_v37 = vadd.f32 %v9469_v12, %v5409_v41  ;;  %v5617_v18 = vpop.f32.mrf.mxu2  ;;  %v10551_v41 = vld [vmem:[#allocation19_spill] sm:$0xff] }
 0x679   : > { %v5736_v39 = vpop.f32.mrf.mxu3  ;;  %6697 = vst.msk [vmem:[%s7670_s23 + $0x30] sm:$0xff] %vm6690_vm5, %v6515_v53  ;;  %v6334_v13 = vmin.f32 %v6297_v9, %v9605_v63  ;;  %v6406_v61 = vmin.f32 %v6370_v0, %v9605_v63  ;;  %v6151_v35 = vmul.f32 %v7478_v28, %v9584_v1  ;;  %v5618_v50 = vadd.f32 %v9566_v33, %v5617_v18  ;;  %v10552_v18 = vld [vmem:[#allocation18_spill] sm:$0xff] }
 0x67a   : > { %6733 = vst.msk [vmem:[%s7675_s12 + $0x30] sm:$0xff] %vm6690_vm5, %v6623_v22  ;;  %7479 = vpow2.f32 %v6089_v25  ;;  %v5485_v52 = vmax.f32 %v5449_v37, 0.0  ;;  %v5737_v12 = vadd.f32 %v9574_v29, %v5736_v39  ;;  %v5151_v39 = vadd.f32 %v10552_v18, %v4891_v27  ;;  %v5935_v18 = vld [vmem:[%s10537_s0 + $0x58] sm:$0xff] }
 0x67b   : > { %v6443_v31 = vmul.f32 %v9613_v24, %v6334_v13  ;;  %v6552_v10 = vmul.f32 %v9613_v24, %v6406_v61  ;;  %v6187_v2 = vmul.f32 0.5, %v6151_v35  ;;  %6663 = vst.msk [vmem:[%s7665_s20 + $0x48] sm:$0xff] %vm6653_vm4, %v5618_v50  ;;  %v5858_v19 = vpop.f32.mrf.mxu0 }
 0x67c   : > { %v5507_v59 = vpack.c.bf16 %v5485_v52, %v5484_v45  ;;  %v5859_v60 = vadd.f32 %v9556_v58, %v5858_v19  ;;  %v5362_v57 = vpop.f32.mrf.mxu1  ;;  %v5972_v43 = vmul.f32 %v9584_v1, %v5737_v12  ;;  %v9840_v52 = vld [vmem:[%s10484_s4] ss:$0 sm:$0xff] }
 0x67d   : > { %v6479_v47 = vmax.f32 %v6443_v31, 0.0  ;;  %v6588_v42 = vmax.f32 %v6552_v10, 0.0  ;;  %v6223_v51 = vsub.f32 %v6007_v44, %v6187_v2  ;;  %v6259_v26 = vadd.f32 %v6187_v2, %v6007_v44 }
 0x67e   : > { %v6045_v30 = vmin.f32 %v5859_v60, 4.1351666  ;;  %7351 = vmatmul.msk.bf16.gmra.mxu2 %vm3114_vm3, %v5507_v59  ;;  %7377 = vmatmul.msk.bf16.gmra.mxu3 %vm3114_vm3, %v5507_v59  ;;  %v5410_v53 = vadd.f32 %v5362_v57, %v10551_v41  ;;  %v6008_v28 = vadd.f32 %v5972_v43, %v5933_v56  ;;  %v5934_v57 = vld [vmem:[%s10537_s0 + $0x50] sm:$0xff] }
 0x67f   : > { %v6516_v23 = vmin.f32 %v6479_v47, %v9630_v32  ;;  %v6624_v62 = vmin.f32 %v6588_v42, %v9630_v32  ;;  %v6298_v16 = vmax.f32 %v6223_v51, 0.0  ;;  %v6371_v15 = vmax.f32 %v6259_v26, 0.0  ;;  %7403 = vmatmul.msk.bf16.gmra.mxu0 %vm3114_vm3, %v5507_v59 }
 0x680   : > { %v7480_v40 = vpop.eup %7479  ;;  %v6091_v21 = vmul.f32 1.442695, %v6045_v30  ;;  %v5620_v49 = vpop.f32.mrf.mxu2  ;;  %v5450_v12 = vadd.f32 %v9840_v52, %v5410_v53 }
 0x681   : > { %v5739_v3 = vpop.f32.mrf.mxu3  ;;  %6698 = vst.msk [vmem:[%s7670_s23 + $0x38] sm:$0xff] %vm6690_vm5, %v6516_v23  ;;  %v6335_v38 = vmin.f32 %v6298_v16, %v9605_v63  ;;  %v6407_v20 = vmin.f32 %v6371_v15, %v9605_v63  ;;  %v6152_v7 = vmul.f32 %v7480_v40, %v9584_v1  ;;  %v5621_v5 = vadd.f32 %v9566_v33, %v5620_v49 }
 0x682   : > { %6734 = vst.msk [vmem:[%s7675_s12 + $0x38] sm:$0xff] %vm6690_vm5, %v6624_v62  ;;  %7481 = vpow2.f32 %v6091_v21  ;;  %v5740_v22 = vadd.f32 %v9574_v29, %v5739_v3  ;;  %v5486_v16 = vmax.f32 %v5450_v12, 0.0  ;;  %v4633_v3 = vadd.f32 %v9442_v6, %v9434_v17 }
 0x683   : > { %v6444_v9 = vmul.f32 %v9613_v24, %v6335_v38  ;;  %v6553_v0 = vmul.f32 %v9613_v24, %v6407_v20  ;;  %v6188_v4 = vmul.f32 0.5, %v6152_v7  ;;  %6664 = vst.msk [vmem:[%s7665_s20 + $0x50] sm:$0xff] %vm6653_vm4, %v5621_v5  ;;  %v5860_v25 = vpop.f32.mrf.mxu0 }
 0x684   : > { %v5861_v37 = vadd.f32 %v9556_v58, %v5860_v25  ;;  %v5364_v13 = vpop.f32.mrf.mxu1  ;;  %v5973_v31 = vmul.f32 %v9584_v1, %v5740_v22 }
 0x685   : > { %v6480_v61 = vmax.f32 %v6444_v9, 0.0  ;;  %v6589_v35 = vmax.f32 %v6553_v0, 0.0  ;;  %v6224_v50 = vsub.f32 %v6008_v28, %v6188_v4  ;;  %v6260_v45 = vadd.f32 %v6188_v4, %v6008_v28 }
 0x686   : > { %v6046_v10 = vmin.f32 %v5861_v37, 4.1351666  ;;  %v5411_v44 = vadd.f32 %v5364_v13, %v5151_v39  ;;  %v6009_v56 = vadd.f32 %v5973_v31, %v5934_v57  ;;  %v4893_v37 = vadd.f32 %v9436_v54, %v4633_v3  ;;  %v10553_v54 = vld [vmem:[#allocation20_spill] sm:$0xff]  ;;  %v10554_v57 = vld [vmem:[#allocation21_spill] sm:$0xff] }
 0x687   : > { %v6517_v2 = vmin.f32 %v6480_v61, %v9630_v32  ;;  %v6625_v19 = vmin.f32 %v6589_v35, %v9630_v32  ;;  %v6299_v14 = vmax.f32 %v6224_v50, 0.0  ;;  %v6372_v59 = vmax.f32 %v6260_v45, 0.0 }
 0x688   : > { %v7482_v60 = vpop.eup %7481  ;;  %v6093_v47 = vmul.f32 1.442695, %v6046_v10  ;;  %v5451_v42 = vadd.f32 %v9840_v52, %v5411_v44  ;;  %v5622_v51 = vpop.f32.mrf.mxu2 }
 0x689   : > { %v5741_v26 = vpop.f32.mrf.mxu3  ;;  %6699 = vst.msk [vmem:[%s7670_s23 + $0x40] sm:$0xff] %vm6690_vm5, %v6517_v2  ;;  %v6336_v43 = vmin.f32 %v6299_v14, %v9605_v63  ;;  %v6408_v30 = vmin.f32 %v6372_v59, %v9605_v63  ;;  %v6153_v23 = vmul.f32 %v7482_v60, %v9584_v1  ;;  %v5623_v62 = vadd.f32 %v9566_v33, %v5622_v51 }
 0x68a   : > { %6735 = vst.msk [vmem:[%s7675_s12 + $0x40] sm:$0xff] %vm6690_vm5, %v6625_v19  ;;  %7483 = vpow2.f32 %v6093_v47  ;;  %v5487_v15 = vmax.f32 %v5451_v42, 0.0  ;;  %v5742_v40 = vadd.f32 %v9574_v29, %v5741_v26  ;;  %v5153_v47 = vadd.f32 %v10554_v57, %v4893_v37 }
 0x68b   : > { %v6445_v48 = vmul.f32 %v9613_v24, %v6336_v43  ;;  %v6554_v27 = vmul.f32 %v9613_v24, %v6408_v30  ;;  %v6189_v21 = vmul.f32 0.5, %v6153_v23  ;;  %6665 = vst.msk [vmem:[%s7665_s20 + $0x58] sm:$0xff] %vm6653_vm4, %v5623_v62  ;;  %v5863_v49 = vpop.f32.mrf.mxu0 }
 0x68c   : > { %v5508_v38 = vpack.c.bf16 %v5487_v15, %v5486_v16  ;;  %v5864_v20 = vadd.f32 %v9556_v58, %v5863_v49  ;;  %v5367_v7 = vpop.f32.mrf.mxu1  ;;  %v5974_v9 = vmul.f32 %v9584_v1, %v5742_v40  ;;  %v5936_v49 = vld [vmem:[%s10537_s0 + $0x60] sm:$0xff] }
 0x68d   : > { %v6481_v5 = vmax.f32 %v6445_v48, 0.0  ;;  %v6590_v41 = vmax.f32 %v6554_v27, 0.0  ;;  %v6225_v53 = vsub.f32 %v6009_v56, %v6189_v21  ;;  %v6261_v22 = vadd.f32 %v6189_v21, %v6009_v56 }
 0x68e   : > { %v6047_v0 = vmin.f32 %v5864_v20, 4.1351666  ;;  %7352 = vmatmul.msk.bf16.gmra.mxu2 %vm3114_vm3, %v5508_v38  ;;  %7378 = vmatmul.msk.bf16.gmra.mxu3 %vm3114_vm3, %v5508_v38  ;;  %v5412_v31 = vadd.f32 %v5367_v7, %v10553_v54  ;;  %v6010_v19 = vadd.f32 %v5974_v9, %v5935_v18  ;;  %v10555_v18 = vld [vmem:[#allocation24_spill] sm:$0xff] }
 0x68f   : > { %v6518_v28 = vmin.f32 %v6481_v5, %v9630_v32  ;;  %v6626_v6 = vmin.f32 %v6590_v41, %v9630_v32  ;;  %v6300_v17 = vmax.f32 %v6225_v53, 0.0  ;;  %v6373_v4 = vmax.f32 %v6261_v22, 0.0  ;;  %7404 = vmatmul.msk.bf16.gmra.mxu0 %vm3114_vm3, %v5508_v38 }
 0x690   : > { %v7484_v25 = vpop.eup %7483  ;;  %v6095_v39 = vmul.f32 1.442695, %v6047_v0  ;;  %v5625_v13 = vpop.f32.mrf.mxu2  ;;  %v5452_v23 = vadd.f32 %v9840_v52, %v5412_v31 }
 0x691   : > { %v5744_v61 = vpop.f32.mrf.mxu3  ;;  %6700 = vst.msk [vmem:[%s7670_s23 + $0x48] sm:$0xff] %vm6690_vm5, %v6518_v28  ;;  %v6337_v35 = vmin.f32 %v6300_v17, %v9605_v63  ;;  %v6409_v50 = vmin.f32 %v6373_v4, %v9605_v63  ;;  %v6154_v45 = vmul.f32 %v7484_v25, %v9584_v1  ;;  %v5626_v12 = vadd.f32 %v9566_v33, %v5625_v13 }
 0x692   : > { %6736 = vst.msk [vmem:[%s7675_s12 + $0x48] sm:$0xff] %vm6690_vm5, %v6626_v6  ;;  %7485 = vpow2.f32 %v6095_v39  ;;  %v5745_v10 = vadd.f32 %v9574_v29, %v5744_v61  ;;  %v5488_v9 = vmax.f32 %v5452_v23, 0.0  ;;  %v4635_v39 = vadd.f32 %v10555_v18, %v9447_v36  ;;  %v5938_v18 = vld [vmem:[%s10537_s0 + $0x70] sm:$0xff] }
 0x693   : > { %v6446_v44 = vmul.f32 %v9613_v24, %v6337_v35  ;;  %v6555_v2 = vmul.f32 %v9613_v24, %v6409_v50  ;;  %v6190_v14 = vmul.f32 0.5, %v6154_v45  ;;  %6666 = vst.msk [vmem:[%s7665_s20 + $0x60] sm:$0xff] %vm6653_vm4, %v5626_v12  ;;  %v5865_v59 = vpop.f32.mrf.mxu0 }
 0x694   : > { %v5866_v60 = vadd.f32 %v9556_v58, %v5865_v59  ;;  %v5369_v42 = vpop.f32.mrf.mxu1  ;;  %v5975_v62 = vmul.f32 %v9584_v1, %v5745_v10 }
 0x695   : > { %v6482_v51 = vmax.f32 %v6446_v44, 0.0  ;;  %v6591_v26 = vmax.f32 %v6555_v2, 0.0  ;;  %v6226_v43 = vsub.f32 %v6010_v19, %v6190_v14  ;;  %v6262_v30 = vadd.f32 %v6190_v14, %v6010_v19  ;;  %v10556_v2 = vld [vmem:[#allocation23_spill] sm:$0xff]  ;;  %v5937_v14 = vld [vmem:[%s10537_s0 + $0x68] sm:$0xff] }
 0x696   : > { %v6048_v16 = vmin.f32 %v5866_v60, 4.1351666  ;;  %v5413_v15 = vadd.f32 %v5369_v42, %v5153_v47  ;;  %v6011_v4 = vadd.f32 %v5975_v62, %v5936_v49  ;;  %v4895_v19 = vadd.f32 %v10556_v2, %v4635_v39  ;;  %v9943_v62 = vld [vmem:[%s10488_s8] ss:$0 sm:$0xff]  ;;  %v10558_v49 = vld [vmem:[#allocation25_spill] sm:$0xff] }
 0x697   : > { %v6519_v40 = vmin.f32 %v6482_v51, %v9630_v32  ;;  %v6627_v48 = vmin.f32 %v6591_v26, %v9630_v32  ;;  %v6301_v27 = vmax.f32 %v6226_v43, 0.0  ;;  %v6374_v56 = vmax.f32 %v6262_v30, 0.0  ;;  %v9934_v26 = vld [vmem:[%s10486_s6] ss:$0 sm:$0xff]  ;;  %v10557_v30 = vld [vmem:[#allocation22_spill] sm:$0xff] }
 0x698   : > { %v7486_v21 = vpop.eup %7485  ;;  %v6097_v3 = vmul.f32 1.442695, %v6048_v16  ;;  %v5453_v38 = vadd.f32 %v9840_v52, %v5413_v15  ;;  %v5627_v20 = vpop.f32.mrf.mxu2  ;;  %v4637_v2 = vadd.f32 %v9549_v11, %v9460_v34 }
 0x699   : > { %v5746_v7 = vpop.f32.mrf.mxu3  ;;  %6701 = vst.msk [vmem:[%s7670_s23 + $0x50] sm:$0xff] %vm6690_vm5, %v6519_v40  ;;  %v6338_v5 = vmin.f32 %v6301_v27, %v9605_v63  ;;  %v6410_v41 = vmin.f32 %v6374_v56, %v9605_v63  ;;  %v6155_v53 = vmul.f32 %v7486_v21, %v9584_v1  ;;  %v5628_v22 = vadd.f32 %v9566_v33, %v5627_v20  ;;  %v9953_v56 = vld [vmem:[%s10490_s10] ss:$0 sm:$0xff] }
 0x69a   : > { %6737 = vst.msk [vmem:[%s7675_s12 + $0x50] sm:$0xff] %vm6690_vm5, %v6627_v48  ;;  %7487 = vpow2.f32 %v6097_v3  ;;  %v5489_v0 = vmax.f32 %v5453_v38, 0.0  ;;  %v5747_v28 = vadd.f32 %v9574_v29, %v5746_v7  ;;  %v5155_v3 = vadd.f32 %v10558_v49, %v4895_v19 }
 0x69b   : > { %v6447_v6 = vmul.f32 %v9613_v24, %v6338_v5  ;;  %v6556_v17 = vmul.f32 %v9613_v24, %v6410_v41  ;;  %v6191_v25 = vmul.f32 0.5, %v6155_v53  ;;  %6667 = vst.msk [vmem:[%s7665_s20 + $0x68] sm:$0xff] %vm6653_vm4, %v5628_v22  ;;  %v5868_v37 = vpop.f32.mrf.mxu0  ;;  %v9961_v22 = vld [vmem:[%s10493_s13] ss:$0 sm:$0xff] }
 0x69c   : > { %v5509_v33 = vpack.c.bf16 %v5489_v0, %v5488_v9  ;;  %v5869_v13 = vadd.f32 %v9556_v58, %v5868_v37  ;;  %v5372_v61 = vpop.f32.mrf.mxu1  ;;  %v5976_v12 = vmul.f32 %v9584_v1, %v5747_v28 }
 0x69d   : > { %v6483_v35 = vmax.f32 %v6447_v6, 0.0  ;;  %v6592_v50 = vmax.f32 %v6556_v17, 0.0  ;;  %v6227_v45 = vsub.f32 %v6011_v4, %v6191_v25  ;;  %v6263_v29 = vadd.f32 %v6191_v25, %v6011_v4 }
 0x69e   : > { %v6049_v54 = vmin.f32 %v5869_v13, 4.1351666  ;;  %7353 = vmatmul.msk.bf16.gmra.mxu2 %vm3114_vm3, %v5509_v33  ;;  %7379 = vmatmul.msk.bf16.gmra.mxu3 %vm3114_vm3, %v5509_v33  ;;  %v5414_v23 = vadd.f32 %v5372_v61, %v10557_v30  ;;  %v6012_v40 = vadd.f32 %v5976_v12, %v5937_v14 }
 0x69f   : > { %v6520_v31 = vmin.f32 %v6483_v35, %v9630_v32  ;;  %v6628_v36 = vmin.f32 %v6592_v50, %v9630_v32  ;;  %v6302_v10 = vmax.f32 %v6227_v45, 0.0  ;;  %v6375_v58 = vmax.f32 %v6263_v29, 0.0  ;;  %7405 = vmatmul.msk.bf16.gmra.mxu0 %vm3114_vm3, %v5509_v33 }
 0x6a0   : > { %v7488_v44 = vpop.eup %7487  ;;  %v6099_v59 = vmul.f32 1.442695, %v6049_v54  ;;  %v5630_v60 = vpop.f32.mrf.mxu2  ;;  %v5454_v53 = vadd.f32 %v9840_v52, %v5414_v23 }
 0x6a1   : > { %v5749_v57 = vpop.f32.mrf.mxu3  ;;  %6702 = vst.msk [vmem:[%s7670_s23 + $0x58] sm:$0xff] %vm6690_vm5, %v6520_v31  ;;  %v6339_v47 = vmin.f32 %v6302_v10, %v9605_v63  ;;  %v6411_v42 = vmin.f32 %v6375_v58, %v9605_v63  ;;  %v6156_v51 = vmul.f32 %v7488_v44, %v9584_v1  ;;  %v5631_v43 = vadd.f32 %v9934_v26, %v5630_v60 }
 0x6a2   : > { %6738 = vst.msk [vmem:[%s7675_s12 + $0x58] sm:$0xff] %vm6690_vm5, %v6628_v36  ;;  %7489 = vpow2.f32 %v6099_v59  ;;  %v5750_v16 = vadd.f32 %v9943_v62, %v5749_v57  ;;  %v5490_v12 = vmax.f32 %v5454_v53, 0.0 }
 0x6a3   : > { %v6448_v1 = vmul.f32 %v9613_v24, %v6339_v47  ;;  %v6557_v15 = vmul.f32 %v9613_v24, %v6411_v42  ;;  %v6192_v48 = vmul.f32 0.5, %v6156_v51  ;;  %6668 = vst.msk [vmem:[%s7665_s20 + $0x70] sm:$0xff] %vm6653_vm4, %v5631_v43  ;;  %v5870_v27 = vpop.f32.mrf.mxu0 }
 0x6a4   : > { %v5871_v21 = vadd.f32 %v9953_v56, %v5870_v27  ;;  %v5374_v38 = vpop.f32.mrf.mxu1  ;;  %v5977_v9 = vmul.f32 %v9961_v22, %v5750_v16  ;;  %v4897_v16 = vadd.f32 %v9551_v46, %v4637_v2 }
 0x6a5   : > { %v6484_v20 = vmax.f32 %v6448_v1, 0.0  ;;  %v6593_v7 = vmax.f32 %v6557_v15, 0.0  ;;  %v6228_v5 = vsub.f32 %v6012_v40, %v6192_v48  ;;  %v6264_v41 = vadd.f32 %v6192_v48, %v6012_v40  ;;  %v5939_v1 = vld [vmem:[%s10537_s0 + $0x78] sm:$0xff] }
 0x6a6   : > { %v6050_v0 = vmin.f32 %v5871_v21, 4.1351666  ;;  %v5415_v28 = vadd.f32 %v5374_v38, %v5155_v3  ;;  %v6013_v58 = vadd.f32 %v5977_v9, %v5938_v18 }
 0x6a7   : > { %v6521_v6 = vmin.f32 %v6484_v20, %v9630_v32  ;;  %v6629_v17 = vmin.f32 %v6593_v7, %v9630_v32  ;;  %v6303_v4 = vmax.f32 %v6228_v5, 0.0  ;;  %v6376_v25 = vmax.f32 %v6264_v41, 0.0  ;;  %v10014_v20 = vld [vmem:[%s10538_s1 + $0x1] ss:$0 sm:$0xff] }
 0x6a8   : > { %v7490_v37 = vpop.eup %7489  ;;  %v6101_v39 = vmul.f32 1.442695, %v6050_v0  ;;  %v5455_v33 = vadd.f32 %v9840_v52, %v5415_v28  ;;  %v5632_v13 = vpop.f32.mrf.mxu2  ;;  %v5157_v0 = vadd.f32 %v9544_v8, %v4897_v16 }
 0x6a9   : > { %v5751_v61 = vpop.f32.mrf.mxu3  ;;  %6703 = vst.msk [vmem:[%s7670_s23 + $0x60] sm:$0xff] %vm6690_vm5, %v6521_v6  ;;  %v6340_v35 = vmin.f32 %v6303_v4, %v9605_v63  ;;  %v6412_v50 = vmin.f32 %v6376_v25, %v9605_v63  ;;  %v6157_v45 = vmul.f32 %v9961_v22, %v7490_v37  ;;  %v5633_v29 = vadd.f32 %v9934_v26, %v5632_v13  ;;  %v10027_v13 = vld [vmem:[%s10538_s1 + $0x2] ss:$0 sm:$0xff] }
 0x6aa   : > { %6739 = vst.msk [vmem:[%s7675_s12 + $0x60] sm:$0xff] %vm6690_vm5, %v6629_v17  ;;  %7491 = vpow2.f32 %v6101_v39  ;;  %v5491_v54 = vmax.f32 %v5455_v33, 0.0  ;;  %v5752_v31 = vadd.f32 %v9943_v62, %v5751_v61 }
 0x6ab   : > { %v6449_v36 = vmul.f32 %v9613_v24, %v6340_v35  ;;  %v6558_v10 = vmul.f32 %v9613_v24, %v6412_v50  ;;  %v6193_v44 = vmul.f32 0.5, %v6157_v45  ;;  %6669 = vst.msk [vmem:[%s7665_s20 + $0x78] sm:$0xff] %vm6653_vm4, %v5633_v29  ;;  %v5873_v63 = vpop.f32.mrf.mxu0  ;;  %v5940_v29 = vld [vmem:[%s10537_s0 + $0x80] sm:$0xff] }
 0x6ac   : > { %v5510_v19 = vpack.c.bf16 %v5491_v54, %v5490_v12  ;;  %v5874_v14 = vadd.f32 %v9953_v56, %v5873_v63  ;;  %v5377_v59 = vpop.f32.mrf.mxu1  ;;  %v5978_v51 = vmul.f32 %v9961_v22, %v5752_v31 }
 0x6ad   : > { %v6485_v60 = vmax.f32 %v6449_v36, 0.0  ;;  %v6594_v57 = vmax.f32 %v6558_v10, 0.0  ;;  %v6229_v47 = vsub.f32 %v6013_v58, %v6193_v44  ;;  %v6265_v42 = vadd.f32 %v6193_v44, %v6013_v58 }
 0x6ae   : > { %v6051_v24 = vmin.f32 %v5874_v14, 4.1351666  ;;  %7354 = vmatmul.msk.bf16.gmra.mxu2 %vm3114_vm3, %v5510_v19  ;;  %7380 = vmatmul.msk.bf16.gmra.mxu3 %vm3114_vm3, %v5510_v19  ;;  %v5416_v3 = vadd.f32 %v5377_v59, %v9462_v55  ;;  %v6014_v41 = vadd.f32 %v5978_v51, %v5939_v1 }
 0x6af   : > { %v6522_v43 = vmin.f32 %v6485_v60, %v9630_v32  ;;  %v6630_v34 = vmin.f32 %v6594_v57, %v9630_v32  ;;  %v6304_v11 = vmax.f32 %v6229_v47, 0.0  ;;  %v6377_v30 = vmax.f32 %v6265_v42, 0.0  ;;  %7406 = vmatmul.msk.bf16.gmra.mxu0 %vm3114_vm3, %v5510_v19  ;;  %v10001_v32 = vld [vmem:[%s10538_s1] ss:$0 sm:$0xff] }
 0x6b0   : > { %v7492_v23 = vpop.eup %7491  ;;  %v6103_v15 = vmul.f32 1.442695, %v6051_v24  ;;  %v5635_v40 = vpop.f32.mrf.mxu2  ;;  %v5456_v37 = vadd.f32 %v9840_v52, %v5416_v3 }
 0x6b1   : > { %v5754_v48 = vpop.f32.mrf.mxu3  ;;  %6704 = vst.msk [vmem:[%s7670_s23 + $0x68] sm:$0xff] %vm6690_vm5, %v6522_v43  ;;  %v6341_v27 = vmin.f32 %v6304_v11, %v10001_v32  ;;  %v6413_v21 = vmin.f32 %v6377_v30, %v10001_v32  ;;  %v6158_v46 = vmul.f32 %v9961_v22, %v7492_v23  ;;  %v5636_v49 = vadd.f32 %v9934_v26, %v5635_v40 }
 0x6b2   : > { %6740 = vst.msk [vmem:[%s7675_s12 + $0x68] sm:$0xff] %vm6690_vm5, %v6630_v34  ;;  %7493 = vpow2.f32 %v6103_v15  ;;  %v5755_v38 = vadd.f32 %v9943_v62, %v5754_v48  ;;  %v5492_v2 = vmax.f32 %v5456_v37, 0.0 }
 0x6b3   : > { %v6450_v7 = vmul.f32 %v10014_v20, %v6341_v27  ;;  %v6559_v5 = vmul.f32 %v10014_v20, %v6413_v21  ;;  %v6194_v53 = vmul.f32 0.5, %v6158_v46  ;;  %6670 = vst.msk [vmem:[%s7665_s20 + $0x80] sm:$0xff] %vm6653_vm4, %v5636_v49  ;;  %v5875_v9 = vpop.f32.mrf.mxu0  ;;  %v5941_v27 = vld [vmem:[%s10537_s0 + $0x88] sm:$0xff] }
 0x6b4   : > { %v5876_v55 = vadd.f32 %v9953_v56, %v5875_v9  ;;  %v5379_v28 = vpop.f32.mrf.mxu1  ;;  %v5979_v18 = vmul.f32 %v9961_v22, %v5755_v38 }
 0x6b5   : > { %v6486_v6 = vmax.f32 %v6450_v7, 0.0  ;;  %v6595_v17 = vmax.f32 %v6559_v5, 0.0  ;;  %v6230_v4 = vsub.f32 %v6014_v41, %v6194_v53  ;;  %v6266_v25 = vadd.f32 %v6194_v53, %v6014_v41 }
 0x6b6   : > { %v6052_v39 = vmin.f32 %v5876_v55, 4.1351666  ;;  %v5417_v33 = vadd.f32 %v5379_v28, %v5157_v0  ;;  %v6015_v60 = vadd.f32 %v5979_v18, %v5940_v29 }
 0x6b7   : > { %v6523_v8 = vmin.f32 %v6486_v6, %v10027_v13  ;;  %v6631_v61 = vmin.f32 %v6595_v17, %v10027_v13  ;;  %v6305_v35 = vmax.f32 %v6230_v4, 0.0  ;;  %v6378_v50 = vmax.f32 %v6266_v25, 0.0 }
 0x6b8   : > { %v7494_v45 = vpop.eup %7493  ;;  %v6105_v12 = vmul.f32 1.442695, %v6052_v39  ;;  %v5457_v54 = vadd.f32 %v9840_v52, %v5417_v33  ;;  %v5637_v31 = vpop.f32.mrf.mxu2 }
 0x6b9   : > { %v5756_v36 = vpop.f32.mrf.mxu3  ;;  %6705 = vst.msk [vmem:[%s7670_s23 + $0x70] sm:$0xff] %vm6690_vm5, %v6523_v8  ;;  %v6342_v10 = vmin.f32 %v6305_v35, %v10001_v32  ;;  %v6414_v58 = vmin.f32 %v6378_v50, %v10001_v32  ;;  %v6159_v44 = vmul.f32 %v9961_v22, %v7494_v45  ;;  %v5638_v63 = vadd.f32 %v9934_v26, %v5637_v31  ;;  %v5942_v45 = vld [vmem:[%s10537_s0 + $0x90] sm:$0xff] }
 0x6ba   : > { %6741 = vst.msk [vmem:[%s7675_s12 + $0x70] sm:$0xff] %vm6690_vm5, %v6631_v61  ;;  %7495 = vpow2.f32 %v6105_v12  ;;  %v5493_v19 = vmax.f32 %v5457_v54, 0.0  ;;  %v5757_v52 = vadd.f32 %v9943_v62, %v5756_v36 }
 0x6bb   : > { %v6451_v14 = vmul.f32 %v10014_v20, %v6342_v10  ;;  %v6560_v59 = vmul.f32 %v10014_v20, %v6414_v58  ;;  %v6195_v57 = vmul.f32 0.5, %v6159_v44  ;;  %6671 = vst.msk [vmem:[%s7665_s20 + $0x88] sm:$0xff] %vm6653_vm4, %v5638_v63  ;;  %v5878_v47 = vpop.f32.mrf.mxu0 }
 0x6bc   : > { %v5511_v42 = vpack.c.bf16 %v5493_v19, %v5492_v2  ;;  %v5879_v51 = vadd.f32 %v9953_v56, %v5878_v47  ;;  %v5980_v30 = vmul.f32 %v9961_v22, %v5757_v52 }
 0x6bd   : > { %v6487_v24 = vmax.f32 %v6451_v14, 0.0  ;;  %v6596_v43 = vmax.f32 %v6560_v59, 0.0  ;;  %v6231_v34 = vsub.f32 %v6015_v60, %v6195_v57  ;;  %v6267_v11 = vadd.f32 %v6195_v57, %v6015_v60 }
 0x6be   : > { %v6053_v23 = vmin.f32 %v5879_v51, 4.1351666  ;;  %7355 = vmatmul.msk.bf16.gmra.mxu2 %vm3114_vm3, %v5511_v42  ;;  %7381 = vmatmul.msk.bf16.gmra.mxu3 %vm3114_vm3, %v5511_v42  ;;  %v6016_v0 = vadd.f32 %v5980_v30, %v5941_v27 }
 0x6bf   : > { %v6524_v16 = vmin.f32 %v6487_v24, %v10027_v13  ;;  %v6632_v1 = vmin.f32 %v6596_v43, %v10027_v13  ;;  %v6306_v15 = vmax.f32 %v6231_v34, 0.0  ;;  %v6379_v40 = vmax.f32 %v6267_v11, 0.0  ;;  %7407 = vmatmul.msk.bf16.gmra.mxu0 %vm3114_vm3, %v5511_v42 }
 0x6c0   : > { %v7496_v48 = vpop.eup %7495  ;;  %v6107_v21 = vmul.f32 1.442695, %v6053_v23  ;;  %v5640_v46 = vpop.f32.mrf.mxu2  ;;  %v5943_v23 = vld [vmem:[%s10537_s0 + $0x98] sm:$0xff] }
 0x6c1   : > { %6706 = vst.msk [vmem:[%s7670_s23 + $0x78] sm:$0xff] %vm6690_vm5, %v6524_v16  ;;  %v6343_v49 = vmin.f32 %v6306_v15, %v10001_v32  ;;  %v6415_v3 = vmin.f32 %v6379_v40, %v10001_v32  ;;  %v6160_v38 = vmul.f32 %v9961_v22, %v7496_v48  ;;  %v5641_v7 = vadd.f32 %v9934_v26, %v5640_v46  ;;  %v5759_v5 = vpop.f32.mrf.mxu3 }
 0x6c2   : > { %6742 = vst.msk [vmem:[%s7675_s12 + $0x78] sm:$0xff] %vm6690_vm5, %v6632_v1  ;;  %7497 = vpow2.f32 %v6107_v21  ;;  %v5760_v41 = vadd.f32 %v9943_v62, %v5759_v5 }
 0x6c3   : > { %v6452_v53 = vmul.f32 %v10014_v20, %v6343_v49  ;;  %v6561_v9 = vmul.f32 %v10014_v20, %v6415_v3  ;;  %v6196_v55 = vmul.f32 0.5, %v6160_v38  ;;  %6672 = vst.msk [vmem:[%s7665_s20 + $0x90] sm:$0xff] %vm6653_vm4, %v5641_v7  ;;  %v5880_v28 = vpop.f32.mrf.mxu0 }
 0x6c4   : > { %v5881_v6 = vadd.f32 %v9953_v56, %v5880_v28  ;;  %v5981_v18 = vmul.f32 %v9961_v22, %v5760_v41 }
 0x6c5   : > { %v6488_v17 = vmax.f32 %v6452_v53, 0.0  ;;  %v6597_v4 = vmax.f32 %v6561_v9, 0.0  ;;  %v6232_v25 = vsub.f32 %v6016_v0, %v6196_v55  ;;  %v6268_v37 = vadd.f32 %v6196_v55, %v6016_v0 }
 0x6c6   : > { %v6054_v39 = vmin.f32 %v5881_v6, 4.1351666  ;;  %v6017_v19 = vadd.f32 %v5981_v18, %v5942_v45 }
 0x6c7   : > { %v6525_v33 = vmin.f32 %v6488_v17, %v10027_v13  ;;  %v6633_v8 = vmin.f32 %v6597_v4, %v10027_v13  ;;  %v6307_v61 = vmax.f32 %v6232_v25, 0.0  ;;  %v6380_v35 = vmax.f32 %v6268_v37, 0.0 }
 0x6c8   : > { %v7498_v50 = vpop.eup %7497  ;;  %v6109_v29 = vmul.f32 1.442695, %v6054_v39  ;;  %v5642_v12 = vpop.f32.mrf.mxu2 }
 0x6c9   : > { %6707 = vst.msk [vmem:[%s7670_s23 + $0x80] sm:$0xff] %vm6690_vm5, %v6525_v33  ;;  %v6344_v54 = vmin.f32 %v6307_v61, %v10001_v32  ;;  %v6416_v31 = vmin.f32 %v6380_v35, %v10001_v32  ;;  %v6161_v36 = vmul.f32 %v9961_v22, %v7498_v50  ;;  %v5643_v10 = vadd.f32 %v9934_v26, %v5642_v12  ;;  %v5761_v58 = vpop.f32.mrf.mxu3 }
 0x6ca   : > { %6743 = vst.msk [vmem:[%s7675_s12 + $0x80] sm:$0xff] %vm6690_vm5, %v6633_v8  ;;  %7499 = vpow2.f32 %v6109_v29  ;;  %v5762_v44 = vadd.f32 %v9943_v62, %v5761_v58  ;;  %v5944_v8 = vld [vmem:[%s10537_s0 + $0xa0] sm:$0xff] }
 0x6cb   : > { %v6453_v63 = vmul.f32 %v10014_v20, %v6344_v54  ;;  %v6562_v2 = vmul.f32 %v10014_v20, %v6416_v31  ;;  %v6197_v52 = vmul.f32 0.5, %v6161_v36  ;;  %6673 = vst.msk [vmem:[%s7665_s20 + $0x98] sm:$0xff] %vm6653_vm4, %v5643_v10 }
 0x6cc   : > { %v5883_v14 = vpop.f32.mrf.mxu0  ;;  %v5982_v42 = vmul.f32 %v9961_v22, %v5762_v44 }
 0x6cd   : > { %v6489_v59 = vmax.f32 %v6453_v63, 0.0  ;;  %v6598_v60 = vmax.f32 %v6562_v2, 0.0  ;;  %v6233_v57 = vsub.f32 %v6017_v19, %v6197_v52  ;;  %v6269_v47 = vadd.f32 %v6197_v52, %v6017_v19 }
 0x6ce   : > { %v5884_v51 = vadd.f32 %v9953_v56, %v5883_v14  ;;  %v6018_v38 = vadd.f32 %v5982_v42, %v5943_v23 }
 0x6cf   : > { %v6526_v24 = vmin.f32 %v6489_v59, %v10027_v13  ;;  %v6634_v43 = vmin.f32 %v6598_v60, %v10027_v13  ;;  %v6308_v34 = vmax.f32 %v6233_v57, 0.0  ;;  %v6381_v11 = vmax.f32 %v6269_v47, 0.0 }
 0x6d0   : > { %v7500_v30 = vpop.eup %7499  ;;  %v6055_v16 = vmin.f32 %v5884_v51, 4.1351666 }
 0x6d1   : > { %6708 = vst.msk [vmem:[%s7670_s23 + $0x88] sm:$0xff] %vm6690_vm5, %v6526_v24  ;;  %v6345_v1 = vmin.f32 %v6308_v34, %v10001_v32  ;;  %v6417_v15 = vmin.f32 %v6381_v11, %v10001_v32  ;;  %v6162_v40 = vmul.f32 %v9961_v22, %v7500_v30  ;;  %v5645_v48 = vpop.f32.mrf.mxu2  ;;  %v5764_v27 = vpop.f32.mrf.mxu3  ;;  %v5945_v24 = vld [vmem:[%s10537_s0 + $0xa8] sm:$0xff] }
 0x6d2   : > { %6744 = vst.msk [vmem:[%s7675_s12 + $0x88] sm:$0xff] %vm6690_vm5, %v6634_v43  ;;  %v6111_v21 = vmul.f32 1.442695, %v6055_v16  ;;  %v5646_v46 = vadd.f32 %v9934_v26, %v5645_v48  ;;  %v5765_v5 = vadd.f32 %v9943_v62, %v5764_v27 }
 0x6d3   : > { %v6454_v49 = vmul.f32 %v10014_v20, %v6345_v1  ;;  %v6563_v3 = vmul.f32 %v10014_v20, %v6417_v15  ;;  %v6198_v7 = vmul.f32 0.5, %v6162_v40 }
 0x6d4   : > { %7501 = vpow2.f32 %v6111_v21  ;;  %6674 = vst.msk [vmem:[%s7665_s20 + $0xa0] sm:$0xff] %vm6653_vm4, %v5646_v46  ;;  %v5885_v41 = vpop.f32.mrf.mxu0  ;;  %v5983_v37 = vmul.f32 %v9961_v22, %v5765_v5 }
 0x6d5   : > { %v6490_v53 = vmax.f32 %v6454_v49, 0.0  ;;  %v6599_v9 = vmax.f32 %v6563_v3, 0.0  ;;  %v6234_v0 = vsub.f32 %v6018_v38, %v6198_v7  ;;  %v6270_v55 = vadd.f32 %v6198_v7, %v6018_v38 }
 0x6d6   : > { %v5886_v28 = vadd.f32 %v9953_v56, %v5885_v41  ;;  %v6019_v36 = vadd.f32 %v5983_v37, %v5944_v8 }
 0x6d7   : > { %v6527_v6 = vmin.f32 %v6490_v53, %v10027_v13  ;;  %v6635_v17 = vmin.f32 %v6599_v9, %v10027_v13  ;;  %v6309_v4 = vmax.f32 %v6234_v0, 0.0  ;;  %v6382_v25 = vmax.f32 %v6270_v55, 0.0 }
 0x6d8   : > { %v6056_v18 = vmin.f32 %v5886_v28, 4.1351666 }
 0x6d9   : > { %6709 = vst.msk [vmem:[%s7670_s23 + $0x90] sm:$0xff] %vm6690_vm5, %v6527_v6  ;;  %v6346_v39 = vmin.f32 %v6309_v4, %v10001_v32  ;;  %v6418_v33 = vmin.f32 %v6382_v25, %v10001_v32  ;;  %v5647_v61 = vpop.f32.mrf.mxu2  ;;  %v5766_v35 = vpop.f32.mrf.mxu3 }
 0x6da   : > { %v7502_v50 = vpop.eup %7501  ;;  %6745 = vst.msk [vmem:[%s7675_s12 + $0x90] sm:$0xff] %vm6690_vm5, %v6635_v17  ;;  %v6113_v45 = vmul.f32 1.442695, %v6056_v18  ;;  %v5648_v29 = vadd.f32 %v9934_v26, %v5647_v61  ;;  %v5767_v10 = vadd.f32 %v9943_v62, %v5766_v35  ;;  %v5946_v17 = vld [vmem:[%s10537_s0 + $0xb0] sm:$0xff] }
 0x6db   : > { %v6455_v12 = vmul.f32 %v10014_v20, %v6346_v39  ;;  %v6564_v54 = vmul.f32 %v10014_v20, %v6418_v33  ;;  %v6163_v31 = vmul.f32 %v9961_v22, %v7502_v50 }
 0x6dc   : > { %7503 = vpow2.f32 %v6113_v45  ;;  %6675 = vst.msk [vmem:[%s7665_s20 + $0xa8] sm:$0xff] %vm6653_vm4, %v5648_v29  ;;  %v5888_v58 = vpop.f32.mrf.mxu0  ;;  %v5984_v57 = vmul.f32 %v9961_v22, %v5767_v10 }
 0x6dd   : > { %v6491_v44 = vmax.f32 %v6455_v12, 0.0  ;;  %v6600_v63 = vmax.f32 %v6564_v54, 0.0  ;;  %v6199_v2 = vmul.f32 0.5, %v6163_v31  ;;  %v5889_v19 = vadd.f32 %v9953_v56, %v5888_v58 }
 0x6de   : > { %v6020_v40 = vadd.f32 %v5984_v57, %v5945_v24 }
 0x6df   : > { %v6528_v52 = vmin.f32 %v6491_v44, %v10027_v13  ;;  %v6636_v14 = vmin.f32 %v6600_v63, %v10027_v13  ;;  %v6235_v59 = vsub.f32 %v6019_v36, %v6199_v2  ;;  %v6271_v60 = vadd.f32 %v6199_v2, %v6019_v36 }
 0x6e0   : > { %v6057_v47 = vmin.f32 %v5889_v19, 4.1351666 }
 0x6e1   : > { %6710 = vst.msk [vmem:[%s7670_s23 + $0x98] sm:$0xff] %vm6690_vm5, %v6528_v52  ;;  %v6310_v42 = vmax.f32 %v6235_v59, 0.0  ;;  %v6383_v51 = vmax.f32 %v6271_v60, 0.0  ;;  %v5650_v43 = vpop.f32.mrf.mxu2  ;;  %v5769_v34 = vpop.f32.mrf.mxu3  ;;  %v5947_v60 = vld [vmem:[%s10537_s0 + $0xb8] sm:$0xff] }
 0x6e2   : > { %v7504_v11 = vpop.eup %7503  ;;  %6746 = vst.msk [vmem:[%s7675_s12 + $0x98] sm:$0xff] %vm6690_vm5, %v6636_v14  ;;  %v6115_v30 = vmul.f32 1.442695, %v6057_v47  ;;  %v5651_v23 = vadd.f32 %v9934_v26, %v5650_v43  ;;  %v5770_v48 = vadd.f32 %v9943_v62, %v5769_v34 }
 0x6e3   : > { %v6347_v16 = vmin.f32 %v6310_v42, %v10001_v32  ;;  %v6419_v1 = vmin.f32 %v6383_v51, %v10001_v32  ;;  %v6164_v15 = vmul.f32 %v9961_v22, %v7504_v11 }
 0x6e4   : > { %7505 = vpow2.f32 %v6115_v30  ;;  %6676 = vst.msk [vmem:[%s7665_s20 + $0xb0] sm:$0xff] %vm6653_vm4, %v5651_v23  ;;  %v5890_v27 = vpop.f32.mrf.mxu0  ;;  %v5985_v53 = vmul.f32 %v9961_v22, %v5770_v48 }
 0x6e5   : > { %v6456_v21 = vmul.f32 %v10014_v20, %v6347_v16  ;;  %v6565_v46 = vmul.f32 %v10014_v20, %v6419_v1  ;;  %v6200_v49 = vmul.f32 0.5, %v6164_v15  ;;  %v5891_v3 = vadd.f32 %v9953_v56, %v5890_v27 }
 0x6e6   : > { %v6021_v35 = vadd.f32 %v5985_v53, %v5946_v17 }
 0x6e7   : > { %v6492_v38 = vmax.f32 %v6456_v21, 0.0  ;;  %v6601_v7 = vmax.f32 %v6565_v46, 0.0  ;;  %v6236_v5 = vsub.f32 %v6020_v40, %v6200_v49  ;;  %v6272_v41 = vadd.f32 %v6200_v49, %v6020_v40 }
 0x6e8   : > { %v6058_v9 = vmin.f32 %v5891_v3, 4.1351666 }
 0x6e9   : > { %v6529_v0 = vmin.f32 %v6492_v38, %v10027_v13  ;;  %v6637_v55 = vmin.f32 %v6601_v7, %v10027_v13  ;;  %v6311_v28 = vmax.f32 %v6236_v5, 0.0  ;;  %v6384_v6 = vmax.f32 %v6272_v41, 0.0  ;;  %v5652_v4 = vpop.f32.mrf.mxu2  ;;  %v5771_v25 = vpop.f32.mrf.mxu3 }
 0x6ea   : > { %v7506_v37 = vpop.eup %7505  ;;  %v6117_v18 = vmul.f32 1.442695, %v6058_v9  ;;  %v5653_v39 = vadd.f32 %v9934_v26, %v5652_v4  ;;  %v5772_v50 = vadd.f32 %v9943_v62, %v5771_v25  ;;  %v5948_v9 = vld [vmem:[%s10537_s0 + $0xc0] sm:$0xff] }
 0x6eb   : > { %6711 = vst.msk [vmem:[%s7670_s23 + $0xa0] sm:$0xff] %vm6690_vm5, %v6529_v0  ;;  %v6348_v33 = vmin.f32 %v6311_v28, %v10001_v32  ;;  %v6420_v8 = vmin.f32 %v6384_v6, %v10001_v32  ;;  %v6165_v61 = vmul.f32 %v9961_v22, %v7506_v37 }
 0x6ec   : > { %6747 = vst.msk [vmem:[%s7675_s12 + $0xa0] sm:$0xff] %vm6690_vm5, %v6637_v55  ;;  %7507 = vpow2.f32 %v6117_v18  ;;  %v5893_v45 = vpop.f32.mrf.mxu0  ;;  %v5986_v63 = vmul.f32 %v9961_v22, %v5772_v50 }
 0x6ed   : > { %v6457_v29 = vmul.f32 %v10014_v20, %v6348_v33  ;;  %v6566_v12 = vmul.f32 %v10014_v20, %v6420_v8  ;;  %v6201_v54 = vmul.f32 0.5, %v6165_v61  ;;  %6677 = vst.msk [vmem:[%s7665_s20 + $0xb8] sm:$0xff] %vm6653_vm4, %v5653_v39  ;;  %v5894_v31 = vadd.f32 %v9953_v56, %v5893_v45 }
 0x6ee   : > { %v6022_v30 = vadd.f32 %v5986_v63, %v5947_v60 }
 0x6ef   : > { %v6493_v36 = vmax.f32 %v6457_v29, 0.0  ;;  %v6602_v10 = vmax.f32 %v6566_v12, 0.0  ;;  %v6237_v58 = vsub.f32 %v6021_v35, %v6201_v54  ;;  %v6273_v44 = vadd.f32 %v6201_v54, %v6021_v35 }
 0x6f0   : > { %v6059_v2 = vmin.f32 %v5894_v31, 4.1351666 }
 0x6f1   : > { %v6530_v19 = vmin.f32 %v6493_v36, %v10027_v13  ;;  %v6638_v52 = vmin.f32 %v6602_v10, %v10027_v13  ;;  %v6312_v14 = vmax.f32 %v6237_v58, 0.0  ;;  %v6385_v59 = vmax.f32 %v6273_v44, 0.0  ;;  %v5655_v57 = vpop.f32.mrf.mxu2  ;;  %v5774_v47 = vpop.f32.mrf.mxu3 }
 0x6f2   : > { %v7508_v42 = vpop.eup %7507  ;;  %v6119_v51 = vmul.f32 1.442695, %v6059_v2  ;;  %v5656_v24 = vadd.f32 %v9934_v26, %v5655_v57  ;;  %v5775_v23 = vadd.f32 %v9943_v62, %v5774_v47  ;;  %v5949_v2 = vld [vmem:[%s10537_s0 + $0xc8] sm:$0xff] }
 0x6f3   : > { %6712 = vst.msk [vmem:[%s7670_s23 + $0xa8] sm:$0xff] %vm6690_vm5, %v6530_v19  ;;  %v6349_v43 = vmin.f32 %v6312_v14, %v10001_v32  ;;  %v6421_v34 = vmin.f32 %v6385_v59, %v10001_v32  ;;  %v6166_v11 = vmul.f32 %v9961_v22, %v7508_v42 }
 0x6f4   : > { %6748 = vst.msk [vmem:[%s7675_s12 + $0xa8] sm:$0xff] %vm6690_vm5, %v6638_v52  ;;  %7509 = vpow2.f32 %v6119_v51  ;;  %v5895_v16 = vpop.f32.mrf.mxu0  ;;  %v5987_v3 = vmul.f32 %v9961_v22, %v5775_v23 }
 0x6f5   : > { %v6458_v1 = vmul.f32 %v10014_v20, %v6349_v43  ;;  %v6567_v15 = vmul.f32 %v10014_v20, %v6421_v34  ;;  %v6202_v40 = vmul.f32 0.5, %v6166_v11  ;;  %6678 = vst.msk [vmem:[%s7665_s20 + $0xc0] sm:$0xff] %vm6653_vm4, %v5656_v24  ;;  %v5896_v48 = vadd.f32 %v9953_v56, %v5895_v16 }
 0x6f6   : > { %v6023_v18 = vadd.f32 %v5987_v3, %v5948_v9 }
 0x6f7   : > { %v6494_v27 = vmax.f32 %v6458_v1, 0.0  ;;  %v6603_v21 = vmax.f32 %v6567_v15, 0.0  ;;  %v6238_v46 = vsub.f32 %v6022_v30, %v6202_v40  ;;  %v6274_v49 = vadd.f32 %v6202_v40, %v6022_v30 }
 0x6f8   : > { %v6060_v38 = vmin.f32 %v5896_v48, 4.1351666 }
 0x6f9   : > { %v6531_v7 = vmin.f32 %v6494_v27, %v10027_v13  ;;  %v6639_v5 = vmin.f32 %v6603_v21, %v10027_v13  ;;  %v6313_v41 = vmax.f32 %v6238_v46, 0.0  ;;  %v6386_v53 = vmax.f32 %v6274_v49, 0.0  ;;  %v5657_v0 = vpop.f32.mrf.mxu2  ;;  %v5776_v55 = vpop.f32.mrf.mxu3 }
 0x6fa   : > { %v7510_v28 = vpop.eup %7509  ;;  %v6121_v6 = vmul.f32 1.442695, %v6060_v38  ;;  %v5658_v17 = vadd.f32 %v9934_v26, %v5657_v0  ;;  %v5777_v39 = vadd.f32 %v9943_v62, %v5776_v55  ;;  %v5950_v38 = vld [vmem:[%s10537_s0 + $0xd0] sm:$0xff] }
 0x6fb   : > { %6713 = vst.msk [vmem:[%s7670_s23 + $0xb0] sm:$0xff] %vm6690_vm5, %v6531_v7  ;;  %v6350_v4 = vmin.f32 %v6313_v41, %v10001_v32  ;;  %v6422_v25 = vmin.f32 %v6386_v53, %v10001_v32  ;;  %v6167_v37 = vmul.f32 %v9961_v22, %v7510_v28 }
 0x6fc   : > { %6749 = vst.msk [vmem:[%s7675_s12 + $0xb0] sm:$0xff] %vm6690_vm5, %v6639_v5  ;;  %7511 = vpow2.f32 %v6121_v6  ;;  %v5898_v33 = vpop.f32.mrf.mxu0  ;;  %v5988_v31 = vmul.f32 %v9961_v22, %v5777_v39 }
 0x6fd   : > { %v6459_v8 = vmul.f32 %v10014_v20, %v6350_v4  ;;  %v6568_v61 = vmul.f32 %v10014_v20, %v6422_v25  ;;  %v6203_v35 = vmul.f32 0.5, %v6167_v37  ;;  %6679 = vst.msk [vmem:[%s7665_s20 + $0xc8] sm:$0xff] %vm6653_vm4, %v5658_v17  ;;  %v5899_v50 = vadd.f32 %v9953_v56, %v5898_v33 }
 0x6fe   : > { %v6024_v51 = vadd.f32 %v5988_v31, %v5949_v2 }
 0x6ff   : > { %v6495_v45 = vmax.f32 %v6459_v8, 0.0  ;;  %v6604_v29 = vmax.f32 %v6568_v61, 0.0  ;;  %v6239_v12 = vsub.f32 %v6023_v18, %v6203_v35  ;;  %v6275_v54 = vadd.f32 %v6203_v35, %v6023_v18 }
 0x700   : > { %v6061_v36 = vmin.f32 %v5899_v50, 4.1351666 }
 0x701   : > { %v6532_v10 = vmin.f32 %v6495_v45, %v10027_v13  ;;  %v6640_v58 = vmin.f32 %v6604_v29, %v10027_v13  ;;  %v6314_v44 = vmax.f32 %v6239_v12, 0.0  ;;  %v6387_v63 = vmax.f32 %v6275_v54, 0.0  ;;  %v5660_v19 = vpop.f32.mrf.mxu2  ;;  %v5779_v52 = vpop.f32.mrf.mxu3 }
 0x702   : > { %v7512_v14 = vpop.eup %7511  ;;  %v6123_v59 = vmul.f32 1.442695, %v6061_v36  ;;  %v5661_v60 = vadd.f32 %v9934_v26, %v5660_v19  ;;  %v5780_v24 = vadd.f32 %v9943_v62, %v5779_v52  ;;  %v5951_v36 = vld [vmem:[%s10537_s0 + $0xd8] sm:$0xff] }
 0x703   : > { %6714 = vst.msk [vmem:[%s7670_s23 + $0xb8] sm:$0xff] %vm6690_vm5, %v6532_v10  ;;  %v6351_v57 = vmin.f32 %v6314_v44, %v10001_v32  ;;  %v6423_v47 = vmin.f32 %v6387_v63, %v10001_v32  ;;  %v6168_v42 = vmul.f32 %v9961_v22, %v7512_v14 }
 0x704   : > { %6750 = vst.msk [vmem:[%s7675_s12 + $0xb8] sm:$0xff] %vm6690_vm5, %v6640_v58  ;;  %7513 = vpow2.f32 %v6123_v59  ;;  %v5900_v43 = vpop.f32.mrf.mxu0  ;;  %v5989_v48 = vmul.f32 %v9961_v22, %v5780_v24 }
 0x705   : > { %v6460_v34 = vmul.f32 %v10014_v20, %v6351_v57  ;;  %v6569_v11 = vmul.f32 %v10014_v20, %v6423_v47  ;;  %v6204_v30 = vmul.f32 0.5, %v6168_v42  ;;  %6680 = vst.msk [vmem:[%s7665_s20 + $0xd0] sm:$0xff] %vm6653_vm4, %v5661_v60  ;;  %v5901_v23 = vadd.f32 %v9953_v56, %v5900_v43 }
 0x706   : > { %v6025_v6 = vadd.f32 %v5989_v48, %v5950_v38 }
 0x707   : > { %v6496_v16 = vmax.f32 %v6460_v34, 0.0  ;;  %v6605_v1 = vmax.f32 %v6569_v11, 0.0  ;;  %v6240_v15 = vsub.f32 %v6024_v51, %v6204_v30  ;;  %v6276_v40 = vadd.f32 %v6204_v30, %v6024_v51 }
 0x708   : > { %v6062_v27 = vmin.f32 %v5901_v23, 4.1351666 }
 0x709   : > { %v6533_v21 = vmin.f32 %v6496_v16, %v10027_v13  ;;  %v6641_v46 = vmin.f32 %v6605_v1, %v10027_v13  ;;  %v6315_v49 = vmax.f32 %v6240_v15, 0.0  ;;  %v6388_v3 = vmax.f32 %v6276_v40, 0.0  ;;  %v5662_v7 = vpop.f32.mrf.mxu2  ;;  %v5781_v5 = vpop.f32.mrf.mxu3 }
 0x70a   : > { %v7514_v41 = vpop.eup %7513  ;;  %v6125_v53 = vmul.f32 1.442695, %v6062_v27  ;;  %v5663_v9 = vadd.f32 %v9934_v26, %v5662_v7  ;;  %v5782_v17 = vadd.f32 %v9943_v62, %v5781_v5  ;;  %v5952_v27 = vld [vmem:[%s10537_s0 + $0xe0] sm:$0xff] }
 0x70b   : > { %6715 = vst.msk [vmem:[%s7670_s23 + $0xc0] sm:$0xff] %vm6690_vm5, %v6533_v21  ;;  %v6352_v0 = vmin.f32 %v6315_v49, %v10001_v32  ;;  %v6424_v55 = vmin.f32 %v6388_v3, %v10001_v32  ;;  %v6169_v28 = vmul.f32 %v9961_v22, %v7514_v41 }
 0x70c   : > { %6751 = vst.msk [vmem:[%s7675_s12 + $0xc0] sm:$0xff] %vm6690_vm5, %v6641_v46  ;;  %7515 = vpow2.f32 %v6125_v53  ;;  %v5903_v4 = vpop.f32.mrf.mxu0  ;;  %v5990_v50 = vmul.f32 %v9961_v22, %v5782_v17 }
 0x70d   : > { %v6461_v25 = vmul.f32 %v10014_v20, %v6352_v0  ;;  %v6570_v37 = vmul.f32 %v10014_v20, %v6424_v55  ;;  %v6205_v18 = vmul.f32 0.5, %v6169_v28  ;;  %6681 = vst.msk [vmem:[%s7665_s20 + $0xd8] sm:$0xff] %vm6653_vm4, %v5663_v9  ;;  %v5904_v39 = vadd.f32 %v9953_v56, %v5903_v4 }
 0x70e   : > { %v6026_v59 = vadd.f32 %v5990_v50, %v5951_v36 }
 0x70f   : > { %v6497_v33 = vmax.f32 %v6461_v25, 0.0  ;;  %v6606_v8 = vmax.f32 %v6570_v37, 0.0  ;;  %v6241_v61 = vsub.f32 %v6025_v6, %v6205_v18  ;;  %v6277_v35 = vadd.f32 %v6205_v18, %v6025_v6 }
 0x710   : > { %v6063_v45 = vmin.f32 %v5904_v39, 4.1351666 }
 0x711   : > { %v6534_v29 = vmin.f32 %v6497_v33, %v10027_v13  ;;  %v6642_v12 = vmin.f32 %v6606_v8, %v10027_v13  ;;  %v6316_v54 = vmax.f32 %v6241_v61, 0.0  ;;  %v6389_v31 = vmax.f32 %v6277_v35, 0.0  ;;  %v5665_v10 = vpop.f32.mrf.mxu2  ;;  %v5784_v58 = vpop.f32.mrf.mxu3 }
 0x712   : > { %v7516_v44 = vpop.eup %7515  ;;  %v6127_v63 = vmul.f32 1.442695, %v6063_v45  ;;  %v5666_v2 = vadd.f32 %v9934_v26, %v5665_v10  ;;  %v5785_v60 = vadd.f32 %v9943_v62, %v5784_v58  ;;  %v5953_v45 = vld [vmem:[%s10537_s0 + $0xe8] sm:$0xff] }
 0x713   : > { %6716 = vst.msk [vmem:[%s7670_s23 + $0xc8] sm:$0xff] %vm6690_vm5, %v6534_v29  ;;  %v6353_v19 = vmin.f32 %v6316_v54, %v10001_v32  ;;  %v6425_v52 = vmin.f32 %v6389_v31, %v10001_v32  ;;  %v6170_v14 = vmul.f32 %v9961_v22, %v7516_v44 }
 0x714   : > { %6752 = vst.msk [vmem:[%s7675_s12 + $0xc8] sm:$0xff] %vm6690_vm5, %v6642_v12  ;;  %7517 = vpow2.f32 %v6127_v63  ;;  %v5905_v57 = vpop.f32.mrf.mxu0  ;;  %v5991_v23 = vmul.f32 %v9961_v22, %v5785_v60 }
 0x715   : > { %v6462_v47 = vmul.f32 %v10014_v20, %v6353_v19  ;;  %v6571_v42 = vmul.f32 %v10014_v20, %v6425_v52  ;;  %v6206_v51 = vmul.f32 0.5, %v6170_v14  ;;  %6682 = vst.msk [vmem:[%s7665_s20 + $0xe0] sm:$0xff] %vm6653_vm4, %v5666_v2  ;;  %v5906_v24 = vadd.f32 %v9953_v56, %v5905_v57 }
 0x716   : > { %v6027_v53 = vadd.f32 %v5991_v23, %v5952_v27  ;;  %v10331_v27 = vld [vmem:[%s10493_s13] ss:$0 sm:$0xff] }
 0x717   : > { %v6498_v43 = vmax.f32 %v6462_v47, 0.0  ;;  %v6607_v34 = vmax.f32 %v6571_v42, 0.0  ;;  %v6242_v11 = vsub.f32 %v6026_v59, %v6206_v51  ;;  %v6278_v30 = vadd.f32 %v6206_v51, %v6026_v59 }
 0x718   : > { %v6064_v16 = vmin.f32 %v5906_v24, 4.1351666 }
 0x719   : > { %v6535_v1 = vmin.f32 %v6498_v43, %v10027_v13  ;;  %v6643_v15 = vmin.f32 %v6607_v34, %v10027_v13  ;;  %v6317_v40 = vmax.f32 %v6242_v11, 0.0  ;;  %v6390_v48 = vmax.f32 %v6278_v30, 0.0  ;;  %v5667_v21 = vpop.f32.mrf.mxu2  ;;  %v5786_v46 = vpop.f32.mrf.mxu3  ;;  %v5954_v30 = vld [vmem:[%s10537_s0 + $0xf0] sm:$0xff] }
 0x71a   : > { %v7518_v49 = vpop.eup %7517  ;;  %v6129_v3 = vmul.f32 1.442695, %v6064_v16  ;;  %v5668_v38 = vadd.f32 %v9934_v26, %v5667_v21  ;;  %v5787_v9 = vadd.f32 %v9943_v62, %v5786_v46 }
 0x71b   : > { %6717 = vst.msk [vmem:[%s7670_s23 + $0xd0] sm:$0xff] %vm6690_vm5, %v6535_v1  ;;  %v6354_v7 = vmin.f32 %v6317_v40, %v10001_v32  ;;  %v6426_v5 = vmin.f32 %v6390_v48, %v10001_v32  ;;  %v6171_v41 = vmul.f32 %v9961_v22, %v7518_v49  ;;  %v10339_v49 = vld [vmem:[%s10488_s8] ss:$0 sm:$0xff] }
 0x71c   : > { %6753 = vst.msk [vmem:[%s7675_s12 + $0xd0] sm:$0xff] %vm6690_vm5, %v6643_v15  ;;  %7519 = vpow2.f32 %v6129_v3  ;;  %v5908_v0 = vpop.f32.mrf.mxu0  ;;  %v5992_v39 = vmul.f32 %v9961_v22, %v5787_v9 }
 0x71d   : > { %v6463_v55 = vmul.f32 %v10014_v20, %v6354_v7  ;;  %v6572_v28 = vmul.f32 %v10014_v20, %v6426_v5  ;;  %v6207_v6 = vmul.f32 0.5, %v6171_v41  ;;  %6683 = vst.msk [vmem:[%s7665_s20 + $0xe8] sm:$0xff] %vm6653_vm4, %v5668_v38  ;;  %v5909_v17 = vadd.f32 %v9953_v56, %v5908_v0 }
 0x71e   : > { %v6028_v63 = vadd.f32 %v5992_v39, %v5953_v45 }
 0x71f   : > { %v6499_v4 = vmax.f32 %v6463_v55, 0.0  ;;  %v6608_v25 = vmax.f32 %v6572_v28, 0.0  ;;  %v6243_v37 = vsub.f32 %v6027_v53, %v6207_v6  ;;  %v6279_v18 = vadd.f32 %v6207_v6, %v6027_v53  ;;  %v10349_v53 = vld [vmem:[%s10490_s10] ss:$0 sm:$0xff] }
 0x720   : > { %v6065_v33 = vmin.f32 %v5909_v17, 4.1351666 }
 0x721   : > { %v6536_v8 = vmin.f32 %v6499_v4, %v10027_v13  ;;  %v6644_v61 = vmin.f32 %v6608_v25, %v10027_v13  ;;  %v6318_v35 = vmax.f32 %v6243_v37, 0.0  ;;  %v6391_v50 = vmax.f32 %v6279_v18, 0.0  ;;  %v5670_v29 = vpop.f32.mrf.mxu2  ;;  %v5789_v12 = vpop.f32.mrf.mxu3 }
 0x722   : > { %v7520_v54 = vpop.eup %7519  ;;  %v6131_v31 = vmul.f32 1.442695, %v6065_v33  ;;  %v5671_v36 = vadd.f32 %v9934_v26, %v5670_v29  ;;  %v5790_v2 = vadd.f32 %v9943_v62, %v5789_v12  ;;  %v5955_v33 = vld [vmem:[%s10537_s0 + $0xf8] sm:$0xff] }
 0x723   : > { %6718 = vst.msk [vmem:[%s7670_s23 + $0xd8] sm:$0xff] %vm6690_vm5, %v6536_v8  ;;  %v6355_v10 = vmin.f32 %v6318_v35, %v10001_v32  ;;  %v6427_v58 = vmin.f32 %v6391_v50, %v10001_v32  ;;  %v6172_v44 = vmul.f32 %v9961_v22, %v7520_v54 }
 0x724   : > { %6754 = vst.msk [vmem:[%s7675_s12 + $0xd8] sm:$0xff] %vm6690_vm5, %v6644_v61  ;;  %7521 = vpow2.f32 %v6131_v31  ;;  %v5910_v19 = vpop.f32.mrf.mxu0  ;;  %v5993_v51 = vmul.f32 %v9961_v22, %v5790_v2  ;;  %v10321_v22 = vld [vmem:[%s10486_s6] ss:$0 sm:$0xff] }
 0x725   : > { %v6464_v52 = vmul.f32 %v10014_v20, %v6355_v10  ;;  %v6573_v14 = vmul.f32 %v10014_v20, %v6427_v58  ;;  %v6208_v26 = vmul.f32 0.5, %v6172_v44  ;;  %6684 = vst.msk [vmem:[%s7665_s20 + $0xf0] sm:$0xff] %vm6653_vm4, %v5671_v36  ;;  %v5911_v59 = vadd.f32 %v9953_v56, %v5910_v19 }
 0x726   : > { %v6029_v46 = vadd.f32 %v5993_v51, %v5954_v30 }
 0x727   : > { %v6500_v60 = vmax.f32 %v6464_v52, 0.0  ;;  %v6609_v57 = vmax.f32 %v6573_v14, 0.0  ;;  %v6244_v47 = vsub.f32 %v6028_v63, %v6208_v26  ;;  %v6280_v42 = vadd.f32 %v6208_v26, %v6028_v63 }
 0x728   : > { %v6066_v24 = vmin.f32 %v5911_v59, 4.1351666 }
 0x729   : > { %v6537_v62 = vmin.f32 %v6500_v60, %v10027_v13  ;;  %v6645_v43 = vmin.f32 %v6609_v57, %v10027_v13  ;;  %v6319_v34 = vmax.f32 %v6244_v47, 0.0  ;;  %v6392_v11 = vmax.f32 %v6280_v42, 0.0  ;;  %v5672_v56 = vpop.f32.mrf.mxu2  ;;  %v5791_v23 = vpop.f32.mrf.mxu3  ;;  %v5956_v42 = vld [vmem:[%s10537_s0 + $0x100] sm:$0xff] }
 0x72a   : > { %v7522_v16 = vpop.eup %7521  ;;  %v6133_v1 = vmul.f32 1.442695, %v6066_v24  ;;  %v5673_v15 = vadd.f32 %v10321_v22, %v5672_v56  ;;  %v5792_v3 = vadd.f32 %v10339_v49, %v5791_v23 }
 0x72b   : > { %6719 = vst.msk [vmem:[%s7670_s23 + $0xe0] sm:$0xff] %vm6690_vm5, %v6537_v62  ;;  %v6356_v40 = vmin.f32 %v6319_v34, %v10001_v32  ;;  %v6428_v48 = vmin.f32 %v6392_v11, %v10001_v32  ;;  %v6173_v21 = vmul.f32 %v10331_v27, %v7522_v16  ;;  %v10384_v11 = vld [vmem:[%s10538_s1] ss:$0 sm:$0xff] }
 0x72c   : > { %6755 = vst.msk [vmem:[%s7675_s12 + $0xe0] sm:$0xff] %vm6690_vm5, %v6645_v43  ;;  %7523 = vpow2.f32 %v6133_v1  ;;  %v5913_v38 = vpop.f32.mrf.mxu0  ;;  %v5994_v17 = vmul.f32 %v10331_v27, %v5792_v3 }
 0x72d   : > { %v6465_v7 = vmul.f32 %v10014_v20, %v6356_v40  ;;  %v6574_v5 = vmul.f32 %v10014_v20, %v6428_v48  ;;  %v6209_v41 = vmul.f32 0.5, %v6173_v21  ;;  %6685 = vst.msk [vmem:[%s7665_s20 + $0xf8] sm:$0xff] %vm6653_vm4, %v5673_v15  ;;  %v5914_v9 = vadd.f32 %v10349_v53, %v5913_v38  ;;  %v10395_v15 = vld [vmem:[%s10538_s1 + $0x1] ss:$0 sm:$0xff] }
 0x72e   : > { %v6030_v31 = vadd.f32 %v5994_v17, %v5955_v33 }
 0x72f   : > { %v6501_v0 = vmax.f32 %v6465_v7, 0.0  ;;  %v6610_v55 = vmax.f32 %v6574_v5, 0.0  ;;  %v6245_v28 = vsub.f32 %v6029_v46, %v6209_v41  ;;  %v6281_v6 = vadd.f32 %v6209_v41, %v6029_v46 }
 0x730   : > { %v6067_v4 = vmin.f32 %v5914_v9, 4.1351666 }
 0x731   : > { %v6538_v25 = vmin.f32 %v6501_v0, %v10027_v13  ;;  %v6646_v37 = vmin.f32 %v6610_v55, %v10027_v13  ;;  %v6320_v18 = vmax.f32 %v6245_v28, 0.0  ;;  %v6393_v39 = vmax.f32 %v6281_v6, 0.0  ;;  %v5675_v8 = vpop.f32.mrf.mxu2  ;;  %v5794_v61 = vpop.f32.mrf.mxu3  ;;  %v10406_v0 = vld [vmem:[%s10538_s1 + $0x2] ss:$0 sm:$0xff] }
 0x732   : > { %v7524_v35 = vpop.eup %7523  ;;  %v6135_v50 = vmul.f32 1.442695, %v6067_v4  ;;  %v5676_v45 = vadd.f32 %v10321_v22, %v5675_v8  ;;  %v5795_v36 = vadd.f32 %v10339_v49, %v5794_v61  ;;  %v5957_v4 = vld [vmem:[%s10537_s0 + $0x108] sm:$0xff] }
 0x733   : > { %6720 = vst.msk [vmem:[%s7670_s23 + $0xe8] sm:$0xff] %vm6690_vm5, %v6538_v25  ;;  %v6357_v29 = vmin.f32 %v6320_v18, %v10001_v32  ;;  %v6429_v12 = vmin.f32 %v6393_v39, %v10001_v32  ;;  %v6174_v54 = vmul.f32 %v10331_v27, %v7524_v35 }
 0x734   : > { %6756 = vst.msk [vmem:[%s7675_s12 + $0xe8] sm:$0xff] %vm6690_vm5, %v6646_v37  ;;  %7525 = vpow2.f32 %v6135_v50  ;;  %v5915_v10 = vpop.f32.mrf.mxu0  ;;  %v5995_v26 = vmul.f32 %v10331_v27, %v5795_v36 }
 0x735   : > { %v6466_v58 = vmul.f32 %v10014_v20, %v6357_v29  ;;  %v6575_v44 = vmul.f32 %v10014_v20, %v6429_v12  ;;  %v6210_v63 = vmul.f32 0.5, %v6174_v54  ;;  %6686 = vst.msk [vmem:[%s7665_s20 + $0x100] sm:$0xff] %vm6653_vm4, %v5676_v45  ;;  %v5916_v2 = vadd.f32 %v10349_v53, %v5915_v10 }
 0x736   : > { %v6031_v23 = vadd.f32 %v5995_v26, %v5956_v42 }
 0x737   : > { %v6502_v19 = vmax.f32 %v6466_v58, 0.0  ;;  %v6611_v32 = vmax.f32 %v6575_v44, 0.0  ;;  %v6246_v52 = vsub.f32 %v6030_v31, %v6210_v63  ;;  %v6282_v14 = vadd.f32 %v6210_v63, %v6030_v31 }
 0x738   : > { %v6068_v59 = vmin.f32 %v5916_v2, 4.1351666 }
 0x739   : > { %v6539_v60 = vmin.f32 %v6502_v19, %v10027_v13  ;;  %v6647_v57 = vmin.f32 %v6611_v32, %v10027_v13  ;;  %v6321_v47 = vmax.f32 %v6246_v52, 0.0  ;;  %v6394_v20 = vmax.f32 %v6282_v14, 0.0  ;;  %v5677_v51 = vpop.f32.mrf.mxu2  ;;  %v5796_v24 = vpop.f32.mrf.mxu3 }
 0x73a   : > { %v7526_v62 = vpop.eup %7525  ;;  %v6137_v43 = vmul.f32 1.442695, %v6068_v59  ;;  %v5678_v34 = vadd.f32 %v10321_v22, %v5677_v51  ;;  %v5797_v16 = vadd.f32 %v10339_v49, %v5796_v24 }
 0x73b   : > { %6721 = vst.msk [vmem:[%s7670_s23 + $0xf0] sm:$0xff] %vm6690_vm5, %v6539_v60  ;;  %v6358_v13 = vmin.f32 %v6321_v47, %v10384_v11  ;;  %v6430_v30 = vmin.f32 %v6394_v20, %v10384_v11  ;;  %v6175_v56 = vmul.f32 %v10331_v27, %v7526_v62 }
 0x73c   : > { %6757 = vst.msk [vmem:[%s7675_s12 + $0xf0] sm:$0xff] %vm6690_vm5, %v6647_v57  ;;  %7527 = vpow2.f32 %v6137_v43  ;;  %v5918_v1 = vpop.f32.mrf.mxu0  ;;  %v5996_v41 = vmul.f32 %v10331_v27, %v5797_v16 }
 0x73d   : > { %v6467_v40 = vmul.f32 %v10395_v15, %v6358_v13  ;;  %v6576_v48 = vmul.f32 %v10395_v15, %v6430_v30  ;;  %v6211_v21 = vmul.f32 0.5, %v6175_v56  ;;  %6687 = vst.msk [vmem:[%s7665_s20 + $0x108] sm:$0xff] %vm6653_vm4, %v5678_v34  ;;  %v5919_v46 = vadd.f32 %v10349_v53, %v5918_v1 }
 0x73e   : > { %v6032_v50 = vadd.f32 %v5996_v41, %v5957_v4 }
 0x73f   : > { %v6503_v3 = vmax.f32 %v6467_v40, 0.0  ;;  %v6612_v38 = vmax.f32 %v6576_v48, 0.0  ;;  %v6247_v7 = vsub.f32 %v6031_v23, %v6211_v21  ;;  %v6283_v5 = vadd.f32 %v6211_v21, %v6031_v23 }
 0x740   : > { %v6069_v9 = vmin.f32 %v5919_v46, 4.1351666 }
 0x741   : > { %v6540_v55 = vmin.f32 %v6503_v3, %v10406_v0  ;;  %v6648_v28 = vmin.f32 %v6612_v38, %v10406_v0  ;;  %v6322_v6 = vmax.f32 %v6247_v7, 0.0  ;;  %v6395_v17 = vmax.f32 %v6283_v5, 0.0  ;;  %v5680_v25 = vpop.f32.mrf.mxu2  ;;  %v5799_v37 = vpop.f32.mrf.mxu3  ;;  %v5959_v3 = vld [vmem:[%s10537_s0 + $0x118] sm:$0xff] }
 0x742   : > { %v7528_v18 = vpop.eup %7527  ;;  %v6139_v39 = vmul.f32 1.442695, %v6069_v9  ;;  %v5681_v33 = vadd.f32 %v10321_v22, %v5680_v25  ;;  %v5800_v45 = vadd.f32 %v10339_v49, %v5799_v37 }
 0x743   : > { %6722 = vst.msk [vmem:[%s7670_s23 + $0xf8] sm:$0xff] %vm6690_vm5, %v6540_v55  ;;  %v6359_v8 = vmin.f32 %v6322_v6, %v10384_v11  ;;  %v6431_v61 = vmin.f32 %v6395_v17, %v10384_v11  ;;  %v6176_v35 = vmul.f32 %v10331_v27, %v7528_v18 }
 0x744   : > { %6758 = vst.msk [vmem:[%s7675_s12 + $0xf8] sm:$0xff] %vm6690_vm5, %v6648_v28  ;;  %7529 = vpow2.f32 %v6139_v39  ;;  %v5920_v29 = vpop.f32.mrf.mxu0  ;;  %v5997_v2 = vmul.f32 %v10331_v27, %v5800_v45 }
 0x745   : > { %v6468_v12 = vmul.f32 %v10395_v15, %v6359_v8  ;;  %v6577_v54 = vmul.f32 %v10395_v15, %v6431_v61  ;;  %v6212_v31 = vmul.f32 0.5, %v6176_v35  ;;  %6688 = vst.msk [vmem:[%s7665_s20 + $0x110] sm:$0xff] %vm6653_vm4, %v5681_v33  ;;  %v5921_v36 = vadd.f32 %v10349_v53, %v5920_v29  ;;  %v5958_v53 = vld [vmem:[%s10537_s0 + $0x110] sm:$0xff] }
 0x746   : > { %v6033_v13 = vadd.f32 %v5997_v2, %v5958_v53 }
 0x747   : > { %v6504_v10 = vmax.f32 %v6468_v12, 0.0  ;;  %v6613_v58 = vmax.f32 %v6577_v54, 0.0  ;;  %v6248_v44 = vsub.f32 %v6032_v50, %v6212_v31  ;;  %v6284_v63 = vadd.f32 %v6212_v31, %v6032_v50 }
 0x748   : > { %v6070_v19 = vmin.f32 %v5921_v36, 4.1351666 }
 0x749   : > { %v6541_v32 = vmin.f32 %v6504_v10, %v10406_v0  ;;  %v6649_v52 = vmin.f32 %v6613_v58, %v10406_v0  ;;  %v6323_v14 = vmax.f32 %v6248_v44, 0.0  ;;  %v6396_v26 = vmax.f32 %v6284_v63, 0.0  ;;  %v5682_v59 = vpop.f32.mrf.mxu2  ;;  %v5801_v60 = vpop.f32.mrf.mxu3 }
 0x74a   : > { %v7530_v57 = vpop.eup %7529  ;;  %v6141_v47 = vmul.f32 1.442695, %v6070_v19  ;;  %v5683_v20 = vadd.f32 %v10321_v22, %v5682_v59  ;;  %v5802_v62 = vadd.f32 %v10339_v49, %v5801_v60 }
 0x74b   : > { %6723 = vst.msk [vmem:[%s7670_s23 + $0x100] sm:$0xff] %vm6690_vm5, %v6541_v32  ;;  %v6360_v42 = vmin.f32 %v6323_v14, %v10384_v11  ;;  %v6432_v51 = vmin.f32 %v6396_v26, %v10384_v11  ;;  %v6177_v24 = vmul.f32 %v10331_v27, %v7530_v57 }
 0x74c   : > { %6759 = vst.msk [vmem:[%s7675_s12 + $0x100] sm:$0xff] %vm6690_vm5, %v6649_v52  ;;  %7531 = vpow2.f32 %v6141_v47  ;;  %v5998_v1 = vmul.f32 %v10331_v27, %v5802_v62 }
 0x74d   : > { %v6469_v43 = vmul.f32 %v10395_v15, %v6360_v42  ;;  %v6578_v34 = vmul.f32 %v10395_v15, %v6432_v51  ;;  %v6213_v22 = vmul.f32 0.5, %v6177_v24  ;;  %6689 = vst.msk [vmem:[%s7665_s20 + $0x118] sm:$0xff] %vm6653_vm4, %v5683_v20 }
 0x74e   : > { %v6034_v55 = vadd.f32 %v5998_v1, %v5959_v3 }
 0x74f   : > { %v6505_v30 = vmax.f32 %v6469_v43, 0.0  ;;  %v6614_v56 = vmax.f32 %v6578_v34, 0.0  ;;  %v6249_v23 = vsub.f32 %v6033_v13, %v6213_v22  ;;  %v6285_v16 = vadd.f32 %v6213_v22, %v6033_v13 }
 0x751   : > { %v6542_v40 = vmin.f32 %v6505_v30, %v10406_v0  ;;  %v6650_v49 = vmin.f32 %v6614_v56, %v10406_v0  ;;  %v6324_v48 = vmax.f32 %v6249_v23, 0.0  ;;  %v6397_v21 = vmax.f32 %v6285_v16, 0.0 }
 0x752   : > { %v7532_v46 = vpop.eup %7531 }
 0x753   : > { %6724 = vst.msk [vmem:[%s7670_s23 + $0x108] sm:$0xff] %vm6690_vm5, %v6542_v40  ;;  %v6361_v38 = vmin.f32 %v6324_v48, %v10384_v11  ;;  %v6433_v7 = vmin.f32 %v6397_v21, %v10384_v11  ;;  %v6178_v5 = vmul.f32 %v10331_v27, %v7532_v46 }
 0x754   : > { %6760 = vst.msk [vmem:[%s7675_s12 + $0x108] sm:$0xff] %vm6690_vm5, %v6650_v49 }
 0x755   : > { %v6470_v41 = vmul.f32 %v10395_v15, %v6361_v38  ;;  %v6579_v9 = vmul.f32 %v10395_v15, %v6433_v7  ;;  %v6214_v28 = vmul.f32 0.5, %v6178_v5 }
 0x757   : > { %v6506_v6 = vmax.f32 %v6470_v41, 0.0  ;;  %v6615_v17 = vmax.f32 %v6579_v9, 0.0  ;;  %v6250_v4 = vsub.f32 %v6034_v55, %v6214_v28  ;;  %v6286_v25 = vadd.f32 %v6214_v28, %v6034_v55 }
 0x759   : > { %v6543_v37 = vmin.f32 %v6506_v6, %v10406_v0  ;;  %v6651_v18 = vmin.f32 %v6615_v17, %v10406_v0  ;;  %v6325_v27 = vmax.f32 %v6250_v4, 0.0  ;;  %v6398_v39 = vmax.f32 %v6286_v25, 0.0 }
 0x75b   : > { %6725 = vst.msk [vmem:[%s7670_s23 + $0x110] sm:$0xff] %vm6690_vm5, %v6543_v37  ;;  %v6362_v33 = vmin.f32 %v6325_v27, %v10384_v11  ;;  %v6434_v8 = vmin.f32 %v6398_v39, %v10384_v11 }
 0x75c   : > { %6761 = vst.msk [vmem:[%s7675_s12 + $0x110] sm:$0xff] %vm6690_vm5, %v6651_v18 }
 0x75d   : > { %v6471_v61 = vmul.f32 %v10395_v15, %v6362_v33  ;;  %v6580_v35 = vmul.f32 %v10395_v15, %v6434_v8 }
 0x75f   : > { %v6507_v50 = vmax.f32 %v6471_v61, 0.0  ;;  %v6616_v45 = vmax.f32 %v6580_v35, 0.0 }
 0x761   : > { %v6544_v29 = vmin.f32 %v6507_v50, %v10406_v0  ;;  %v6652_v12 = vmin.f32 %v6616_v45, %v10406_v0 }
 0x763   : > { %6726 = vst.msk [vmem:[%s7670_s23 + $0x118] sm:$0xff] %vm6690_vm5, %v6544_v29 }
 0x764   : > { %6762 = vst.msk [vmem:[%s7675_s12 + $0x118] sm:$0xff] %vm6690_vm5, %v6652_v12 }
 0x765 PF: > { %s10559_s20 = sld [smem:[#allocation3_spill]] }
 0x76b   : > { %s28_s24 = sadd.s32 1, %s10559_s20  }
 0x76c   : > { %p25_p5 = scmp.ge.s32.totalorder %s28_s24, 4  }
 0x76e   :  { %27 = sbr.rel (!%p25_p5) target bundleno = 5 (0x5), region = 154 }

</bundles_post_ra>
